<compile_context>
chip_gen: v5e
topology: v5e:2x2
jax: 0.10.0
libtpu: 0.0.40
codegen_flags: <defaults>
</compile_context>

<pallas_src>
import functools
import math

import numpy as np
import jax
import jax.numpy as jnp
from jax import lax
from jax.experimental import pallas as pl
from jax.experimental.pallas import tpu as pltpu

# ----------------------- small hyper-parameters --------------------------
B = 2
ENC_IN = 4            # number of input variables
N_MARK = 4            # TimeFeatureEmbedding d_inp
INPUT_SIZE = 63       # history length (FC decoder appends 1 predict token -> 64)
OUT_LEN = 4           # predict_step
D_MODEL = 64
N_HEAD = 4
D_K = 16
D_V = 16
D_INNER = 128
D_BOTTLENECK = 32
N_LAYER = 4
WINDOW_SIZE = [4, 4, 4]
INNER_SIZE = 3
L_PAD = 128           # pyramid length 85 padded to an (8,128)-friendly 128


# ----------------------- constant buffers (numpy) -------------------------
def get_mask_np(input_size, window_size, inner_size):
    all_size = [input_size]
    for w in window_size:
        all_size.append(math.floor(all_size[-1] / w))
    L = sum(all_size)
    mask = np.zeros((L, L), dtype=np.float32)
    inner_window = inner_size // 2
    for li in range(len(all_size)):
        start = sum(all_size[:li])
        for i in range(start, start + all_size[li]):
            left = max(i - inner_window, start)
            right = min(i + inner_window + 1, start + all_size[li])
            mask[i, left:right] = 1
    for li in range(1, len(all_size)):
        start = sum(all_size[:li])
        for i in range(start, start + all_size[li]):
            left = (start - all_size[li - 1]) + (i - start) * window_size[li - 1]
            if i == (start + all_size[li] - 1):
                right = start
            else:
                right = (start - all_size[li - 1]) + (i - start + 1) * window_size[li - 1]
            mask[i, left:right] = 1
            mask[left:right, i] = 1
    # 1.0 == masked position (same as the torch bool mask with True = masked)
    return (1.0 - mask).astype(np.float32), all_size


def refer_points_np(all_sizes, window_size):
    input_size = all_sizes[0]
    indexes = np.zeros((input_size, len(all_sizes)), dtype=np.int32)
    for i in range(input_size):
        indexes[i, 0] = i
        former = i
        for j in range(1, len(all_sizes)):
            start = sum(all_sizes[:j])
            inner = former - (start - all_sizes[j - 1])
            former = start + min(inner // window_size[j - 1], all_sizes[j] - 1)
            indexes[i, j] = former
    return indexes


def positional_embedding_np(n, d_model):
    pe = np.zeros((n, d_model), dtype=np.float32)
    position = np.arange(n, dtype=np.float32)[:, None]
    div_term = np.exp(np.arange(0, d_model, 2, dtype=np.float32)
                      * -(math.log(10000.0) / d_model))
    pe[:, 0::2] = np.sin(position * div_term)
    pe[:, 1::2] = np.cos(position * div_term)
    return pe  # (n, d_model)


MASK_NP, ALL_SIZE = get_mask_np(INPUT_SIZE + 1, WINDOW_SIZE, INNER_SIZE)
SEQ_TOTAL = sum(ALL_SIZE)                          # 64 + 16 + 4 + 1 = 85
N_SEQ = ALL_SIZE[0]                                # 64

# Padded additive mask: -1e9 at masked / padded key positions, 0 elsewhere.
_MASK_PAD = np.ones((L_PAD, L_PAD), dtype=np.float32)   # 1 = masked
_MASK_PAD[:SEQ_TOTAL, :SEQ_TOTAL] = MASK_NP
MASK_ADD = jnp.asarray(_MASK_PAD * np.float32(-1e9))    # (128, 128)

INDEXES = refer_points_np(ALL_SIZE, WINDOW_SIZE)        # (64, 4) int32
LAST_IDX = jnp.asarray(INDEXES[-1])                     # rows feeding the last token
PE = jnp.asarray(positional_embedding_np(N_SEQ, D_MODEL))   # (64, D_MODEL)


# ----------------------- in-kernel math helpers ----------------------------
def _layernorm(x, g, b, eps):
    mu = jnp.mean(x, axis=-1, keepdims=True)
    xc = x - mu
    var = jnp.mean(xc * xc, axis=-1, keepdims=True)
    return xc * lax.rsqrt(var + eps) * g + b


def _expm1_neg(y):
    """Accurate expm1 for y <= 0 using only exp/log (Kahan trick)."""
    u = jnp.exp(y)
    safe = (u - 1.0) * y / jnp.log(u)
    return jnp.where(u == 1.0, y, jnp.where(u == 0.0, -1.0, safe))


def _erf(z):
    # Abramowitz & Stegun 7.1.26, |err| < 1.5e-7 (i.e. f32-exact); uses only
    # ops with guaranteed Mosaic lowerings (abs/exp/div/where).
    a = jnp.abs(z)
    t = 1.0 / (1.0 + 0.3275911 * a)
    poly = t * (0.254829592 + t * (-0.284496736 + t * (1.421413741
                + t * (-1.453152027 + t * 1.061405429))))
    e = 1.0 - poly * jnp.exp(-a * a)
    return jnp.where(z < 0, -e, e)


def _gelu_exact(x):
    # exact-erf GELU (matches torch F.gelu default) to within f32 rounding
    return 0.5 * x * (1.0 + _erf(x * 0.7071067811865476))


# ----------------------- generic linear kernel ------------------------------
def _linear_kernel(x_ref, w_ref, *rest, has_bias, activation):
    if has_bias:
        b_ref, o_ref = rest
    else:
        (o_ref,) = rest
    y = jnp.dot(x_ref[...], w_ref[...], preferred_element_type=jnp.float32)
    if has_bias:
        y = y + b_ref[...]
    if activation == "elu":                       # ELU(alpha=1), overflow-safe
        y = jnp.where(y > 0, y, _expm1_neg(jnp.minimum(y, 0.0)))
    o_ref[...] = y


def pallas_linear(x, w, b=None, activation=None):
    """x: (M, K) @ w: (K, N) [+ b] -> (M, N); full-block VMEM kernel."""
    M, K = x.shape
    N = w.shape[1]
    has_bias = b is not None
    kern = functools.partial(_linear_kernel, has_bias=has_bias, activation=activation)
    args = (x.astype(jnp.float32), w.astype(jnp.float32))
    if has_bias:
        args = args + (b.reshape(1, N).astype(jnp.float32),)
    return pl.pallas_call(
        kern, out_shape=jax.ShapeDtypeStruct((M, N), jnp.float32))(*args)


# ----------------------- fused embedding + down projection ------------------
def _embed_kernel(cols_ref, xm_ref, pe_ref, tokW_ref, tokb_ref, tmpW_ref,
                  tmpb_ref, dW_ref, db_ref, emb_ref, down_ref):
    val = jnp.dot(cols_ref[...], tokW_ref[...],
                  preferred_element_type=jnp.float32) + tokb_ref[...]
    tmp = jnp.dot(xm_ref[...], tmpW_ref[...],
                  preferred_element_type=jnp.float32) + tmpb_ref[...]
    emb = val + pe_ref[...] + tmp                  # dropout -> identity (eval)
    emb_ref[...] = emb
    down_ref[...] = jnp.dot(emb, dW_ref[...],
                            preferred_element_type=jnp.float32) + db_ref[...]


def pallas_embed(cols, xm, pe, tokW, tokb, tmpW, tmpb, dW, db):
    M = cols.shape[0]
    return pl.pallas_call(
        _embed_kernel,
        out_shape=(jax.ShapeDtypeStruct((M, D_MODEL), jnp.float32),
                   jax.ShapeDtypeStruct((M, D_BOTTLENECK), jnp.float32)),
    )(cols, xm, pe, tokW, tokb.reshape(1, D_MODEL), tmpW,
      tmpb.reshape(1, D_MODEL), dW, db.reshape(1, D_BOTTLENECK))


# ----------------------- fused CSCM up + concat + LayerNorm + pad -----------
def _cscm_out_kernel(x_ref, c_ref, upW_ref, upb_ref, g_ref, b_ref, o_ref):
    up = jnp.dot(c_ref[...], upW_ref[...],
                 preferred_element_type=jnp.float32) + upb_ref[...]   # (21, D)
    g = g_ref[...]
    b = b_ref[...]
    o_ref[...] = jnp.zeros(o_ref.shape, o_ref.dtype)                  # pad rows
    o_ref[pl.ds(0, N_SEQ), :] = _layernorm(x_ref[...], g, b, 1e-5)
    o_ref[pl.ds(N_SEQ, SEQ_TOTAL - N_SEQ), :] = _layernorm(up, g, b, 1e-5)


def pallas_cscm_out(x, convcat, upW, upb, g, b):
    Bsz = x.shape[0]
    Lc = convcat.shape[1]
    w_spec = lambda shape: pl.BlockSpec(shape, lambda i: (0, 0))
    return pl.pallas_call(
        _cscm_out_kernel,
        out_shape=jax.ShapeDtypeStruct((Bsz, L_PAD, D_MODEL), jnp.float32),
        grid=(Bsz,),
        in_specs=[
            pl.BlockSpec((None, N_SEQ, D_MODEL), lambda i: (i, 0, 0)),
            pl.BlockSpec((None, Lc, D_BOTTLENECK), lambda i: (i, 0, 0)),
            w_spec((D_BOTTLENECK, D_MODEL)),
            w_spec((1, D_MODEL)), w_spec((1, D_MODEL)), w_spec((1, D_MODEL)),
        ],
        out_specs=pl.BlockSpec((None, L_PAD, D_MODEL), lambda i: (i, 0, 0)),
        compiler_params=pltpu.CompilerParams(dimension_semantics=("parallel",)),
    )(x, convcat, upW, upb.reshape(1, D_MODEL), g.reshape(1, D_MODEL),
      b.reshape(1, D_MODEL))


# ----------------------- fully fused encoder layer --------------------------
def _encoder_layer_kernel(x_ref, mask_ref, wqkv_ref, wfc_ref, bfc_ref,
                          ln1g_ref, ln1b_ref, w1_ref, b1_ref, w2_ref, b2_ref,
                          ln2g_ref, ln2b_ref, o_ref):
    x = x_ref[...]                                            # (L_PAD, D)
    mask_add = mask_ref[...]                                  # (L_PAD, L_PAD)
    qkv = jnp.dot(x, wqkv_ref[...], preferred_element_type=jnp.float32)
    inv_t = 1.0 / (float(D_K) ** 0.5)
    hdk = N_HEAD * D_K

    heads = []
    for h in range(N_HEAD):                                   # static unroll
        q = qkv[:, h * D_K:(h + 1) * D_K] * inv_t
        k = qkv[:, hdk + h * D_K: hdk + (h + 1) * D_K]
        v = qkv[:, 2 * hdk + h * D_V: 2 * hdk + (h + 1) * D_V]
        s = lax.dot_general(q, k, (((1,), (1,)), ((), ())),
                            preferred_element_type=jnp.float32)   # q @ k^T
        s = s + mask_add                                      # masked_fill(-1e9)
        s = s - jnp.max(s, axis=-1, keepdims=True)
        p = jnp.exp(s)
        p = p / jnp.sum(p, axis=-1, keepdims=True)            # softmax
        heads.append(jnp.dot(p, v, preferred_element_type=jnp.float32))
    ao = jnp.concatenate(heads, axis=-1)                      # (L_PAD, H*Dv)

    # output projection + residual + post-LayerNorm
    o = jnp.dot(ao, wfc_ref[...], preferred_element_type=jnp.float32) \
        + bfc_ref[...] + x
    o = _layernorm(o, ln1g_ref[...], ln1b_ref[...], 1e-6)

    # FFN: w1 -> exact GELU -> w2 + residual + post-LayerNorm
    h1 = jnp.dot(o, w1_ref[...], preferred_element_type=jnp.float32) + b1_ref[...]
    h1 = _gelu_exact(h1)
    h2 = jnp.dot(h1, w2_ref[...], preferred_element_type=jnp.float32) \
        + b2_ref[...] + o
    o_ref[...] = _layernorm(h2, ln2g_ref[...], ln2b_ref[...], 1e-6)


def pallas_encoder_layer(x, mask_add, wqkv, wfc, bfc, ln1g, ln1b,
                         w1, b1, w2, b2, ln2g, ln2b):
    Bsz, Lp, D = x.shape
    w_spec = lambda shape: pl.BlockSpec(shape, lambda i: (0, 0))
    return pl.pallas_call(
        _encoder_layer_kernel,
        out_shape=jax.ShapeDtypeStruct((Bsz, Lp, D), jnp.float32),
        grid=(Bsz,),
        in_specs=[
            pl.BlockSpec((None, Lp, D), lambda i: (i, 0, 0)),
            pl.BlockSpec((Lp, Lp), lambda i: (0, 0)),
            w_spec((D, 3 * N_HEAD * D_K)),
            w_spec((N_HEAD * D_V, D)),
            w_spec((1, D)),
            w_spec((1, D)), w_spec((1, D)),
            w_spec((D, D_INNER)), w_spec((1, D_INNER)),
            w_spec((D_INNER, D)), w_spec((1, D)),
            w_spec((1, D)), w_spec((1, D)),
        ],
        out_specs=pl.BlockSpec((None, Lp, D), lambda i: (i, 0, 0)),
        compiler_params=pltpu.CompilerParams(dimension_semantics=("parallel",)),
    )(x, mask_add, wqkv, wfc, bfc.reshape(1, D), ln1g.reshape(1, D),
      ln1b.reshape(1, D), w1, b1.reshape(1, D_INNER), w2, b2.reshape(1, D),
      ln2g.reshape(1, D), ln2b.reshape(1, D))


# ----------------------- model forward (thin XLA glue) ----------------------
@jax.jit
def model_forward(params, x_enc, x_mark_enc, x_dec, x_mark_dec):
    Bsz = x_enc.shape[0]
    predict_token = jnp.zeros((Bsz, 1, ENC_IN), jnp.float32)
    x = jnp.concatenate([x_enc, predict_token], axis=1)                   # (B,64,C)
    xm = jnp.concatenate([x_mark_enc, x_mark_dec[:, 0:1, :]], axis=1)     # (B,64,4)
    N = N_SEQ

    # --- DataEmbedding + CSCM down projection (1 fused kernel) ---
    # TokenEmbedding: Conv1d(C, D, k=3, padding=1, padding_mode='circular')
    xp = jnp.concatenate([x[:, -1:, :], x, x[:, :1, :]], axis=1)          # circular
    cols = jnp.stack([xp[:, 0:N], xp[:, 1:N + 1], xp[:, 2:N + 2]], axis=2)
    cols = cols.reshape(Bsz * N, 3 * ENC_IN)
    tokW = jnp.transpose(params["tok_W"], (2, 1, 0)).reshape(3 * ENC_IN, D_MODEL)
    pe_t = jnp.broadcast_to(PE, (Bsz, N, D_MODEL)).reshape(Bsz * N, D_MODEL)
    emb, down = pallas_embed(cols, xm.reshape(Bsz * N, N_MARK), pe_t,
                             tokW, params["tok_b"], params["temp_W"],
                             params["temp_b"], params["down_W"], params["down_b"])

    # --- CSCM pyramid convs (3 tiny kernels; im2col reshapes are XLA glue) ---
    cur = down.reshape(Bsz, N, D_BOTTLENECK)
    outs = []
    for i, w in enumerate(WINDOW_SIZE):
        L_in = cur.shape[1]
        L_out = L_in // w
        cols_i = cur[:, :L_out * w, :].reshape(Bsz * L_out, w * D_BOTTLENECK)
        # fold eval-mode BatchNorm1d into the conv weights, fuse ELU in-kernel
        scale = params["bn_gamma"][i] / jnp.sqrt(params["bn_var"][i] + 1e-5)
        Wf = params["conv_W"][i] * scale[:, None, None]                   # (Cout,Cin,w)
        bf = (params["conv_b"][i] - params["bn_mean"][i]) * scale + params["bn_beta"][i]
        Wm = jnp.transpose(Wf, (2, 1, 0)).reshape(w * D_BOTTLENECK, D_BOTTLENECK)
        y = pallas_linear(cols_i, Wm, bf, activation="elu")               # conv+BN+ELU
        cur = y.reshape(Bsz, L_out, D_BOTTLENECK)
        outs.append(cur)
    convcat = jnp.concatenate(outs, axis=1)                               # (B,21,dB)

    # --- CSCM up + concat + LayerNorm, padded to (B, 128, D) (1 fused kernel) ---
    seq = pallas_cscm_out(emb.reshape(Bsz, N, D_MODEL), convcat,
                          params["up_W"], params["up_b"],
                          params["cscm_ln_g"], params["cscm_ln_b"])

    # --- 4 fully fused encoder layers (grid over batch, parallel) ---
    for lp in params["layers"]:
        wqkv = jnp.concatenate([lp["wq"], lp["wk"], lp["wv"]], axis=1)    # (D, 192)
        seq = pallas_encoder_layer(seq, MASK_ADD, wqkv, lp["fc_W"], lp["fc_b"],
                                   lp["ln1_g"], lp["ln1_b"], lp["w1"], lp["b1"],
                                   lp["w2"], lp["b2"], lp["ln2_g"], lp["ln2_b"])

    # --- FC decoder: only the last token's pyramid features are used ---
    last = jnp.take(seq, LAST_IDX, axis=1).reshape(Bsz, len(ALL_SIZE) * D_MODEL)
    pred = pallas_linear(last, params["pred_W"])                          # no bias
    return pred.reshape(Bsz, OUT_LEN, ENC_IN)


# ----------------------- deterministic parameter init ----------------------
def init_params(key):
    it = iter(jax.random.split(key, 128))

    def nrm(shape, scale=0.02):
        return (scale * jax.random.normal(next(it), shape)).astype(jnp.float32)

    p = {}
    # DataEmbedding
    p["tok_W"] = nrm((D_MODEL, ENC_IN, 3))       # Conv1d weight (out, in, k)
    p["tok_b"] = nrm((D_MODEL,))
    p["temp_W"] = nrm((N_MARK, D_MODEL))         # Linear stored as (in, out)
    p["temp_b"] = nrm((D_MODEL,))
    # Bottleneck_Construct
    p["down_W"] = nrm((D_MODEL, D_BOTTLENECK)); p["down_b"] = nrm((D_BOTTLENECK,))
    p["conv_W"] = [nrm((D_BOTTLENECK, D_BOTTLENECK, w)) for w in WINDOW_SIZE]
    p["conv_b"] = [nrm((D_BOTTLENECK,)) for _ in WINDOW_SIZE]
    p["bn_gamma"] = [jnp.ones((D_BOTTLENECK,), jnp.float32) for _ in WINDOW_SIZE]
    p["bn_beta"] = [jnp.zeros((D_BOTTLENECK,), jnp.float32) for _ in WINDOW_SIZE]
    p["bn_mean"] = [jnp.zeros((D_BOTTLENECK,), jnp.float32) for _ in WINDOW_SIZE]
    p["bn_var"] = [jnp.ones((D_BOTTLENECK,), jnp.float32) for _ in WINDOW_SIZE]
    p["up_W"] = nrm((D_BOTTLENECK, D_MODEL)); p["up_b"] = nrm((D_MODEL,))
    p["cscm_ln_g"] = jnp.ones((D_MODEL,), jnp.float32)
    p["cscm_ln_b"] = jnp.zeros((D_MODEL,), jnp.float32)
    # Encoder layers
    layers = []
    for _ in range(N_LAYER):
        layers.append({
            "wq": nrm((D_MODEL, N_HEAD * D_K)),
            "wk": nrm((D_MODEL, N_HEAD * D_K)),
            "wv": nrm((D_MODEL, N_HEAD * D_V)),
            "fc_W": nrm((N_HEAD * D_V, D_MODEL)),
            "fc_b": nrm((D_MODEL,)),
            "ln1_g": jnp.ones((D_MODEL,), jnp.float32),
            "ln1_b": jnp.zeros((D_MODEL,), jnp.float32),
            "w1": nrm((D_MODEL, D_INNER)),
            "b1": nrm((D_INNER,)),
            "w2": nrm((D_INNER, D_MODEL)),
            "b2": nrm((D_MODEL,)),
            "ln2_g": jnp.ones((D_MODEL,), jnp.float32),
            "ln2_b": jnp.zeros((D_MODEL,), jnp.float32),
        })
    p["layers"] = layers
    # Predictor(4*d_model, out_len*enc_in), no bias
    p["pred_W"] = nrm((4 * D_MODEL, OUT_LEN * ENC_IN))
    return p


# ----------------------- main ----------------------------------------------
if __name__ == "__main__":
    key = jax.random.PRNGKey(0)
    kp, kx1, kx2, kx3, kx4 = jax.random.split(key, 5)
    params = init_params(kp)
    x_enc = jax.random.normal(kx1, (B, INPUT_SIZE, ENC_IN), jnp.float32)
    x_mark_enc = jax.random.normal(kx2, (B, INPUT_SIZE, N_MARK), jnp.float32)
    x_dec = jax.random.normal(kx3, (B, OUT_LEN, ENC_IN), jnp.float32)
    x_mark_dec = jax.random.normal(kx4, (B, OUT_LEN, N_MARK), jnp.float32)

    pred = model_forward(params, x_enc, x_mark_enc, x_dec, x_mark_dec)
    jax.block_until_ready(pred)
    assert pred.shape == (B, OUT_LEN, ENC_IN)
    assert bool(jnp.all(jnp.isfinite(pred)))
    print("KERNEL_OK")
</pallas_src>

<mosaic_0001>
module attributes {stable_mosaic.version = 11 : i64} {
  func.func @_embed_kernel(%arg0: memref<128x12xf32, #tpu.memory_space<vmem>>, %arg1: memref<128x4xf32, #tpu.memory_space<vmem>>, %arg2: memref<128x64xf32, #tpu.memory_space<vmem>>, %arg3: memref<12x64xf32, #tpu.memory_space<vmem>>, %arg4: memref<1x64xf32, #tpu.memory_space<vmem>>, %arg5: memref<4x64xf32, #tpu.memory_space<vmem>>, %arg6: memref<1x64xf32, #tpu.memory_space<vmem>>, %arg7: memref<64x32xf32, #tpu.memory_space<vmem>>, %arg8: memref<1x32xf32, #tpu.memory_space<vmem>>, %arg9: memref<128x64xf32, #tpu.memory_space<vmem>>, %arg10: memref<128x32xf32, #tpu.memory_space<vmem>>) attributes {dimension_semantics = [], scalar_prefetch = 0 : i64, scratch_operands = 0 : i64, tpu.core_type = #tpu.core_type<tc>} {
    %c0 = arith.constant 0 : index
    %c0_0 = arith.constant 0 : index
    %0 = vector.load %arg0[%c0, %c0_0] : memref<128x12xf32, #tpu.memory_space<vmem>>, vector<128x12xf32>
    %c0_1 = arith.constant 0 : index
    %c0_2 = arith.constant 0 : index
    %1 = vector.load %arg3[%c0_1, %c0_2] : memref<12x64xf32, #tpu.memory_space<vmem>>, vector<12x64xf32>
    %cst = arith.constant dense<0.000000e+00> : vector<128x64xf32>
    %2 = tpu.matmul %0, %1, %cst {dimension_numbers = #tpu.dot_dimension_numbers<[1], [0], [0], [1], [0, 0, 1, 1], [], []>} : vector<128x12xf32>, vector<12x64xf32>, vector<128x64xf32> -> vector<128x64xf32>
    %c0_3 = arith.constant 0 : index
    %c0_4 = arith.constant 0 : index
    %3 = vector.load %arg4[%c0_3, %c0_4] : memref<1x64xf32, #tpu.memory_space<vmem>>, vector<1x64xf32>
    %4 = vector.broadcast %3 : vector<1x64xf32> to vector<128x64xf32>
    %5 = arith.addf %2, %4 : vector<128x64xf32>
    %c0_5 = arith.constant 0 : index
    %c0_6 = arith.constant 0 : index
    %6 = vector.load %arg1[%c0_5, %c0_6] : memref<128x4xf32, #tpu.memory_space<vmem>>, vector<128x4xf32>
    %c0_7 = arith.constant 0 : index
    %c0_8 = arith.constant 0 : index
    %7 = vector.load %arg5[%c0_7, %c0_8] : memref<4x64xf32, #tpu.memory_space<vmem>>, vector<4x64xf32>
    %cst_9 = arith.constant dense<0.000000e+00> : vector<128x64xf32>
    %8 = tpu.matmul %6, %7, %cst_9 {dimension_numbers = #tpu.dot_dimension_numbers<[1], [0], [0], [1], [0, 0, 1, 1], [], []>} : vector<128x4xf32>, vector<4x64xf32>, vector<128x64xf32> -> vector<128x64xf32>
    %c0_10 = arith.constant 0 : index
    %c0_11 = arith.constant 0 : index
    %9 = vector.load %arg6[%c0_10, %c0_11] : memref<1x64xf32, #tpu.memory_space<vmem>>, vector<1x64xf32>
    %10 = vector.broadcast %9 : vector<1x64xf32> to vector<128x64xf32>
    %11 = arith.addf %8, %10 : vector<128x64xf32>
    %c0_12 = arith.constant 0 : index
    %c0_13 = arith.constant 0 : index
    %12 = vector.load %arg2[%c0_12, %c0_13] : memref<128x64xf32, #tpu.memory_space<vmem>>, vector<128x64xf32>
    %13 = arith.addf %5, %12 : vector<128x64xf32>
    %14 = arith.addf %13, %11 : vector<128x64xf32>
    %c0_14 = arith.constant 0 : index
    %c0_15 = arith.constant 0 : index
    %15 = vector.load %arg9[%c0_14, %c0_15] : memref<128x64xf32, #tpu.memory_space<vmem>>, vector<128x64xf32>
    tpu.vector_store %arg9[%c0_14, %c0_15], %14 {strides = array<i32>} : memref<128x64xf32, #tpu.memory_space<vmem>>, vector<128x64xf32>,
    %c0_16 = arith.constant 0 : index
    %c0_17 = arith.constant 0 : index
    %16 = vector.load %arg7[%c0_16, %c0_17] : memref<64x32xf32, #tpu.memory_space<vmem>>, vector<64x32xf32>
    %cst_18 = arith.constant dense<0.000000e+00> : vector<128x32xf32>
    %17 = tpu.matmul %14, %16, %cst_18 {dimension_numbers = #tpu.dot_dimension_numbers<[1], [0], [0], [1], [0, 0, 1, 1], [], []>} : vector<128x64xf32>, vector<64x32xf32>, vector<128x32xf32> -> vector<128x32xf32>
    %c0_19 = arith.constant 0 : index
    %c0_20 = arith.constant 0 : index
    %18 = vector.load %arg8[%c0_19, %c0_20] : memref<1x32xf32, #tpu.memory_space<vmem>>, vector<1x32xf32>
    %19 = vector.broadcast %18 : vector<1x32xf32> to vector<128x32xf32>
    %20 = arith.addf %17, %19 : vector<128x32xf32>
    %c0_21 = arith.constant 0 : index
    %c0_22 = arith.constant 0 : index
    %21 = vector.load %arg10[%c0_21, %c0_22] : memref<128x32xf32, #tpu.memory_space<vmem>>, vector<128x32xf32>
    tpu.vector_store %arg10[%c0_21, %c0_22], %20 {strides = array<i32>} : memref<128x32xf32, #tpu.memory_space<vmem>>, vector<128x32xf32>,
    return
  }
}

module attributes {stable_mosaic.version = 11 : i64} {
  func.func @_linear_kernel(%arg0: memref<8x128xf32, #tpu.memory_space<vmem>>, %arg1: memref<128x32xf32, #tpu.memory_space<vmem>>, %arg2: memref<1x32xf32, #tpu.memory_space<vmem>>, %arg3: memref<8x32xf32, #tpu.memory_space<vmem>>) attributes {dimension_semantics = [], scalar_prefetch = 0 : i64, scratch_operands = 0 : i64, tpu.core_type = #tpu.core_type<tc>} {
    %c0 = arith.constant 0 : index
    %c0_0 = arith.constant 0 : index
    %0 = vector.load %arg0[%c0, %c0_0] : memref<8x128xf32, #tpu.memory_space<vmem>>, vector<8x128xf32>
    %c0_1 = arith.constant 0 : index
    %c0_2 = arith.constant 0 : index
    %1 = vector.load %arg1[%c0_1, %c0_2] : memref<128x32xf32, #tpu.memory_space<vmem>>, vector<128x32xf32>
    %cst = arith.constant dense<0.000000e+00> : vector<8x32xf32>
    %2 = tpu.matmul %0, %1, %cst {dimension_numbers = #tpu.dot_dimension_numbers<[1], [0], [0], [1], [0, 0, 1, 1], [], []>} : vector<8x128xf32>, vector<128x32xf32>, vector<8x32xf32> -> vector<8x32xf32>
    %c0_3 = arith.constant 0 : index
    %c0_4 = arith.constant 0 : index
    %3 = vector.load %arg2[%c0_3, %c0_4] : memref<1x32xf32, #tpu.memory_space<vmem>>, vector<1x32xf32>
    %4 = vector.broadcast %3 : vector<1x32xf32> to vector<8x32xf32>
    %5 = arith.addf %2, %4 : vector<8x32xf32>
    %cst_5 = arith.constant 0.000000e+00 : f32
    %6 = vector.broadcast %cst_5 : f32 to vector<8x32xf32>
    %7 = arith.cmpf ogt, %5, %6 : vector<8x32xf32>
    %cst_6 = arith.constant 0.000000e+00 : f32
    %8 = vector.broadcast %cst_6 : f32 to vector<8x32xf32>
    %9 = arith.minimumf %5, %8 : vector<8x32xf32>
    %10 = math.exp %9 : vector<8x32xf32>
    %cst_7 = arith.constant 1.000000e+00 : f32
    %11 = vector.broadcast %cst_7 : f32 to vector<8x32xf32>
    %12 = arith.subf %10, %11 : vector<8x32xf32>
    %13 = arith.mulf %12, %9 : vector<8x32xf32>
    %14 = math.log %10 : vector<8x32xf32>
    %15 = arith.divf %13, %14 : vector<8x32xf32>
    %cst_8 = arith.constant 1.000000e+00 : f32
    %16 = vector.broadcast %cst_8 : f32 to vector<8x32xf32>
    %17 = arith.cmpf oeq, %10, %16 : vector<8x32xf32>
    %cst_9 = arith.constant 0.000000e+00 : f32
    %18 = vector.broadcast %cst_9 : f32 to vector<8x32xf32>
    %19 = arith.cmpf oeq, %10, %18 : vector<8x32xf32>
    %cst_10 = arith.constant -1.000000e+00 : f32
    %20 = vector.broadcast %cst_10 : f32 to vector<8x32xf32>
    %21 = arith.select %19, %20, %15 : vector<8x32xi1>, vector<8x32xf32>
    %22 = arith.select %17, %9, %21 : vector<8x32xi1>, vector<8x32xf32>
    %23 = arith.select %7, %5, %22 : vector<8x32xi1>, vector<8x32xf32>
    %c0_11 = arith.constant 0 : index
    %c0_12 = arith.constant 0 : index
    %24 = vector.load %arg3[%c0_11, %c0_12] : memref<8x32xf32, #tpu.memory_space<vmem>>, vector<8x32xf32>
    tpu.vector_store %arg3[%c0_11, %c0_12], %23 {strides = array<i32>} : memref<8x32xf32, #tpu.memory_space<vmem>>, vector<8x32xf32>,
    return
  }
}

module attributes {stable_mosaic.version = 11 : i64} {
  func.func @_linear_kernel(%arg0: memref<32x128xf32, #tpu.memory_space<vmem>>, %arg1: memref<128x32xf32, #tpu.memory_space<vmem>>, %arg2: memref<1x32xf32, #tpu.memory_space<vmem>>, %arg3: memref<32x32xf32, #tpu.memory_space<vmem>>) attributes {dimension_semantics = [], scalar_prefetch = 0 : i64, scratch_operands = 0 : i64, tpu.core_type = #tpu.core_type<tc>} {
    %c0 = arith.constant 0 : index
    %c0_0 = arith.constant 0 : index
    %0 = vector.load %arg0[%c0, %c0_0] : memref<32x128xf32, #tpu.memory_space<vmem>>, vector<32x128xf32>
    %c0_1 = arith.constant 0 : index
    %c0_2 = arith.constant 0 : index
    %1 = vector.load %arg1[%c0_1, %c0_2] : memref<128x32xf32, #tpu.memory_space<vmem>>, vector<128x32xf32>
    %cst = arith.constant dense<0.000000e+00> : vector<32x32xf32>
    %2 = tpu.matmul %0, %1, %cst {dimension_numbers = #tpu.dot_dimension_numbers<[1], [0], [0], [1], [0, 0, 1, 1], [], []>} : vector<32x128xf32>, vector<128x32xf32>, vector<32x32xf32> -> vector<32x32xf32>
    %c0_3 = arith.constant 0 : index
    %c0_4 = arith.constant 0 : index
    %3 = vector.load %arg2[%c0_3, %c0_4] : memref<1x32xf32, #tpu.memory_space<vmem>>, vector<1x32xf32>
    %4 = vector.broadcast %3 : vector<1x32xf32> to vector<32x32xf32>
    %5 = arith.addf %2, %4 : vector<32x32xf32>
    %cst_5 = arith.constant 0.000000e+00 : f32
    %6 = vector.broadcast %cst_5 : f32 to vector<32x32xf32>
    %7 = arith.cmpf ogt, %5, %6 : vector<32x32xf32>
    %cst_6 = arith.constant 0.000000e+00 : f32
    %8 = vector.broadcast %cst_6 : f32 to vector<32x32xf32>
    %9 = arith.minimumf %5, %8 : vector<32x32xf32>
    %10 = math.exp %9 : vector<32x32xf32>
    %cst_7 = arith.constant 1.000000e+00 : f32
    %11 = vector.broadcast %cst_7 : f32 to vector<32x32xf32>
    %12 = arith.subf %10, %11 : vector<32x32xf32>
    %13 = arith.mulf %12, %9 : vector<32x32xf32>
    %14 = math.log %10 : vector<32x32xf32>
    %15 = arith.divf %13, %14 : vector<32x32xf32>
    %cst_8 = arith.constant 1.000000e+00 : f32
    %16 = vector.broadcast %cst_8 : f32 to vector<32x32xf32>
    %17 = arith.cmpf oeq, %10, %16 : vector<32x32xf32>
    %cst_9 = arith.constant 0.000000e+00 : f32
    %18 = vector.broadcast %cst_9 : f32 to vector<32x32xf32>
    %19 = arith.cmpf oeq, %10, %18 : vector<32x32xf32>
    %cst_10 = arith.constant -1.000000e+00 : f32
    %20 = vector.broadcast %cst_10 : f32 to vector<32x32xf32>
    %21 = arith.select %19, %20, %15 : vector<32x32xi1>, vector<32x32xf32>
    %22 = arith.select %17, %9, %21 : vector<32x32xi1>, vector<32x32xf32>
    %23 = arith.select %7, %5, %22 : vector<32x32xi1>, vector<32x32xf32>
    %c0_11 = arith.constant 0 : index
    %c0_12 = arith.constant 0 : index
    %24 = vector.load %arg3[%c0_11, %c0_12] : memref<32x32xf32, #tpu.memory_space<vmem>>, vector<32x32xf32>
    tpu.vector_store %arg3[%c0_11, %c0_12], %23 {strides = array<i32>} : memref<32x32xf32, #tpu.memory_space<vmem>>, vector<32x32xf32>,
    return
  }
}

module attributes {stable_mosaic.version = 11 : i64} {
  func.func @_linear_kernel(%arg0: memref<2x128xf32, #tpu.memory_space<vmem>>, %arg1: memref<128x32xf32, #tpu.memory_space<vmem>>, %arg2: memref<1x32xf32, #tpu.memory_space<vmem>>, %arg3: memref<2x32xf32, #tpu.memory_space<vmem>>) attributes {dimension_semantics = [], scalar_prefetch = 0 : i64, scratch_operands = 0 : i64, tpu.core_type = #tpu.core_type<tc>} {
    %c0 = arith.constant 0 : index
    %c0_0 = arith.constant 0 : index
    %0 = vector.load %arg0[%c0, %c0_0] : memref<2x128xf32, #tpu.memory_space<vmem>>, vector<2x128xf32>
    %c0_1 = arith.constant 0 : index
    %c0_2 = arith.constant 0 : index
    %1 = vector.load %arg1[%c0_1, %c0_2] : memref<128x32xf32, #tpu.memory_space<vmem>>, vector<128x32xf32>
    %cst = arith.constant dense<0.000000e+00> : vector<2x32xf32>
    %2 = tpu.matmul %0, %1, %cst {dimension_numbers = #tpu.dot_dimension_numbers<[1], [0], [0], [1], [0, 0, 1, 1], [], []>} : vector<2x128xf32>, vector<128x32xf32>, vector<2x32xf32> -> vector<2x32xf32>
    %c0_3 = arith.constant 0 : index
    %c0_4 = arith.constant 0 : index
    %3 = vector.load %arg2[%c0_3, %c0_4] : memref<1x32xf32, #tpu.memory_space<vmem>>, vector<1x32xf32>
    %4 = vector.broadcast %3 : vector<1x32xf32> to vector<2x32xf32>
    %5 = arith.addf %2, %4 : vector<2x32xf32>
    %cst_5 = arith.constant 0.000000e+00 : f32
    %6 = vector.broadcast %cst_5 : f32 to vector<2x32xf32>
    %7 = arith.cmpf ogt, %5, %6 : vector<2x32xf32>
    %cst_6 = arith.constant 0.000000e+00 : f32
    %8 = vector.broadcast %cst_6 : f32 to vector<2x32xf32>
    %9 = arith.minimumf %5, %8 : vector<2x32xf32>
    %10 = math.exp %9 : vector<2x32xf32>
    %cst_7 = arith.constant 1.000000e+00 : f32
    %11 = vector.broadcast %cst_7 : f32 to vector<2x32xf32>
    %12 = arith.subf %10, %11 : vector<2x32xf32>
    %13 = arith.mulf %12, %9 : vector<2x32xf32>
    %14 = math.log %10 : vector<2x32xf32>
    %15 = arith.divf %13, %14 : vector<2x32xf32>
    %cst_8 = arith.constant 1.000000e+00 : f32
    %16 = vector.broadcast %cst_8 : f32 to vector<2x32xf32>
    %17 = arith.cmpf oeq, %10, %16 : vector<2x32xf32>
    %cst_9 = arith.constant 0.000000e+00 : f32
    %18 = vector.broadcast %cst_9 : f32 to vector<2x32xf32>
    %19 = arith.cmpf oeq, %10, %18 : vector<2x32xf32>
    %cst_10 = arith.constant -1.000000e+00 : f32
    %20 = vector.broadcast %cst_10 : f32 to vector<2x32xf32>
    %21 = arith.select %19, %20, %15 : vector<2x32xi1>, vector<2x32xf32>
    %22 = arith.select %17, %9, %21 : vector<2x32xi1>, vector<2x32xf32>
    %23 = arith.select %7, %5, %22 : vector<2x32xi1>, vector<2x32xf32>
    %c0_11 = arith.constant 0 : index
    %c0_12 = arith.constant 0 : index
    %24 = vector.load %arg3[%c0_11, %c0_12] : memref<2x32xf32, #tpu.memory_space<vmem>>, vector<2x32xf32>
    tpu.vector_store %arg3[%c0_11, %c0_12], %23 {strides = array<i32>} : memref<2x32xf32, #tpu.memory_space<vmem>>, vector<2x32xf32>,
    return
  }
}

module attributes {stable_mosaic.version = 11 : i64} {
  func.func @_cscm_out_kernel(%arg0: i32, %arg1: memref<1x64x64xf32, #tpu.memory_space<vmem>>, %arg2: memref<1x21x32xf32, #tpu.memory_space<vmem>>, %arg3: memref<32x64xf32, #tpu.memory_space<vmem>>, %arg4: memref<1x64xf32, #tpu.memory_space<vmem>>, %arg5: memref<1x64xf32, #tpu.memory_space<vmem>>, %arg6: memref<1x64xf32, #tpu.memory_space<vmem>>, %arg7: memref<1x128x64xf32, #tpu.memory_space<vmem>>) attributes {dimension_semantics = [#tpu.dimension_semantics<parallel>], iteration_bounds = array<i64: 2>, scalar_prefetch = 0 : i64, scratch_operands = 0 : i64, tpu.core_type = #tpu.core_type<tc>, window_params = [{transform_indices = @transform_0, window_bounds = array<i64: 1, 64, 64>}, {transform_indices = @transform_1, window_bounds = array<i64: 1, 21, 32>}, {pipeline_mode = #tpu.pipeline_mode<synchronous>, transform_indices = @transform_2, window_bounds = array<i64: 32, 64>}, {pipeline_mode = #tpu.pipeline_mode<synchronous>, transform_indices = @transform_3, window_bounds = array<i64: 1, 64>}, {pipeline_mode = #tpu.pipeline_mode<synchronous>, transform_indices = @transform_4, window_bounds = array<i64: 1, 64>}, {pipeline_mode = #tpu.pipeline_mode<synchronous>, transform_indices = @transform_5, window_bounds = array<i64: 1, 64>}, {transform_indices = @transform_6, window_bounds = array<i64: 1, 128, 64>}]} {
    %c0 = arith.constant 0 : index
    %c0_0 = arith.constant 0 : index
    %c0_1 = arith.constant 0 : index
    %0 = vector.load %arg2[%c0, %c0_0, %c0_1] : memref<1x21x32xf32, #tpu.memory_space<vmem>>, vector<1x21x32xf32>
    %1 = vector.shape_cast %0 : vector<1x21x32xf32> to vector<21x32xf32>
    %c0_2 = arith.constant 0 : index
    %c0_3 = arith.constant 0 : index
    %2 = vector.load %arg3[%c0_2, %c0_3] : memref<32x64xf32, #tpu.memory_space<vmem>>, vector<32x64xf32>
    %cst = arith.constant dense<0.000000e+00> : vector<21x64xf32>
    %3 = tpu.matmul %1, %2, %cst {dimension_numbers = #tpu.dot_dimension_numbers<[1], [0], [0], [1], [0, 0, 1, 1], [], []>} : vector<21x32xf32>, vector<32x64xf32>, vector<21x64xf32> -> vector<21x64xf32>
    %c0_4 = arith.constant 0 : index
    %c0_5 = arith.constant 0 : index
    %4 = vector.load %arg4[%c0_4, %c0_5] : memref<1x64xf32, #tpu.memory_space<vmem>>, vector<1x64xf32>
    %5 = vector.broadcast %4 : vector<1x64xf32> to vector<21x64xf32>
    %6 = arith.addf %3, %5 : vector<21x64xf32>
    %c0_6 = arith.constant 0 : index
    %c0_7 = arith.constant 0 : index
    %7 = vector.load %arg5[%c0_6, %c0_7] : memref<1x64xf32, #tpu.memory_space<vmem>>, vector<1x64xf32>
    %c0_8 = arith.constant 0 : index
    %c0_9 = arith.constant 0 : index
    %8 = vector.load %arg6[%c0_8, %c0_9] : memref<1x64xf32, #tpu.memory_space<vmem>>, vector<1x64xf32>
    %cst_10 = arith.constant 0.000000e+00 : f32
    %9 = vector.broadcast %cst_10 : f32 to vector<128x64xf32>
    %c0_11 = arith.constant 0 : index
    %c0_12 = arith.constant 0 : index
    %c0_13 = arith.constant 0 : index
    %10 = vector.load %arg7[%c0_11, %c0_12, %c0_13] : memref<1x128x64xf32, #tpu.memory_space<vmem>>, vector<1x128x64xf32>
    %11 = vector.shape_cast %10 : vector<1x128x64xf32> to vector<128x64xf32>
    %12 = vector.shape_cast %9 : vector<128x64xf32> to vector<1x128x64xf32>
    tpu.vector_store %arg7[%c0_11, %c0_12, %c0_13], %12 {strides = array<i32>} : memref<1x128x64xf32, #tpu.memory_space<vmem>>, vector<1x128x64xf32>,
    %c0_14 = arith.constant 0 : index
    %c0_15 = arith.constant 0 : index
    %c0_16 = arith.constant 0 : index
    %13 = vector.load %arg1[%c0_14, %c0_15, %c0_16] : memref<1x64x64xf32, #tpu.memory_space<vmem>>, vector<1x64x64xf32>
    %14 = vector.shape_cast %13 : vector<1x64x64xf32> to vector<64x64xf32>
    %cst_17 = arith.constant dense<0.000000e+00> : vector<64xf32>
    %15 = vector.multi_reduction <add>, %14, %cst_17 [1] : vector<64x64xf32> to vector<64xf32>
    %16 = vector.shape_cast %15 : vector<64xf32> to vector<64x1xf32>
    %cst_18 = arith.constant 6.400000e+01 : f32
    %17 = vector.broadcast %cst_18 : f32 to vector<64x1xf32>
    %18 = arith.divf %16, %17 : vector<64x1xf32>
    %19 = vector.broadcast %18 : vector<64x1xf32> to vector<64x64xf32>
    %20 = arith.subf %14, %19 : vector<64x64xf32>
    %21 = arith.mulf %20, %20 : vector<64x64xf32>
    %cst_19 = arith.constant dense<0.000000e+00> : vector<64xf32>
    %22 = vector.multi_reduction <add>, %21, %cst_19 [1] : vector<64x64xf32> to vector<64xf32>
    %23 = vector.shape_cast %22 : vector<64xf32> to vector<64x1xf32>
    %cst_20 = arith.constant 6.400000e+01 : f32
    %24 = vector.broadcast %cst_20 : f32 to vector<64x1xf32>
    %25 = arith.divf %23, %24 : vector<64x1xf32>
    %cst_21 = arith.constant 9.99999974E-6 : f32
    %26 = vector.broadcast %cst_21 : f32 to vector<64x1xf32>
    %27 = arith.addf %25, %26 : vector<64x1xf32>
    %28 = math.rsqrt %27 : vector<64x1xf32>
    %29 = vector.broadcast %28 : vector<64x1xf32> to vector<64x64xf32>
    %30 = arith.mulf %20, %29 : vector<64x64xf32>
    %31 = vector.broadcast %7 : vector<1x64xf32> to vector<64x64xf32>
    %32 = arith.mulf %30, %31 : vector<64x64xf32>
    %33 = vector.broadcast %8 : vector<1x64xf32> to vector<64x64xf32>
    %34 = arith.addf %32, %33 : vector<64x64xf32>
    %c0_22 = arith.constant 0 : index
    %c0_23 = arith.constant 0 : index
    %c0_24 = arith.constant 0 : index
    %35 = vector.load %arg7[%c0_22, %c0_23, %c0_24] : memref<1x128x64xf32, #tpu.memory_space<vmem>>, vector<1x64x64xf32>
    %36 = vector.shape_cast %35 : vector<1x64x64xf32> to vector<64x64xf32>
    %37 = vector.shape_cast %34 : vector<64x64xf32> to vector<1x64x64xf32>
    tpu.vector_store %arg7[%c0_22, %c0_23, %c0_24], %37 {strides = array<i32>} : memref<1x128x64xf32, #tpu.memory_space<vmem>>, vector<1x64x64xf32>,
    %cst_25 = arith.constant dense<0.000000e+00> : vector<21xf32>
    %38 = vector.multi_reduction <add>, %6, %cst_25 [1] : vector<21x64xf32> to vector<21xf32>
    %39 = vector.shape_cast %38 : vector<21xf32> to vector<21x1xf32>
    %cst_26 = arith.constant 6.400000e+01 : f32
    %40 = vector.broadcast %cst_26 : f32 to vector<21x1xf32>
    %41 = arith.divf %39, %40 : vector<21x1xf32>
    %42 = vector.broadcast %41 : vector<21x1xf32> to vector<21x64xf32>
    %43 = arith.subf %6, %42 : vector<21x64xf32>
    %44 = arith.mulf %43, %43 : vector<21x64xf32>
    %cst_27 = arith.constant dense<0.000000e+00> : vector<21xf32>
    %45 = vector.multi_reduction <add>, %44, %cst_27 [1] : vector<21x64xf32> to vector<21xf32>
    %46 = vector.shape_cast %45 : vector<21xf32> to vector<21x1xf32>
    %cst_28 = arith.constant 6.400000e+01 : f32
    %47 = vector.broadcast %cst_28 : f32 to vector<21x1xf32>
    %48 = arith.divf %46, %47 : vector<21x1xf32>
    %cst_29 = arith.constant 9.99999974E-6 : f32
    %49 = vector.broadcast %cst_29 : f32 to vector<21x1xf32>
    %50 = arith.addf %48, %49 : vector<21x1xf32>
    %51 = math.rsqrt %50 : vector<21x1xf32>
    %52 = vector.broadcast %51 : vector<21x1xf32> to vector<21x64xf32>
    %53 = arith.mulf %43, %52 : vector<21x64xf32>
    %54 = vector.broadcast %7 : vector<1x64xf32> to vector<21x64xf32>
    %55 = arith.mulf %53, %54 : vector<21x64xf32>
    %56 = vector.broadcast %8 : vector<1x64xf32> to vector<21x64xf32>
    %57 = arith.addf %55, %56 : vector<21x64xf32>
    %c0_30 = arith.constant 0 : index
    %c64 = arith.constant 64 : index
    %c0_31 = arith.constant 0 : index
    %58 = vector.load %arg7[%c0_30, %c64, %c0_31] : memref<1x128x64xf32, #tpu.memory_space<vmem>>, vector<1x21x64xf32>
    %59 = vector.shape_cast %58 : vector<1x21x64xf32> to vector<21x64xf32>
    %60 = vector.shape_cast %57 : vector<21x64xf32> to vector<1x21x64xf32>
    tpu.vector_store %arg7[%c0_30, %c64, %c0_31], %60 {strides = array<i32>} : memref<1x128x64xf32, #tpu.memory_space<vmem>>, vector<1x21x64xf32>,
    return
  }
  func.func @transform_0(%arg0: i32) -> (i32, i32, i32) {
    %c0_i32 = arith.constant 0 : i32
    %c0_i32_0 = arith.constant 0 : i32
    %c0_i32_1 = arith.constant 0 : i32
    return %arg0, %c0_i32, %c0_i32_0 : i32, i32, i32
  }
  func.func @transform_1(%arg0: i32) -> (i32, i32, i32) {
    %c0_i32 = arith.constant 0 : i32
    %c0_i32_0 = arith.constant 0 : i32
    %c0_i32_1 = arith.constant 0 : i32
    return %arg0, %c0_i32, %c0_i32_0 : i32, i32, i32
  }
  func.func @transform_2(%arg0: i32) -> (i32, i32) {
    %c0_i32 = arith.constant 0 : i32
    %c0_i32_0 = arith.constant 0 : i32
    %c0_i32_1 = arith.constant 0 : i32
    return %c0_i32, %c0_i32_0 : i32, i32
  }
  func.func @transform_3(%arg0: i32) -> (i32, i32) {
    %c0_i32 = arith.constant 0 : i32
    %c0_i32_0 = arith.constant 0 : i32
    %c0_i32_1 = arith.constant 0 : i32
    return %c0_i32, %c0_i32_0 : i32, i32
  }
  func.func @transform_4(%arg0: i32) -> (i32, i32) {
    %c0_i32 = arith.constant 0 : i32
    %c0_i32_0 = arith.constant 0 : i32
    %c0_i32_1 = arith.constant 0 : i32
    return %c0_i32, %c0_i32_0 : i32, i32
  }
  func.func @transform_5(%arg0: i32) -> (i32, i32) {
    %c0_i32 = arith.constant 0 : i32
    %c0_i32_0 = arith.constant 0 : i32
    %c0_i32_1 = arith.constant 0 : i32
    return %c0_i32, %c0_i32_0 : i32, i32
  }
  func.func @transform_6(%arg0: i32) -> (i32, i32, i32) {
    %c0_i32 = arith.constant 0 : i32
    %c0_i32_0 = arith.constant 0 : i32
    %c0_i32_1 = arith.constant 0 : i32
    return %arg0, %c0_i32, %c0_i32_0 : i32, i32, i32
  }
}

module attributes {stable_mosaic.version = 11 : i64} {
  func.func @_encoder_layer_kernel(%arg0: i32, %arg1: memref<1x128x64xf32, #tpu.memory_space<vmem>>, %arg2: memref<128x128xf32, #tpu.memory_space<vmem>>, %arg3: memref<64x192xf32, #tpu.memory_space<vmem>>, %arg4: memref<64x64xf32, #tpu.memory_space<vmem>>, %arg5: memref<1x64xf32, #tpu.memory_space<vmem>>, %arg6: memref<1x64xf32, #tpu.memory_space<vmem>>, %arg7: memref<1x64xf32, #tpu.memory_space<vmem>>, %arg8: memref<64x128xf32, #tpu.memory_space<vmem>>, %arg9: memref<1x128xf32, #tpu.memory_space<vmem>>, %arg10: memref<128x64xf32, #tpu.memory_space<vmem>>, %arg11: memref<1x64xf32, #tpu.memory_space<vmem>>, %arg12: memref<1x64xf32, #tpu.memory_space<vmem>>, %arg13: memref<1x64xf32, #tpu.memory_space<vmem>>, %arg14: memref<1x128x64xf32, #tpu.memory_space<vmem>>) attributes {dimension_semantics = [#tpu.dimension_semantics<parallel>], iteration_bounds = array<i64: 2>, scalar_prefetch = 0 : i64, scratch_operands = 0 : i64, tpu.core_type = #tpu.core_type<tc>, window_params = [{transform_indices = @transform_0, window_bounds = array<i64: 1, 128, 64>}, {pipeline_mode = #tpu.pipeline_mode<synchronous>, transform_indices = @transform_1, window_bounds = array<i64: 128, 128>}, {pipeline_mode = #tpu.pipeline_mode<synchronous>, transform_indices = @transform_2, window_bounds = array<i64: 64, 192>}, {pipeline_mode = #tpu.pipeline_mode<synchronous>, transform_indices = @transform_3, window_bounds = array<i64: 64, 64>}, {pipeline_mode = #tpu.pipeline_mode<synchronous>, transform_indices = @transform_4, window_bounds = array<i64: 1, 64>}, {pipeline_mode = #tpu.pipeline_mode<synchronous>, transform_indices = @transform_5, window_bounds = array<i64: 1, 64>}, {pipeline_mode = #tpu.pipeline_mode<synchronous>, transform_indices = @transform_6, window_bounds = array<i64: 1, 64>}, {pipeline_mode = #tpu.pipeline_mode<synchronous>, transform_indices = @transform_7, window_bounds = array<i64: 64, 128>}, {pipeline_mode = #tpu.pipeline_mode<synchronous>, transform_indices = @transform_8, window_bounds = array<i64: 1, 128>}, {pipeline_mode = #tpu.pipeline_mode<synchronous>, transform_indices = @transform_9, window_bounds = array<i64: 128, 64>}, {pipeline_mode = #tpu.pipeline_mode<synchronous>, transform_indices = @transform_10, window_bounds = array<i64: 1, 64>}, {pipeline_mode = #tpu.pipeline_mode<synchronous>, transform_indices = @transform_11, window_bounds = array<i64: 1, 64>}, {pipeline_mode = #tpu.pipeline_mode<synchronous>, transform_indices = @transform_12, window_bounds = array<i64: 1, 64>}, {transform_indices = @transform_13, window_bounds = array<i64: 1, 128, 64>}]} {
    %c0 = arith.constant 0 : index
    %c0_0 = arith.constant 0 : index
    %c0_1 = arith.constant 0 : index
    %0 = vector.load %arg1[%c0, %c0_0, %c0_1] : memref<1x128x64xf32, #tpu.memory_space<vmem>>, vector<1x128x64xf32>
    %1 = vector.shape_cast %0 : vector<1x128x64xf32> to vector<128x64xf32>
    %c0_2 = arith.constant 0 : index
    %c0_3 = arith.constant 0 : index
    %2 = vector.load %arg2[%c0_2, %c0_3] : memref<128x128xf32, #tpu.memory_space<vmem>>, vector<128x128xf32>
    %c0_4 = arith.constant 0 : index
    %c0_5 = arith.constant 0 : index
    %3 = vector.load %arg3[%c0_4, %c0_5] : memref<64x192xf32, #tpu.memory_space<vmem>>, vector<64x192xf32>
    %cst = arith.constant dense<0.000000e+00> : vector<128x192xf32>
    %4 = tpu.matmul %1, %3, %cst {dimension_numbers = #tpu.dot_dimension_numbers<[1], [0], [0], [1], [0, 0, 1, 1], [], []>} : vector<128x64xf32>, vector<64x192xf32>, vector<128x192xf32> -> vector<128x192xf32>
    %5 = vector.extract_strided_slice %4 {offsets = [0, 0], sizes = [128, 16], strides = [1, 1]} : vector<128x192xf32> to vector<128x16xf32>
    %cst_6 = arith.constant 2.500000e-01 : f32
    %6 = vector.broadcast %cst_6 : f32 to vector<128x16xf32>
    %7 = arith.mulf %5, %6 : vector<128x16xf32>
    %8 = vector.extract_strided_slice %4 {offsets = [0, 64], sizes = [128, 16], strides = [1, 1]} : vector<128x192xf32> to vector<128x16xf32>
    %9 = vector.extract_strided_slice %4 {offsets = [0, 128], sizes = [128, 16], strides = [1, 1]} : vector<128x192xf32> to vector<128x16xf32>
    %cst_7 = arith.constant dense<0.000000e+00> : vector<128x128xf32>
    %10 = tpu.matmul %7, %8, %cst_7 {dimension_numbers = #tpu.dot_dimension_numbers<[1], [1], [0], [0], [0, 0, 1, 0], [], []>} : vector<128x16xf32>, vector<128x16xf32>, vector<128x128xf32> -> vector<128x128xf32>
    %11 = arith.addf %10, %2 : vector<128x128xf32>
    %cst_8 = arith.constant dense<0xFF800000> : vector<128xf32>
    %12 = vector.multi_reduction <maximumf>, %11, %cst_8 [1] : vector<128x128xf32> to vector<128xf32>
    %13 = vector.shape_cast %12 : vector<128xf32> to vector<128x1xf32>
    %14 = vector.broadcast %13 : vector<128x1xf32> to vector<128x128xf32>
    %15 = arith.subf %11, %14 : vector<128x128xf32>
    %16 = math.exp %15 : vector<128x128xf32>
    %cst_9 = arith.constant dense<0.000000e+00> : vector<128xf32>
    %17 = vector.multi_reduction <add>, %16, %cst_9 [1] : vector<128x128xf32> to vector<128xf32>
    %18 = vector.shape_cast %17 : vector<128xf32> to vector<128x1xf32>
    %19 = vector.broadcast %18 : vector<128x1xf32> to vector<128x128xf32>
    %20 = arith.divf %16, %19 : vector<128x128xf32>
    %cst_10 = arith.constant dense<0.000000e+00> : vector<128x16xf32>
    %21 = tpu.matmul %20, %9, %cst_10 {dimension_numbers = #tpu.dot_dimension_numbers<[1], [0], [0], [1], [0, 0, 1, 1], [], []>} : vector<128x128xf32>, vector<128x16xf32>, vector<128x16xf32> -> vector<128x16xf32>
    %22 = vector.extract_strided_slice %4 {offsets = [0, 16], sizes = [128, 16], strides = [1, 1]} : vector<128x192xf32> to vector<128x16xf32>
    %cst_11 = arith.constant 2.500000e-01 : f32
    %23 = vector.broadcast %cst_11 : f32 to vector<128x16xf32>
    %24 = arith.mulf %22, %23 : vector<128x16xf32>
    %25 = vector.extract_strided_slice %4 {offsets = [0, 80], sizes = [128, 16], strides = [1, 1]} : vector<128x192xf32> to vector<128x16xf32>
    %26 = vector.extract_strided_slice %4 {offsets = [0, 144], sizes = [128, 16], strides = [1, 1]} : vector<128x192xf32> to vector<128x16xf32>
    %cst_12 = arith.constant dense<0.000000e+00> : vector<128x128xf32>
    %27 = tpu.matmul %24, %25, %cst_12 {dimension_numbers = #tpu.dot_dimension_numbers<[1], [1], [0], [0], [0, 0, 1, 0], [], []>} : vector<128x16xf32>, vector<128x16xf32>, vector<128x128xf32> -> vector<128x128xf32>
    %28 = arith.addf %27, %2 : vector<128x128xf32>
    %cst_13 = arith.constant dense<0xFF800000> : vector<128xf32>
    %29 = vector.multi_reduction <maximumf>, %28, %cst_13 [1] : vector<128x128xf32> to vector<128xf32>
    %30 = vector.shape_cast %29 : vector<128xf32> to vector<128x1xf32>
    %31 = vector.broadcast %30 : vector<128x1xf32> to vector<128x128xf32>
    %32 = arith.subf %28, %31 : vector<128x128xf32>
    %33 = math.exp %32 : vector<128x128xf32>
    %cst_14 = arith.constant dense<0.000000e+00> : vector<128xf32>
    %34 = vector.multi_reduction <add>, %33, %cst_14 [1] : vector<128x128xf32> to vector<128xf32>
    %35 = vector.shape_cast %34 : vector<128xf32> to vector<128x1xf32>
    %36 = vector.broadcast %35 : vector<128x1xf32> to vector<128x128xf32>
    %37 = arith.divf %33, %36 : vector<128x128xf32>
    %cst_15 = arith.constant dense<0.000000e+00> : vector<128x16xf32>
    %38 = tpu.matmul %37, %26, %cst_15 {dimension_numbers = #tpu.dot_dimension_numbers<[1], [0], [0], [1], [0, 0, 1, 1], [], []>} : vector<128x128xf32>, vector<128x16xf32>, vector<128x16xf32> -> vector<128x16xf32>
    %39 = vector.extract_strided_slice %4 {offsets = [0, 32], sizes = [128, 16], strides = [1, 1]} : vector<128x192xf32> to vector<128x16xf32>
    %cst_16 = arith.constant 2.500000e-01 : f32
    %40 = vector.broadcast %cst_16 : f32 to vector<128x16xf32>
    %41 = arith.mulf %39, %40 : vector<128x16xf32>
    %42 = vector.extract_strided_slice %4 {offsets = [0, 96], sizes = [128, 16], strides = [1, 1]} : vector<128x192xf32> to vector<128x16xf32>
    %43 = vector.extract_strided_slice %4 {offsets = [0, 160], sizes = [128, 16], strides = [1, 1]} : vector<128x192xf32> to vector<128x16xf32>
    %cst_17 = arith.constant dense<0.000000e+00> : vector<128x128xf32>
    %44 = tpu.matmul %41, %42, %cst_17 {dimension_numbers = #tpu.dot_dimension_numbers<[1], [1], [0], [0], [0, 0, 1, 0], [], []>} : vector<128x16xf32>, vector<128x16xf32>, vector<128x128xf32> -> vector<128x128xf32>
    %45 = arith.addf %44, %2 : vector<128x128xf32>
    %cst_18 = arith.constant dense<0xFF800000> : vector<128xf32>
    %46 = vector.multi_reduction <maximumf>, %45, %cst_18 [1] : vector<128x128xf32> to vector<128xf32>
    %47 = vector.shape_cast %46 : vector<128xf32> to vector<128x1xf32>
    %48 = vector.broadcast %47 : vector<128x1xf32> to vector<128x128xf32>
    %49 = arith.subf %45, %48 : vector<128x128xf32>
    %50 = math.exp %49 : vector<128x128xf32>
    %cst_19 = arith.constant dense<0.000000e+00> : vector<128xf32>
    %51 = vector.multi_reduction <add>, %50, %cst_19 [1] : vector<128x128xf32> to vector<128xf32>
    %52 = vector.shape_cast %51 : vector<128xf32> to vector<128x1xf32>
    %53 = vector.broadcast %52 : vector<128x1xf32> to vector<128x128xf32>
    %54 = arith.divf %50, %53 : vector<128x128xf32>
    %cst_20 = arith.constant dense<0.000000e+00> : vector<128x16xf32>
    %55 = tpu.matmul %54, %43, %cst_20 {dimension_numbers = #tpu.dot_dimension_numbers<[1], [0], [0], [1], [0, 0, 1, 1], [], []>} : vector<128x128xf32>, vector<128x16xf32>, vector<128x16xf32> -> vector<128x16xf32>
    %56 = vector.extract_strided_slice %4 {offsets = [0, 48], sizes = [128, 16], strides = [1, 1]} : vector<128x192xf32> to vector<128x16xf32>
    %cst_21 = arith.constant 2.500000e-01 : f32
    %57 = vector.broadcast %cst_21 : f32 to vector<128x16xf32>
    %58 = arith.mulf %56, %57 : vector<128x16xf32>
    %59 = vector.extract_strided_slice %4 {offsets = [0, 112], sizes = [128, 16], strides = [1, 1]} : vector<128x192xf32> to vector<128x16xf32>
    %60 = vector.extract_strided_slice %4 {offsets = [0, 176], sizes = [128, 16], strides = [1, 1]} : vector<128x192xf32> to vector<128x16xf32>
    %cst_22 = arith.constant dense<0.000000e+00> : vector<128x128xf32>
    %61 = tpu.matmul %58, %59, %cst_22 {dimension_numbers = #tpu.dot_dimension_numbers<[1], [1], [0], [0], [0, 0, 1, 0], [], []>} : vector<128x16xf32>, vector<128x16xf32>, vector<128x128xf32> -> vector<128x128xf32>
    %62 = arith.addf %61, %2 : vector<128x128xf32>
    %cst_23 = arith.constant dense<0xFF800000> : vector<128xf32>
    %63 = vector.multi_reduction <maximumf>, %62, %cst_23 [1] : vector<128x128xf32> to vector<128xf32>
    %64 = vector.shape_cast %63 : vector<128xf32> to vector<128x1xf32>
    %65 = vector.broadcast %64 : vector<128x1xf32> to vector<128x128xf32>
    %66 = arith.subf %62, %65 : vector<128x128xf32>
    %67 = math.exp %66 : vector<128x128xf32>
    %cst_24 = arith.constant dense<0.000000e+00> : vector<128xf32>
    %68 = vector.multi_reduction <add>, %67, %cst_24 [1] : vector<128x128xf32> to vector<128xf32>
    %69 = vector.shape_cast %68 : vector<128xf32> to vector<128x1xf32>
    %70 = vector.broadcast %69 : vector<128x1xf32> to vector<128x128xf32>
    %71 = arith.divf %67, %70 : vector<128x128xf32>
    %cst_25 = arith.constant dense<0.000000e+00> : vector<128x16xf32>
    %72 = tpu.matmul %71, %60, %cst_25 {dimension_numbers = #tpu.dot_dimension_numbers<[1], [0], [0], [1], [0, 0, 1, 1], [], []>} : vector<128x128xf32>, vector<128x16xf32>, vector<128x16xf32> -> vector<128x16xf32>
    %73 = tpu.concatenate %21, %38, %55, %72 in 1 : vector<128x16xf32>, vector<128x16xf32>, vector<128x16xf32>, vector<128x16xf32> -> vector<128x64xf32>
    %c0_26 = arith.constant 0 : index
    %c0_27 = arith.constant 0 : index
    %74 = vector.load %arg4[%c0_26, %c0_27] : memref<64x64xf32, #tpu.memory_space<vmem>>, vector<64x64xf32>
    %cst_28 = arith.constant dense<0.000000e+00> : vector<128x64xf32>
    %75 = tpu.matmul %73, %74, %cst_28 {dimension_numbers = #tpu.dot_dimension_numbers<[1], [0], [0], [1], [0, 0, 1, 1], [], []>} : vector<128x64xf32>, vector<64x64xf32>, vector<128x64xf32> -> vector<128x64xf32>
    %c0_29 = arith.constant 0 : index
    %c0_30 = arith.constant 0 : index
    %76 = vector.load %arg5[%c0_29, %c0_30] : memref<1x64xf32, #tpu.memory_space<vmem>>, vector<1x64xf32>
    %77 = vector.broadcast %76 : vector<1x64xf32> to vector<128x64xf32>
    %78 = arith.addf %75, %77 : vector<128x64xf32>
    %79 = arith.addf %78, %1 : vector<128x64xf32>
    %c0_31 = arith.constant 0 : index
    %c0_32 = arith.constant 0 : index
    %80 = vector.load %arg6[%c0_31, %c0_32] : memref<1x64xf32, #tpu.memory_space<vmem>>, vector<1x64xf32>
    %c0_33 = arith.constant 0 : index
    %c0_34 = arith.constant 0 : index
    %81 = vector.load %arg7[%c0_33, %c0_34] : memref<1x64xf32, #tpu.memory_space<vmem>>, vector<1x64xf32>
    %cst_35 = arith.constant dense<0.000000e+00> : vector<128xf32>
    %82 = vector.multi_reduction <add>, %79, %cst_35 [1] : vector<128x64xf32> to vector<128xf32>
    %83 = vector.shape_cast %82 : vector<128xf32> to vector<128x1xf32>
    %cst_36 = arith.constant 6.400000e+01 : f32
    %84 = vector.broadcast %cst_36 : f32 to vector<128x1xf32>
    %85 = arith.divf %83, %84 : vector<128x1xf32>
    %86 = vector.broadcast %85 : vector<128x1xf32> to vector<128x64xf32>
    %87 = arith.subf %79, %86 : vector<128x64xf32>
    %88 = arith.mulf %87, %87 : vector<128x64xf32>
    %cst_37 = arith.constant dense<0.000000e+00> : vector<128xf32>
    %89 = vector.multi_reduction <add>, %88, %cst_37 [1] : vector<128x64xf32> to vector<128xf32>
    %90 = vector.shape_cast %89 : vector<128xf32> to vector<128x1xf32>
    %cst_38 = arith.constant 6.400000e+01 : f32
    %91 = vector.broadcast %cst_38 : f32 to vector<128x1xf32>
    %92 = arith.divf %90, %91 : vector<128x1xf32>
    %cst_39 = arith.constant 9.99999997E-7 : f32
    %93 = vector.broadcast %cst_39 : f32 to vector<128x1xf32>
    %94 = arith.addf %92, %93 : vector<128x1xf32>
    %95 = math.rsqrt %94 : vector<128x1xf32>
    %96 = vector.broadcast %95 : vector<128x1xf32> to vector<128x64xf32>
    %97 = arith.mulf %87, %96 : vector<128x64xf32>
    %98 = vector.broadcast %80 : vector<1x64xf32> to vector<128x64xf32>
    %99 = arith.mulf %97, %98 : vector<128x64xf32>
    %100 = vector.broadcast %81 : vector<1x64xf32> to vector<128x64xf32>
    %101 = arith.addf %99, %100 : vector<128x64xf32>
    %c0_40 = arith.constant 0 : index
    %c0_41 = arith.constant 0 : index
    %102 = vector.load %arg8[%c0_40, %c0_41] : memref<64x128xf32, #tpu.memory_space<vmem>>, vector<64x128xf32>
    %cst_42 = arith.constant dense<0.000000e+00> : vector<128x128xf32>
    %103 = tpu.matmul %101, %102, %cst_42 {dimension_numbers = #tpu.dot_dimension_numbers<[1], [0], [0], [1], [0, 0, 1, 1], [], []>} : vector<128x64xf32>, vector<64x128xf32>, vector<128x128xf32> -> vector<128x128xf32>
    %c0_43 = arith.constant 0 : index
    %c0_44 = arith.constant 0 : index
    %104 = vector.load %arg9[%c0_43, %c0_44] : memref<1x128xf32, #tpu.memory_space<vmem>>, vector<1x128xf32>
    %105 = vector.broadcast %104 : vector<1x128xf32> to vector<128x128xf32>
    %106 = arith.addf %103, %105 : vector<128x128xf32>
    %cst_45 = arith.constant 5.000000e-01 : f32
    %107 = vector.broadcast %cst_45 : f32 to vector<128x128xf32>
    %108 = arith.mulf %107, %106 : vector<128x128xf32>
    %cst_46 = arith.constant 0.707106769 : f32
    %109 = vector.broadcast %cst_46 : f32 to vector<128x128xf32>
    %110 = arith.mulf %106, %109 : vector<128x128xf32>
    %111 = math.absf %110 : vector<128x128xf32>
    %cst_47 = arith.constant 0.327591091 : f32
    %112 = vector.broadcast %cst_47 : f32 to vector<128x128xf32>
    %113 = arith.mulf %112, %111 : vector<128x128xf32>
    %cst_48 = arith.constant 1.000000e+00 : f32
    %114 = vector.broadcast %cst_48 : f32 to vector<128x128xf32>
    %115 = arith.addf %114, %113 : vector<128x128xf32>
    %cst_49 = arith.constant 1.000000e+00 : f32
    %116 = vector.broadcast %cst_49 : f32 to vector<128x128xf32>
    %117 = arith.divf %116, %115 : vector<128x128xf32>
    %cst_50 = arith.constant 1.06140542 : f32
    %118 = vector.broadcast %cst_50 : f32 to vector<128x128xf32>
    %119 = arith.mulf %117, %118 : vector<128x128xf32>
    %cst_51 = arith.constant -1.45315206 : f32
    %120 = vector.broadcast %cst_51 : f32 to vector<128x128xf32>
    %121 = arith.addf %120, %119 : vector<128x128xf32>
    %122 = arith.mulf %117, %121 : vector<128x128xf32>
    %cst_52 = arith.constant 1.42141378 : f32
    %123 = vector.broadcast %cst_52 : f32 to vector<128x128xf32>
    %124 = arith.addf %123, %122 : vector<128x128xf32>
    %125 = arith.mulf %117, %124 : vector<128x128xf32>
    %cst_53 = arith.constant -0.284496725 : f32
    %126 = vector.broadcast %cst_53 : f32 to vector<128x128xf32>
    %127 = arith.addf %126, %125 : vector<128x128xf32>
    %128 = arith.mulf %117, %127 : vector<128x128xf32>
    %cst_54 = arith.constant 0.254829586 : f32
    %129 = vector.broadcast %cst_54 : f32 to vector<128x128xf32>
    %130 = arith.addf %129, %128 : vector<128x128xf32>
    %131 = arith.mulf %117, %130 : vector<128x128xf32>
    %cst_55 = arith.constant 0.000000e+00 : f32
    %132 = vector.broadcast %cst_55 : f32 to vector<128x128xf32>
    %133 = arith.subf %132, %111 : vector<128x128xf32>
    %134 = arith.mulf %133, %111 : vector<128x128xf32>
    %135 = math.exp %134 : vector<128x128xf32>
    %136 = arith.mulf %131, %135 : vector<128x128xf32>
    %cst_56 = arith.constant 1.000000e+00 : f32
    %137 = vector.broadcast %cst_56 : f32 to vector<128x128xf32>
    %138 = arith.subf %137, %136 : vector<128x128xf32>
    %cst_57 = arith.constant 0.000000e+00 : f32
    %139 = vector.broadcast %cst_57 : f32 to vector<128x128xf32>
    %140 = arith.cmpf olt, %110, %139 : vector<128x128xf32>
    %cst_58 = arith.constant 0.000000e+00 : f32
    %141 = vector.broadcast %cst_58 : f32 to vector<128x128xf32>
    %142 = arith.subf %141, %138 : vector<128x128xf32>
    %143 = arith.select %140, %142, %138 : vector<128x128xi1>, vector<128x128xf32>
    %cst_59 = arith.constant 1.000000e+00 : f32
    %144 = vector.broadcast %cst_59 : f32 to vector<128x128xf32>
    %145 = arith.addf %144, %143 : vector<128x128xf32>
    %146 = arith.mulf %108, %145 : vector<128x128xf32>
    %c0_60 = arith.constant 0 : index
    %c0_61 = arith.constant 0 : index
    %147 = vector.load %arg10[%c0_60, %c0_61] : memref<128x64xf32, #tpu.memory_space<vmem>>, vector<128x64xf32>
    %cst_62 = arith.constant dense<0.000000e+00> : vector<128x64xf32>
    %148 = tpu.matmul %146, %147, %cst_62 {dimension_numbers = #tpu.dot_dimension_numbers<[1], [0], [0], [1], [0, 0, 1, 1], [], []>} : vector<128x128xf32>, vector<128x64xf32>, vector<128x64xf32> -> vector<128x64xf32>
    %c0_63 = arith.constant 0 : index
    %c0_64 = arith.constant 0 : index
    %149 = vector.load %arg11[%c0_63, %c0_64] : memref<1x64xf32, #tpu.memory_space<vmem>>, vector<1x64xf32>
    %150 = vector.broadcast %149 : vector<1x64xf32> to vector<128x64xf32>
    %151 = arith.addf %148, %150 : vector<128x64xf32>
    %152 = arith.addf %151, %101 : vector<128x64xf32>
    %c0_65 = arith.constant 0 : index
    %c0_66 = arith.constant 0 : index
    %153 = vector.load %arg12[%c0_65, %c0_66] : memref<1x64xf32, #tpu.memory_space<vmem>>, vector<1x64xf32>
    %c0_67 = arith.constant 0 : index
    %c0_68 = arith.constant 0 : index
    %154 = vector.load %arg13[%c0_67, %c0_68] : memref<1x64xf32, #tpu.memory_space<vmem>>, vector<1x64xf32>
    %cst_69 = arith.constant dense<0.000000e+00> : vector<128xf32>
    %155 = vector.multi_reduction <add>, %152, %cst_69 [1] : vector<128x64xf32> to vector<128xf32>
    %156 = vector.shape_cast %155 : vector<128xf32> to vector<128x1xf32>
    %cst_70 = arith.constant 6.400000e+01 : f32
    %157 = vector.broadcast %cst_70 : f32 to vector<128x1xf32>
    %158 = arith.divf %156, %157 : vector<128x1xf32>
    %159 = vector.broadcast %158 : vector<128x1xf32> to vector<128x64xf32>
    %160 = arith.subf %152, %159 : vector<128x64xf32>
    %161 = arith.mulf %160, %160 : vector<128x64xf32>
    %cst_71 = arith.constant dense<0.000000e+00> : vector<128xf32>
    %162 = vector.multi_reduction <add>, %161, %cst_71 [1] : vector<128x64xf32> to vector<128xf32>
    %163 = vector.shape_cast %162 : vector<128xf32> to vector<128x1xf32>
    %cst_72 = arith.constant 6.400000e+01 : f32
    %164 = vector.broadcast %cst_72 : f32 to vector<128x1xf32>
    %165 = arith.divf %163, %164 : vector<128x1xf32>
    %cst_73 = arith.constant 9.99999997E-7 : f32
    %166 = vector.broadcast %cst_73 : f32 to vector<128x1xf32>
    %167 = arith.addf %165, %166 : vector<128x1xf32>
    %168 = math.rsqrt %167 : vector<128x1xf32>
    %169 = vector.broadcast %168 : vector<128x1xf32> to vector<128x64xf32>
    %170 = arith.mulf %160, %169 : vector<128x64xf32>
    %171 = vector.broadcast %153 : vector<1x64xf32> to vector<128x64xf32>
    %172 = arith.mulf %170, %171 : vector<128x64xf32>
    %173 = vector.broadcast %154 : vector<1x64xf32> to vector<128x64xf32>
    %174 = arith.addf %172, %173 : vector<128x64xf32>
    %c0_74 = arith.constant 0 : index
    %c0_75 = arith.constant 0 : index
    %c0_76 = arith.constant 0 : index
    %175 = vector.load %arg14[%c0_74, %c0_75, %c0_76] : memref<1x128x64xf32, #tpu.memory_space<vmem>>, vector<1x128x64xf32>
    %176 = vector.shape_cast %175 : vector<1x128x64xf32> to vector<128x64xf32>
    %177 = vector.shape_cast %174 : vector<128x64xf32> to vector<1x128x64xf32>
    tpu.vector_store %arg14[%c0_74, %c0_75, %c0_76], %177 {strides = array<i32>} : memref<1x128x64xf32, #tpu.memory_space<vmem>>, vector<1x128x64xf32>,
    return
  }
  func.func @transform_0(%arg0: i32) -> (i32, i32, i32) {
    %c0_i32 = arith.constant 0 : i32
    %c0_i32_0 = arith.constant 0 : i32
    %c0_i32_1 = arith.constant 0 : i32
    return %arg0, %c0_i32, %c0_i32_0 : i32, i32, i32
  }
  func.func @transform_1(%arg0: i32) -> (i32, i32) {
    %c0_i32 = arith.constant 0 : i32
    %c0_i32_0 = arith.constant 0 : i32
    %c0_i32_1 = arith.constant 0 : i32
    return %c0_i32, %c0_i32_0 : i32, i32
  }
  func.func @transform_2(%arg0: i32) -> (i32, i32) {
    %c0_i32 = arith.constant 0 : i32
    %c0_i32_0 = arith.constant 0 : i32
    %c0_i32_1 = arith.constant 0 : i32
    return %c0_i32, %c0_i32_0 : i32, i32
  }
  func.func @transform_3(%arg0: i32) -> (i32, i32) {
    %c0_i32 = arith.constant 0 : i32
    %c0_i32_0 = arith.constant 0 : i32
    %c0_i32_1 = arith.constant 0 : i32
    return %c0_i32, %c0_i32_0 : i32, i32
  }
  func.func @transform_4(%arg0: i32) -> (i32, i32) {
    %c0_i32 = arith.constant 0 : i32
    %c0_i32_0 = arith.constant 0 : i32
    %c0_i32_1 = arith.constant 0 : i32
    return %c0_i32, %c0_i32_0 : i32, i32
  }
  func.func @transform_5(%arg0: i32) -> (i32, i32) {
    %c0_i32 = arith.constant 0 : i32
    %c0_i32_0 = arith.constant 0 : i32
    %c0_i32_1 = arith.constant 0 : i32
    return %c0_i32, %c0_i32_0 : i32, i32
  }
  func.func @transform_6(%arg0: i32) -> (i32, i32) {
    %c0_i32 = arith.constant 0 : i32
    %c0_i32_0 = arith.constant 0 : i32
    %c0_i32_1 = arith.constant 0 : i32
    return %c0_i32, %c0_i32_0 : i32, i32
  }
  func.func @transform_7(%arg0: i32) -> (i32, i32) {
    %c0_i32 = arith.constant 0 : i32
    %c0_i32_0 = arith.constant 0 : i32
    %c0_i32_1 = arith.constant 0 : i32
    return %c0_i32, %c0_i32_0 : i32, i32
  }
  func.func @transform_8(%arg0: i32) -> (i32, i32) {
    %c0_i32 = arith.constant 0 : i32
    %c0_i32_0 = arith.constant 0 : i32
    %c0_i32_1 = arith.constant 0 : i32
    return %c0_i32, %c0_i32_0 : i32, i32
  }
  func.func @transform_9(%arg0: i32) -> (i32, i32) {
    %c0_i32 = arith.constant 0 : i32
    %c0_i32_0 = arith.constant 0 : i32
    %c0_i32_1 = arith.constant 0 : i32
    return %c0_i32, %c0_i32_0 : i32, i32
  }
  func.func @transform_10(%arg0: i32) -> (i32, i32) {
    %c0_i32 = arith.constant 0 : i32
    %c0_i32_0 = arith.constant 0 : i32
    %c0_i32_1 = arith.constant 0 : i32
    return %c0_i32, %c0_i32_0 : i32, i32
  }
  func.func @transform_11(%arg0: i32) -> (i32, i32) {
    %c0_i32 = arith.constant 0 : i32
    %c0_i32_0 = arith.constant 0 : i32
    %c0_i32_1 = arith.constant 0 : i32
    return %c0_i32, %c0_i32_0 : i32, i32
  }
  func.func @transform_12(%arg0: i32) -> (i32, i32) {
    %c0_i32 = arith.constant 0 : i32
    %c0_i32_0 = arith.constant 0 : i32
    %c0_i32_1 = arith.constant 0 : i32
    return %c0_i32, %c0_i32_0 : i32, i32
  }
  func.func @transform_13(%arg0: i32) -> (i32, i32, i32) {
    %c0_i32 = arith.constant 0 : i32
    %c0_i32_0 = arith.constant 0 : i32
    %c0_i32_1 = arith.constant 0 : i32
    return %arg0, %c0_i32, %c0_i32_0 : i32, i32, i32
  }
}

module attributes {stable_mosaic.version = 11 : i64} {
  func.func @_linear_kernel(%arg0: memref<2x256xf32, #tpu.memory_space<vmem>>, %arg1: memref<256x16xf32, #tpu.memory_space<vmem>>, %arg2: memref<2x16xf32, #tpu.memory_space<vmem>>) attributes {dimension_semantics = [], scalar_prefetch = 0 : i64, scratch_operands = 0 : i64, tpu.core_type = #tpu.core_type<tc>} {
    %c0 = arith.constant 0 : index
    %c0_0 = arith.constant 0 : index
    %0 = vector.load %arg0[%c0, %c0_0] : memref<2x256xf32, #tpu.memory_space<vmem>>, vector<2x256xf32>
    %c0_1 = arith.constant 0 : index
    %c0_2 = arith.constant 0 : index
    %1 = vector.load %arg1[%c0_1, %c0_2] : memref<256x16xf32, #tpu.memory_space<vmem>>, vector<256x16xf32>
    %cst = arith.constant dense<0.000000e+00> : vector<2x16xf32>
    %2 = tpu.matmul %0, %1, %cst {dimension_numbers = #tpu.dot_dimension_numbers<[1], [0], [0], [1], [0, 0, 1, 1], [], []>} : vector<2x256xf32>, vector<256x16xf32>, vector<2x16xf32> -> vector<2x16xf32>
    %c0_3 = arith.constant 0 : index
    %c0_4 = arith.constant 0 : index
    %3 = vector.load %arg2[%c0_3, %c0_4] : memref<2x16xf32, #tpu.memory_space<vmem>>, vector<2x16xf32>
    tpu.vector_store %arg2[%c0_3, %c0_4], %2 {strides = array<i32>} : memref<2x16xf32, #tpu.memory_space<vmem>>, vector<2x16xf32>,
    return
  }
}

</mosaic_0001>

<bundles_post_ra>
// kernel: model_forward.12
= control target key start
LH: loop header
LB: loop body
LE: loop exit
PB: predicated region body
PF: predicated region fallthrough
CT: control target
= control target key end

     0   :  { %vm83_vm6 = vcmask 261120   ;;  %s174_s1 = inlined_call_operand.vmem [shape: f32[128,32], index: 1, kind: input, shape index: {}]   ;;  %s175_s2 = inlined_call_operand.vmem [shape: f32[1,32], index: 2, kind: input, shape index: {}]   ;;  %s176_s0 = inlined_call_operand.vmem [shape: f32[8,128], index: 0, kind: input, shape index: {}]   ;;  %s177_s3 = inlined_call_operand.vmem [shape: f32[8,32], index: 3, kind: output, shape index: {}]  }
   0x1   :  { %v30_v0 = vld [vmem:[%s174_s1 + $0x78] sm:$0xff]  ;;  %v29_v1 = vld [vmem:[%s174_s1 + $0x70] sm:$0xff]  ;;  %v28_v2 = vld [vmem:[%s174_s1 + $0x68] sm:$0xff] }
   0x2   :  { %35 = vmatpush.msra.mxu0 %v30_v0  ;;  %v27_v3 = vld [vmem:[%s174_s1 + $0x60] sm:$0xff]  ;;  %v26_v4 = vld [vmem:[%s174_s1 + $0x58] sm:$0xff]  ;;  %v25_v5 = vld [vmem:[%s174_s1 + $0x50] sm:$0xff] }
   0x3   :  { %v24_v6 = vld [vmem:[%s174_s1 + $0x48] sm:$0xff]  ;;  %v23_v7 = vld [vmem:[%s174_s1 + $0x40] sm:$0xff]  ;;  %v22_v8 = vld [vmem:[%s174_s1 + $0x38] sm:$0xff] }
   0x4   :  { %36 = vmatpush.msra.mxu0 %v29_v1  ;;  %v21_v9 = vld [vmem:[%s174_s1 + $0x30] sm:$0xff]  ;;  %v20_v10 = vld [vmem:[%s174_s1 + $0x28] sm:$0xff]  ;;  %v19_v11 = vld [vmem:[%s174_s1 + $0x20] sm:$0xff] }
   0x5   :  { %v18_v12 = vld [vmem:[%s174_s1 + $0x18] sm:$0xff]  ;;  %v17_v13 = vld [vmem:[%s174_s1 + $0x10] sm:$0xff]  ;;  %v16_v14 = vld [vmem:[%s174_s1 + $0x8] sm:$0xff] }
   0x6   :  { %37 = vmatpush.msra.mxu0 %v28_v2  ;;  %v15_v15 = vld [vmem:[%s174_s1] sm:$0xff] }
   0x7   :  { %v14_v16 = vld [vmem:[%s176_s0] sm:$0xff] }
   0x8   :  { %38 = vmatpush.msra.mxu0 %v27_v3  ;;  %v90_v17 = vld [vmem:[%s175_s2] ss:$0 sm:$0xff] }
   0xa   :  { %39 = vmatpush.msra.mxu0 %v26_v4 }
   0xc   :  { %40 = vmatpush.msra.mxu0 %v25_v5 }
   0xe   :  { %41 = vmatpush.msra.mxu0 %v24_v6 }
  0x10   :  { %42 = vmatpush.msra.mxu0 %v23_v7 }
  0x12   :  { %43 = vmatpush.msra.mxu0 %v22_v8 }
  0x14   :  { %44 = vmatpush.msra.mxu0 %v21_v9 }
  0x16   :  { %45 = vmatpush.msra.mxu0 %v20_v10 }
  0x18   :  { %46 = vmatpush.msra.mxu0 %v19_v11 }
  0x1a   :  { %47 = vmatpush.msra.mxu0 %v18_v12 }
  0x1c   :  { %48 = vmatpush.msra.mxu0 %v17_v13 }
  0x1e   :  { %49 = vmatpush.msra.mxu0 %v16_v14 }
  0x20   :  { %50 = vmatpush.msra.mxu0 %v15_v15 }
  0x21   :  { %51 = vmatmul.f32.vlgmr.msra.gmra.mxu0 %v14_v16 }
  0x9e   :  { %v52_v18 = vpop.f32.mrf.mxu0 }
  0x9f   :  { %v53_v19 = vadd.f32 %v90_v17, %v52_v18 }
  0xa1   :  { %v56_v20 = vmin.f32 %v53_v19, 0.0  ;;  %vm55_vm7 = vcmp.gt.f32.partialorder %v53_v19, 0.0 }
  0xa3   :  { %v57_v21 = vmul.f32 1.442695, %v56_v20 }
  0xa5   :  { %91 = vpow2.f32 %v57_v21 }
  0xab   :  { %v92_v22 = vpop.eup %91 }
  0xac   :  { %93 = vlog2.f32 %v92_v22  ;;  %v89_v29 = vadd.f32 -1.0, %v92_v22  ;;  %vm79_vm4 = vcmp.eq.f32.partialorder %v92_v22, 0.0  ;;  %vm78_vm5 = vcmp.eq.f32.partialorder %v92_v22, 1.0 }
  0xae   :  { %v60_v34 = vmul.f32 %v89_v29, %v56_v20 }
  0xb2   :  { %v94_v23 = vpop.eup %93 }
  0xb3   :  { %v62_v24 = vmul.f32 0.6931472, %v94_v23 }
  0xb5   :  { %95 = vrcp.f32 %v62_v24  ;;  %v74_v28 = vand.u32 2147483648, %v62_v24  ;;  %v72_v31 = vand.u32 2147483647, %v62_v24  ;;  %vm68_vm1 = vweird.f32 %v62_v24 }
  0xb7   :  { %v75_v33 = vor.u32 1.1754944e-38, %v74_v28  ;;  %vm73_vm3 = vcmp.eq.f32.partialorder %v72_v31, 8.507059e+37 }
  0xbb   :  { %v96_v25 = vpop.eup %95 }
  0xbc   :  { %v64_v26 = vmul.f32 %v96_v25, %v62_v24  ;;  %vm69_vm0 = vweird.f32 %v96_v25 }
  0xbd   :  { %vm70_vm2 = vmor %vm68_vm1, %vm69_vm0 }
  0xbe   :  { %v65_v27 = vsub.f32 1.0, %v64_v26 }
  0xc0   :  { %v66_v30 = vmul.f32 %v96_v25, %v65_v27 }
  0xc2   :  { %v67_v32 = vadd.f32 %v96_v25, %v66_v30 }
  0xc4   :  { %v71_v35 = vsel %vm70_vm2, %v96_v25, %v67_v32 }
  0xc5   :  { %v76_v36 = vsel %vm73_vm3, %v75_v33, %v71_v35 }
  0xc6   :  { %v77_v37 = vmul.f32 %v76_v36, %v60_v34 }
  0xc8   :  { %v80_v38 = vsel %vm79_vm4, -1.0, %v77_v37 }
  0xc9   :  { %v81_v39 = vsel %vm78_vm5, %v56_v20, %v80_v38 }
  0xca   :  { %v82_v40 = vsel %vm55_vm7, %v53_v19, %v81_v39 }
  0xcb   :  { %84 = vst.msk [vmem:[%s177_s3] sm:$0xff] %vm83_vm6, %v82_v40 }

// kernel: model_forward.11
= control target key start
LH: loop header
LB: loop body
LE: loop exit
PB: predicated region body
PF: predicated region fallthrough
CT: control target
= control target key end

     0   :  { %vm179_vm11 = vcmask 261120   ;;  %s448_s1 = inlined_call_operand.vmem [shape: f32[128,32], index: 1, kind: input, shape index: {}]   ;;  %s449_s2 = inlined_call_operand.vmem [shape: f32[1,32], index: 2, kind: input, shape index: {}]   ;;  %s450_s0 = inlined_call_operand.vmem [shape: f32[32,128], index: 0, kind: input, shape index: {}]   ;;  %s451_s3 = inlined_call_operand.vmem [shape: f32[32,32], index: 3, kind: output, shape index: {}]  }
   0x1   :  { %v33_v0 = vld [vmem:[%s448_s1 + $0x78] sm:$0xff]  ;;  %v32_v1 = vld [vmem:[%s448_s1 + $0x70] sm:$0xff]  ;;  %v31_v2 = vld [vmem:[%s448_s1 + $0x68] sm:$0xff] }
   0x2   :  { %38 = vmatpush.msra.mxu0 %v33_v0  ;;  %192 = vmatpush.msra.mxu1 %v33_v0  ;;  %v30_v3 = vld [vmem:[%s448_s1 + $0x60] sm:$0xff]  ;;  %v29_v4 = vld [vmem:[%s448_s1 + $0x58] sm:$0xff]  ;;  %v28_v5 = vld [vmem:[%s448_s1 + $0x50] sm:$0xff] }
   0x3   :  { %193 = vmatpush.msra.mxu2 %v33_v0  ;;  %194 = vmatpush.msra.mxu3 %v33_v0  ;;  %v27_v6 = vld [vmem:[%s448_s1 + $0x48] sm:$0xff]  ;;  %v26_v7 = vld [vmem:[%s448_s1 + $0x40] sm:$0xff]  ;;  %v25_v8 = vld [vmem:[%s448_s1 + $0x38] sm:$0xff] }
   0x4   :  { %39 = vmatpush.msra.mxu0 %v32_v1  ;;  %195 = vmatpush.msra.mxu1 %v32_v1  ;;  %v24_v9 = vld [vmem:[%s448_s1 + $0x30] sm:$0xff]  ;;  %v23_v10 = vld [vmem:[%s448_s1 + $0x28] sm:$0xff]  ;;  %v22_v11 = vld [vmem:[%s448_s1 + $0x20] sm:$0xff] }
   0x5   :  { %196 = vmatpush.msra.mxu2 %v32_v1  ;;  %197 = vmatpush.msra.mxu3 %v32_v1  ;;  %v21_v12 = vld [vmem:[%s448_s1 + $0x18] sm:$0xff]  ;;  %v20_v13 = vld [vmem:[%s448_s1 + $0x10] sm:$0xff]  ;;  %v19_v14 = vld [vmem:[%s448_s1 + $0x8] sm:$0xff] }
   0x6   :  { %40 = vmatpush.msra.mxu0 %v31_v2  ;;  %198 = vmatpush.msra.mxu1 %v31_v2  ;;  %v18_v15 = vld [vmem:[%s448_s1] sm:$0xff]  ;;  %v15_v17 = vld [vmem:[%s450_s0 + $0x8] sm:$0xff]  ;;  %v16_v18 = vld [vmem:[%s450_s0 + $0x10] sm:$0xff] }
   0x7   :  { %199 = vmatpush.msra.mxu2 %v31_v2  ;;  %200 = vmatpush.msra.mxu3 %v31_v2  ;;  %v14_v16 = vld [vmem:[%s450_s0] sm:$0xff]  ;;  %v17_v19 = vld [vmem:[%s450_s0 + $0x18] sm:$0xff] }
   0x8   :  { %41 = vmatpush.msra.mxu0 %v30_v3  ;;  %201 = vmatpush.msra.mxu1 %v30_v3  ;;  %v240_v20 = vld [vmem:[%s449_s2] ss:$0 sm:$0xff] }
   0x9   :  { %202 = vmatpush.msra.mxu2 %v30_v3  ;;  %203 = vmatpush.msra.mxu3 %v30_v3 }
   0xa   :  { %42 = vmatpush.msra.mxu0 %v29_v4  ;;  %204 = vmatpush.msra.mxu1 %v29_v4 }
   0xb   :  { %205 = vmatpush.msra.mxu2 %v29_v4  ;;  %206 = vmatpush.msra.mxu3 %v29_v4 }
   0xc   :  { %43 = vmatpush.msra.mxu0 %v28_v5  ;;  %207 = vmatpush.msra.mxu1 %v28_v5 }
   0xd   :  { %208 = vmatpush.msra.mxu2 %v28_v5  ;;  %209 = vmatpush.msra.mxu3 %v28_v5 }
   0xe   :  { %44 = vmatpush.msra.mxu0 %v27_v6  ;;  %210 = vmatpush.msra.mxu1 %v27_v6 }
   0xf   :  { %211 = vmatpush.msra.mxu2 %v27_v6  ;;  %212 = vmatpush.msra.mxu3 %v27_v6 }
  0x10   :  { %45 = vmatpush.msra.mxu0 %v26_v7  ;;  %213 = vmatpush.msra.mxu1 %v26_v7 }
  0x11   :  { %214 = vmatpush.msra.mxu2 %v26_v7  ;;  %215 = vmatpush.msra.mxu3 %v26_v7 }
  0x12   :  { %46 = vmatpush.msra.mxu0 %v25_v8  ;;  %216 = vmatpush.msra.mxu1 %v25_v8 }
  0x13   :  { %217 = vmatpush.msra.mxu2 %v25_v8  ;;  %218 = vmatpush.msra.mxu3 %v25_v8 }
  0x14   :  { %47 = vmatpush.msra.mxu0 %v24_v9  ;;  %219 = vmatpush.msra.mxu1 %v24_v9 }
  0x15   :  { %220 = vmatpush.msra.mxu2 %v24_v9  ;;  %221 = vmatpush.msra.mxu3 %v24_v9 }
  0x16   :  { %48 = vmatpush.msra.mxu0 %v23_v10  ;;  %222 = vmatpush.msra.mxu1 %v23_v10 }
  0x17   :  { %223 = vmatpush.msra.mxu2 %v23_v10  ;;  %224 = vmatpush.msra.mxu3 %v23_v10 }
  0x18   :  { %49 = vmatpush.msra.mxu0 %v22_v11  ;;  %225 = vmatpush.msra.mxu1 %v22_v11 }
  0x19   :  { %226 = vmatpush.msra.mxu2 %v22_v11  ;;  %227 = vmatpush.msra.mxu3 %v22_v11 }
  0x1a   :  { %50 = vmatpush.msra.mxu0 %v21_v12  ;;  %228 = vmatpush.msra.mxu1 %v21_v12 }
  0x1b   :  { %229 = vmatpush.msra.mxu2 %v21_v12  ;;  %230 = vmatpush.msra.mxu3 %v21_v12 }
  0x1c   :  { %51 = vmatpush.msra.mxu0 %v20_v13  ;;  %231 = vmatpush.msra.mxu1 %v20_v13 }
  0x1d   :  { %232 = vmatpush.msra.mxu2 %v20_v13  ;;  %233 = vmatpush.msra.mxu3 %v20_v13 }
  0x1e   :  { %52 = vmatpush.msra.mxu0 %v19_v14  ;;  %234 = vmatpush.msra.mxu1 %v19_v14 }
  0x1f   :  { %235 = vmatpush.msra.mxu2 %v19_v14  ;;  %236 = vmatpush.msra.mxu3 %v19_v14 }
  0x20   :  { %53 = vmatpush.msra.mxu0 %v18_v15  ;;  %237 = vmatpush.msra.mxu1 %v18_v15 }
  0x21   :  { %238 = vmatpush.msra.mxu2 %v18_v15  ;;  %239 = vmatpush.msra.mxu3 %v18_v15 }
  0x22   :  { %54 = vmatmul.f32.vlgmr.msra.gmra.mxu0 %v14_v16  ;;  %57 = vmatmul.f32.vlgmr.msra.gmra.mxu1 %v15_v17 }
  0x23   :  { %60 = vmatmul.f32.vlgmr.msra.gmra.mxu2 %v16_v18  ;;  %63 = vmatmul.f32.vlgmr.msra.gmra.mxu3 %v17_v19 }
  0x9f   :  { %v55_v21 = vpop.f32.mrf.mxu0  ;;  %v58_v22 = vpop.f32.mrf.mxu1 }
  0xa0   :  { %v348_v23 = vadd.f32 %v240_v20, %v55_v21  ;;  %v350_v24 = vadd.f32 %v240_v20, %v58_v22 }
  0xa2   :  { %v353_v25 = vmin.f32 %v348_v23, 0.0  ;;  %v356_v26 = vmin.f32 %v350_v24, 0.0  ;;  %vm67_vm8 = vcmp.gt.f32.partialorder %v348_v23, 0.0  ;;  %vm68_vm9 = vcmp.gt.f32.partialorder %v350_v24, 0.0 }
  0xa4   :  { %v75_v27 = vmul.f32 1.442695, %v353_v25  ;;  %v77_v28 = vmul.f32 1.442695, %v356_v26 }
  0xa6   :  { %241 = vpow2.f32 %v75_v27  ;;  %v61_v29 = vpop.f32.mrf.mxu2  ;;  %v64_v30 = vpop.f32.mrf.mxu3 }
  0xa7   :  { %243 = vpow2.f32 %v77_v28  ;;  %v360_v31 = vadd.f32 %v240_v20, %v61_v29  ;;  %v362_v32 = vadd.f32 %v240_v20, %v64_v30 }
  0xa9   :  { %v365_v33 = vmin.f32 %v360_v31, 0.0  ;;  %v368_v34 = vmin.f32 %v362_v32, 0.0 }
  0xab   :  { %v79_v35 = vmul.f32 1.442695, %v365_v33  ;;  %v81_v38 = vmul.f32 1.442695, %v368_v34 }
  0xac   :  { %v371_v36 = vpop.eup %241 }
  0xad   :  { %v373_v37 = vpop.eup %243  ;;  %245 = vlog2.f32 %v371_v36  ;;  %v188_v49 = vadd.f32 -1.0, %v371_v36  ;;  %vm163_vm10 = vcmp.eq.f32.partialorder %v371_v36, 0.0  ;;  %vm159_vm12 = vcmp.eq.f32.partialorder %v371_v36, 1.0 }
  0xae   :  { %247 = vlog2.f32 %v373_v37  ;;  %v189_v52 = vadd.f32 -1.0, %v373_v37  ;;  %vm160_vm13 = vcmp.eq.f32.partialorder %v373_v37, 1.0  ;;  %vm164_vm14 = vcmp.eq.f32.partialorder %v373_v37, 0.0 }
  0xaf   :  { %249 = vpow2.f32 %v79_v35  ;;  %v87_v2 = vmul.f32 %v188_v49, %v353_v25 }
  0xb0   :  { %251 = vpow2.f32 %v81_v38  ;;  %v88_v6 = vmul.f32 %v189_v52, %v356_v26 }
  0xb3   :  { %v246_v39 = vpop.eup %245 }
  0xb4   :  { %v248_v40 = vpop.eup %247  ;;  %v92_v41 = vmul.f32 0.6931472, %v246_v39 }
  0xb5   :  { %v378_v42 = vpop.eup %249  ;;  %v94_v43 = vmul.f32 0.6931472, %v248_v40 }
  0xb6   :  { %253 = vrcp.f32 %v92_v41  ;;  %v380_v44 = vpop.eup %251  ;;  %vm104_vm0 = vweird.f32 %v92_v41  ;;  %v108_v55 = vand.u32 2147483647, %v92_v41  ;;  %v110_v56 = vand.u32 2147483648, %v92_v41 }
  0xb7   :  { %255 = vrcp.f32 %v94_v43  ;;  %vm119_vm1 = vweird.f32 %v94_v43  ;;  %v125_v59 = vand.u32 2147483648, %v94_v43  ;;  %v123_v61 = vand.u32 2147483647, %v94_v43 }
  0xb8   :  { %257 = vlog2.f32 %v378_v42  ;;  %v111_v0 = vor.u32 1.1754944e-38, %v110_v56  ;;  %vm109_vm5 = vcmp.eq.f32.partialorder %v108_v55, 8.507059e+37  ;;  %v190_v17 = vadd.f32 -1.0, %v378_v42 }
  0xb9   :  { %259 = vlog2.f32 %v380_v44  ;;  %v126_v4 = vor.u32 1.1754944e-38, %v125_v59  ;;  %vm124_vm7 = vcmp.eq.f32.partialorder %v123_v61, 8.507059e+37  ;;  %v191_v29 = vadd.f32 -1.0, %v380_v44 }
  0xba   :  { %v89_v37 = vmul.f32 %v190_v17, %v365_v33 }
  0xbc   :  { %v254_v45 = vpop.eup %253 }
  0xbd   :  { %v256_v46 = vpop.eup %255  ;;  %v100_v47 = vmul.f32 %v254_v45, %v92_v41  ;;  %vm105_vm2 = vweird.f32 %v254_v45 }
  0xbe   :  { %v258_v48 = vpop.eup %257  ;;  %v115_v50 = vmul.f32 %v256_v46, %v94_v43  ;;  %vm120_vm3 = vweird.f32 %v256_v46  ;;  %vm106_vm4 = vmor %vm104_vm0, %vm105_vm2 }
  0xbf   :  { %v101_v51 = vsub.f32 1.0, %v100_v47  ;;  %v386_v53 = vmul.f32 0.6931472, %v258_v48  ;;  %v260_v54 = vpop.eup %259  ;;  %vm121_vm6 = vmor %vm119_vm1, %vm120_vm3 }
  0xc0   :  { %v116_v57 = vsub.f32 1.0, %v115_v50  ;;  %v389_v62 = vmul.f32 0.6931472, %v260_v54 }
  0xc1   :  { %v102_v58 = vmul.f32 %v254_v45, %v101_v51  ;;  %261 = vrcp.f32 %v386_v53  ;;  %v140_v21 = vand.u32 2147483648, %v386_v53  ;;  %v138_v28 = vand.u32 2147483647, %v386_v53 }
  0xc2   :  { %v117_v60 = vmul.f32 %v256_v46, %v116_v57  ;;  %263 = vrcp.f32 %v389_v62  ;;  %vm134_vm0 = vweird.f32 %v386_v53  ;;  %v155_v30 = vand.u32 2147483648, %v389_v62 }
  0xc3   :  { %v103_v63 = vadd.f32 %v254_v45, %v102_v58  ;;  %v141_v35 = vor.u32 1.1754944e-38, %v140_v21  ;;  %v153_v36 = vand.u32 2147483647, %v389_v62  ;;  %vm139_vm3 = vcmp.eq.f32.partialorder %v138_v28, 8.507059e+37 }
  0xc4   :  { %v118_v1 = vadd.f32 %v256_v46, %v117_v60  ;;  %v156_v43 = vor.u32 1.1754944e-38, %v155_v30 }
  0xc5   :  { %v107_v3 = vsel %vm106_vm4, %v254_v45, %v103_v63  ;;  %vm149_vm4 = vweird.f32 %v389_v62  ;;  %v90_v45 = vmul.f32 %v191_v29, %v368_v34 }
  0xc6   :  { %v112_v5 = vsel %vm109_vm5, %v111_v0, %v107_v3  ;;  %v122_v7 = vsel %vm121_vm6, %v256_v46, %v118_v1  ;;  %vm165_vm6 = vcmp.eq.f32.partialorder %v378_v42, 0.0 }
  0xc7   :  { %v262_v8 = vpop.eup %261  ;;  %v113_v9 = vmul.f32 %v112_v5, %v87_v2  ;;  %v127_v10 = vsel %vm124_vm7, %v126_v4, %v122_v7  ;;  %vm154_vm7 = vcmp.eq.f32.partialorder %v153_v36, 8.507059e+37 }
  0xc8   :  { %v128_v11 = vmul.f32 %v127_v10, %v88_v6  ;;  %v130_v12 = vmul.f32 %v262_v8, %v386_v53  ;;  %v264_v14 = vpop.eup %263  ;;  %vm135_vm15 = vweird.f32 %v262_v8 }
  0xc9   :  { %v167_v13 = vsel %vm163_vm10, -1.0, %v113_v9  ;;  %v145_v22 = vmul.f32 %v264_v14, %v389_v62  ;;  %vm136_vm1 = vmor %vm134_vm0, %vm135_vm15  ;;  %vm150_vm2 = vweird.f32 %v264_v14  ;;  %vm166_vm10 = vcmp.eq.f32.partialorder %v380_v44, 0.0 }
  0xca   :  { %v171_v15 = vsel %vm159_vm12, %v353_v25, %v167_v13  ;;  %v168_v16 = vsel %vm164_vm14, -1.0, %v128_v11  ;;  %v131_v18 = vsub.f32 1.0, %v130_v12  ;;  %vm151_vm5 = vmor %vm149_vm4, %vm150_vm2  ;;  %vm162_vm12 = vcmp.eq.f32.partialorder %v380_v44, 1.0 }
  0xcb   :  { %v175_v19 = vsel %vm67_vm8, %v348_v23, %v171_v15  ;;  %v172_v20 = vsel %vm160_vm13, %v356_v26, %v168_v16  ;;  %v146_v23 = vsub.f32 1.0, %v145_v22  ;;  %vm161_vm8 = vcmp.eq.f32.partialorder %v378_v42, 1.0 }
  0xcc   :  { %180 = vst.msk [vmem:[%s451_s3] sm:$0xff] %vm179_vm11, %v175_v19  ;;  %v176_v25 = vsel %vm68_vm9, %v350_v24, %v172_v20  ;;  %v132_v27 = vmul.f32 %v262_v8, %v131_v18  ;;  %vm69_vm9 = vcmp.gt.f32.partialorder %v360_v31, 0.0  ;;  %vm70_vm13 = vcmp.gt.f32.partialorder %v362_v32, 0.0 }
  0xcd   :  { %181 = vst.msk [vmem:[%s451_s3 + $0x8] sm:$0xff] %vm179_vm11, %v176_v25  ;;  %v147_v24 = vmul.f32 %v264_v14, %v146_v23 }
  0xce   :  { %v133_v26 = vadd.f32 %v262_v8, %v132_v27 }
  0xcf   :  { %v148_v40 = vadd.f32 %v264_v14, %v147_v24 }
  0xd0   :  { %v137_v38 = vsel %vm136_vm1, %v262_v8, %v133_v26 }
  0xd1   :  { %v142_v39 = vsel %vm139_vm3, %v141_v35, %v137_v38  ;;  %v152_v46 = vsel %vm151_vm5, %v264_v14, %v148_v40 }
  0xd2   :  { %v143_v41 = vmul.f32 %v142_v39, %v89_v37  ;;  %v157_v48 = vsel %vm154_vm7, %v156_v43, %v152_v46 }
  0xd3   :  { %v158_v50 = vmul.f32 %v157_v48, %v90_v45 }
  0xd4   :  { %v169_v47 = vsel %vm165_vm6, -1.0, %v143_v41 }
  0xd5   :  { %v173_v49 = vsel %vm161_vm8, %v365_v33, %v169_v47  ;;  %v170_v52 = vsel %vm166_vm10, -1.0, %v158_v50 }
  0xd6   :  { %v177_v51 = vsel %vm69_vm9, %v360_v31, %v173_v49  ;;  %v174_v42 = vsel %vm162_vm12, %v368_v34, %v170_v52 }
  0xd7   :  { %182 = vst.msk [vmem:[%s451_s3 + $0x10] sm:$0xff] %vm179_vm11, %v177_v51  ;;  %v178_v53 = vsel %vm70_vm13, %v362_v32, %v174_v42 }
  0xd8   :  { %183 = vst.msk [vmem:[%s451_s3 + $0x18] sm:$0xff] %vm179_vm11, %v178_v53 }

// kernel: model_forward.10
= control target key start
LH: loop header
LB: loop body
LE: loop exit
PB: predicated region body
PF: predicated region fallthrough
CT: control target
= control target key end

     0   :  { %vm105_vm0 = vcmask 1043456   ;;  %vm195_vm1 = vcmask 31744   ;;  %vm56_vm2 = vcmask 97280   ;;  %vm360_vm3 = vcmask 523264   ;;  %s1052_s3 = inlined_call_operand.vmem [shape: f32[12,64], index: 3, kind: input, shape index: {}]   ;;  %s1053_s0 = inlined_call_operand.vmem [shape: f32[128,12], index: 0, kind: input, shape index: {}]   ;;  %s1054_s5 = inlined_call_operand.vmem [shape: f32[4,64], index: 5, kind: input, shape index: {}]   ;;  %s1055_s1 = inlined_call_operand.vmem [shape: f32[128,4], index: 1, kind: input, shape index: {}]   ;;  %s1056_s4 = inlined_call_operand.vmem [shape: f32[1,64], index: 4, kind: input, shape index: {}]   ;;  %s1057_s6 = inlined_call_operand.vmem [shape: f32[1,64], index: 6, kind: input, shape index: {}]   ;;  %s1058_s7 = inlined_call_operand.vmem [shape: f32[64,32], index: 7, kind: input, shape index: {}]   ;;  %s1059_s2 = inlined_call_operand.vmem [shape: f32[128,64], index: 2, kind: input, shape index: {}]   ;;  %s1060_s8 = inlined_call_operand.vmem [shape: f32[1,32], index: 8, kind: input, shape index: {}]   ;;  %s1061_s9 = inlined_call_operand.vmem [shape: f32[128,64], index: 9, kind: output, shape index: {0}]   ;;  %s1062_s10 = inlined_call_operand.vmem [shape: f32[128,32], index: 10, kind: output, shape index: {1}]  }
   0x1   :  { %v51_v0 = vld [vmem:[%s1052_s3 + $0x8] sm:$0xf]  ;;  %v50_v1 = vld [vmem:[%s1052_s3] sm:$0xff]  ;;  %v176_v7 = vld [vmem:[%s1055_s1 + $0x10] sm:$0xff]  ;;  %vm502_vm4 = vcmask 261120  }
   0x2   :  { %527 = vmatpush.msk.msra.mxu0 %vm105_vm0, %v51_v0  ;;  %v34_v2 = vld [vmem:[%s1053_s0] sm:$0xff]  ;;  %577 = vmatpush.msk.msra.mxu3 %vm105_vm0, %v51_v0  ;;  %v175_v5 = vld [vmem:[%s1055_s1 + $0x8] sm:$0xff]  ;;  %v36_v8 = vld [vmem:[%s1053_s0 + $0x10] sm:$0xff] }
   0x3   :  { %v190_v3 = vld [vmem:[%s1054_s5] sm:$0xf]  ;;  %v35_v6 = vld [vmem:[%s1053_s0 + $0x8] sm:$0xff]  ;;  %v177_v10 = vld [vmem:[%s1055_s1 + $0x18] sm:$0xff] }
   0x4   :  { %v174_v4 = vld [vmem:[%s1055_s1] sm:$0xff]  ;;  %544 = vmatpush.msk.msra.mxu1 %vm105_vm0, %v190_v3  ;;  %124 = vmatpush.msra.mxu0 %v50_v1  ;;  %v47_v9 = vld [vmem:[%s1053_s0 + $0x68] sm:$0xff]  ;;  %v37_v11 = vld [vmem:[%s1053_s0 + $0x18] sm:$0xff] }
   0x5   :  { %545 = vmatmul.msk.f32.vlgmr.msra.gmra.mxu1 %vm195_vm1, %v174_v4  ;;  %528 = vmatmul.msk.f32.vlgmr.msra.gmra.mxu0 %vm56_vm2, %v34_v2  ;;  %v48_v12 = vld [vmem:[%s1053_s0 + $0x70] sm:$0xff]  ;;  %v178_v13 = vld [vmem:[%s1055_s1 + $0x20] sm:$0xff]  ;;  %v49_v15 = vld [vmem:[%s1053_s0 + $0x78] sm:$0xff] }
   0x6   :  { %578 = vmatpush.msra.mxu3 %v50_v1  ;;  %v38_v14 = vld [vmem:[%s1053_s0 + $0x20] sm:$0xff]  ;;  %v179_v16 = vld [vmem:[%s1055_s1 + $0x28] sm:$0xff]  ;;  %v180_v19 = vld [vmem:[%s1055_s1 + $0x30] sm:$0xff] }
   0x7   :  { %541 = vmatmul.msk.f32.vlgmr.msra.gmra.mxu3 %vm56_vm2, %v47_v9  ;;  %v39_v17 = vld [vmem:[%s1053_s0 + $0x28] sm:$0xff]  ;;  %v40_v20 = vld [vmem:[%s1053_s0 + $0x30] sm:$0xff]  ;;  %v181_v22 = vld [vmem:[%s1055_s1 + $0x38] sm:$0xff] }
   0x8   :  { %579 = vmatpush.msk.msrb.mxu3 %vm105_vm0, %v190_v3  ;;  %v187_v18 = vld [vmem:[%s1055_s1 + $0x68] sm:$0xff]  ;;  %v188_v21 = vld [vmem:[%s1055_s1 + $0x70] sm:$0xff]  ;;  %v41_v23 = vld [vmem:[%s1053_s0 + $0x38] sm:$0xff] }
   0x9   :  { %v189_v24 = vld [vmem:[%s1055_s1 + $0x78] sm:$0xff]  ;;  %v182_v25 = vld [vmem:[%s1055_s1 + $0x40] sm:$0xff]  ;;  %v383_v28 = vld [vmem:[%s1058_s7 + $0x30] sm:$0xff] }
   0xa   :  { %v42_v26 = vld [vmem:[%s1053_s0 + $0x40] sm:$0xff]  ;;  %v384_v27 = vld [vmem:[%s1058_s7 + $0x38] sm:$0xff]  ;;  %v382_v29 = vld [vmem:[%s1058_s7 + $0x28] sm:$0xff] }
   0xb   :  { %445 = vmatpush.msra.mxu2 %v384_v27  ;;  %580 = vmatpush.msra.mxu3 %v384_v27  ;;  %v183_v30 = vld [vmem:[%s1055_s1 + $0x48] sm:$0xff]  ;;  %v381_v31 = vld [vmem:[%s1058_s7 + $0x20] sm:$0xff]  ;;  %v184_v33 = vld [vmem:[%s1055_s1 + $0x50] sm:$0xff] }
   0xc   :  { %v43_v32 = vld [vmem:[%s1053_s0 + $0x48] sm:$0xff]  ;;  %v44_v34 = vld [vmem:[%s1053_s0 + $0x50] sm:$0xff]  ;;  %v185_v35 = vld [vmem:[%s1055_s1 + $0x58] sm:$0xff] }
   0xd   :  { %546 = vmatmul.msk.f32.gmra.mxu1 %vm195_vm1, %v175_v5  ;;  %529 = vmatmul.msk.f32.gmra.mxu0 %vm56_vm2, %v35_v6  ;;  %v45_v36 = vld [vmem:[%s1053_s0 + $0x58] sm:$0xff]  ;;  %v186_v37 = vld [vmem:[%s1055_s1 + $0x60] sm:$0xff]  ;;  %v379_v40 = vld [vmem:[%s1058_s7 + $0x10] sm:$0xff] }
   0xe   :  { %446 = vmatpush.msra.mxu2 %v383_v28  ;;  %581 = vmatpush.msra.mxu3 %v383_v28  ;;  %v380_v38 = vld [vmem:[%s1058_s7 + $0x18] sm:$0xff]  ;;  %v46_v39 = vld [vmem:[%s1053_s0 + $0x60] sm:$0xff]  ;;  %v378_v41 = vld [vmem:[%s1058_s7 + $0x8] sm:$0xff] }
   0xf   :  { %542 = vmatmul.msk.f32.gmra.mxu3 %vm56_vm2, %v48_v12  ;;  %v377_v42 = vld [vmem:[%s1058_s7] sm:$0xff]  ;;  %v313_v54 = vld [vmem:[%s1059_s2 + $0x8] sm:$0xff]  ;;  %v314_v61 = vld [vmem:[%s1059_s2 + $0x10] sm:$0xff] }
  0x10   :  { %447 = vmatpush.msra.mxu2 %v382_v29  ;;  %582 = vmatpush.msra.mxu3 %v382_v29  ;;  %v814_v43 = vld [vmem:[%s1056_s4] ss:$0 sm:$0xff]  ;;  %v315_v4 = vld [vmem:[%s1059_s2 + $0x18] sm:$0xff]  ;;  %v318_v29 = vld [vmem:[%s1059_s2 + $0x30] sm:$0xff] }
  0x11   :  { %v819_v44 = vld [vmem:[%s1057_s6] ss:$0 sm:$0xff] }
  0x12   :  { %448 = vmatpush.msra.mxu2 %v381_v31  ;;  %583 = vmatpush.msra.mxu3 %v381_v31  ;;  %v312_v47 = vld [vmem:[%s1059_s2] sm:$0xff] }
  0x13   :  { %v316_v12 = vld [vmem:[%s1059_s2 + $0x20] sm:$0xff] }
  0x14   :  { %449 = vmatpush.msra.mxu2 %v380_v38  ;;  %584 = vmatpush.msra.mxu3 %v380_v38 }
  0x15   :  { %547 = vmatmul.msk.f32.gmra.mxu1 %vm195_vm1, %v176_v7  ;;  %530 = vmatmul.msk.f32.gmra.mxu0 %vm56_vm2, %v36_v8 }
  0x16   :  { %450 = vmatpush.msra.mxu2 %v379_v40  ;;  %585 = vmatpush.msra.mxu3 %v379_v40 }
  0x17   :  { %543 = vmatmul.msk.f32.gmra.mxu3 %vm56_vm2, %v49_v15 }
  0x18   :  { %451 = vmatpush.msra.mxu2 %v378_v41  ;;  %586 = vmatpush.msra.mxu3 %v378_v41 }
  0x1a   :  { %452 = vmatpush.msra.mxu2 %v377_v42  ;;  %587 = vmatpush.msra.mxu3 %v377_v42  ;;  %v319_v42 = vld [vmem:[%s1059_s2 + $0x38] sm:$0xff] }
  0x1d   :  { %548 = vmatmul.msk.f32.gmra.mxu1 %vm195_vm1, %v177_v10  ;;  %531 = vmatmul.msk.f32.gmra.mxu0 %vm56_vm2, %v37_v11 }
  0x1f   :  { %558 = vmatmul.msk.f32.vlgmr.msrb.gmra.mxu3 %vm195_vm1, %v187_v18 }
  0x25   :  { %549 = vmatmul.msk.f32.gmra.mxu1 %vm195_vm1, %v178_v13  ;;  %532 = vmatmul.msk.f32.gmra.mxu0 %vm56_vm2, %v38_v14 }
  0x27   :  { %559 = vmatmul.msk.f32.gmra.mxu3 %vm195_vm1, %v188_v21 }
  0x2d   :  { %550 = vmatmul.msk.f32.gmra.mxu1 %vm195_vm1, %v179_v16  ;;  %533 = vmatmul.msk.f32.gmra.mxu0 %vm56_vm2, %v39_v17 }
  0x2f   :  { %560 = vmatmul.msk.f32.gmra.mxu3 %vm195_vm1, %v189_v24 }
  0x35   :  { %551 = vmatmul.msk.f32.gmra.mxu1 %vm195_vm1, %v180_v19  ;;  %534 = vmatmul.msk.f32.gmra.mxu0 %vm56_vm2, %v40_v20  ;;  %v317_v20 = vld [vmem:[%s1059_s2 + $0x28] sm:$0xff] }
  0x3d   :  { %552 = vmatmul.msk.f32.gmra.mxu1 %vm195_vm1, %v181_v22  ;;  %535 = vmatmul.msk.f32.gmra.mxu0 %vm56_vm2, %v41_v23 }
  0x45   :  { %553 = vmatmul.msk.f32.gmra.mxu1 %vm195_vm1, %v182_v25  ;;  %536 = vmatmul.msk.f32.gmra.mxu0 %vm56_vm2, %v42_v26 }
  0x4d   :  { %554 = vmatmul.msk.f32.gmra.mxu1 %vm195_vm1, %v183_v30  ;;  %537 = vmatmul.msk.f32.gmra.mxu0 %vm56_vm2, %v43_v32  ;;  %v325_v30 = vld [vmem:[%s1059_s2 + $0x68] sm:$0xff] }
  0x55   :  { %555 = vmatmul.msk.f32.gmra.mxu1 %vm195_vm1, %v184_v33  ;;  %538 = vmatmul.msk.f32.gmra.mxu0 %vm56_vm2, %v44_v34 }
  0x5d   :  { %556 = vmatmul.msk.f32.gmra.mxu1 %vm195_vm1, %v185_v35  ;;  %539 = vmatmul.msk.f32.gmra.mxu0 %vm56_vm2, %v45_v36 }
  0x65   :  { %557 = vmatmul.msk.f32.gmra.mxu1 %vm195_vm1, %v186_v37  ;;  %540 = vmatmul.msk.f32.gmra.mxu0 %vm56_vm2, %v46_v39 }
  0x82   :  { %v264_v45 = vpop.f32.mrf.mxu1  ;;  %v126_v46 = vpop.f32.mrf.mxu0 }
  0x83   :  { %v127_v48 = vadd.f32 %v814_v43, %v126_v46  ;;  %v265_v49 = vadd.f32 %v819_v44, %v264_v45  ;;  %v326_v45 = vld [vmem:[%s1059_s2 + $0x70] sm:$0xff] }
  0x85   :  { %v328_v50 = vadd.f32 %v312_v47, %v127_v48 }
  0x87   :  { %v344_v51 = vadd.f32 %v328_v50, %v265_v49 }
  0x89   :  { %361 = vst.msk [vmem:[%s1061_s9] sm:$0xff] %vm360_vm3, %v344_v51  ;;  %561 = vmatmul.msk.f32.vlgmr.msra.gmra.mxu2 %vm360_vm3, %v344_v51 }
  0x8a   :  { %v267_v52 = vpop.f32.mrf.mxu1  ;;  %v129_v53 = vpop.f32.mrf.mxu0 }
  0x8b   :  { %v130_v55 = vadd.f32 %v814_v43, %v129_v53  ;;  %v268_v56 = vadd.f32 %v819_v44, %v267_v52  ;;  %v165_v8 = vpop.f32.mrf.mxu3 }
  0x8c   :  { %v166_v27 = vadd.f32 %v814_v43, %v165_v8 }
  0x8d   :  { %v329_v57 = vadd.f32 %v313_v54, %v130_v55 }
  0x8e   :  { %v341_v34 = vadd.f32 %v325_v30, %v166_v27 }
  0x8f   :  { %v345_v58 = vadd.f32 %v329_v57, %v268_v56  ;;  %v320_v57 = vld [vmem:[%s1059_s2 + $0x40] sm:$0xff] }
  0x91   :  { %362 = vst.msk [vmem:[%s1061_s9 + $0x8] sm:$0xff] %vm360_vm3, %v345_v58  ;;  %562 = vmatmul.msk.f32.gmra.mxu2 %vm360_vm3, %v345_v58  ;;  %v327_v58 = vld [vmem:[%s1059_s2 + $0x78] sm:$0xff] }
  0x92   :  { %v270_v59 = vpop.f32.mrf.mxu1  ;;  %v132_v60 = vpop.f32.mrf.mxu0 }
  0x93   :  { %v133_v62 = vadd.f32 %v814_v43, %v132_v60  ;;  %v271_v63 = vadd.f32 %v819_v44, %v270_v59  ;;  %v168_v16 = vpop.f32.mrf.mxu3 }
  0x94   :  { %v169_v39 = vadd.f32 %v814_v43, %v168_v16 }
  0x95   :  { %v330_v0 = vadd.f32 %v314_v61, %v133_v62 }
  0x96   :  { %v342_v49 = vadd.f32 %v326_v45, %v169_v39 }
  0x97   :  { %v346_v1 = vadd.f32 %v330_v0, %v271_v63 }
  0x99   :  { %363 = vst.msk [vmem:[%s1061_s9 + $0x10] sm:$0xff] %vm360_vm3, %v346_v1  ;;  %563 = vmatmul.msk.f32.gmra.mxu2 %vm360_vm3, %v346_v1 }
  0x9a   :  { %v273_v2 = vpop.f32.mrf.mxu1  ;;  %v135_v3 = vpop.f32.mrf.mxu0 }
  0x9b   :  { %v136_v5 = vadd.f32 %v814_v43, %v135_v3  ;;  %v274_v6 = vadd.f32 %v819_v44, %v273_v2  ;;  %v171_v24 = vpop.f32.mrf.mxu3 }
  0x9c   :  { %v172_v54 = vadd.f32 %v814_v43, %v171_v24 }
  0x9d   :  { %v331_v7 = vadd.f32 %v315_v4, %v136_v5  ;;  %v321_v5 = vld [vmem:[%s1059_s2 + $0x48] sm:$0xff] }
  0x9e   :  { %v343_v62 = vadd.f32 %v327_v58, %v172_v54 }
  0x9f   :  { %v347_v9 = vadd.f32 %v331_v7, %v274_v6 }
  0xa1   :  { %364 = vst.msk [vmem:[%s1061_s9 + $0x18] sm:$0xff] %vm360_vm3, %v347_v9  ;;  %564 = vmatmul.msk.f32.gmra.mxu2 %vm360_vm3, %v347_v9 }
  0xa2   :  { %v276_v10 = vpop.f32.mrf.mxu1  ;;  %v138_v11 = vpop.f32.mrf.mxu0 }
  0xa3   :  { %v139_v13 = vadd.f32 %v814_v43, %v138_v11  ;;  %v277_v14 = vadd.f32 %v819_v44, %v276_v10  ;;  %v303_v35 = vpop.f32.mrf.mxu3 }
  0xa4   :  { %v304_v37 = vadd.f32 %v819_v44, %v303_v35 }
  0xa5   :  { %v332_v15 = vadd.f32 %v316_v12, %v139_v13  ;;  %v322_v12 = vld [vmem:[%s1059_s2 + $0x50] sm:$0xff] }
  0xa6   :  { %v897_v40 = vadd.f32 %v341_v34, %v304_v37 }
  0xa7   :  { %v348_v17 = vadd.f32 %v332_v15, %v277_v14 }
  0xa8   :  { %374 = vst.msk [vmem:[%s1061_s9 + $0x68] sm:$0xff] %vm360_vm3, %v897_v40 }
  0xa9   :  { %365 = vst.msk [vmem:[%s1061_s9 + $0x20] sm:$0xff] %vm360_vm3, %v348_v17  ;;  %565 = vmatmul.msk.f32.gmra.mxu2 %vm360_vm3, %v348_v17 }
  0xaa   :  { %v279_v18 = vpop.f32.mrf.mxu1  ;;  %v141_v19 = vpop.f32.mrf.mxu0 }
  0xab   :  { %v142_v21 = vadd.f32 %v814_v43, %v141_v19  ;;  %v280_v22 = vadd.f32 %v819_v44, %v279_v18  ;;  %v306_v50 = vpop.f32.mrf.mxu3  ;;  %v323_v19 = vld [vmem:[%s1059_s2 + $0x58] sm:$0xff] }
  0xac   :  { %v307_v52 = vadd.f32 %v819_v44, %v306_v50 }
  0xad   :  { %v333_v23 = vadd.f32 %v317_v20, %v142_v21 }
  0xae   :  { %v358_v55 = vadd.f32 %v342_v49, %v307_v52 }
  0xaf   :  { %v349_v25 = vadd.f32 %v333_v23, %v280_v22 }
  0xb0   :  { %375 = vst.msk [vmem:[%s1061_s9 + $0x70] sm:$0xff] %vm360_vm3, %v358_v55 }
  0xb1   :  { %366 = vst.msk [vmem:[%s1061_s9 + $0x28] sm:$0xff] %vm360_vm3, %v349_v25  ;;  %566 = vmatmul.msk.f32.gmra.mxu2 %vm360_vm3, %v349_v25 }
  0xb2   :  { %v282_v26 = vpop.f32.mrf.mxu1  ;;  %v144_v28 = vpop.f32.mrf.mxu0 }
  0xb3   :  { %v145_v31 = vadd.f32 %v814_v43, %v144_v28  ;;  %v283_v32 = vadd.f32 %v819_v44, %v282_v26  ;;  %v309_v63 = vpop.f32.mrf.mxu3  ;;  %v324_v26 = vld [vmem:[%s1059_s2 + $0x60] sm:$0xff] }
  0xb4   :  { %v310_v1 = vadd.f32 %v819_v44, %v309_v63 }
  0xb5   :  { %v334_v33 = vadd.f32 %v318_v29, %v145_v31 }
  0xb6   :  { %v359_v3 = vadd.f32 %v343_v62, %v310_v1 }
  0xb7   :  { %v350_v36 = vadd.f32 %v334_v33, %v283_v32 }
  0xb8   :  { %376 = vst.msk [vmem:[%s1061_s9 + $0x78] sm:$0xff] %vm360_vm3, %v359_v3 }
  0xb9   :  { %367 = vst.msk [vmem:[%s1061_s9 + $0x30] sm:$0xff] %vm360_vm3, %v350_v36  ;;  %567 = vmatmul.msk.f32.gmra.mxu2 %vm360_vm3, %v350_v36 }
  0xba   :  { %v285_v38 = vpop.f32.mrf.mxu1  ;;  %v147_v41 = vpop.f32.mrf.mxu0 }
  0xbb   :  { %v148_v46 = vadd.f32 %v814_v43, %v147_v41  ;;  %v286_v47 = vadd.f32 %v819_v44, %v285_v38 }
  0xbd   :  { %v335_v48 = vadd.f32 %v319_v42, %v148_v46 }
  0xbf   :  { %v351_v51 = vadd.f32 %v335_v48, %v286_v47 }
  0xc1   :  { %368 = vst.msk [vmem:[%s1061_s9 + $0x38] sm:$0xff] %vm360_vm3, %v351_v51  ;;  %568 = vmatmul.msk.f32.gmra.mxu2 %vm360_vm3, %v351_v51 }
  0xc2   :  { %v288_v53 = vpop.f32.mrf.mxu1  ;;  %v150_v56 = vpop.f32.mrf.mxu0 }
  0xc3   :  { %v151_v59 = vadd.f32 %v814_v43, %v150_v56  ;;  %v289_v60 = vadd.f32 %v819_v44, %v288_v53 }
  0xc5   :  { %v336_v61 = vadd.f32 %v320_v57, %v151_v59 }
  0xc7   :  { %v352_v0 = vadd.f32 %v336_v61, %v289_v60 }
  0xc9   :  { %369 = vst.msk [vmem:[%s1061_s9 + $0x40] sm:$0xff] %vm360_vm3, %v352_v0  ;;  %569 = vmatmul.msk.f32.gmra.mxu2 %vm360_vm3, %v352_v0 }
  0xca   :  { %v291_v2 = vpop.f32.mrf.mxu1  ;;  %v153_v4 = vpop.f32.mrf.mxu0 }
  0xcb   :  { %v154_v6 = vadd.f32 %v814_v43, %v153_v4  ;;  %v292_v7 = vadd.f32 %v819_v44, %v291_v2 }
  0xcd   :  { %v337_v8 = vadd.f32 %v321_v5, %v154_v6 }
  0xcf   :  { %v353_v9 = vadd.f32 %v337_v8, %v292_v7 }
  0xd1   :  { %370 = vst.msk [vmem:[%s1061_s9 + $0x48] sm:$0xff] %vm360_vm3, %v353_v9  ;;  %570 = vmatmul.msk.f32.gmra.mxu2 %vm360_vm3, %v353_v9 }
  0xd2   :  { %v294_v10 = vpop.f32.mrf.mxu1  ;;  %v156_v11 = vpop.f32.mrf.mxu0 }
  0xd3   :  { %v157_v13 = vadd.f32 %v814_v43, %v156_v11  ;;  %v295_v14 = vadd.f32 %v819_v44, %v294_v10 }
  0xd5   :  { %v338_v15 = vadd.f32 %v322_v12, %v157_v13 }
  0xd7   :  { %v354_v16 = vadd.f32 %v338_v15, %v295_v14 }
  0xd9   :  { %371 = vst.msk [vmem:[%s1061_s9 + $0x50] sm:$0xff] %vm360_vm3, %v354_v16  ;;  %571 = vmatmul.msk.f32.gmra.mxu2 %vm360_vm3, %v354_v16 }
  0xda   :  { %v297_v17 = vpop.f32.mrf.mxu1  ;;  %v159_v18 = vpop.f32.mrf.mxu0 }
  0xdb   :  { %v160_v20 = vadd.f32 %v814_v43, %v159_v18  ;;  %v298_v21 = vadd.f32 %v819_v44, %v297_v17 }
  0xdd   :  { %v339_v22 = vadd.f32 %v323_v19, %v160_v20 }
  0xdf   :  { %v355_v23 = vadd.f32 %v339_v22, %v298_v21 }
  0xe1   :  { %372 = vst.msk [vmem:[%s1061_s9 + $0x58] sm:$0xff] %vm360_vm3, %v355_v23  ;;  %572 = vmatmul.msk.f32.vlgmr.msra.gmra.mxu3 %vm360_vm3, %v355_v23 }
  0xe2   :  { %v300_v24 = vpop.f32.mrf.mxu1  ;;  %v162_v25 = vpop.f32.mrf.mxu0 }
  0xe3   :  { %v163_v27 = vadd.f32 %v814_v43, %v162_v25  ;;  %v301_v28 = vadd.f32 %v819_v44, %v300_v24  ;;  %v590_v43 = vld [vmem:[%s1060_s8] ss:$0 sm:$0xff] }
  0xe5   :  { %v340_v29 = vadd.f32 %v324_v26, %v163_v27 }
  0xe7   :  { %v356_v30 = vadd.f32 %v340_v29, %v301_v28 }
  0xe9   :  { %373 = vst.msk [vmem:[%s1061_s9 + $0x60] sm:$0xff] %vm360_vm3, %v356_v30  ;;  %573 = vmatmul.msk.f32.gmra.mxu3 %vm360_vm3, %v356_v30 }
  0xf1   :  { %574 = vmatmul.msk.f32.gmra.mxu3 %vm360_vm3, %v897_v40 }
  0xf9   :  { %575 = vmatmul.msk.f32.gmra.mxu3 %vm360_vm3, %v358_v55 }
 0x101   :  { %576 = vmatmul.msk.f32.gmra.mxu3 %vm360_vm3, %v359_v3 }
 0x10c   :  { %v454_v44 = vpop.f32.mrf.mxu2 }
 0x10d   :  { %v455_v31 = vadd.f32 %v590_v43, %v454_v44 }
 0x10f   :  { %503 = vst.msk [vmem:[%s1062_s10] sm:$0xff] %vm502_vm4, %v455_v31 }
 0x114   :  { %v457_v32 = vpop.f32.mrf.mxu2 }
 0x115   :  { %v458_v33 = vadd.f32 %v590_v43, %v457_v32 }
 0x117   :  { %504 = vst.msk [vmem:[%s1062_s10 + $0x8] sm:$0xff] %vm502_vm4, %v458_v33 }
 0x11c   :  { %v460_v34 = vpop.f32.mrf.mxu2 }
 0x11d   :  { %v461_v35 = vadd.f32 %v590_v43, %v460_v34 }
 0x11f   :  { %505 = vst.msk [vmem:[%s1062_s10 + $0x10] sm:$0xff] %vm502_vm4, %v461_v35 }
 0x124   :  { %v463_v36 = vpop.f32.mrf.mxu2 }
 0x125   :  { %v464_v37 = vadd.f32 %v590_v43, %v463_v36 }
 0x127   :  { %506 = vst.msk [vmem:[%s1062_s10 + $0x18] sm:$0xff] %vm502_vm4, %v464_v37 }
 0x12c   :  { %v466_v38 = vpop.f32.mrf.mxu2 }
 0x12d   :  { %v467_v39 = vadd.f32 %v590_v43, %v466_v38 }
 0x12f   :  { %507 = vst.msk [vmem:[%s1062_s10 + $0x20] sm:$0xff] %vm502_vm4, %v467_v39 }
 0x134   :  { %v469_v40 = vpop.f32.mrf.mxu2 }
 0x135   :  { %v470_v41 = vadd.f32 %v590_v43, %v469_v40 }
 0x137   :  { %508 = vst.msk [vmem:[%s1062_s10 + $0x28] sm:$0xff] %vm502_vm4, %v470_v41 }
 0x13c   :  { %v472_v42 = vpop.f32.mrf.mxu2 }
 0x13d   :  { %v473_v45 = vadd.f32 %v590_v43, %v472_v42 }
 0x13f   :  { %509 = vst.msk [vmem:[%s1062_s10 + $0x30] sm:$0xff] %vm502_vm4, %v473_v45 }
 0x144   :  { %v475_v46 = vpop.f32.mrf.mxu2 }
 0x145   :  { %v476_v47 = vadd.f32 %v590_v43, %v475_v46 }
 0x147   :  { %510 = vst.msk [vmem:[%s1062_s10 + $0x38] sm:$0xff] %vm502_vm4, %v476_v47 }
 0x14c   :  { %v478_v48 = vpop.f32.mrf.mxu2 }
 0x14d   :  { %v479_v49 = vadd.f32 %v590_v43, %v478_v48 }
 0x14f   :  { %511 = vst.msk [vmem:[%s1062_s10 + $0x40] sm:$0xff] %vm502_vm4, %v479_v49 }
 0x154   :  { %v481_v50 = vpop.f32.mrf.mxu2 }
 0x155   :  { %v482_v51 = vadd.f32 %v590_v43, %v481_v50 }
 0x157   :  { %512 = vst.msk [vmem:[%s1062_s10 + $0x48] sm:$0xff] %vm502_vm4, %v482_v51 }
 0x15c   :  { %v484_v52 = vpop.f32.mrf.mxu2 }
 0x15d   :  { %v485_v53 = vadd.f32 %v590_v43, %v484_v52 }
 0x15f   :  { %513 = vst.msk [vmem:[%s1062_s10 + $0x50] sm:$0xff] %vm502_vm4, %v485_v53 }
 0x164   :  { %v487_v54 = vpop.f32.mrf.mxu3 }
 0x165   :  { %v488_v55 = vadd.f32 %v590_v43, %v487_v54 }
 0x167   :  { %514 = vst.msk [vmem:[%s1062_s10 + $0x58] sm:$0xff] %vm502_vm4, %v488_v55 }
 0x16c   :  { %v490_v56 = vpop.f32.mrf.mxu3 }
 0x16d   :  { %v491_v57 = vadd.f32 %v590_v43, %v490_v56 }
 0x16f   :  { %515 = vst.msk [vmem:[%s1062_s10 + $0x60] sm:$0xff] %vm502_vm4, %v491_v57 }
 0x174   :  { %v493_v58 = vpop.f32.mrf.mxu3 }
 0x175   :  { %v494_v59 = vadd.f32 %v590_v43, %v493_v58 }
 0x177   :  { %516 = vst.msk [vmem:[%s1062_s10 + $0x68] sm:$0xff] %vm502_vm4, %v494_v59 }
 0x17c   :  { %v496_v60 = vpop.f32.mrf.mxu3 }
 0x17d   :  { %v497_v61 = vadd.f32 %v590_v43, %v496_v60 }
 0x17f   :  { %517 = vst.msk [vmem:[%s1062_s10 + $0x70] sm:$0xff] %vm502_vm4, %v497_v61 }
 0x184   :  { %v499_v62 = vpop.f32.mrf.mxu3 }
 0x185   :  { %v500_v63 = vadd.f32 %v590_v43, %v499_v62 }
 0x187   :  { %518 = vst.msk [vmem:[%s1062_s10 + $0x78] sm:$0xff] %vm502_vm4, %v500_v63 }

// kernel: model_forward.13
= control target key start
LH: loop header
LB: loop body
LE: loop exit
PB: predicated region body
PF: predicated region fallthrough
CT: control target
= control target key end

     0   :  { %vm83_vm6 = vcmask 254976   ;;  %s174_s1 = inlined_call_operand.vmem [shape: f32[128,32], index: 1, kind: input, shape index: {}]   ;;  %s175_s2 = inlined_call_operand.vmem [shape: f32[1,32], index: 2, kind: input, shape index: {}]   ;;  %s176_s0 = inlined_call_operand.vmem [shape: f32[2,128], index: 0, kind: input, shape index: {}]   ;;  %s177_s3 = inlined_call_operand.vmem [shape: f32[2,32], index: 3, kind: output, shape index: {}]  }
   0x1   :  { %v30_v0 = vld [vmem:[%s174_s1 + $0x78] sm:$0xff]  ;;  %v29_v1 = vld [vmem:[%s174_s1 + $0x70] sm:$0xff]  ;;  %v28_v2 = vld [vmem:[%s174_s1 + $0x68] sm:$0xff] }
   0x2   :  { %35 = vmatpush.msra.mxu0 %v30_v0  ;;  %v27_v3 = vld [vmem:[%s174_s1 + $0x60] sm:$0xff]  ;;  %v26_v4 = vld [vmem:[%s174_s1 + $0x58] sm:$0xff]  ;;  %v25_v5 = vld [vmem:[%s174_s1 + $0x50] sm:$0xff] }
   0x3   :  { %v24_v6 = vld [vmem:[%s174_s1 + $0x48] sm:$0xff]  ;;  %v23_v7 = vld [vmem:[%s174_s1 + $0x40] sm:$0xff]  ;;  %v22_v8 = vld [vmem:[%s174_s1 + $0x38] sm:$0xff] }
   0x4   :  { %36 = vmatpush.msra.mxu0 %v29_v1  ;;  %v21_v9 = vld [vmem:[%s174_s1 + $0x30] sm:$0xff]  ;;  %v20_v10 = vld [vmem:[%s174_s1 + $0x28] sm:$0xff]  ;;  %v19_v11 = vld [vmem:[%s174_s1 + $0x20] sm:$0xff] }
   0x5   :  { %v18_v12 = vld [vmem:[%s174_s1 + $0x18] sm:$0xff]  ;;  %v17_v13 = vld [vmem:[%s174_s1 + $0x10] sm:$0xff]  ;;  %v16_v14 = vld [vmem:[%s174_s1 + $0x8] sm:$0xff] }
   0x6   :  { %37 = vmatpush.msra.mxu0 %v28_v2  ;;  %v15_v15 = vld [vmem:[%s174_s1] sm:$0xff] }
   0x7   :  { %v14_v16 = vld [vmem:[%s176_s0] sm:$0x3] }
   0x8   :  { %38 = vmatpush.msra.mxu0 %v27_v3  ;;  %v90_v17 = vld [vmem:[%s175_s2] ss:$0 sm:$0xff] }
   0xa   :  { %39 = vmatpush.msra.mxu0 %v26_v4 }
   0xc   :  { %40 = vmatpush.msra.mxu0 %v25_v5 }
   0xe   :  { %41 = vmatpush.msra.mxu0 %v24_v6 }
  0x10   :  { %42 = vmatpush.msra.mxu0 %v23_v7 }
  0x12   :  { %43 = vmatpush.msra.mxu0 %v22_v8 }
  0x14   :  { %44 = vmatpush.msra.mxu0 %v21_v9 }
  0x16   :  { %45 = vmatpush.msra.mxu0 %v20_v10 }
  0x18   :  { %46 = vmatpush.msra.mxu0 %v19_v11 }
  0x1a   :  { %47 = vmatpush.msra.mxu0 %v18_v12 }
  0x1c   :  { %48 = vmatpush.msra.mxu0 %v17_v13 }
  0x1e   :  { %49 = vmatpush.msra.mxu0 %v16_v14 }
  0x20   :  { %50 = vmatpush.msra.mxu0 %v15_v15 }
  0x21   :  { %51 = vmatmul.f32.vlgmr.msra.gmra.mxu0 %v14_v16 }
  0x9e   :  { %v52_v18 = vpop.f32.mrf.mxu0 }
  0x9f   :  { %v53_v19 = vadd.f32 %v90_v17, %v52_v18 }
  0xa1   :  { %v56_v20 = vmin.f32 %v53_v19, 0.0  ;;  %vm55_vm7 = vcmp.gt.f32.partialorder %v53_v19, 0.0 }
  0xa3   :  { %v57_v21 = vmul.f32 1.442695, %v56_v20 }
  0xa5   :  { %91 = vpow2.f32 %v57_v21 }
  0xab   :  { %v92_v22 = vpop.eup %91 }
  0xac   :  { %93 = vlog2.f32 %v92_v22  ;;  %v89_v29 = vadd.f32 -1.0, %v92_v22  ;;  %vm79_vm4 = vcmp.eq.f32.partialorder %v92_v22, 0.0  ;;  %vm78_vm5 = vcmp.eq.f32.partialorder %v92_v22, 1.0 }
  0xae   :  { %v60_v34 = vmul.f32 %v89_v29, %v56_v20 }
  0xb2   :  { %v94_v23 = vpop.eup %93 }
  0xb3   :  { %v62_v24 = vmul.f32 0.6931472, %v94_v23 }
  0xb5   :  { %95 = vrcp.f32 %v62_v24  ;;  %v74_v28 = vand.u32 2147483648, %v62_v24  ;;  %v72_v31 = vand.u32 2147483647, %v62_v24  ;;  %vm68_vm1 = vweird.f32 %v62_v24 }
  0xb7   :  { %v75_v33 = vor.u32 1.1754944e-38, %v74_v28  ;;  %vm73_vm3 = vcmp.eq.f32.partialorder %v72_v31, 8.507059e+37 }
  0xbb   :  { %v96_v25 = vpop.eup %95 }
  0xbc   :  { %v64_v26 = vmul.f32 %v96_v25, %v62_v24  ;;  %vm69_vm0 = vweird.f32 %v96_v25 }
  0xbd   :  { %vm70_vm2 = vmor %vm68_vm1, %vm69_vm0 }
  0xbe   :  { %v65_v27 = vsub.f32 1.0, %v64_v26 }
  0xc0   :  { %v66_v30 = vmul.f32 %v96_v25, %v65_v27 }
  0xc2   :  { %v67_v32 = vadd.f32 %v96_v25, %v66_v30 }
  0xc4   :  { %v71_v35 = vsel %vm70_vm2, %v96_v25, %v67_v32 }
  0xc5   :  { %v76_v36 = vsel %vm73_vm3, %v75_v33, %v71_v35 }
  0xc6   :  { %v77_v37 = vmul.f32 %v76_v36, %v60_v34 }
  0xc8   :  { %v80_v38 = vsel %vm79_vm4, -1.0, %v77_v37 }
  0xc9   :  { %v81_v39 = vsel %vm78_vm5, %v56_v20, %v80_v38 }
  0xca   :  { %v82_v40 = vsel %vm55_vm7, %v53_v19, %v81_v39 }
  0xcb   :  { %84 = vst.msk [vmem:[%s177_s3] sm:$0x3] %vm83_vm6, %v82_v40 }

// kernel: model_forward.14
= control target key start
LH: loop header
LB: loop body
LE: loop exit
PB: predicated region body
PF: predicated region fallthrough
CT: control target
= control target key end

     0   :  { %s808_s21 = smov 0   ;;  %s1151_s0 = inlined_call_operand.vmem [shape: f32[2,64,64], index: 0, kind: input, shape index: {}]   ;;  %s1152_s1 = inlined_call_operand.vmem [shape: f32[2,21,32], index: 1, kind: input, shape index: {}]   ;;  %s1153_s2 = inlined_call_operand.vmem [shape: f32[32,64], index: 2, kind: input, shape index: {}]   ;;  %s1154_s3 = inlined_call_operand.vmem [shape: f32[1,64], index: 3, kind: input, shape index: {}]   ;;  %s1155_s4 = inlined_call_operand.vmem [shape: f32[1,64], index: 4, kind: input, shape index: {}]   ;;  %s1156_s5 = inlined_call_operand.vmem [shape: f32[1,64], index: 5, kind: input, shape index: {}]   ;;  %s1157_s6 = inlined_call_operand.vmem [shape: f32[2,128,64], index: 6, kind: output, shape index: {}]  }
   0x1 LB: > { %s702_s22 = sadd.s32 4294967295, %s769_s21   ;;  %p706_p0 = scmp.ge.s32.totalorder %s769_s21, 1  ;;  %s769_s21 = sphi %s808_s21, %s16_s21  }
   0x2   : > { %p222_p1 = scmp.lt.s32.totalorder %s769_s21, 3 }
   0x4   : > { %p223_p2 = pnand %p706_p0, %p222_p1 }
   0x5   : > { %p257_p3 = scmp.lt.s32.totalorder (!%p223_p2), %s702_s22, 1 }
   0x6   : > { %226 = sbr.rel (%p223_p2) target bundleno = 423 (0x1a7), region = 44 }
   0xb   : > { %v278_v0 = vld [vmem:[%s1153_s2 + $0x18] sm:$0xff]  ;;  %v277_v1 = vld [vmem:[%s1153_s2 + $0x10] sm:$0xff]  ;;  %v276_v2 = vld [vmem:[%s1153_s2 + $0x8] sm:$0xff]  ;;  %s1169_s22 = smov (!%p257_p3, %s702_s22), 1  ;;  %vm321_vm0 = vcmask 523264   ;;  %vm283_vm1 = vcmask 261120  }
   0xc   : > { %305 = vmatpush.msra.mxu0 %v278_v0  ;;  %719 = vmatpush.msra.mxu1 %v278_v0  ;;  %v275_v3 = vld [vmem:[%s1153_s2] sm:$0xff]  ;;  %s717_s7 = sshll.u32 %s1169_s22, 6  ;;  %s727_s8 = smul.u32 24, %s1169_s22  ;;  %v771_v23 = vmov 64.0   ;;  %vm565_vm3 = vcmask 520192  }
   0xd   : > { %720 = vmatpush.msra.mxu2 %v278_v0  ;;  %s835_s11 = scalar_lea.vmem %s1151_s0, %s717_s7  ;;  %739 = vrcp.f32 %v771_v23  ;;  %v738_v33 = vld [vmem:[%s1154_s3] ss:$0 sm:$0xff]  ;;  %s718_s17 = sshll.u32 %s1169_s22, 7 }
   0xe   : > { %306 = vmatpush.msra.mxu0 %v277_v1  ;;  %721 = vmatpush.msra.mxu1 %v277_v1  ;;  %s266_s14 = scalar_lea.vmem %s1152_s1, %s727_s8  ;;  %v338_v4 = vld [vmem:[%s835_s11] sm:$0xff]  ;;  %v842_v5 = vld [vmem:[%s835_s11 + $0x10] sm:$0xff]  ;;  %v339_v13 = vld [vmem:[%s835_s11 + $0x8] sm:$0xff]  ;;  %s940_s20 = scalar_lea.vmem %s1157_s6, %s718_s17 }
   0xf   : > { %722 = vmatpush.msra.mxu2 %v277_v1  ;;  %v272_v6 = vld [vmem:[%s266_s14] sm:$0xff]  ;;  %v273_v7 = vld [vmem:[%s266_s14 + $0x8] sm:$0xff]  ;;  %v274_v8 = vld [vmem:[%s266_s14 + $0x10] sm:$0x1f]  ;;  %v346_v9 = vsel %vm321_vm0, %v338_v4, 0.0  ;;  %v352_v10 = vsel %vm321_vm0, %v842_v5, 0.0 }
  0x10   : > { %307 = vmatpush.msra.mxu0 %v276_v2  ;;  %723 = vmatpush.msra.mxu1 %v276_v2  ;;  %v342_v11 = vld [vmem:[%s835_s11 + $0x20] sm:$0xff]  ;;  %v341_v14 = vld [vmem:[%s835_s11 + $0x18] sm:$0xff]  ;;  %v855_v15 = vld [vmem:[%s835_s11 + $0x28] sm:$0xff]  ;;  %v349_v16 = vsel %vm321_vm0, %v339_v13, 0.0 }
  0x11   : > { %724 = vmatpush.msra.mxu2 %v276_v2  ;;  %v358_v12 = vsel %vm321_vm0, %v342_v11, 0.0  ;;  %347 = vadd.xlane.f32.xlu0 %v346_v9  ;;  %v355_v17 = vsel %vm321_vm0, %v341_v14, 0.0  ;;  %v361_v18 = vsel %vm321_vm0, %v855_v15, 0.0  ;;  %v862_v19 = vld [vmem:[%s835_s11 + $0x38] sm:$0xff]  ;;  %v344_v20 = vld [vmem:[%s835_s11 + $0x30] sm:$0xff] }
  0x12   : > { %308 = vmatpush.msra.mxu0 %v275_v3  ;;  %725 = vmatpush.msra.mxu1 %v275_v3  ;;  %v367_v21 = vsel %vm321_vm0, %v862_v19, 0.0  ;;  %v364_v22 = vsel %vm321_vm0, %v344_v20, 0.0 }
  0x13   : > { %726 = vmatpush.msra.mxu2 %v275_v3  ;;  %712 = vmatmul.msk.f32.vlgmr.msra.gmra.mxu0 %vm283_vm1, %v272_v6  ;;  %v740_v24 = vpop.eup %739 }
  0x14   : > { %713 = vmatmul.msk.f32.vlgmr.msra.gmra.mxu1 %vm283_vm1, %v273_v7  ;;  %714 = vmatmul.msk.f32.vlgmr.msra.gmra.mxu2 %vm283_vm1, %v274_v8  ;;  %v371_v25 = vmul.f32 64.0, %v740_v24  ;;  %vm375_vm2 = vweird.f32 %v740_v24 }
  0x15   : > { %353 = vadd.xlane.f32.xlu1 %v352_v10  ;;  %359 = vadd.xlane.f32.xlu2 %v358_v12 }
  0x16   : > { %v372_v26 = vsub.f32 1.0, %v371_v25 }
  0x18   : > { %v373_v27 = vmul.f32 %v740_v24, %v372_v26 }
  0x19   : > { %350 = vadd.xlane.f32.xlu0 %v349_v16  ;;  %v772_v16 = vmov 0.0  }
  0x1a   : > { %v374_v28 = vadd.f32 %v740_v24, %v373_v27  ;;  %322 = vst.msk [vmem:[%s940_s20] sm:$0xff] %vm321_vm0, %v772_v16 }
  0x1b   : > { %333 = vst.msk [vmem:[%s940_s20 + $0x58] sm:$0xff] %vm321_vm0, %v772_v16 }
  0x1c   : > { %v868_v31 = vsel %vm375_vm2, %v740_v24, %v374_v28  ;;  %334 = vst.msk [vmem:[%s940_s20 + $0x60] sm:$0xff] %vm321_vm0, %v772_v16 }
  0x1d   : > { %356 = vadd.xlane.f32.xlu1 %v355_v17  ;;  %362 = vadd.xlane.f32.xlu2 %v361_v18  ;;  %335 = vst.msk [vmem:[%s940_s20 + $0x68] sm:$0xff] %vm321_vm0, %v772_v16 }
  0x1e   : > { %336 = vst.msk [vmem:[%s940_s20 + $0x70] sm:$0xff] %vm321_vm0, %v772_v16 }
  0x1f   : > { %337 = vst.msk [vmem:[%s940_s20 + $0x78] sm:$0xff] %vm321_vm0, %v772_v16 }
  0x20   : > { %323 = vst.msk [vmem:[%s940_s20 + $0x8] sm:$0xff] %vm321_vm0, %v772_v16 }
  0x21   : > { %365 = vadd.xlane.f32.xlu0 %v364_v22  ;;  %324 = vst.msk [vmem:[%s940_s20 + $0x10] sm:$0xff] %vm321_vm0, %v772_v16 }
  0x22   : > { %325 = vst.msk [vmem:[%s940_s20 + $0x18] sm:$0xff] %vm321_vm0, %v772_v16 }
  0x23   : > { %326 = vst.msk [vmem:[%s940_s20 + $0x20] sm:$0xff] %vm321_vm0, %v772_v16 }
  0x24   : > { %327 = vst.msk [vmem:[%s940_s20 + $0x28] sm:$0xff] %vm321_vm0, %v772_v16 }
  0x25   : > { %368 = vadd.xlane.f32.xlu1 %v367_v21  ;;  %328 = vst.msk [vmem:[%s940_s20 + $0x30] sm:$0xff] %vm321_vm0, %v772_v16 }
  0x26   : > { %329 = vst.msk [vmem:[%s940_s20 + $0x38] sm:$0xff] %vm321_vm0, %v772_v16 }
  0x27   : > { %330 = vst.msk [vmem:[%s940_s20 + $0x40] sm:$0xff] %vm321_vm0, %v772_v16 }
  0x28   : > { %331 = vst.msk [vmem:[%s940_s20 + $0x48] sm:$0xff] %vm321_vm0, %v772_v16 }
  0x29   : > { %332 = vst.msk [vmem:[%s940_s20 + $0x50] sm:$0xff] %vm321_vm0, %v772_v16 }
  0x84   : > { %v348_v29 = vpop.xlane.xlu0 %347 }
  0x85   : > { %v377_v32 = vmul.f32 %v868_v31, %v348_v29 }
  0x87   : > { %v874_v37 = vsub.f32 %v338_v4, %v377_v32 }
  0x88   : > { %v354_v30 = vpop.xlane.xlu1 %353  ;;  %v360_v34 = vpop.xlane.xlu2 %359 }
  0x89   : > { %v379_v45 = vmul.f32 %v868_v31, %v354_v30  ;;  %v393_v48 = vmul.f32 %v874_v37, %v874_v37  ;;  %v381_v49 = vmul.f32 %v868_v31, %v360_v34 }
  0x8b   : > { %v895_v52 = vsub.f32 %v842_v5, %v379_v45  ;;  %v401_v55 = vsel %vm321_vm0, %v393_v48, 0.0  ;;  %v902_v57 = vsub.f32 %v342_v11, %v381_v49 }
  0x8c   : > { %v351_v36 = vpop.xlane.xlu0 %350 }
  0x8d   : > { %v378_v40 = vmul.f32 %v868_v31, %v351_v36  ;;  %v395_v63 = vmul.f32 %v895_v52, %v895_v52  ;;  %v397_v3 = vmul.f32 %v902_v57, %v902_v57 }
  0x8f   : > { %v883_v44 = vsub.f32 %v339_v13, %v378_v40  ;;  %v407_v5 = vsel %vm321_vm0, %v395_v63, 0.0  ;;  %v413_v9 = vsel %vm321_vm0, %v397_v3, 0.0 }
  0x90   : > { %v310_v35 = vpop.f32.mrf.mxu0  ;;  %v357_v41 = vpop.xlane.xlu1 %356 }
  0x91   : > { %v876_v38 = vadd.f32 %v738_v33, %v310_v35  ;;  %v313_v39 = vpop.f32.mrf.mxu1  ;;  %v380_v47 = vmul.f32 %v868_v31, %v357_v41  ;;  %v394_v50 = vmul.f32 %v883_v44, %v883_v44  ;;  %v363_v56 = vpop.xlane.xlu2 %362 }
  0x92   : > { %v879_v42 = vadd.f32 %v738_v33, %v313_v39  ;;  %v382_v62 = vmul.f32 %v868_v31, %v363_v56 }
  0x93   : > { %v559_v43 = vsel %vm321_vm0, %v876_v38, 0.0  ;;  %v899_v54 = vsub.f32 %v341_v14, %v380_v47  ;;  %v404_v59 = vsel %vm321_vm0, %v394_v50, 0.0 }
  0x94   : > { %560 = vadd.xlane.f32.xlu2 %v559_v43  ;;  %v562_v46 = vsel %vm321_vm0, %v879_v42, 0.0  ;;  %v366_v60 = vpop.xlane.xlu0 %365  ;;  %v917_v4 = vsub.f32 %v855_v15, %v382_v62 }
  0x95   : > { %563 = vadd.xlane.f32.xlu0 %v562_v46  ;;  %v396_v0 = vmul.f32 %v899_v54, %v899_v54  ;;  %v383_v1 = vmul.f32 %v868_v31, %v366_v60 }
  0x96   : > { %v398_v10 = vmul.f32 %v917_v4, %v917_v4 }
  0x97   : > { %v316_v51 = vpop.f32.mrf.mxu2  ;;  %v410_v6 = vsel %vm321_vm0, %v396_v0, 0.0  ;;  %v921_v7 = vsub.f32 %v344_v20, %v383_v1 }
  0x98   : > { %v897_v53 = vadd.f32 %v738_v33, %v316_v51  ;;  %v369_v61 = vpop.xlane.xlu1 %368  ;;  %v416_v13 = vsel %vm321_vm0, %v398_v10, 0.0 }
  0x99   : > { %v384_v2 = vmul.f32 %v868_v31, %v369_v61  ;;  %v399_v11 = vmul.f32 %v921_v7, %v921_v7  ;;  %v320_v61 = vld [vmem:[%s1156_s5] sm:$0x1] }
  0x9a   : > { %v566_v58 = vsel %vm565_vm3, %v897_v53, 0.0 }
  0x9b   : > { %567 = vadd.xlane.f32.xlu1 %v566_v58  ;;  %v924_v8 = vsub.f32 %v862_v19, %v384_v2  ;;  %v419_v14 = vsel %vm321_vm0, %v399_v11, 0.0  ;;  %v319_v58 = vld [vmem:[%s1155_s4] sm:$0x1] }
  0x9c   : > { %402 = vadd.xlane.f32.xlu2 %v401_v55 }
  0x9d   : > { %405 = vadd.xlane.f32.xlu0 %v404_v59  ;;  %v400_v12 = vmul.f32 %v924_v8, %v924_v8 }
  0x9f   : > { %v422_v15 = vsel %vm321_vm0, %v400_v12, 0.0 }
  0xa3   : > { %408 = vadd.xlane.f32.xlu1 %v407_v5 }
  0xa4   : > { %411 = vadd.xlane.f32.xlu2 %v410_v6  ;;  %v1017_v6 = vperm.slane %v319_v58, 0 }
  0xa5   : > { %414 = vadd.xlane.f32.xlu0 %v413_v9 }
  0xab   : > { %417 = vadd.xlane.f32.xlu1 %v416_v13  ;;  %v1022_v13 = vperm.slane %v320_v61, 0 }
  0xac   : > { %420 = vadd.xlane.f32.xlu2 %v419_v14 }
  0xad   : > { %423 = vadd.xlane.f32.xlu0 %v422_v15 }
 0x107   : > { %v561_v17 = vpop.xlane.xlu2 %560 }
 0x108   : > { %v569_v18 = vmul.f32 %v561_v17, %v868_v31  ;;  %v564_v19 = vpop.xlane.xlu0 %563 }
 0x109   : > { %v570_v20 = vmul.f32 %v564_v19, %v868_v31 }
 0x10a   : > { %v977_v21 = vsub.f32 %v876_v38, %v569_v18 }
 0x10b   : > { %v980_v22 = vsub.f32 %v879_v42, %v570_v20 }
 0x10c   : > { %v575_v23 = vmul.f32 %v977_v21, %v977_v21 }
 0x10d   : > { %v576_v24 = vmul.f32 %v980_v22, %v980_v22 }
 0x10e   : > { %v568_v25 = vpop.xlane.xlu1 %567  ;;  %v578_v26 = vsel %vm321_vm0, %v575_v23, 0.0 }
 0x10f   : > { %v571_v27 = vmul.f32 %v568_v25, %v868_v31  ;;  %579 = vadd.xlane.f32.xlu1 %v578_v26  ;;  %v403_v28 = vpop.xlane.xlu2 %402  ;;  %v581_v29 = vsel %vm321_vm0, %v576_v24, 0.0 }
 0x110   : > { %v425_v30 = vmul.f32 %v403_v28, %v868_v31  ;;  %582 = vadd.xlane.f32.xlu2 %v581_v29  ;;  %v406_v32 = vpop.xlane.xlu0 %405 }
 0x111   : > { %v991_v33 = vsub.f32 %v897_v53, %v571_v27  ;;  %v426_v34 = vmul.f32 %v406_v32, %v868_v31 }
 0x112   : > { %v433_v35 = vadd.f32 1e-05, %v425_v30 }
 0x113   : > { %v434_v36 = vadd.f32 1e-05, %v426_v34  ;;  %v577_v38 = vmul.f32 %v991_v33, %v991_v33 }
 0x114   : > { %741 = vrsqrt.f32 %v433_v35  ;;  %vm447_vm4 = vweird.f32 %v433_v35 }
 0x115   : > { %743 = vrsqrt.f32 %v434_v36  ;;  %v584_v39 = vsel %vm565_vm3, %v577_v38, 0.0  ;;  %vm457_vm6 = vweird.f32 %v434_v36 }
 0x116   : > { %v409_v40 = vpop.xlane.xlu1 %408  ;;  %585 = vadd.xlane.f32.xlu0 %v584_v39 }
 0x117   : > { %v427_v41 = vmul.f32 %v409_v40, %v868_v31  ;;  %v412_v42 = vpop.xlane.xlu2 %411 }
 0x118   : > { %v428_v43 = vmul.f32 %v412_v42, %v868_v31  ;;  %v415_v45 = vpop.xlane.xlu0 %414 }
 0x119   : > { %v999_v46 = vadd.f32 1e-05, %v427_v41  ;;  %v429_v47 = vmul.f32 %v415_v45, %v868_v31 }
 0x11a   : > { %v742_v48 = vpop.eup %741  ;;  %v1002_v49 = vadd.f32 1e-05, %v428_v43 }
 0x11b   : > { %v744_v50 = vpop.eup %743  ;;  %v442_v51 = vmul.f32 %v742_v48, %v433_v35  ;;  %745 = vrsqrt.f32 %v999_v46  ;;  %v1006_v56 = vadd.f32 1e-05, %v429_v47  ;;  %vm448_vm5 = vweird.f32 %v742_v48 }
 0x11c   : > { %v452_v53 = vmul.f32 %v744_v50, %v434_v36  ;;  %747 = vrsqrt.f32 %v1002_v49  ;;  %vm458_vm7 = vweird.f32 %v744_v50  ;;  %vm1026_vm8 = vmor %vm447_vm4, %vm448_vm5  ;;  %vm467_vm10 = vweird.f32 %v999_v46 }
 0x11d   : > { %v443_v55 = vmul.f32 %v742_v48, %v442_v51  ;;  %749 = vrsqrt.f32 %v1006_v56  ;;  %vm1035_vm9 = vmor %vm457_vm6, %vm458_vm7  ;;  %vm477_vm11 = vweird.f32 %v1002_v49  ;;  %vm487_vm15 = vweird.f32 %v1006_v56 }
 0x11e   : > { %v453_v59 = vmul.f32 %v744_v50, %v452_v53  ;;  %v418_v60 = vpop.xlane.xlu1 %417 }
 0x11f   : > { %v444_v62 = vmul.f32 0.5, %v443_v55  ;;  %v430_v63 = vmul.f32 %v418_v60, %v868_v31  ;;  %v421_v0 = vpop.xlane.xlu2 %420 }
 0x120   : > { %v454_v1 = vmul.f32 0.5, %v453_v59  ;;  %v431_v2 = vmul.f32 %v421_v0, %v868_v31  ;;  %v424_v3 = vpop.xlane.xlu0 %423 }
 0x121   : > { %v746_v5 = vpop.eup %745  ;;  %v445_v9 = vsub.f32 1.5, %v444_v62  ;;  %v1019_v10 = vadd.f32 1e-05, %v430_v63  ;;  %v432_v11 = vmul.f32 %v424_v3, %v868_v31 }
 0x122   : > { %v748_v12 = vpop.eup %747  ;;  %v455_v15 = vsub.f32 1.5, %v454_v1  ;;  %v462_v16 = vmul.f32 %v746_v5, %v999_v46  ;;  %v1031_v17 = vadd.f32 1e-05, %v431_v2  ;;  %vm468_vm12 = vweird.f32 %v746_v5 }
 0x123   : > { %v446_v18 = vmul.f32 %v742_v48, %v445_v9  ;;  %v472_v20 = vmul.f32 %v748_v12, %v1002_v49  ;;  %751 = vrsqrt.f32 %v1019_v10  ;;  %v750_v25 = vpop.eup %749  ;;  %v1046_v28 = vadd.f32 1e-05, %v432_v11  ;;  %vm1059_vm14 = vmor %vm467_vm10, %vm468_vm12 }
 0x124   : > { %v456_v23 = vmul.f32 %v744_v50, %v455_v15  ;;  %v463_v24 = vmul.f32 %v746_v5, %v462_v16  ;;  %753 = vrsqrt.f32 %v1031_v17  ;;  %v482_v34 = vmul.f32 %v750_v25, %v1006_v56 }
 0x125   : > { %v450_v26 = vsel %vm1026_vm8, %v742_v48, %v446_v18  ;;  %v473_v27 = vmul.f32 %v748_v12, %v472_v20  ;;  %vm478_vm13 = vweird.f32 %v748_v12  ;;  %755 = vrsqrt.f32 %v1046_v28 }
 0x126   : > { %v521_v29 = vmul.f32 %v450_v26, %v874_v37  ;;  %v460_v30 = vsel %vm1035_vm9, %v744_v50, %v456_v23  ;;  %v464_v32 = vmul.f32 0.5, %v463_v24  ;;  %v483_v40 = vmul.f32 %v750_v25, %v482_v34  ;;  %vm1067_vm2 = vmor %vm477_vm11, %vm478_vm13 }
 0x127   : > { %v522_v35 = vmul.f32 %v460_v30, %v883_v44  ;;  %v474_v36 = vmul.f32 0.5, %v473_v27  ;;  %vm488_vm1 = vweird.f32 %v750_v25  ;;  %vm497_vm4 = vweird.f32 %v1019_v10 }
 0x128   : > { %v532_v38 = vmul.f32 %v1017_v6, %v521_v29  ;;  %v465_v39 = vsub.f32 1.5, %v464_v32  ;;  %v484_v46 = vmul.f32 0.5, %v483_v40  ;;  %vm1087_vm5 = vmor %vm487_vm15, %vm488_vm1  ;;  %vm507_vm7 = vweird.f32 %v1031_v17 }
 0x129   : > { %v752_v41 = vpop.eup %751  ;;  %v533_v37 = vmul.f32 %v1017_v6, %v522_v35  ;;  %v475_v44 = vsub.f32 1.5, %v474_v36  ;;  %vm517_vm10 = vweird.f32 %v1046_v28 }
 0x12a   : > { %v754_v43 = vpop.eup %753  ;;  %v543_v45 = vadd.f32 %v1022_v13, %v532_v38  ;;  %v466_v47 = vmul.f32 %v746_v5, %v465_v39  ;;  %v492_v50 = vmul.f32 %v752_v41, %v1019_v10  ;;  %v485_v59 = vsub.f32 1.5, %v484_v46 }
 0x12b   : > { %v544_v51 = vadd.f32 %v1022_v13, %v533_v37  ;;  %v476_v53 = vmul.f32 %v748_v12, %v475_v44  ;;  %v502_v55 = vmul.f32 %v754_v43, %v1031_v17  ;;  %v756_v49 = vpop.eup %755  ;;  %vm498_vm6 = vweird.f32 %v752_v41 }
 0x12c   : > { %551 = vst.msk [vmem:[%s940_s20] sm:$0xff] %vm321_vm0, %v543_v45  ;;  %v470_v58 = vsel %vm1059_vm14, %v746_v5, %v466_v47  ;;  %v493_v60 = vmul.f32 %v752_v41, %v492_v50  ;;  %v486_v2 = vmul.f32 %v750_v25, %v485_v59  ;;  %v512_v5 = vmul.f32 %v756_v49, %v1046_v28  ;;  %vm499_vm9 = vmor %vm497_vm4, %vm498_vm6 }
 0x12d   : > { %552 = vst.msk [vmem:[%s940_s20 + $0x8] sm:$0xff] %vm321_vm0, %v544_v51  ;;  %v523_v61 = vmul.f32 %v470_v58, %v895_v52  ;;  %v480_v62 = vsel %vm1067_vm2, %v748_v12, %v476_v53  ;;  %v503_v0 = vmul.f32 %v754_v43, %v502_v55  ;;  %vm508_vm8 = vweird.f32 %v754_v43 }
 0x12e   : > { %v524_v1 = vmul.f32 %v480_v62, %v899_v54  ;;  %v494_v3 = vmul.f32 0.5, %v493_v60  ;;  %v490_v11 = vsel %vm1087_vm5, %v750_v25, %v486_v2  ;;  %v513_v14 = vmul.f32 %v756_v49, %v512_v5  ;;  %vm509_vm11 = vmor %vm507_vm7, %vm508_vm8 }
 0x12f   : > { %v534_v52 = vmul.f32 %v1017_v6, %v523_v61  ;;  %v504_v9 = vmul.f32 0.5, %v503_v0  ;;  %v525_v15 = vmul.f32 %v490_v11, %v902_v57  ;;  %vm518_vm12 = vweird.f32 %v756_v49 }
 0x130   : > { %v535_v56 = vmul.f32 %v1017_v6, %v524_v1  ;;  %v495_v12 = vsub.f32 1.5, %v494_v3  ;;  %v514_v19 = vmul.f32 0.5, %v513_v14  ;;  %vm519_vm13 = vmor %vm517_vm10, %vm518_vm12 }
 0x131   : > { %v545_v54 = vadd.f32 %v1022_v13, %v534_v52  ;;  %v505_v16 = vsub.f32 1.5, %v504_v9  ;;  %v536_v20 = vmul.f32 %v1017_v6, %v525_v15 }
 0x132   : > { %v546_v17 = vadd.f32 %v1022_v13, %v535_v56  ;;  %v496_v18 = vmul.f32 %v752_v41, %v495_v12  ;;  %v515_v10 = vsub.f32 1.5, %v514_v19 }
 0x133   : > { %553 = vst.msk [vmem:[%s940_s20 + $0x10] sm:$0xff] %vm321_vm0, %v545_v54  ;;  %v506_v23 = vmul.f32 %v754_v43, %v505_v16  ;;  %v547_v24 = vadd.f32 %v1022_v13, %v536_v20 }
 0x134   : > { %554 = vst.msk [vmem:[%s940_s20 + $0x18] sm:$0xff] %vm321_vm0, %v546_v17  ;;  %v500_v57 = vsel %vm499_vm9, %v752_v41, %v496_v18  ;;  %v516_v29 = vmul.f32 %v756_v49, %v515_v10 }
 0x135   : > { %v526_v25 = vmul.f32 %v500_v57, %v917_v4  ;;  %v510_v26 = vsel %vm509_vm11, %v754_v43, %v506_v23  ;;  %555 = vst.msk [vmem:[%s940_s20 + $0x20] sm:$0xff] %vm321_vm0, %v547_v24 }
 0x136   : > { %v527_v27 = vmul.f32 %v510_v26, %v921_v7  ;;  %v520_v34 = vsel %vm519_vm13, %v756_v49, %v516_v29 }
 0x137   : > { %v537_v30 = vmul.f32 %v1017_v6, %v526_v25  ;;  %v528_v36 = vmul.f32 %v520_v34, %v924_v8 }
 0x138   : > { %v538_v32 = vmul.f32 %v1017_v6, %v527_v27 }
 0x139   : > { %v548_v35 = vadd.f32 %v1022_v13, %v537_v30  ;;  %v539_v28 = vmul.f32 %v1017_v6, %v528_v36 }
 0x13a   : > { %v549_v4 = vadd.f32 %v1022_v13, %v538_v32 }
 0x13b   : > { %556 = vst.msk [vmem:[%s940_s20 + $0x28] sm:$0xff] %vm321_vm0, %v548_v35  ;;  %v550_v7 = vadd.f32 %v1022_v13, %v539_v28 }
 0x13c   : > { %557 = vst.msk [vmem:[%s940_s20 + $0x30] sm:$0xff] %vm321_vm0, %v549_v4 }
 0x13d   : > { %558 = vst.msk [vmem:[%s940_s20 + $0x38] sm:$0xff] %vm321_vm0, %v550_v7 }
 0x182   : > { %v580_v38 = vpop.xlane.xlu1 %579 }
 0x183   : > { %v587_v39 = vmul.f32 %v580_v38, %v868_v31  ;;  %v583_v40 = vpop.xlane.xlu2 %582 }
 0x184   : > { %v588_v41 = vmul.f32 %v583_v40, %v868_v31 }
 0x185   : > { %v590_v37 = vadd.f32 1e-05, %v587_v39 }
 0x186   : > { %v591_v8 = vadd.f32 1e-05, %v588_v41 }
 0x187   : > { %757 = vrsqrt.f32 %v590_v37  ;;  %vm599_vm1 = vweird.f32 %v590_v37 }
 0x188   : > { %759 = vrsqrt.f32 %v591_v8  ;;  %vm609_vm4 = vweird.f32 %v591_v8 }
 0x189   : > { %v586_v42 = vpop.xlane.xlu0 %585 }
 0x18a   : > { %v589_v44 = vmul.f32 %v586_v42, %v868_v31 }
 0x18c   : > { %v592_v43 = vadd.f32 1e-05, %v589_v44 }
 0x18d   : > { %v758_v45 = vpop.eup %757 }
 0x18e   : > { %v760_v47 = vpop.eup %759  ;;  %v594_v48 = vmul.f32 %v758_v45, %v590_v37  ;;  %761 = vrsqrt.f32 %v592_v43  ;;  %vm600_vm14 = vweird.f32 %v758_v45  ;;  %vm619_vm7 = vweird.f32 %v592_v43 }
 0x18f   : > { %v604_v46 = vmul.f32 %v760_v47, %v591_v8  ;;  %vm610_vm15 = vweird.f32 %v760_v47  ;;  %vm601_vm2 = vmor %vm599_vm1, %vm600_vm14 }
 0x190   : > { %v595_v50 = vmul.f32 %v758_v45, %v594_v48  ;;  %vm611_vm5 = vmor %vm609_vm4, %vm610_vm15 }
 0x191   : > { %v605_v51 = vmul.f32 %v760_v47, %v604_v46 }
 0x192   : > { %v596_v53 = vmul.f32 0.5, %v595_v50 }
 0x193   : > { %v606_v55 = vmul.f32 0.5, %v605_v51 }
 0x194   : > { %v762_v58 = vpop.eup %761  ;;  %v597_v59 = vsub.f32 1.5, %v596_v53 }
 0x195   : > { %v607_v60 = vsub.f32 1.5, %v606_v55  ;;  %v614_v49 = vmul.f32 %v762_v58, %v592_v43  ;;  %vm620_vm6 = vweird.f32 %v762_v58 }
 0x196   : > { %v598_v61 = vmul.f32 %v758_v45, %v597_v59  ;;  %vm621_vm8 = vmor %vm619_vm7, %vm620_vm6 }
 0x197   : > { %v608_v31 = vmul.f32 %v760_v47, %v607_v60  ;;  %v615_v62 = vmul.f32 %v762_v58, %v614_v49 }
 0x198   : > { %v602_v63 = vsel %vm601_vm2, %v758_v45, %v598_v61 }
 0x199   : > { %v623_v0 = vmul.f32 %v602_v63, %v977_v21  ;;  %v612_v1 = vsel %vm611_vm5, %v760_v47, %v608_v31  ;;  %v616_v2 = vmul.f32 0.5, %v615_v62 }
 0x19a   : > { %v624_v3 = vmul.f32 %v612_v1, %v980_v22 }
 0x19b   : > { %v626_v5 = vmul.f32 %v623_v0, %v1017_v6  ;;  %v617_v52 = vsub.f32 1.5, %v616_v2 }
 0x19c   : > { %v627_v9 = vmul.f32 %v624_v3, %v1017_v6 }
 0x19d   : > { %v629_v56 = vadd.f32 %v626_v5, %v1022_v13  ;;  %v618_v11 = vmul.f32 %v762_v58, %v617_v52 }
 0x19e   : > { %v630_v12 = vadd.f32 %v627_v9, %v1022_v13 }
 0x19f   : > { %632 = vst.msk [vmem:[%s940_s20 + $0x40] sm:$0xff] %vm321_vm0, %v629_v56  ;;  %v622_v21 = vsel %vm621_vm8, %v762_v58, %v618_v11 }
 0x1a0   : > { %633 = vst.msk [vmem:[%s940_s20 + $0x48] sm:$0xff] %vm321_vm0, %v630_v12  ;;  %v625_v22 = vmul.f32 %v622_v21, %v991_v33 }
 0x1a2   : > { %v628_v14 = vmul.f32 %v625_v22, %v1017_v6 }
 0x1a4   : > { %v631_v54 = vadd.f32 %v628_v14, %v1022_v13 }
 0x1a6   : > { %634 = vst.msk [vmem:[%s940_s20 + $0x50] sm:$0x1f] %vm565_vm3, %v631_v54 }
 0x1a7 PF: > { %s16_s21 = sadd.s32 1, %s769_s21  }
 0x1a8   : > { %p13_p4 = scmp.ge.s32.totalorder %s16_s21, 4  }
 0x1aa   :  { %15 = sbr.rel (!%p13_p4) target bundleno = 1 (0x1), region = 77 }

// kernel: model_forward.19
= control target key start
LH: loop header
LB: loop body
LE: loop exit
PB: predicated region body
PF: predicated region fallthrough
CT: control target
= control target key end

     0   :  { %vm90_vm0 = vcmask 123904   ;;  %s213_s1 = inlined_call_operand.vmem [shape: f32[256,16], index: 1, kind: input, shape index: {}]   ;;  %s214_s0 = inlined_call_operand.vmem [shape: f32[2,256], index: 0, kind: input, shape index: {}]   ;;  %s215_s2 = inlined_call_operand.vmem [shape: f32[2,16], index: 2, kind: output, shape index: {}]  }
   0x1   :  { %v27_v0 = vld [vmem:[%s213_s1 + $0x78] sm:$0xff]  ;;  %v26_v2 = vld [vmem:[%s213_s1 + $0x70] sm:$0xff]  ;;  %v25_v4 = vld [vmem:[%s213_s1 + $0x68] sm:$0xff] }
   0x2   :  { %v43_v1 = vld [vmem:[%s213_s1 + $0xf8] sm:$0xff]  ;;  %50 = vmatpush.msra.mxu0 %v27_v0  ;;  %v42_v3 = vld [vmem:[%s213_s1 + $0xf0] sm:$0xff]  ;;  %v41_v5 = vld [vmem:[%s213_s1 + $0xe8] sm:$0xff] }
   0x3   :  { %70 = vmatpush.msra.mxu1 %v43_v1  ;;  %v24_v6 = vld [vmem:[%s213_s1 + $0x60] sm:$0xff]  ;;  %v23_v8 = vld [vmem:[%s213_s1 + $0x58] sm:$0xff]  ;;  %v22_v10 = vld [vmem:[%s213_s1 + $0x50] sm:$0xff] }
   0x4   :  { %51 = vmatpush.msra.mxu0 %v26_v2  ;;  %v40_v7 = vld [vmem:[%s213_s1 + $0xe0] sm:$0xff]  ;;  %v39_v9 = vld [vmem:[%s213_s1 + $0xd8] sm:$0xff]  ;;  %v38_v11 = vld [vmem:[%s213_s1 + $0xd0] sm:$0xff] }
   0x5   :  { %71 = vmatpush.msra.mxu1 %v42_v3  ;;  %v21_v12 = vld [vmem:[%s213_s1 + $0x48] sm:$0xff]  ;;  %v11_v14 = vld [vmem:[%s214_s0] sm:$0xf]  ;;  %v19_v17 = vld [vmem:[%s213_s1 + $0x38] sm:$0xff] }
   0x6   :  { %52 = vmatpush.msra.mxu0 %v25_v4  ;;  %v37_v13 = vld [vmem:[%s213_s1 + $0xc8] sm:$0xff]  ;;  %45 = vst [vmem:[#allocation1] ss:$4 sm:$0xff] %v11_v14  ;;  %v20_v15 = vld [vmem:[%s213_s1 + $0x40] sm:$0xff]  ;;  %v35_v18 = vld [vmem:[%s213_s1 + $0xb8] sm:$0xff] }
   0x7   :  { %72 = vmatpush.msra.mxu1 %v41_v5  ;;  %v36_v16 = vld [vmem:[%s213_s1 + $0xc0] sm:$0xff]  ;;  %v18_v19 = vld [vmem:[%s213_s1 + $0x30] sm:$0xff]  ;;  %v17_v21 = vld [vmem:[%s213_s1 + $0x28] sm:$0xff] }
   0x8   :  { %53 = vmatpush.msra.mxu0 %v24_v6  ;;  %v34_v20 = vld [vmem:[%s213_s1 + $0xb0] sm:$0xff]  ;;  %v33_v22 = vld [vmem:[%s213_s1 + $0xa8] sm:$0xff]  ;;  %v16_v23 = vld [vmem:[%s213_s1 + $0x20] sm:$0xff] }
   0x9   :  { %73 = vmatpush.msra.mxu1 %v40_v7  ;;  %v32_v24 = vld [vmem:[%s213_s1 + $0xa0] sm:$0xff]  ;;  %v15_v25 = vld [vmem:[%s213_s1 + $0x18] sm:$0xff]  ;;  %v14_v27 = vld [vmem:[%s213_s1 + $0x10] sm:$0xff] }
   0xa   :  { %54 = vmatpush.msra.mxu0 %v23_v8  ;;  %v31_v26 = vld [vmem:[%s213_s1 + $0x98] sm:$0xff]  ;;  %v30_v28 = vld [vmem:[%s213_s1 + $0x90] sm:$0xff]  ;;  %v13_v29 = vld [vmem:[%s213_s1 + $0x8] sm:$0xff] }
   0xb   :  { %74 = vmatpush.msra.mxu1 %v39_v9  ;;  %v29_v30 = vld [vmem:[%s213_s1 + $0x88] sm:$0xff]  ;;  %v12_v31 = vld [vmem:[%s213_s1] sm:$0xff] }
   0xc   :  { %55 = vmatpush.msra.mxu0 %v22_v10  ;;  %v28_v32 = vld [vmem:[%s213_s1 + $0x80] sm:$0xff] }
   0xd   :  { %75 = vmatpush.msra.mxu1 %v38_v11  ;;  %v46_v33 = vld.sshfl [vmem:[#allocation1] sm:$0xff pattern:$0x73625140]  ;;  %v47_v34 = vld.sshfl [vmem:[#allocation1 + $0x8] sm:$0xff pattern:$0x73625140] }
   0xe   :  { %56 = vmatpush.msra.mxu0 %v21_v12 }
   0xf   :  { %76 = vmatpush.msra.mxu1 %v37_v13 }
  0x10   :  { %57 = vmatpush.msra.mxu0 %v20_v15 }
  0x11   :  { %77 = vmatpush.msra.mxu1 %v36_v16 }
  0x12   :  { %58 = vmatpush.msra.mxu0 %v19_v17 }
  0x13   :  { %78 = vmatpush.msra.mxu1 %v35_v18 }
  0x14   :  { %59 = vmatpush.msra.mxu0 %v18_v19 }
  0x15   :  { %79 = vmatpush.msra.mxu1 %v34_v20 }
  0x16   :  { %60 = vmatpush.msra.mxu0 %v17_v21 }
  0x17   :  { %80 = vmatpush.msra.mxu1 %v33_v22 }
  0x18   :  { %61 = vmatpush.msra.mxu0 %v16_v23 }
  0x19   :  { %81 = vmatpush.msra.mxu1 %v32_v24 }
  0x1a   :  { %62 = vmatpush.msra.mxu0 %v15_v25 }
  0x1b   :  { %82 = vmatpush.msra.mxu1 %v31_v26 }
  0x1c   :  { %63 = vmatpush.msra.mxu0 %v14_v27 }
  0x1d   :  { %83 = vmatpush.msra.mxu1 %v30_v28 }
  0x1e   :  { %64 = vmatpush.msra.mxu0 %v13_v29 }
  0x1f   :  { %84 = vmatpush.msra.mxu1 %v29_v30 }
  0x20   :  { %65 = vmatpush.msra.mxu0 %v12_v31 }
  0x21   :  { %85 = vmatpush.msra.mxu1 %v28_v32  ;;  %66 = vmatmul.f32.vlgmr.msra.gmra.mxu0 %v46_v33 }
  0x22   :  { %86 = vmatmul.f32.vlgmr.msra.gmra.mxu1 %v47_v34 }
  0x9e   :  { %v67_v35 = vpop.f32.mrf.mxu0 }
  0x9f   :  { %v87_v36 = vpop.f32.mrf.mxu1 }
  0xa0   :  { %v88_v37 = vadd.f32 %v87_v36, %v67_v35 }
  0xa2   :  { %91 = vst.msk [vmem:[%s215_s2] sm:$0x3] %vm90_vm0, %v88_v37 }

// kernel: model_forward.15
= control target key start
LH: loop header
LB: loop body
LE: loop exit
PB: predicated region body
PF: predicated region fallthrough
CT: control target
= control target key end

     0   :  { %s6282_s25 = smov 0   ;;  %s9885_s0 = inlined_call_operand.vmem [shape: f32[2,128,64], index: 0, kind: input, shape index: {}]   ;;  %s9886_s1 = inlined_call_operand.vmem [shape: f32[128,128], index: 1, kind: input, shape index: {}]   ;;  %s9887_s2 = inlined_call_operand.vmem [shape: f32[64,192], index: 2, kind: input, shape index: {}]   ;;  %s9888_s3 = inlined_call_operand.vmem [shape: f32[64,64], index: 3, kind: input, shape index: {}]   ;;  %s9889_s4 = inlined_call_operand.vmem [shape: f32[1,64], index: 4, kind: input, shape index: {}]   ;;  %s9890_s5 = inlined_call_operand.vmem [shape: f32[1,64], index: 5, kind: input, shape index: {}]   ;;  %s9891_s6 = inlined_call_operand.vmem [shape: f32[1,64], index: 6, kind: input, shape index: {}]   ;;  %s9892_s7 = inlined_call_operand.vmem [shape: f32[64,128], index: 7, kind: input, shape index: {}]   ;;  %s9893_s8 = inlined_call_operand.vmem [shape: f32[1,128], index: 8, kind: input, shape index: {}]   ;;  %s9894_s9 = inlined_call_operand.vmem [shape: f32[128,64], index: 9, kind: input, shape index: {}]   ;;  %s9895_s10 = inlined_call_operand.vmem [shape: f32[1,64], index: 10, kind: input, shape index: {}]   ;;  %s9896_s11 = inlined_call_operand.vmem [shape: f32[1,64], index: 11, kind: input, shape index: {}]   ;;  %s9897_s12 = inlined_call_operand.vmem [shape: f32[1,64], index: 12, kind: input, shape index: {}]   ;;  %s9898_s13 = inlined_call_operand.vmem [shape: f32[2,128,64], index: 13, kind: output, shape index: {}]  }
   0x1 LB: > { %s5396_s26 = sadd.s32 4294967295, %s6202_s25   ;;  %p5400_p0 = scmp.ge.s32.totalorder %s6202_s25, 1  ;;  %s6202_s25 = sphi %s6282_s25, %s23_s25  }
   0x2   : > { %p387_p1 = scmp.lt.s32.totalorder %s6202_s25, 3 }
   0x4   : > { %p388_p2 = pnand %p5400_p0, %p387_p1 }
   0x6   : > { %391 = sbr.rel (%p388_p2) target bundleno = 3095 (0xc17), region = 72 }
   0xb   : > { %v487_v0 = vld [vmem:[%s9887_s2 + $0x70] sm:$0xff]  ;;  %v485_v1 = vld [vmem:[%s9887_s2 + $0x60] sm:$0xff]  ;;  %p431_p3 = scmp.lt.s32.totalorder %s5396_s26, 1  ;;  %vm489_vm0 = vcmask 523264   ;;  %v488_v14 = vld [vmem:[%s9887_s2 + $0x78] sm:$0xff]  ;;  %s6204_s18 = smov 48  }
   0xc   : > { %546 = vmatpush.msra.mxu0 %v487_v0  ;;  %5601 = vmatpush.msra.mxu1 %v487_v0  ;;  %v483_v2 = vld [vmem:[%s9887_s2 + $0x50] sm:$0xff]  ;;  %v481_v3 = vld [vmem:[%s9887_s2 + $0x40] sm:$0xff]  ;;  %v486_v15 = vld [vmem:[%s9887_s2 + $0x68] sm:$0xff]  ;;  %s6205_s19 = smov 64   ;;  %s6206_s21 = smov 112   ;;  %vm732_vm1 = vcmask 130048  }
   0xd   : > { %s10041_s26 = smov (!%p431_p3, %s5396_s26), 1  ;;  %v479_v4 = vld [vmem:[%s9887_s2 + $0x30] sm:$0xff]  ;;  %v477_v5 = vld [vmem:[%s9887_s2 + $0x20] sm:$0xff]  ;;  %v484_v16 = vld [vmem:[%s9887_s2 + $0x58] sm:$0xff]  ;;  %s6207_s22 = smov 32  }
   0xe   : > { %547 = vmatpush.msra.mxu0 %v485_v1  ;;  %5602 = vmatpush.msra.mxu1 %v485_v1  ;;  %s5599_s20 = sshll.u32 %s10041_s26, 7  ;;  %v475_v6 = vld [vmem:[%s9887_s2 + $0x10] sm:$0xff]  ;;  %v473_v7 = vld [vmem:[%s9887_s2] sm:$0xff]  ;;  %v482_v17 = vld [vmem:[%s9887_s2 + $0x48] sm:$0xff]  ;;  %s6208_s23 = smov 16  }
   0xf   : > { %s6319_s29 = scalar_lea.vmem %s9885_s0, %s5599_s20  ;;  %v480_v20 = vld [vmem:[%s9887_s2 + $0x38] sm:$0xff]  ;;  %v478_v21 = vld [vmem:[%s9887_s2 + $0x28] sm:$0xff]  ;;  %s6209_s24 = smov 96  }
  0x10   : > { %548 = vmatpush.msra.mxu0 %v483_v2  ;;  %5603 = vmatpush.msra.mxu1 %v483_v2  ;;  %v441_v8 = vld [vmem:[%s6319_s29] sm:$0xff]  ;;  %v442_v10 = vld [vmem:[%s6319_s29 + $0x8] sm:$0xff]  ;;  %v6339_v12 = vld [vmem:[%s6319_s29 + $0x50] sm:$0xff]  ;;  %s6210_s27 = smov 80  }
  0x11   : > { %v6326_v9 = vld [vmem:[%s6319_s29 + $0x40] sm:$0xff]  ;;  %v6333_v11 = vld [vmem:[%s6319_s29 + $0x48] sm:$0xff]  ;;  %v443_v13 = vld [vmem:[%s6319_s29 + $0x10] sm:$0xff] }
  0x12   : > { %549 = vmatpush.msra.mxu0 %v481_v3  ;;  %5604 = vmatpush.msra.mxu1 %v481_v3  ;;  %v6358_v18 = vld [vmem:[%s6319_s29 + $0x58] sm:$0xff]  ;;  %v474_v23 = vld [vmem:[%s9887_s2 + $0x8] sm:$0xff]  ;;  %v453_v24 = vld [vmem:[%s6319_s29 + $0x60] sm:$0xff] }
  0x13   : > { %v444_v19 = vld [vmem:[%s6319_s29 + $0x18] sm:$0xff]  ;;  %v445_v25 = vld [vmem:[%s6319_s29 + $0x20] sm:$0xff]  ;;  %v454_v26 = vld [vmem:[%s6319_s29 + $0x68] sm:$0xff] }
  0x14   : > { %550 = vmatpush.msra.mxu0 %v479_v4  ;;  %5605 = vmatpush.msra.mxu1 %v479_v4  ;;  %v476_v22 = vld [vmem:[%s9887_s2 + $0x18] sm:$0xff]  ;;  %v446_v27 = vld [vmem:[%s6319_s29 + $0x28] sm:$0xff]  ;;  %v455_v28 = vld [vmem:[%s6319_s29 + $0x70] sm:$0xff] }
  0x15   : > { %v447_v29 = vld [vmem:[%s6319_s29 + $0x30] sm:$0xff]  ;;  %v6389_v30 = vld [vmem:[%s6319_s29 + $0x78] sm:$0xff] }
  0x16   : > { %551 = vmatpush.msra.mxu0 %v477_v5  ;;  %5606 = vmatpush.msra.mxu1 %v477_v5  ;;  %v448_v31 = vld [vmem:[%s6319_s29 + $0x38] sm:$0xff] }
  0x18   : > { %552 = vmatpush.msra.mxu0 %v475_v6  ;;  %5607 = vmatpush.msra.mxu1 %v475_v6 }
  0x1a   : > { %553 = vmatpush.msra.mxu0 %v473_v7  ;;  %5608 = vmatpush.msra.mxu1 %v473_v7 }
  0x1b   : > { %5405 = vmatmul.msk.f32.vlgmr.msra.gmra.mxu0 %vm489_vm0, %v441_v8  ;;  %5413 = vmatmul.msk.f32.vlgmr.msra.gmra.mxu1 %vm489_vm0, %v6326_v9 }
  0x1c   : > { %611 = vmatpush.msrb.mxu1 %v488_v14 }
  0x1e   : > { %612 = vmatpush.msrb.mxu1 %v486_v15 }
  0x20   : > { %613 = vmatpush.msrb.mxu1 %v484_v16 }
  0x22   : > { %614 = vmatpush.msrb.mxu1 %v482_v17 }
  0x23   : > { %5406 = vmatmul.msk.f32.gmra.mxu0 %vm489_vm0, %v442_v10  ;;  %5414 = vmatmul.msk.f32.gmra.mxu1 %vm489_vm0, %v6333_v11 }
  0x24   : > { %615 = vmatpush.msrb.mxu1 %v480_v20 }
  0x26   : > { %616 = vmatpush.msrb.mxu1 %v478_v21 }
  0x28   : > { %617 = vmatpush.msrb.mxu1 %v476_v22 }
  0x2a   : > { %618 = vmatpush.msrb.mxu1 %v474_v23 }
  0x2b   : > { %5415 = vmatmul.msk.f32.gmra.mxu1 %vm489_vm0, %v6339_v12  ;;  %5407 = vmatmul.msk.f32.gmra.mxu0 %vm489_vm0, %v443_v13 }
  0x33   : > { %5416 = vmatmul.msk.f32.gmra.mxu1 %vm489_vm0, %v6358_v18  ;;  %5408 = vmatmul.msk.f32.gmra.mxu0 %vm489_vm0, %v444_v19 }
  0x3b   : > { %5417 = vmatmul.msk.f32.gmra.mxu1 %vm489_vm0, %v453_v24  ;;  %5409 = vmatmul.msk.f32.gmra.mxu0 %vm489_vm0, %v445_v25 }
  0x43   : > { %5418 = vmatmul.msk.f32.gmra.mxu1 %vm489_vm0, %v454_v26  ;;  %5410 = vmatmul.msk.f32.gmra.mxu0 %vm489_vm0, %v446_v27 }
  0x4b   : > { %5419 = vmatmul.msk.f32.gmra.mxu1 %vm489_vm0, %v455_v28  ;;  %5411 = vmatmul.msk.f32.gmra.mxu0 %vm489_vm0, %v447_v29 }
  0x53   : > { %5420 = vmatmul.msk.f32.gmra.mxu1 %vm489_vm0, %v6389_v30  ;;  %5412 = vmatmul.msk.f32.gmra.mxu0 %vm489_vm0, %v448_v31 }
  0x5b   : > { %5421 = vmatmul.msk.f32.vlgmr.msrb.gmra.mxu1 %vm489_vm0, %v441_v8 }
  0x63   : > { %5422 = vmatmul.msk.f32.gmra.mxu1 %vm489_vm0, %v442_v10 }
  0x6b   : > { %5423 = vmatmul.msk.f32.gmra.mxu1 %vm489_vm0, %v443_v13 }
  0x73   : > { %5424 = vmatmul.msk.f32.gmra.mxu1 %vm489_vm0, %v444_v19 }
  0x7b   : > { %5425 = vmatmul.msk.f32.gmra.mxu1 %vm489_vm0, %v445_v25 }
  0x83   : > { %5426 = vmatmul.msk.f32.gmra.mxu1 %vm489_vm0, %v446_v27 }
  0x8b   : > { %5427 = vmatmul.msk.f32.gmra.mxu1 %vm489_vm0, %v447_v29 }
  0x93   : > { %5428 = vmatmul.msk.f32.gmra.mxu1 %vm489_vm0, %v448_v31 }
  0x98   : > { %v6403_v32 = vpop.f32.mrf.mxu0  ;;  %v6405_v33 = vpop.f32.mrf.mxu1 }
  0x99   : > { %1343 = vrot.lane.b32.xlu2 %v6405_v33, %s6204_s18  ;;  %716 = vrot.lane.b32.xlu1 %v6405_v33, %s6205_s19  ;;  %v6420_v36 = vmul.f32 0.25, %v6403_v32  ;;  %v6643_v22 = vmul.f32 0.25, %v6405_v33 }
  0x9a   : > { %700 = vrot.lane.b32.xlu0 %v6403_v32, %s6205_s19 }
  0x9b   : > { %5429 = vmatmul.msk.f32.gmra.mxu1 %vm489_vm0, %v6326_v9 }
  0xa0   : > { %v6415_v34 = vpop.f32.mrf.mxu0  ;;  %v6417_v35 = vpop.f32.mrf.mxu1 }
  0xa1   : > { %1327 = vrot.lane.b32.xlu1 %v6403_v32, %s6204_s18  ;;  %702 = vrot.lane.b32.xlu2 %v6415_v34, %s6205_s19  ;;  %v6443_v39 = vmul.f32 0.25, %v6415_v34  ;;  %v6554_v60 = vmul.f32 0.25, %v6417_v35 }
  0xa2   : > { %1295 = vrot.lane.b32.xlu0 %v6420_v36, %s6206_s21 }
  0xa3   : > { %5430 = vmatmul.msk.f32.gmra.mxu1 %vm489_vm0, %v6333_v11 }
  0xa8   : > { %v6430_v37 = vpop.f32.mrf.mxu1  ;;  %v6440_v38 = vpop.f32.mrf.mxu0 }
  0xa9   : > { %1345 = vrot.lane.b32.xlu1 %v6417_v35, %s6204_s18  ;;  %1329 = vrot.lane.b32.xlu2 %v6415_v34, %s6204_s18  ;;  %v6458_v42 = vmul.f32 0.25, %v6440_v38  ;;  %v6621_v15 = vmul.f32 0.25, %v6430_v37 }
  0xaa   : > { %718 = vrot.lane.b32.xlu0 %v6417_v35, %s6205_s19 }
  0xab   : > { %5431 = vmatmul.msk.f32.gmra.mxu1 %vm489_vm0, %v6339_v12  ;;  %9932 = vst [vmem:[#allocation9_spill] sm:$0xff] %v6621_v15 }
  0xb0   : > { %v6445_v40 = vpop.f32.mrf.mxu1  ;;  %v6455_v41 = vpop.f32.mrf.mxu0 }
  0xb1   : > { %1297 = vrot.lane.b32.xlu2 %v6443_v39, %s6206_s21  ;;  %704 = vrot.lane.b32.xlu1 %v6440_v38, %s6205_s19  ;;  %v6492_v48 = vmul.f32 0.25, %v6455_v41 }
  0xb2   : > { %1347 = vrot.lane.b32.xlu0 %v6430_v37, %s6204_s18 }
  0xb3   : > { %5432 = vmatmul.msk.f32.gmra.mxu1 %vm489_vm0, %v6358_v18 }
  0xb8   : > { %v6460_v43 = vpop.f32.mrf.mxu1  ;;  %v6478_v45 = vpop.f32.mrf.mxu0 }
  0xb9   : > { %720 = vrot.lane.b32.xlu2 %v6430_v37, %s6205_s19  ;;  %1299 = vrot.lane.b32.xlu1 %v6458_v42, %s6206_s21  ;;  %v6515_v53 = vmul.f32 0.25, %v6478_v45 }
  0xba   : > { %706 = vrot.lane.b32.xlu0 %v6455_v41, %s6205_s19 }
  0xbb   : > { %5433 = vmatmul.msk.f32.gmra.mxu1 %vm489_vm0, %v453_v24 }
  0xc0   : > { %v6469_v44 = vpop.f32.mrf.mxu1  ;;  %v6494_v49 = vpop.f32.mrf.mxu0 }
  0xc1   : > { %1331 = vrot.lane.b32.xlu2 %v6440_v38, %s6204_s18  ;;  %724 = vrot.lane.b32.xlu1 %v6460_v43, %s6205_s19  ;;  %v6528_v56 = vmul.f32 0.25, %v6494_v49 }
  0xc2   : > { %1349 = vrot.lane.b32.xlu0 %v6445_v40, %s6204_s18 }
  0xc3   : > { %5434 = vmatmul.msk.f32.gmra.mxu1 %vm489_vm0, %v454_v26 }
  0xc8   : > { %v6480_v46 = vpop.f32.mrf.mxu1  ;;  %v573_v51 = vpop.f32.mrf.mxu0 }
  0xc9   : > { %722 = vrot.lane.b32.xlu2 %v6445_v40, %s6205_s19  ;;  %1335 = vrot.lane.b32.xlu1 %v6478_v45, %s6204_s18  ;;  %v6512_v52 = vmul.f32 0.25, %v573_v51  ;;  %v6638_v20 = vmul.f32 0.25, %v6480_v46 }
  0xca   : > { %1333 = vrot.lane.b32.xlu0 %v6455_v41, %s6204_s18 }
  0xcb   : > { %5435 = vmatmul.msk.f32.gmra.mxu1 %vm489_vm0, %v455_v28  ;;  %9934 = vst [vmem:[#allocation11_spill] sm:$0xff] %v6638_v20 }
  0xd0   : > { %v6489_v47 = vpop.f32.mrf.mxu1  ;;  %v6525_v55 = vpop.f32.mrf.mxu0 }
  0xd1   : > { %726 = vrot.lane.b32.xlu1 %v6469_v44, %s6205_s19  ;;  %708 = vrot.lane.b32.xlu2 %v6478_v45, %s6205_s19  ;;  %v6606_v10 = vmul.f32 0.25, %v6525_v55 }
  0xd2   : > { %1301 = vrot.lane.b32.xlu0 %v6492_v48, %s6206_s21 }
  0xd3   : > { %5436 = vmatmul.msk.f32.gmra.mxu1 %vm489_vm0, %v6389_v30  ;;  %v6672_v30 = vmul.f32 0.25, %v6445_v40 }
  0xd5   : > { %9937 = vst [vmem:[#allocation14_spill] sm:$0xff] %v6672_v30 }
  0xd8   : > { %v6504_v50 = vpop.f32.mrf.mxu1 }
  0xd9   : > { %9925 = vst [vmem:[#allocation2_spill] sm:$0xff] %v6504_v50  ;;  %1353 = vrot.lane.b32.xlu2 %v6469_v44, %s6204_s18  ;;  %710 = vrot.lane.b32.xlu1 %v6494_v49, %s6205_s19 }
  0xda   : > { %1351 = vrot.lane.b32.xlu0 %v6460_v43, %s6204_s18 }
  0xe0   : > { %v6517_v54 = vpop.f32.mrf.mxu1 }
  0xe1   : > { %9926 = vst [vmem:[#allocation3_spill] sm:$0xff] %v6517_v54  ;;  %1337 = vrot.lane.b32.xlu1 %v6494_v49, %s6204_s18  ;;  %1307 = vrot.lane.b32.xlu2 %v6512_v52, %s6206_s21 }
  0xe2   : > { %1303 = vrot.lane.b32.xlu0 %v6515_v53, %s6206_s21 }
  0xe8   : > { %v6530_v57 = vpop.f32.mrf.mxu1 }
  0xe9   : > { %9927 = vst [vmem:[#allocation4_spill] sm:$0xff] %v6530_v57  ;;  %2027 = vrot.lane.b32.xlu1 %v6469_v44, %s6207_s22  ;;  %714 = vrot.lane.b32.xlu2 %v6525_v55, %s6205_s19 }
  0xea   : > { %1305 = vrot.lane.b32.xlu0 %v6528_v56, %s6206_s21 }
  0xf0   : > { %v6538_v58 = vpop.f32.mrf.mxu1 }
  0xf1   : > { %9928 = vst [vmem:[#allocation5_spill] sm:$0xff] %v6538_v58  ;;  %2029 = vrot.lane.b32.xlu1 %v6480_v46, %s6207_s22  ;;  %2031 = vrot.lane.b32.xlu2 %v6489_v47, %s6207_s22 }
  0xf2   : > { %728 = vrot.lane.b32.xlu0 %v6480_v46, %s6205_s19 }
  0xf3   : > { %v6558_v62 = vpop.permute.xlu2 %1343 }
  0xf8   : > { %v6546_v59 = vpop.f32.mrf.mxu1 }
  0xf9   : > { %9929 = vst [vmem:[#allocation6_spill] sm:$0xff] %v6546_v59  ;;  %1357 = vrot.lane.b32.xlu1 %v6489_v47, %s6204_s18  ;;  %2689 = vrot.lane.b32.xlu2 %v6489_v47, %s6208_s23 }
  0xfa   : > { %712 = vrot.lane.b32.xlu0 %v573_v51, %s6205_s19 }
  0xfb   : > { %v6573_v0 = vpop.permute.xlu2 %702 }
 0x100   : > { %v6556_v61 = vpop.f32.mrf.mxu1 }
 0x101   : > { %9930 = vst [vmem:[#allocation7_spill] sm:$0xff] %v6556_v61  ;;  %2025 = vrot.lane.b32.xlu1 %v6460_v43, %s6207_s22  ;;  %1313 = vrot.lane.b32.xlu2 %v6554_v60, %s6206_s21 }
 0x102   : > { %1355 = vrot.lane.b32.xlu0 %v6480_v46, %s6204_s18 }
 0x103   : > { %v6591_v6 = vpop.permute.xlu2 %1329 }
 0x108   : > { %v6566_v63 = vpop.f32.mrf.mxu1 }
 0x109   : > { %9931 = vst [vmem:[#allocation8_spill] sm:$0xff] %v6566_v63  ;;  %2023 = vrot.lane.b32.xlu1 %v6445_v40, %s6207_s22  ;;  %2685 = vrot.lane.b32.xlu2 %v6469_v44, %s6208_s23 }
 0x10a   : > { %1339 = vrot.lane.b32.xlu0 %v573_v51, %s6204_s18 }
 0x10b   : > { %v6575_v1 = vpop.permute.xlu1 %716  ;;  %v6608_v11 = vpop.permute.xlu2 %1297 }
 0x10c   : > { %v6577_v2 = vpop.permute.xlu0 %700 }
 0x110   : > { %v6579_v3 = vpop.f32.mrf.mxu1 }
 0x111   : > { %2017 = vrot.lane.b32.xlu1 %v6405_v33, %s6207_s22  ;;  %2015 = vrot.lane.b32.xlu2 %v6525_v55, %s6207_s22 }
 0x112   : > { %730 = vrot.lane.b32.xlu0 %v6489_v47, %s6205_s19 }
 0x113   : > { %v6587_v4 = vpop.permute.xlu1 %1327  ;;  %v6625_v17 = vpop.permute.xlu2 %720 }
 0x114   : > { %v6589_v5 = vpop.permute.xlu0 %1295 }
 0x118   : > { %v6593_v7 = vpop.f32.mrf.mxu1 }
 0x119   : > { %2683 = vrot.lane.b32.xlu1 %v6460_v43, %s6208_s23  ;;  %2677 = vrot.lane.b32.xlu2 %v6417_v35, %s6208_s23 }
 0x11a   : > { %1341 = vrot.lane.b32.xlu0 %v6525_v55, %s6204_s18 }
 0x11b   : > { %v6601_v8 = vpop.permute.xlu1 %1345  ;;  %v6651_v23 = vpop.permute.xlu2 %1331 }
 0x11c   : > { %v6603_v9 = vpop.permute.xlu0 %718 }
 0x120   : > { %v6610_v12 = vpop.f32.mrf.mxu1 }
 0x121   : > { %2013 = vrot.lane.b32.xlu1 %v573_v51, %s6207_s22  ;;  %2671 = vrot.lane.b32.xlu2 %v573_v51, %s6208_s23 }
 0x122   : > { %1309 = vrot.lane.b32.xlu0 %v6606_v10, %s6206_s21 }
 0x123   : > { %v6616_v13 = vpop.permute.xlu1 %704  ;;  %v6669_v29 = vpop.permute.xlu2 %722 }
 0x124   : > { %v6618_v14 = vpop.permute.xlu0 %1347 }
 0x128   : > { %v6623_v16 = vpop.f32.mrf.mxu1 }
 0x129   : > { %9933 = vst [vmem:[#allocation10_spill] sm:$0xff] %v6623_v16  ;;  %1315 = vrot.lane.b32.xlu1 %v6621_v15, %s6206_s21  ;;  %2669 = vrot.lane.b32.xlu2 %v6494_v49, %s6208_s23 }
 0x12a   : > { %2021 = vrot.lane.b32.xlu0 %v6430_v37, %s6207_s22 }
 0x12b   : > { %v6633_v18 = vpop.permute.xlu1 %1299 }
 0x12c   : > { %v6635_v19 = vpop.permute.xlu0 %706 }
 0x130   : > { %v6640_v21 = vpop.f32.mrf.mxu1 }
 0x131   : > { %9935 = vst [vmem:[#allocation12_spill] sm:$0xff] %v6640_v21  ;;  %2011 = vrot.lane.b32.xlu1 %v6494_v49, %s6207_s22  ;;  %1323 = vrot.lane.b32.xlu2 %v6638_v20, %s6206_s21  ;;  %v6686_v49 = vpop.permute.xlu2 %708 }
 0x132   : > { %1311 = vrot.lane.b32.xlu0 %v6643_v22, %s6206_s21 }
 0x133   : > { %v6653_v24 = vpop.permute.xlu1 %724 }
 0x134   : > { %v6655_v25 = vpop.permute.xlu0 %1349 }
 0x138   : > { %v6657_v26 = vpop.f32.mrf.mxu1 }
 0x139   : > { %9936 = vst [vmem:[#allocation13_spill] sm:$0xff] %v6657_v26  ;;  %2679 = vrot.lane.b32.xlu1 %v6430_v37, %s6208_s23  ;;  %2663 = vrot.lane.b32.xlu2 %v6440_v38, %s6208_s23 }
 0x13a   : > { %2019 = vrot.lane.b32.xlu0 %v6417_v35, %s6207_s22 }
 0x13b   : > { %v6665_v27 = vpop.permute.xlu1 %1335 }
 0x13c   : > { %v6667_v28 = vpop.permute.xlu0 %1333 }
 0x140   : > { %v6674_v31 = vpop.f32.mrf.mxu1 }
 0x141   : > { %9938 = vst [vmem:[#allocation15_spill] sm:$0xff] %v6674_v31  ;;  %1317 = vrot.lane.b32.xlu1 %v6672_v30, %s6206_s21  ;;  %1973 = vrot.lane.b32.xlu2 %v6458_v42, %s6209_s24  ;;  %v6699_v30 = vmul.f32 0.25, %v6460_v43 }
 0x142   : > { %2687 = vrot.lane.b32.xlu0 %v6480_v46, %s6208_s23 }
 0x143   : > { %v6682_v35 = vpop.permute.xlu1 %726 }
 0x144   : > { %v6684_v37 = vpop.permute.xlu0 %1301 }
 0x145   : > { %9939 = vst [vmem:[#allocation16_spill] sm:$0xff] %v6684_v37  ;;  %v1354_v37 = vpop.permute.xlu2 %1353 }
 0x148   : > { %v6688_v51 = vpop.f32.mrf.mxu1 }
 0x149   : > { %9940 = vst [vmem:[#allocation17_spill] sm:$0xff] %v6688_v51  ;;  %2675 = vrot.lane.b32.xlu1 %v6405_v33, %s6208_s23  ;;  %1975 = vrot.lane.b32.xlu2 %v6492_v48, %s6209_s24 }
 0x14a   : > { %2681 = vrot.lane.b32.xlu0 %v6445_v40, %s6208_s23 }
 0x14b   : > { %v6696_v20 = vpop.permute.xlu1 %710 }
 0x14c   : > { %v1352_v46 = vpop.permute.xlu0 %1351 }
 0x14d   : > { %v6724_v43 = vpop.permute.xlu2 %1307 }
 0x150   : > { %v6701_v15 = vpop.f32.mrf.mxu1 }
 0x151   : > { %9941 = vst [vmem:[#allocation18_spill] sm:$0xff] %v6701_v15  ;;  %1230 = vmatpush.msra.mxu3 %v6701_v15  ;;  %1319 = vrot.lane.b32.xlu1 %v6699_v30, %s6206_s21 }
 0x152   : > { %2631 = vrot.lane.b32.xlu2 %v6458_v42, %s6210_s27  ;;  %2009 = vrot.lane.b32.xlu0 %v6478_v45, %s6207_s22 }
 0x153   : > { %1231 = vmatpush.msra.mxu3 %v6688_v51  ;;  %v6711_v33 = vpop.permute.xlu1 %1337 }
 0x154   : > { %v6713_v40 = vpop.permute.xlu0 %1303 }
 0x155   : > { %1232 = vmatpush.msra.mxu3 %v6674_v31 }
 0x157   : > { %1233 = vmatpush.msra.mxu3 %v6657_v26  ;;  %v6732_v26 = vmul.f32 0.25, %v6469_v44 }
 0x159   : > { %1234 = vmatpush.msra.mxu3 %v6640_v21  ;;  %2003 = vrot.lane.b32.xlu1 %v6415_v34, %s6207_s22  ;;  %v6740_v21 = vpop.permute.xlu2 %714 }
 0x15a   : > { %1981 = vrot.lane.b32.xlu2 %v6512_v52, %s6209_s24  ;;  %2007 = vrot.lane.b32.xlu0 %v6455_v41, %s6207_s22 }
 0x15b   : > { %1235 = vmatpush.msra.mxu3 %v6623_v16  ;;  %v2028_v51 = vpop.permute.xlu1 %2027 }
 0x15c   : > { %v6727_v15 = vpop.permute.xlu0 %1305 }
 0x15d   : > { %1236 = vmatpush.msra.mxu3 %v6610_v12 }
 0x15f   : > { %1237 = vmatpush.msra.mxu3 %v6593_v7 }
 0x161   : > { %1238 = vmatpush.msra.mxu3 %v6579_v3  ;;  %1321 = vrot.lane.b32.xlu1 %v6732_v26, %s6206_s21 }
 0x162   : > { %2005 = vrot.lane.b32.xlu0 %v6440_v38, %s6207_s22 }
 0x163   : > { %1239 = vmatpush.msra.mxu3 %v6566_v63  ;;  %v2030_v31 = vpop.permute.xlu1 %2029 }
 0x164   : > { %v729_v16 = vpop.permute.xlu0 %728 }
 0x165   : > { %1240 = vmatpush.msra.mxu3 %v6556_v61  ;;  %v2032_v61 = vpop.permute.xlu2 %2031 }
 0x167   : > { %1241 = vmatpush.msra.mxu3 %v6546_v59 }
 0x169   : > { %1242 = vmatpush.msra.mxu3 %v6538_v58  ;;  %2667 = vrot.lane.b32.xlu1 %v6478_v45, %s6208_s23 }
 0x16a   : > { %2673 = vrot.lane.b32.xlu0 %v6525_v55, %s6208_s23 }
 0x16b   : > { %1243 = vmatpush.msra.mxu3 %v6530_v57  ;;  %v1358_v38 = vpop.permute.xlu1 %1357 }
 0x16c   : > { %v6750_v44 = vpop.permute.xlu0 %712  ;;  %5469 = vmatpush.xpose.msk.msrb.mxu0 %vm732_vm1, %v1358_v38 }
 0x16d   : > { %1244 = vmatpush.msra.mxu3 %v6517_v54 }
 0x16f   : > { %1245 = vmatpush.msra.mxu3 %v6504_v50 }
 0x171   : > { %5501 = vmatpush.xpose.msk.msrb.mxu3 %vm732_vm1, %v2032_v61  ;;  %1971 = vrot.lane.b32.xlu1 %v6443_v39, %s6209_s24 }
 0x172   : > { %2001 = vrot.lane.b32.xlu0 %v6403_v32, %s6207_s22 }
 0x173   : > { %v2026_v45 = vpop.permute.xlu1 %2025 }
 0x174   : > { %v1356_v55 = vpop.permute.xlu0 %1355 }
 0x175   : > { %5502 = vmatpush.xpose.msk.msrb.mxu3 %vm732_vm1, %v2030_v31  ;;  %5470 = vmatpush.xpose.msk.msrb.mxu0 %vm732_vm1, %v1356_v55 }
 0x179   : > { %5503 = vmatpush.xpose.msk.msrb.mxu3 %vm732_vm1, %v2028_v51  ;;  %5471 = vmatpush.xpose.msk.msrb.mxu0 %vm732_vm1, %v1354_v37  ;;  %v6781_v37 = vmul.f32 0.25, %v6489_v47 }
 0x17a   : > { %2661 = vrot.lane.b32.xlu1 %v6415_v34, %s6208_s23  ;;  %1969 = vrot.lane.b32.xlu0 %v6420_v36, %s6209_s24 }
 0x17b   : > { %v2024_v61 = vpop.permute.xlu1 %2023  ;;  %9942 = vst [vmem:[#allocation19_spill] sm:$0xff] %v6781_v37 }
 0x17c   : > { %v1340_v38 = vpop.permute.xlu0 %1339 }
 0x17d   : > { %5504 = vmatpush.xpose.msk.msrb.mxu3 %vm732_vm1, %v2026_v45  ;;  %5472 = vmatpush.xpose.msk.msrb.mxu0 %vm732_vm1, %v1352_v46 }
 0x181   : > { %5505 = vmatpush.xpose.msk.msrb.mxu3 %vm732_vm1, %v2024_v61  ;;  %5473 = vmatpush.xpose.msk.msrb.mxu0 %vm732_vm1, %v6655_v25 }
 0x182   : > { %2627 = vrot.lane.b32.xlu1 %v6420_v36, %s6210_s27  ;;  %2665 = vrot.lane.b32.xlu0 %v6455_v41, %s6208_s23 }
 0x183   : > { %v2018_v34 = vpop.permute.xlu1 %2017 }
 0x184   : > { %v731_v31 = vpop.permute.xlu0 %730 }
 0x185   : > { %5437 = vmatpush.xpose.msk.msra.mxu2 %vm732_vm1, %v731_v31  ;;  %5474 = vmatpush.xpose.msk.msrb.mxu0 %vm732_vm1, %v6618_v14 }
 0x189   : > { %5438 = vmatpush.xpose.msk.msra.mxu2 %vm732_vm1, %v729_v16  ;;  %5475 = vmatpush.xpose.msk.msrb.mxu0 %vm732_vm1, %v6601_v8 }
 0x18a   : > { %1977 = vrot.lane.b32.xlu1 %v6515_v53, %s6209_s24  ;;  %1325 = vrot.lane.b32.xlu0 %v6781_v37, %s6206_s21 }
 0x18b   : > { %v6790_v41 = vpop.permute.xlu1 %2683 }
 0x18c   : > { %v1342_v25 = vpop.permute.xlu0 %1341 }
 0x18d   : > { %5439 = vmatpush.xpose.msk.msra.mxu2 %vm732_vm1, %v6682_v35  ;;  %5476 = vmatpush.xpose.msk.msrb.mxu0 %vm732_vm1, %v6558_v62  ;;  %v6808_v62 = vpop.permute.xlu2 %2689 }
 0x191   : > { %5440 = vmatpush.xpose.msk.msra.mxu2 %vm732_vm1, %v6653_v24  ;;  %5477 = vmatpush.xpose.msk.msrb.mxu0 %vm732_vm1, %v1342_v25 }
 0x192   : > { %2633 = vrot.lane.b32.xlu1 %v6492_v48, %s6210_s27  ;;  %2659 = vrot.lane.b32.xlu0 %v6403_v32, %s6208_s23 }
 0x193   : > { %v2014_v47 = vpop.permute.xlu1 %2013 }
 0x194   : > { %v6803_v8 = vpop.permute.xlu0 %1309 }
 0x195   : > { %5441 = vmatpush.xpose.msk.msra.mxu2 %vm732_vm1, %v6669_v29  ;;  %5478 = vmatpush.xpose.msk.msrb.mxu0 %vm732_vm1, %v1340_v38  ;;  %v6825_v16 = vpop.permute.xlu2 %1313  ;;  %v458_v38 = vld [vmem:[%s9886_s1 + $0x8] sm:$0xff] }
 0x199   : > { %5442 = vmatpush.xpose.msk.msra.mxu2 %vm732_vm1, %v6625_v17  ;;  %5479 = vmatpush.xpose.msk.msrb.mxu0 %vm732_vm1, %v6711_v33  ;;  %v9946_v33 = vld [vmem:[#allocation9_spill] sm:$0xff] }
 0x19a   : > { %1983 = vrot.lane.b32.xlu1 %v6606_v10, %s6209_s24  ;;  %2629 = vrot.lane.b32.xlu0 %v6443_v39, %s6210_s27 }
 0x19b   : > { %v6818_v32 = vpop.permute.xlu1 %1315 }
 0x19c   : > { %v2022_v14 = vpop.permute.xlu0 %2021 }
 0x19d   : > { %5443 = vmatpush.xpose.msk.msra.mxu2 %vm732_vm1, %v6603_v9  ;;  %5480 = vmatpush.xpose.msk.msrb.mxu0 %vm732_vm1, %v6665_v27 }
 0x19e   : > { %5506 = vmatpush.xpose.msk.msrb.mxu3 %vm732_vm1, %v2022_v14 }
 0x1a1   : > { %5444 = vmatpush.xpose.msk.msra.mxu2 %vm732_vm1, %v6575_v1  ;;  %5481 = vmatpush.xpose.msk.msrb.mxu0 %vm732_vm1, %v6667_v28  ;;  %v6849_v1 = vpop.permute.xlu2 %2685 }
 0x1a2   : > { %1985 = vrot.lane.b32.xlu1 %v6643_v22, %s6209_s24  ;;  %1979 = vrot.lane.b32.xlu0 %v6528_v56, %s6209_s24 }
 0x1a3   : > { %v2012_v9 = vpop.permute.xlu1 %2011 }
 0x1a4   : > { %v6835_v17 = vpop.permute.xlu0 %1311 }
 0x1a5   : > { %5445 = vmatpush.xpose.msk.msra.mxu2 %vm732_vm1, %v6740_v21  ;;  %5482 = vmatpush.xpose.msk.msrb.mxu0 %vm732_vm1, %v6651_v23 }
 0x1a9   : > { %5446 = vmatpush.xpose.msk.msra.mxu2 %vm732_vm1, %v6750_v44  ;;  %5483 = vmatpush.xpose.msk.msrb.mxu0 %vm732_vm1, %v6591_v6  ;;  %v2016_v6 = vpop.permute.xlu2 %2015  ;;  %v457_v44 = vld [vmem:[%s9886_s1] sm:$0xff] }
 0x1aa   : > { %2639 = vrot.lane.b32.xlu1 %v6512_v52, %s6210_s27  ;;  %2635 = vrot.lane.b32.xlu0 %v6515_v53, %s6210_s27 }
 0x1ab   : > { %v6851_v24 = vpop.permute.xlu1 %2679 }
 0x1ac   : > { %v2020_v21 = vpop.permute.xlu0 %2019 }
 0x1ad   : > { %5447 = vmatpush.xpose.msk.msra.mxu2 %vm732_vm1, %v6696_v20  ;;  %5484 = vmatpush.xpose.msk.msrb.mxu0 %vm732_vm1, %v6587_v4 }
 0x1ae   : > { %5507 = vmatpush.xpose.msk.msrb.mxu3 %vm732_vm1, %v2020_v21 }
 0x1b0   : > { %5485 = vmatmul.msk.f32.vlgmr.msrb.gmra.mxu0 %vm732_vm1, %v6589_v5 }
 0x1b1   : > { %5533 = vmatpush.xpose.msk.msra.mxu0 %vm732_vm1, %v6808_v62  ;;  %5448 = vmatpush.xpose.msk.msra.mxu2 %vm732_vm1, %v6686_v49 }
 0x1b2   : > { %5508 = vmatpush.xpose.msk.msrb.mxu3 %vm732_vm1, %v2018_v34  ;;  %1987 = vrot.lane.b32.xlu1 %v6554_v60, %s6209_s24  ;;  %v9949_v34 = vld [vmem:[#allocation11_spill] sm:$0xff] }
 0x1b3   : > { %2637 = vrot.lane.b32.xlu0 %v6528_v56, %s6210_s27  ;;  %v6875_v5 = vpop.permute.xlu1 %1317 }
 0x1b4   : > { %v6869_v4 = vpop.permute.xlu0 %2687 }
 0x1b5   : > { %5449 = vmatpush.xpose.msk.msra.mxu2 %vm732_vm1, %v6635_v19  ;;  %5534 = vmatpush.xpose.msk.msra.mxu0 %vm732_vm1, %v6869_v4 }
 0x1b6   : > { %5509 = vmatpush.xpose.msk.msrb.mxu3 %vm732_vm1, %v2016_v6 }
 0x1b8   : > { %5486 = vmatmul.msk.f32.gmra.mxu0 %vm732_vm1, %v6608_v11  ;;  %v6905_v11 = vpop.permute.xlu2 %2677 }
 0x1b9   : > { %5450 = vmatpush.xpose.msk.msra.mxu2 %vm732_vm1, %v6616_v13  ;;  %5535 = vmatpush.xpose.msk.msra.mxu0 %vm732_vm1, %v6849_v1  ;;  %v9943_v13 = vld [vmem:[#allocation16_spill] sm:$0xff] }
 0x1ba   : > { %5510 = vmatpush.xpose.msk.msrb.mxu3 %vm732_vm1, %v2014_v47 }
 0x1bb   : > { %v6892_v19 = vpop.permute.xlu1 %2675 }
 0x1bc   : > { %v6885_v20 = vpop.permute.xlu0 %2681 }
 0x1bd   : > { %5451 = vmatpush.xpose.msk.msra.mxu2 %vm732_vm1, %v6573_v0  ;;  %5536 = vmatpush.xpose.msk.msra.mxu0 %vm732_vm1, %v6790_v41 }
 0x1be   : > { %5511 = vmatpush.xpose.msk.msrb.mxu3 %vm732_vm1, %v2012_v9 }
 0x1c0   : > { %5487 = vmatmul.msk.f32.gmra.mxu0 %vm732_vm1, %v6633_v18 }
 0x1c1   : > { %5452 = vmatpush.xpose.msk.msra.mxu2 %vm732_vm1, %v6577_v2  ;;  %5537 = vmatpush.xpose.msk.msra.mxu0 %vm732_vm1, %v6885_v20 }
 0x1c3   : > { %v1320_v2 = vpop.permute.xlu1 %1319 }
 0x1c4   : > { %5453 = vmatmul.msk.f32.vlgmr.msra.gmra.mxu2 %vm732_vm1, %v6420_v36  ;;  %v2010_v0 = vpop.permute.xlu0 %2009 }
 0x1c5   : > { %5512 = vmatpush.xpose.msk.msrb.mxu3 %vm732_vm1, %v2010_v0  ;;  %5538 = vmatpush.xpose.msk.msra.mxu0 %vm732_vm1, %v6851_v24 }
 0x1c8   : > { %5488 = vmatmul.msk.f32.gmra.mxu0 %vm732_vm1, %v9943_v13 }
 0x1c9   : > { %5539 = vmatpush.xpose.msk.msra.mxu0 %vm732_vm1, %v6905_v11 }
 0x1cb   : > { %v2004_v36 = vpop.permute.xlu1 %2003 }
 0x1cc   : > { %5454 = vmatmul.msk.f32.gmra.mxu2 %vm732_vm1, %v6443_v39  ;;  %v2008_v18 = vpop.permute.xlu0 %2007  ;;  %v6924_v39 = vpop.permute.xlu2 %2671 }
 0x1cd   : > { %5513 = vmatpush.xpose.msk.msrb.mxu3 %vm732_vm1, %v2008_v18  ;;  %5540 = vmatpush.xpose.msk.msra.mxu0 %vm732_vm1, %v6892_v19 }
 0x1d0   : > { %5489 = vmatmul.msk.f32.gmra.mxu0 %vm732_vm1, %v6713_v40  ;;  %v9947_v40 = vld [vmem:[#allocation14_spill] sm:$0xff] }
 0x1d3   : > { %v1322_v28 = vpop.permute.xlu1 %1321 }
 0x1d4   : > { %5455 = vmatmul.msk.f32.gmra.mxu2 %vm732_vm1, %v6458_v42  ;;  %v2006_v23 = vpop.permute.xlu0 %2005  ;;  %v6936_v42 = vpop.permute.xlu2 %2669 }
 0x1d5   : > { %5514 = vmatpush.xpose.msk.msrb.mxu3 %vm732_vm1, %v2006_v23  ;;  %v7041_v23 = vld [vmem:[%s9886_s1 + $0x10] sm:$0xff] }
 0x1d8   : > { %5490 = vmatmul.msk.f32.gmra.mxu0 %vm732_vm1, %v6727_v15 }
 0x1d9   : > { %5515 = vmatpush.xpose.msk.msrb.mxu3 %vm732_vm1, %v2004_v36 }
 0x1dc   : > { %5456 = vmatmul.msk.f32.gmra.mxu2 %vm732_vm1, %v6492_v48  ;;  %v6928_v27 = vpop.permute.xlu0 %2673  ;;  %v6943_v48 = vpop.permute.xlu1 %2667 }
 0x1dd   : > { %5541 = vmatpush.xpose.msk.msra.mxu0 %vm732_vm1, %v6928_v27 }
 0x1e0   : > { %5491 = vmatmul.msk.f32.gmra.mxu0 %vm732_vm1, %v6724_v43 }
 0x1e1   : > { %5542 = vmatpush.xpose.msk.msra.mxu0 %vm732_vm1, %v6924_v39 }
 0x1e4   : > { %5457 = vmatmul.msk.f32.gmra.mxu2 %vm732_vm1, %v6515_v53  ;;  %v2002_v15 = vpop.permute.xlu0 %2001  ;;  %v1324_v53 = vpop.permute.xlu2 %1323 }
 0x1e5   : > { %5516 = vmatpush.xpose.msk.msrb.mxu3 %vm732_vm1, %v2002_v15  ;;  %5543 = vmatpush.xpose.msk.msra.mxu0 %vm732_vm1, %v6936_v42  ;;  %v6955_v35 = vpop.permute.xlu1 %1971 }
 0x1e6   : > { %9945 = vst [vmem:[#allocation20_spill] sm:$0xff] %v6955_v35 }
 0x1e8   : > { %5492 = vmatmul.msk.f32.gmra.mxu0 %vm732_vm1, %v6803_v8 }
 0x1e9   : > { %5544 = vmatpush.xpose.msk.msra.mxu0 %vm732_vm1, %v6943_v48 }
 0x1ec   : > { %5458 = vmatmul.msk.f32.gmra.mxu2 %vm732_vm1, %v6528_v56  ;;  %v6951_v29 = vpop.permute.xlu0 %1969  ;;  %v6963_v51 = vpop.permute.xlu2 %2663 }
 0x1ed   : > { %9944 = vst [vmem:[#allocation16_spill] sm:$0xff] %v6951_v29  ;;  %v6969_v56 = vpop.permute.xlu1 %2661 }
 0x1f0   : > { %5493 = vmatmul.msk.f32.gmra.mxu0 %vm732_vm1, %v6835_v17 }
 0x1f4   : > { %5459 = vmatmul.msk.f32.gmra.mxu2 %vm732_vm1, %v6512_v52  ;;  %v6959_v49 = vpop.permute.xlu0 %2665  ;;  %v6997_v43 = vpop.permute.xlu2 %1973 }
 0x1f5   : > { %5545 = vmatpush.xpose.msk.msra.mxu0 %vm732_vm1, %v6959_v49  ;;  %9948 = vst [vmem:[#allocation9_spill] sm:$0xff] %v6997_v43  ;;  %v2628_v45 = vpop.permute.xlu1 %2627 }
 0x1f8   : > { %5494 = vmatmul.msk.f32.gmra.mxu0 %vm732_vm1, %v6825_v16 }
 0x1f9   : > { %5546 = vmatpush.xpose.msk.msra.mxu0 %vm732_vm1, %v6963_v51 }
 0x1fc   : > { %v1326_v46 = vpop.permute.xlu0 %1325  ;;  %5460 = vmatmul.msk.f32.gmra.mxu2 %vm732_vm1, %v6606_v10  ;;  %v7013_v31 = vpop.permute.xlu2 %1975 }
 0x1fd   : > { %5547 = vmatpush.xpose.msk.msra.mxu0 %vm732_vm1, %v6969_v56  ;;  %9950 = vst [vmem:[#allocation14_spill] sm:$0xff] %v7013_v31  ;;  %v7017_v8 = vpop.permute.xlu1 %1977 }
 0x1fe   : > { %9952 = vst [vmem:[#allocation21_spill] sm:$0xff] %v7017_v8 }
 0x200   : > { %5495 = vmatmul.msk.f32.gmra.mxu0 %vm732_vm1, %v6818_v32 }
 0x204   : > { %v6977_v52 = vpop.permute.xlu0 %2659  ;;  %5461 = vmatmul.msk.f32.gmra.mxu2 %vm732_vm1, %v6643_v22  ;;  %v2632_v14 = vpop.permute.xlu2 %2631 }
 0x205   : > { %5548 = vmatpush.xpose.msk.msra.mxu0 %vm732_vm1, %v6977_v52  ;;  %v2634_v16 = vpop.permute.xlu1 %2633 }
 0x208   : > { %5496 = vmatmul.msk.f32.gmra.mxu0 %vm732_vm1, %v6875_v5 }
 0x20c   : > { %5462 = vmatmul.msk.f32.gmra.mxu2 %vm732_vm1, %v6554_v60  ;;  %v2630_v32 = vpop.permute.xlu0 %2629 }
 0x20d   : > { %v7030_v6 = vpop.permute.xlu1 %1983 }
 0x20e   : > { %9954 = vst [vmem:[#allocation23_spill] sm:$0xff] %v7030_v6 }
 0x210   : > { %5497 = vmatmul.msk.f32.gmra.mxu0 %vm732_vm1, %v1320_v2 }
 0x214   : > { %5463 = vmatmul.msk.f32.gmra.mxu2 %vm732_vm1, %v9946_v33  ;;  %v7024_v9 = vpop.permute.xlu0 %1979 }
 0x215   : > { %9953 = vst [vmem:[#allocation22_spill] sm:$0xff] %v7024_v9  ;;  %v7036_v2 = vpop.permute.xlu1 %1985 }
 0x216   : > { %9955 = vst [vmem:[#allocation24_spill] sm:$0xff] %v7036_v2  ;;  %v467_v2 = vld [vmem:[%s9886_s1 + $0x50] sm:$0xff] }
 0x218   : > { %5498 = vmatmul.msk.f32.gmra.mxu0 %vm732_vm1, %v1322_v28 }
 0x21c   : > { %5464 = vmatmul.msk.f32.gmra.mxu2 %vm732_vm1, %v9947_v40  ;;  %v2636_v5 = vpop.permute.xlu0 %2635 }
 0x21d   : > { %v2640_v15 = vpop.permute.xlu1 %2639 }
 0x220   : > { %5499 = vmatmul.msk.f32.gmra.mxu0 %vm732_vm1, %v1324_v53 }
 0x224   : > { %5465 = vmatmul.msk.f32.gmra.mxu2 %vm732_vm1, %v6699_v30 }
 0x225   : > { %v2638_v18 = vpop.permute.xlu0 %2637 }
 0x228   : > { %5500 = vmatmul.msk.f32.gmra.mxu0 %vm732_vm1, %v1326_v46  ;;  %v7051_v46 = vld [vmem:[%s9886_s1 + $0x18] sm:$0xff] }
 0x22c   : > { %5466 = vmatmul.msk.f32.gmra.mxu2 %vm732_vm1, %v6732_v26 }
 0x22d   : > { %v1440_v55 = vpop.f32.mrf.mxu0 }
 0x22e   : > { %v7004_v61 = vadd.f32 %v1440_v55, %v457_v44  ;;  %v7061_v55 = vld [vmem:[%s9886_s1 + $0x20] sm:$0xff] }
 0x230   : > { %1488 = vmax.xlane.f32.xlu2 %v7004_v61  ;;  %5549 = vmatmul.msk.f32.vlgmr.msra.gmra.mxu0 %vm732_vm1, %v2628_v45 }
 0x234   : > { %5467 = vmatmul.msk.f32.gmra.mxu2 %vm732_vm1, %v9949_v34 }
 0x235   : > { %v1443_v25 = vpop.f32.mrf.mxu0 }
 0x236   : > { %v7015_v47 = vadd.f32 %v1443_v25, %v458_v38 }
 0x238   : > { %9951 = vst [vmem:[#allocation11_spill] sm:$0xff] %v7015_v47  ;;  %1490 = vmax.xlane.f32.xlu0 %v7015_v47  ;;  %5550 = vmatmul.msk.f32.gmra.mxu0 %vm732_vm1, %v2630_v32  ;;  %v7070_v32 = vld [vmem:[%s9886_s1 + $0x28] sm:$0xff] }
 0x23c   : > { %5468 = vmatmul.msk.f32.gmra.mxu2 %vm732_vm1, %v6781_v37 }
 0x240   : > { %5551 = vmatmul.msk.f32.gmra.mxu0 %vm732_vm1, %v2632_v14 }
 0x247   : > { %v830_v17 = vpop.f32.mrf.mxu2 }
 0x248   : > { %5552 = vmatmul.msk.f32.gmra.mxu0 %vm732_vm1, %v2634_v16  ;;  %v7027_v21 = vadd.f32 %v830_v17, %v457_v44  ;;  %v7079_v16 = vld [vmem:[%s9886_s1 + $0x30] sm:$0xff] }
 0x24a   : > { %878 = vmax.xlane.f32.xlu1 %v7027_v21 }
 0x24f   : > { %v833_v0 = vpop.f32.mrf.mxu2 }
 0x250   : > { %5553 = vmatmul.msk.f32.gmra.mxu0 %vm732_vm1, %v2636_v5  ;;  %v7033_v13 = vadd.f32 %v833_v0, %v458_v38  ;;  %v7088_v0 = vld [vmem:[%s9886_s1 + $0x38] sm:$0xff] }
 0x251   : > { %9956 = vst [vmem:[#allocation25_spill] sm:$0xff] %v7088_v0 }
 0x252   : > { %880 = vmax.xlane.f32.xlu2 %v7033_v13 }
 0x257   : > { %v836_v36 = vpop.f32.mrf.mxu2 }
 0x258   : > { %5554 = vmatmul.msk.f32.gmra.mxu0 %vm732_vm1, %v2638_v18  ;;  %v7045_v28 = vadd.f32 %v836_v36, %v7041_v23 }
 0x25a   : > { %882 = vmax.xlane.f32.xlu0 %v7045_v28 }
 0x25f   : > { %v839_v53 = vpop.f32.mrf.mxu2 }
 0x260   : > { %5555 = vmatmul.msk.f32.gmra.mxu0 %vm732_vm1, %v2640_v15  ;;  %v7055_v44 = vadd.f32 %v839_v53, %v7051_v46  ;;  %v7097_v15 = vld [vmem:[%s9886_s1 + $0x40] sm:$0xff] }
 0x261   : > { %9957 = vst [vmem:[#allocation26_spill] sm:$0xff] %v7097_v15 }
 0x262   : > { %884 = vmax.xlane.f32.xlu2 %v7055_v44 }
 0x267   : > { %v842_v45 = vpop.f32.mrf.mxu2 }
 0x268   : > { %v7064_v38 = vadd.f32 %v842_v45, %v7061_v55 }
 0x26a   : > { %886 = vmax.xlane.f32.xlu2 %v7064_v38 }
 0x26f   : > { %v845_v25 = vpop.f32.mrf.mxu2 }
 0x270   : > { %v7073_v14 = vadd.f32 %v845_v25, %v7070_v32  ;;  %v466_v25 = vld [vmem:[%s9886_s1 + $0x48] sm:$0xff] }
 0x272   : > { %888 = vmax.xlane.f32.xlu1 %v7073_v14 }
 0x277   : > { %v848_v17 = vpop.f32.mrf.mxu2 }
 0x278   : > { %v7082_v5 = vadd.f32 %v848_v17, %v7079_v16 }
 0x27a   : > { %890 = vmax.xlane.f32.xlu2 %v7082_v5 }
 0x27f   : > { %v851_v18 = vpop.f32.mrf.mxu2 }
 0x280   : > { %v7091_v36 = vadd.f32 %v851_v18, %v7088_v0 }
 0x282   : > { %892 = vmax.xlane.f32.xlu2 %v7091_v36 }
 0x287   : > { %v854_v53 = vpop.f32.mrf.mxu2 }
 0x288   : > { %v7100_v45 = vadd.f32 %v854_v53, %v7097_v15  ;;  %v468_v53 = vld [vmem:[%s9886_s1 + $0x58] sm:$0xff] }
 0x28a   : > { %894 = vmax.xlane.f32.xlu2 %v7100_v45 }
 0x28f   : > { %v857_v17 = vpop.f32.mrf.mxu2 }
 0x290   : > { %v7106_v18 = vadd.f32 %v857_v17, %v466_v25  ;;  %v469_v25 = vld [vmem:[%s9886_s1 + $0x60] sm:$0xff] }
 0x292   : > { %896 = vmax.xlane.f32.xlu2 %v7106_v18 }
 0x297   : > { %v860_v6 = vpop.f32.mrf.mxu2 }
 0x298   : > { %v7112_v9 = vadd.f32 %v860_v6, %v467_v2  ;;  %v470_v6 = vld [vmem:[%s9886_s1 + $0x68] sm:$0xff] }
 0x29a   : > { %898 = vmax.xlane.f32.xlu1 %v7112_v9 }
 0x29f   : > { %v863_v8 = vpop.f32.mrf.mxu2 }
 0x2a0   : > { %v7118_v31 = vadd.f32 %v863_v8, %v468_v53  ;;  %v7133_v8 = vpop.permute.xlu2 %1981  ;;  %v7135_v53 = vpop.permute.xlu1 %1987 }
 0x2a1   : > { %9958 = vst [vmem:[#allocation27_spill] sm:$0xff] %v7133_v8 }
 0x2a2   : > { %900 = vmax.xlane.f32.xlu2 %v7118_v31  ;;  %9959 = vst [vmem:[#allocation28_spill] sm:$0xff] %v7135_v53 }
 0x2a7   : > { %v866_v17 = vpop.f32.mrf.mxu2 }
 0x2a8   : > { %v7124_v43 = vadd.f32 %v866_v17, %v469_v25  ;;  %v471_v25 = vld [vmem:[%s9886_s1 + $0x70] sm:$0xff]  ;;  %v7143_v50 = vpop.xlane.xlu2 %1488 }
 0x2aa   : > { %902 = vmax.xlane.f32.xlu1 %v7124_v43 }
 0x2af   : > { %v869_v2 = vpop.f32.mrf.mxu2 }
 0x2b0   : > { %v7130_v35 = vadd.f32 %v869_v2, %v470_v6  ;;  %v472_v2 = vld [vmem:[%s9886_s1 + $0x78] sm:$0xff] }
 0x2b2   : > { %904 = vmax.xlane.f32.xlu0 %v7130_v35 }
 0x2b7   : > { %v872_v17 = vpop.f32.mrf.mxu2 }
 0x2b8   : > { %v7140_v29 = vadd.f32 %v872_v17, %v471_v25 }
 0x2ba   : > { %906 = vmax.xlane.f32.xlu0 %v7140_v29 }
 0x2bd   : > { %v879_v54 = vpop.xlane.xlu1 %878 }
 0x2be   : > { %v910_v6 = vsub.f32 %v7027_v21, %v879_v54  ;;  %v1446_v21 = vpop.f32.mrf.mxu0 }
 0x2bf   : > { %v875_v8 = vpop.f32.mrf.mxu2 }
 0x2c0   : > { %v926_v53 = vmul.f32 1.442695, %v910_v6  ;;  %v7149_v57 = vadd.f32 %v875_v8, %v472_v2  ;;  %v7160_v8 = vadd.f32 %v1446_v21, %v7041_v23  ;;  %v7167_v6 = vpop.xlane.xlu0 %1490 }
 0x2c1   : > { %9961 = vst [vmem:[#allocation30_spill] sm:$0xff] %v7167_v6 }
 0x2c2   : > { %5768 = vpow2.f32 %v926_v53  ;;  %908 = vmax.xlane.f32.xlu2 %v7149_v57  ;;  %9960 = vst [vmem:[#allocation29_spill] sm:$0xff] %v7160_v8 }
 0x2c5   : > { %v881_v25 = vpop.xlane.xlu2 %880 }
 0x2c6   : > { %v911_v17 = vsub.f32 %v7033_v13, %v881_v25 }
 0x2c8   : > { %v7153_v58 = vpop.eup %5768  ;;  %v928_v37 = vmul.f32 1.442695, %v911_v17 }
 0x2c9   : > { %958 = vadd.xlane.f32.xlu0 %v7153_v58 }
 0x2ca   : > { %5770 = vpow2.f32 %v928_v37 }
 0x2cd   : > { %v883_v25 = vpop.xlane.xlu0 %882 }
 0x2ce   : > { %v912_v23 = vsub.f32 %v7045_v28, %v883_v25 }
 0x2d0   : > { %v7156_v54 = vpop.eup %5770  ;;  %v930_v15 = vmul.f32 1.442695, %v912_v23 }
 0x2d1   : > { %960 = vadd.xlane.f32.xlu1 %v7156_v54 }
 0x2d5   : > { %v885_v13 = vpop.xlane.xlu2 %884 }
 0x2d6   : > { %v913_v2 = vsub.f32 %v7055_v44, %v885_v13 }
 0x2d8   : > { %v932_v21 = vmul.f32 1.442695, %v913_v2 }
 0x2d9   : > { %1492 = vmax.xlane.f32.xlu1 %v7160_v8 }
 0x2da   : > { %2641 = vrot.lane.b32.xlu2 %v6606_v10, %s6210_s27  ;;  %5772 = vpow2.f32 %v932_v21 }
 0x2db   : > { %5774 = vpow2.f32 %v930_v15 }
 0x2dd   : > { %1989 = vrot.lane.b32.xlu0 %v9946_v33, %s6209_s24  ;;  %v887_v53 = vpop.xlane.xlu2 %886 }
 0x2de   : > { %v914_v47 = vsub.f32 %v7064_v38, %v887_v53 }
 0x2e0   : > { %v7174_v63 = vpop.eup %5772  ;;  %v934_v44 = vmul.f32 1.442695, %v914_v47 }
 0x2e1   : > { %v7178_v2 = vpop.eup %5774 }
 0x2e5   : > { %v889_v13 = vpop.xlane.xlu1 %888 }
 0x2e6   : > { %v915_v38 = vsub.f32 %v7073_v14, %v889_v13 }
 0x2ed   : > { %v891_v37 = vpop.xlane.xlu2 %890 }
 0x2ee   : > { %v916_v8 = vsub.f32 %v7082_v5, %v891_v37 }
 0x2f0   : > { %v938_v59 = vmul.f32 1.442695, %v916_v8 }
 0x2f5   : > { %v893_v17 = vpop.xlane.xlu2 %892 }
 0x2f6   : > { %v917_v28 = vsub.f32 %v7091_v36, %v893_v17 }
 0x2fd   : > { %v895_v10 = vpop.xlane.xlu2 %894 }
 0x2fe   : > { %v918_v0 = vsub.f32 %v7100_v45, %v895_v10 }
 0x300   : > { %v942_v6 = vmul.f32 1.442695, %v918_v0  ;;  %v940_v0 = vmul.f32 1.442695, %v917_v28 }
 0x302   : > { %5776 = vpow2.f32 %v942_v6 }
 0x303   : > { %964 = vadd.xlane.f32.xlu2 %v7174_v63  ;;  %5778 = vpow2.f32 %v938_v59  ;;  %v936_v59 = vmul.f32 1.442695, %v915_v38 }
 0x304   : > { %5780 = vpow2.f32 %v934_v44 }
 0x305   : > { %v897_v15 = vpop.xlane.xlu2 %896  ;;  %5782 = vpow2.f32 %v940_v0 }
 0x306   : > { %v919_v47 = vsub.f32 %v7106_v18, %v897_v15  ;;  %5784 = vpow2.f32 %v936_v59 }
 0x307   : > { %962 = vadd.xlane.f32.xlu0 %v7178_v2 }
 0x308   : > { %v7181_v5 = vpop.eup %5776  ;;  %v944_v8 = vmul.f32 1.442695, %v919_v47 }
 0x309   : > { %974 = vadd.xlane.f32.xlu1 %v7181_v5  ;;  %v7185_v45 = vpop.eup %5778 }
 0x30a   : > { %v7189_v36 = vpop.eup %5780  ;;  %5786 = vpow2.f32 %v944_v8 }
 0x30b   : > { %970 = vadd.xlane.f32.xlu2 %v7185_v45  ;;  %v7192_v14 = vpop.eup %5782 }
 0x30c   : > { %v7196_v25 = vpop.eup %5784 }
 0x30d   : > { %v899_v53 = vpop.xlane.xlu1 %898 }
 0x30e   : > { %v920_v6 = vsub.f32 %v7112_v9, %v899_v53 }
 0x30f   : > { %966 = vadd.xlane.f32.xlu0 %v7189_v36 }
 0x310   : > { %v946_v18 = vmul.f32 1.442695, %v920_v6  ;;  %v7200_v21 = vpop.eup %5786 }
 0x313   : > { %972 = vadd.xlane.f32.xlu2 %v7192_v14 }
 0x315   : > { %v901_v37 = vpop.xlane.xlu2 %900 }
 0x316   : > { %v921_v17 = vsub.f32 %v7118_v31, %v901_v37 }
 0x317   : > { %968 = vadd.xlane.f32.xlu0 %v7196_v25 }
 0x318   : > { %v948_v23 = vmul.f32 1.442695, %v921_v17 }
 0x31a   : > { %5788 = vpow2.f32 %v948_v23 }
 0x31b   : > { %976 = vadd.xlane.f32.xlu2 %v7200_v21  ;;  %5790 = vpow2.f32 %v946_v18 }
 0x31d   : > { %v903_v10 = vpop.xlane.xlu1 %902 }
 0x31e   : > { %v922_v44 = vsub.f32 %v7124_v43, %v903_v10 }
 0x320   : > { %v7204_v28 = vpop.eup %5788  ;;  %v950_v9 = vmul.f32 1.442695, %v922_v44 }
 0x321   : > { %980 = vadd.xlane.f32.xlu0 %v7204_v28  ;;  %v7207_v13 = vpop.eup %5790 }
 0x322   : > { %5792 = vpow2.f32 %v950_v9 }
 0x323   : > { %978 = vadd.xlane.f32.xlu2 %v7207_v13 }
 0x325   : > { %v905_v31 = vpop.xlane.xlu0 %904 }
 0x326   : > { %v923_v38 = vsub.f32 %v7130_v35, %v905_v31  ;;  %v1449_v35 = vpop.f32.mrf.mxu0 }
 0x328   : > { %v952_v0 = vmul.f32 1.442695, %v923_v38  ;;  %v7211_v15 = vpop.eup %5792  ;;  %v7227_v38 = vadd.f32 %v1449_v35, %v7051_v46 }
 0x32a   : > { %5794 = vpow2.f32 %v952_v0 }
 0x32b   : > { %982 = vadd.xlane.f32.xlu2 %v7211_v15 }
 0x32d   : > { %v907_v43 = vpop.xlane.xlu0 %906 }
 0x32e   : > { %v924_v59 = vsub.f32 %v7140_v29, %v907_v43  ;;  %v1452_v10 = vpop.f32.mrf.mxu0 }
 0x330   : > { %v7215_v47 = vpop.eup %5794  ;;  %v954_v8 = vmul.f32 1.442695, %v924_v59 }
 0x331   : > { %984 = vadd.xlane.f32.xlu1 %v7215_v47 }
 0x332   : > { %5796 = vpow2.f32 %v954_v8 }
 0x335   : > { %v909_v53 = vpop.xlane.xlu2 %908 }
 0x336   : > { %v925_v6 = vsub.f32 %v7149_v57, %v909_v53 }
 0x338   : > { %v7219_v37 = vpop.eup %5796  ;;  %v956_v17 = vmul.f32 1.442695, %v925_v6 }
 0x339   : > { %986 = vadd.xlane.f32.xlu0 %v7219_v37 }
 0x33a   : > { %5798 = vpow2.f32 %v956_v17  ;;  %v1455_v17 = vpop.f32.mrf.mxu0 }
 0x33c   : > { %v959_v18 = vpop.xlane.xlu0 %958 }
 0x33d   : > { %5800 = vrcp.f32 %v959_v18  ;;  %v2642_v23 = vpop.permute.xlu2 %2641  ;;  %v1001_v0 = vand.u32 2147483648, %v959_v18  ;;  %v999_v59 = vand.u32 2147483647, %v959_v18  ;;  %vm995_vm3 = vweird.f32 %v959_v18 }
 0x33e   : > { %5556 = vmatmul.msk.f32.gmra.mxu0 %vm732_vm1, %v2642_v23 }
 0x33f   : > { %v1002_v6 = vor.u32 1.1754944e-38, %v1001_v0  ;;  %vm1000_vm5 = vcmp.eq.f32.partialorder %v999_v59, 8.507059e+37 }
 0x340   : > { %v7223_v29 = vpop.eup %5798 }
 0x341   : > { %9962 = vst [vmem:[#allocation31_spill] sm:$0xff] %v7223_v29  ;;  %988 = vadd.xlane.f32.xlu2 %v7223_v29  ;;  %v7236_v29 = vadd.f32 %v1455_v17, %v7070_v32 }
 0x343   : > { %v5801_v44 = vpop.eup %5800 }
 0x344   : > { %v991_v9 = vmul.f32 %v5801_v44, %v959_v18  ;;  %v961_v57 = vpop.xlane.xlu1 %960  ;;  %vm996_vm2 = vweird.f32 %v5801_v44 }
 0x345   : > { %5802 = vrcp.f32 %v961_v57  ;;  %vm997_vm4 = vmor %vm995_vm3, %vm996_vm2  ;;  %vm1010_vm7 = vweird.f32 %v961_v57 }
 0x346   : > { %v992_v31 = vsub.f32 1.0, %v991_v9 }
 0x348   : > { %v993_v43 = vmul.f32 %v5801_v44, %v992_v31 }
 0x349   : > { %1494 = vmax.xlane.f32.xlu2 %v7227_v38 }
 0x34a   : > { %2643 = vrot.lane.b32.xlu1 %v6643_v22, %s6210_s27  ;;  %v994_v8 = vadd.f32 %v5801_v44, %v993_v43  ;;  %v1016_v22 = vand.u32 2147483648, %v961_v57  ;;  %v1014_v43 = vand.u32 2147483647, %v961_v57 }
 0x34b   : > { %v5803_v53 = vpop.eup %5802 }
 0x34c   : > { %v1006_v23 = vmul.f32 %v5803_v53, %v961_v57  ;;  %v998_v9 = vsel %vm997_vm4, %v5801_v44, %v994_v8  ;;  %vm1011_vm6 = vweird.f32 %v5803_v53  ;;  %vm1015_vm9 = vcmp.eq.f32.partialorder %v1014_v43, 8.507059e+37 }
 0x34d   : > { %1991 = vrot.lane.b32.xlu0 %v9947_v40, %s6209_s24  ;;  %v1003_v46 = vsel %vm1000_vm5, %v1002_v6, %v998_v9  ;;  %vm1012_vm8 = vmor %vm1010_vm7, %vm1011_vm6  ;;  %v9967_v9 = vld [vmem:[#allocation15_spill] sm:$0xff] }
 0x34e   : > { %v1007_v35 = vsub.f32 1.0, %v1006_v23  ;;  %v1004_v31 = vmul.f32 %v7153_v58, %v1003_v46  ;;  %v1017_v58 = vor.u32 1.1754944e-38, %v1016_v22  ;;  %v9968_v46 = vld [vmem:[#allocation13_spill] sm:$0xff] }
 0x350   : > { %1246 = vmatmul.f32.vlgmr.msra.gmra.mxu3 %v1004_v31  ;;  %v1008_v18 = vmul.f32 %v5803_v53, %v1007_v35  ;;  %v7303_v35 = vpack.i.bf16 %v9968_v46, %v9967_v9 }
 0x351   : > { %5609 = vmatpush.xpose.msk.msra.mxu3 %vm732_vm1, %v6808_v62  ;;  %1498 = vmax.xlane.f32.xlu2 %v7236_v29  ;;  %v9964_v62 = vld [vmem:[#allocation17_spill] sm:$0xff] }
 0x352   : > { %2645 = vrot.lane.b32.xlu1 %v6554_v60, %s6210_s27  ;;  %v1009_v44 = vadd.f32 %v5803_v53, %v1008_v18  ;;  %v9963_v60 = vld [vmem:[#allocation18_spill] sm:$0xff] }
 0x353   : > { %v7254_v57 = vpack.i.bf16 %v9964_v62, %v9963_v60  ;;  %v1458_v62 = vpop.f32.mrf.mxu0 }
 0x354   : > { %v1013_v0 = vsel %vm1012_vm8, %v5803_v53, %v1009_v44  ;;  %v1520_v44 = vsub.f32 %v7004_v61, %v7143_v50 }
 0x355   : > { %5610 = vmatpush.xpose.msk.msra.mxu3 %vm732_vm1, %v6869_v4  ;;  %v1018_v32 = vsel %vm1015_vm9, %v1017_v58, %v1013_v0 }
 0x356   : > { %v1019_v59 = vmul.f32 %v7156_v54, %v1018_v32 }
 0x358   : > { %1249 = vmatmul.f32.gmra.mxu3 %v1019_v59 }
 0x359   : > { %5611 = vmatpush.xpose.msk.msra.mxu3 %vm732_vm1, %v6849_v1  ;;  %v9966_v1 = vld [vmem:[#allocation10_spill] sm:$0xff] }
 0x35a   : > { %1993 = vrot.lane.b32.xlu1 %v6699_v30, %s6209_s24 }
 0x35d   : > { %5612 = vmatpush.xpose.msk.msra.mxu3 %vm732_vm1, %v6790_v41  ;;  %v9965_v41 = vld [vmem:[#allocation12_spill] sm:$0xff] }
 0x35e   : > { %v7272_v4 = vpack.i.bf16 %v9966_v1, %v9965_v41  ;;  %v1536_v41 = vmul.f32 1.442695, %v1520_v44 }
 0x361   : > { %5613 = vmatpush.xpose.msk.msra.mxu3 %vm732_vm1, %v6885_v20  ;;  %v7283_v20 = vadd.f32 %v1452_v10, %v7061_v55 }
 0x362   : > { %5642 = vrot.lane.b32.xlu1 %v7254_v57, %s6206_s21 }
 0x365   : > { %5614 = vmatpush.xpose.msk.msra.mxu3 %vm732_vm1, %v6851_v24  ;;  %v7278_v24 = vpop.permute.xlu0 %1989 }
 0x369   : > { %5615 = vmatpush.xpose.msk.msra.mxu3 %vm732_vm1, %v6905_v11  ;;  %2647 = vrot.lane.b32.xlu2 %v9946_v33, %s6210_s27 }
 0x36a   : > { %1995 = vrot.lane.b32.xlu1 %v6732_v26, %s6209_s24 }
 0x36d   : > { %5616 = vmatpush.xpose.msk.msra.mxu3 %vm732_vm1, %v6892_v19 }
 0x371   : > { %5617 = vmatpush.xpose.msk.msra.mxu3 %vm732_vm1, %v6928_v27  ;;  %5652 = vrot.lane.b32.xlu2 %v7272_v4, %s6206_s21 }
 0x375   : > { %5618 = vmatpush.xpose.msk.msra.mxu3 %vm732_vm1, %v6924_v39 }
 0x376   : > { %v965_v11 = vpop.xlane.xlu2 %964 }
 0x377   : > { %5804 = vrcp.f32 %v965_v11  ;;  %1496 = vmax.xlane.f32.xlu0 %v7283_v20  ;;  %v1046_v58 = vand.u32 2147483648, %v965_v11  ;;  %vm1040_vm15 = vweird.f32 %v965_v11  ;;  %v1044_v59 = vand.u32 2147483647, %v965_v11 }
 0x379   : > { %5619 = vmatpush.xpose.msk.msra.mxu3 %vm732_vm1, %v6936_v42  ;;  %v1047_v1 = vor.u32 1.1754944e-38, %v1046_v58  ;;  %vm1045_vm3 = vcmp.eq.f32.partialorder %v1044_v59, 8.507059e+37 }
 0x37a   : > { %v963_v19 = vpop.xlane.xlu0 %962 }
 0x37b   : > { %5806 = vrcp.f32 %v963_v19  ;;  %v1029_v42 = vand.u32 2147483647, %v963_v19  ;;  %v1031_v6 = vand.u32 2147483648, %v963_v19  ;;  %vm1025_vm11 = vweird.f32 %v963_v19 }
 0x37d   : > { %v5805_v27 = vpop.eup %5804  ;;  %5620 = vmatpush.xpose.msk.msra.mxu3 %vm732_vm1, %v6943_v48  ;;  %vm1030_vm13 = vcmp.eq.f32.partialorder %v1029_v42, 8.507059e+37  ;;  %v1032_v31 = vor.u32 1.1754944e-38, %v1031_v6 }
 0x37e   : > { %v1036_v33 = vmul.f32 %v5805_v27, %v965_v11  ;;  %v7295_v53 = vpop.xlane.xlu2 %970  ;;  %vm1041_vm14 = vweird.f32 %v5805_v27  ;;  %v7322_v11 = vpop.xlane.xlu1 %1492 }
 0x37f   : > { %vm1042_vm2 = vmor %vm1040_vm15, %vm1041_vm14 }
 0x380   : > { %v1037_v39 = vsub.f32 1.0, %v1036_v33 }
 0x381   : > { %v5807_v54 = vpop.eup %5806  ;;  %5621 = vmatpush.xpose.msk.msra.mxu3 %vm732_vm1, %v6959_v49 }
 0x382   : > { %v1021_v55 = vmul.f32 %v5807_v54, %v963_v19  ;;  %v7292_v10 = vpop.xlane.xlu0 %966  ;;  %vm1026_vm10 = vweird.f32 %v5807_v54  ;;  %v1038_v17 = vmul.f32 %v5805_v27, %v1037_v39 }
 0x383   : > { %5808 = vrcp.f32 %v7292_v10  ;;  %vm1027_vm12 = vmor %vm1025_vm11, %vm1026_vm10  ;;  %vm1055_vm5 = vweird.f32 %v7292_v10 }
 0x384   : > { %v1022_v8 = vsub.f32 1.0, %v1021_v55  ;;  %v1039_v43 = vadd.f32 %v5805_v27, %v1038_v17 }
 0x385   : > { %5622 = vmatpush.xpose.msk.msra.mxu3 %vm732_vm1, %v6963_v51 }
 0x386   : > { %v1023_v48 = vmul.f32 %v5807_v54, %v1022_v8  ;;  %v7317_v60 = vpop.xlane.xlu2 %972  ;;  %v1043_v50 = vsel %vm1042_vm2, %v5805_v27, %v1039_v43  ;;  %v1061_v27 = vand.u32 2147483648, %v7292_v10 }
 0x387   : > { %v1048_v33 = vsel %vm1045_vm3, %v1047_v1, %v1043_v50  ;;  %vm1100_vm3 = vweird.f32 %v7317_v60 }
 0x388   : > { %v1024_v23 = vadd.f32 %v5807_v54, %v1023_v48  ;;  %v1049_v8 = vmul.f32 %v7174_v63, %v1048_v33  ;;  %v7338_v63 = vpop.xlane.xlu1 %974 }
 0x389   : > { %v5809_v49 = vpop.eup %5808  ;;  %5623 = vmatpush.xpose.msk.msra.mxu3 %vm732_vm1, %v6969_v56 }
 0x38a   : > { %v1051_v51 = vmul.f32 %v5809_v49, %v7292_v10  ;;  %v7306_v22 = vpop.xlane.xlu0 %968  ;;  %v1028_v18 = vsel %vm1027_vm12, %v5807_v54, %v1024_v23  ;;  %vm1056_vm4 = vweird.f32 %v5809_v49 }
 0x38b   : > { %5810 = vrcp.f32 %v7306_v22  ;;  %5647 = vrot.lane.b32.xlu0 %v7303_v35, %s6206_s21  ;;  %v1033_v56 = vsel %vm1030_vm13, %v1032_v31, %v1028_v18  ;;  %vm1057_vm6 = vmor %vm1055_vm5, %vm1056_vm4  ;;  %vm1070_vm9 = vweird.f32 %v7306_v22  ;;  %v1074_v18 = vand.u32 2147483647, %v7306_v22 }
 0x38c   : > { %v1052_v0 = vsub.f32 1.0, %v1051_v51  ;;  %v1034_v32 = vmul.f32 %v7178_v2, %v1033_v56  ;;  %5812 = vrcp.f32 %v7295_v53  ;;  %v7320_v2 = vadd.f32 %v1458_v62, %v7079_v16 }
 0x38d   : > { %5624 = vmatpush.xpose.msk.msra.mxu3 %vm732_vm1, %v6977_v52  ;;  %5814 = vpow2.f32 %v1536_v41  ;;  %v1059_v16 = vand.u32 2147483647, %v7292_v10  ;;  %vm1075_vm11 = vcmp.eq.f32.partialorder %v1074_v18, 8.507059e+37  ;;  %vm1085_vm13 = vweird.f32 %v7295_v53 }
 0x38e   : > { %1252 = vmatmul.f32.gmra.mxu3 %v1034_v32  ;;  %v1053_v61 = vmul.f32 %v5809_v49, %v1052_v0  ;;  %5816 = vrcp.f32 %v7317_v60  ;;  %v7334_v17 = vpop.xlane.xlu2 %976  ;;  %v7351_v0 = vpack.i.bf16 %v6593_v7, %v6610_v12  ;;  %v1089_v41 = vand.u32 2147483647, %v7295_v53 }
 0x38f   : > { %vm1060_vm7 = vcmp.eq.f32.partialorder %v1059_v16, 8.507059e+37  ;;  %5818 = vrcp.f32 %v7338_v63  ;;  %v1119_v18 = vand.u32 2147483647, %v7338_v63 }
 0x390   : > { %v1054_v52 = vadd.f32 %v5809_v49, %v1053_v61  ;;  %v1091_v61 = vand.u32 2147483648, %v7295_v53  ;;  %5820 = vrcp.f32 %v7334_v17  ;;  %vm1090_vm15 = vcmp.eq.f32.partialorder %v1089_v41, 8.507059e+37 }
 0x391   : > { %v5811_v19 = vpop.eup %5810 }
 0x392   : > { %v1066_v54 = vmul.f32 %v5811_v19, %v7306_v22  ;;  %v5813_v39 = vpop.eup %5812  ;;  %v1058_v6 = vsel %vm1057_vm6, %v5809_v49, %v1054_v52  ;;  %vm1071_vm8 = vweird.f32 %v5811_v19  ;;  %v1076_v49 = vand.u32 2147483648, %v7306_v22 }
 0x393   : > { %2649 = vrot.lane.b32.xlu0 %v9947_v40, %s6210_s27  ;;  %v1081_v42 = vmul.f32 %v5813_v39, %v7295_v53  ;;  %v1062_v40 = vor.u32 1.1754944e-38, %v1061_v27  ;;  %v7336_v23 = vpop.eup %5814  ;;  %vm1072_vm10 = vmor %vm1070_vm9, %vm1071_vm8  ;;  %vm1086_vm12 = vweird.f32 %v5813_v39  ;;  %v1106_v53 = vand.u32 2147483648, %v7317_v60 }
 0x394   : > { %v1067_v55 = vsub.f32 1.0, %v1066_v54  ;;  %1500 = vmax.xlane.f32.xlu1 %v7320_v2  ;;  %v5817_v31 = vpop.eup %5816  ;;  %v1077_v58 = vor.u32 1.1754944e-38, %v1076_v49  ;;  %vm1087_vm14 = vmor %vm1085_vm13, %vm1086_vm12  ;;  %vm1120_vm9 = vcmp.eq.f32.partialorder %v1119_v18, 8.507059e+37 }
 0x395   : > { %v1063_v9 = vsel %vm1060_vm7, %v1062_v40, %v1058_v6  ;;  %v1082_v46 = vsub.f32 1.0, %v1081_v42  ;;  %v1096_v43 = vmul.f32 %v5817_v31, %v7317_v60  ;;  %v5819_v22 = vpop.eup %5818  ;;  %vm1101_vm2 = vweird.f32 %v5817_v31 }
 0x396   : > { %1255 = vmatmul.f32.gmra.mxu3 %v1049_v8  ;;  %v1068_v48 = vmul.f32 %v5811_v19, %v1067_v55  ;;  %v1064_v51 = vmul.f32 %v7189_v36, %v1063_v9  ;;  %v7353_v59 = vpop.xlane.xlu2 %978  ;;  %v1111_v7 = vmul.f32 %v5819_v22, %v7338_v63  ;;  %v5821_v27 = vpop.eup %5820  ;;  %vm1102_vm4 = vmor %vm1100_vm3, %vm1101_vm2  ;;  %vm1116_vm6 = vweird.f32 %v5819_v22 }
 0x397   : > { %v1083_v56 = vmul.f32 %v5813_v39, %v1082_v46  ;;  %v1097_v36 = vsub.f32 1.0, %v1096_v43  ;;  %5822 = vrcp.f32 %v7353_v59  ;;  %v1126_v42 = vmul.f32 %v5821_v27, %v7334_v17 }
 0x398   : > { %v1069_v10 = vadd.f32 %v5811_v19, %v1068_v48  ;;  %v1112_v54 = vsub.f32 1.0, %v1111_v7  ;;  %v1107_v48 = vor.u32 1.1754944e-38, %v1106_v53  ;;  %vm1115_vm7 = vweird.f32 %v7338_v63 }
 0x399   : > { %v1084_v50 = vadd.f32 %v5813_v39, %v1083_v56  ;;  %v1098_v1 = vmul.f32 %v5817_v31, %v1097_v36  ;;  %v1127_v9 = vsub.f32 1.0, %v1126_v42  ;;  %vm1117_vm8 = vmor %vm1115_vm7, %vm1116_vm6 }
 0x39a   : > { %1568 = vadd.xlane.f32.xlu2 %v7336_v23  ;;  %v1073_v44 = vsel %vm1072_vm10, %v5811_v19, %v1069_v10  ;;  %v1092_v19 = vor.u32 1.1754944e-38, %v1091_v61  ;;  %v1113_v6 = vmul.f32 %v5819_v22, %v1112_v54  ;;  %v1121_v10 = vand.u32 2147483648, %v7338_v63 }
 0x39b   : > { %1997 = vrot.lane.b32.xlu0 %v9949_v34, %s6209_s24  ;;  %v1078_v32 = vsel %vm1075_vm11, %v1077_v58, %v1073_v44  ;;  %v1088_v12 = vsel %vm1087_vm14, %v5813_v39, %v1084_v50  ;;  %v1099_v52 = vadd.f32 %v5817_v31, %v1098_v1  ;;  %v1104_v39 = vand.u32 2147483647, %v7317_v60  ;;  %v9970_v58 = vld [vmem:[#allocation7_spill] sm:$0xff] }
 0x39c   : > { %v1079_v62 = vmul.f32 %v7196_v25, %v1078_v32  ;;  %v1093_v33 = vsel %vm1090_vm15, %v1092_v19, %v1088_v12  ;;  %v9969_v25 = vld [vmem:[#allocation8_spill] sm:$0xff]  ;;  %v1114_v60 = vadd.f32 %v5819_v22, %v1113_v6  ;;  %v1128_v44 = vmul.f32 %v5821_v27, %v1127_v9  ;;  %v9971_v32 = vld [vmem:[#allocation6_spill] sm:$0xff]  ;;  %v1461_v9 = vpop.f32.mrf.mxu0 }
 0x39d   : > { %v7365_v55 = vpack.i.bf16 %v9969_v25, %v6579_v3  ;;  %v1094_v16 = vmul.f32 %v7185_v45, %v1093_v33  ;;  %v1103_v3 = vsel %vm1102_vm4, %v5817_v31, %v1099_v52  ;;  %vm1105_vm5 = vcmp.eq.f32.partialorder %v1104_v39, 8.507059e+37  ;;  %v7377_v45 = vpop.xlane.xlu0 %980  ;;  %v5823_v46 = vpop.eup %5822 }
 0x39e   : > { %1258 = vmatmul.f32.gmra.mxu3 %v1064_v51  ;;  %v7368_v8 = vpop.xlane.xlu2 %982  ;;  %v1108_v40 = vsel %vm1105_vm5, %v1107_v48, %v1103_v3  ;;  %5824 = vrcp.f32 %v7377_v45  ;;  %v1118_v43 = vsel %vm1117_vm8, %v5819_v22, %v1114_v60  ;;  %v1122_v56 = vor.u32 1.1754944e-38, %v1121_v10  ;;  %v9972_v60 = vld [vmem:[#allocation30_spill] sm:$0xff] }
 0x39f   : > { %v1109_v31 = vmul.f32 %v7192_v14, %v1108_v40  ;;  %v7393_v36 = vpack.i.bf16 %v9971_v32, %v9970_v58  ;;  %v1129_v63 = vadd.f32 %v5821_v27, %v1128_v44  ;;  %vm1131_vm10 = vweird.f32 %v5821_v27  ;;  %v9974_v44 = vld [vmem:[#allocation25_spill] sm:$0xff] }
 0x3a0   : > { %v1123_v50 = vsel %vm1120_vm9, %v1122_v56, %v1118_v43  ;;  %vm1130_vm11 = vweird.f32 %v7334_v17  ;;  %v1134_v12 = vand.u32 2147483647, %v7334_v17  ;;  %5826 = vrcp.f32 %v7368_v8 }
 0x3a1   : > { %v1124_v7 = vmul.f32 %v7181_v5, %v1123_v50  ;;  %vm1132_vm12 = vmor %vm1130_vm11, %vm1131_vm10  ;;  %vm1146_vm14 = vweird.f32 %v5823_v46  ;;  %vm1145_vm15 = vweird.f32 %v7353_v59  ;;  %v1166_v56 = vand.u32 2147483648, %v7377_v45 }
 0x3a2   : > { %v1133_v19 = vsel %vm1132_vm12, %v5821_v27, %v1129_v63  ;;  %vm1135_vm13 = vcmp.eq.f32.partialorder %v1134_v12, 8.507059e+37  ;;  %v1149_v27 = vand.u32 2147483647, %v7353_v59  ;;  %vm1147_vm2 = vmor %vm1145_vm15, %vm1146_vm14  ;;  %vm1160_vm5 = vweird.f32 %v7377_v45  ;;  %v9975_v12 = vld [vmem:[#allocation29_spill] sm:$0xff] }
 0x3a3   : > { %5657 = vrot.lane.b32.xlu0 %v7351_v0, %s6206_s21  ;;  %v1164_v63 = vand.u32 2147483647, %v7377_v45  ;;  %vm1175_vm9 = vweird.f32 %v7368_v8 }
 0x3a4   : > { %v7382_v49 = vpop.xlane.xlu1 %984  ;;  %v7397_v61 = vpop.eup %5824  ;;  %vm1150_vm3 = vcmp.eq.f32.partialorder %v1149_v27, 8.507059e+37 }
 0x3a5   : > { %v1156_v1 = vmul.f32 %v7397_v61, %v7377_v45  ;;  %5828 = vrcp.f32 %v7382_v49  ;;  %vm1161_vm4 = vweird.f32 %v7397_v61  ;;  %v1522_v45 = vsub.f32 %v9975_v12, %v7322_v11  ;;  %v9978_v12 = vld [vmem:[#allocation5_spill] sm:$0xff] }
 0x3a6   : > { %1261 = vmatmul.f32.gmra.mxu3 %v1079_v62  ;;  %v1136_v62 = vand.u32 2147483648, %v7334_v17  ;;  %v7409_v53 = vpop.eup %5826  ;;  %v1151_v17 = vand.u32 2147483648, %v7353_v59  ;;  %vm1162_vm6 = vmor %vm1160_vm5, %vm1161_vm4  ;;  %vm1165_vm7 = vcmp.eq.f32.partialorder %v1164_v63, 8.507059e+37 }
 0x3a7   : > { %v1157_v25 = vsub.f32 1.0, %v1156_v1  ;;  %v1171_v3 = vmul.f32 %v7409_v53, %v7368_v8  ;;  %vm1176_vm8 = vweird.f32 %v7409_v53 }
 0x3a8   : > { %v1137_v54 = vor.u32 1.1754944e-38, %v1136_v62  ;;  %v1152_v40 = vor.u32 1.1754944e-38, %v1151_v17  ;;  %v1179_v17 = vand.u32 2147483647, %v7368_v8  ;;  %vm1177_vm10 = vmor %vm1175_vm9, %vm1176_vm8 }
 0x3a9   : > { %v1158_v48 = vmul.f32 %v7397_v61, %v1157_v25  ;;  %v1540_v25 = vmul.f32 1.442695, %v1522_v45  ;;  %v9979_v45 = vld [vmem:[#allocation4_spill] sm:$0xff] }
 0x3aa   : > { %v1138_v52 = vsel %vm1135_vm13, %v1137_v54, %v1133_v19  ;;  %vm1180_vm11 = vcmp.eq.f32.partialorder %v1179_v17, 8.507059e+37  ;;  %vm1190_vm13 = vweird.f32 %v7382_v49 }
 0x3ab   : > { %v1139_v42 = vmul.f32 %v7200_v21, %v1138_v52  ;;  %v9973_v21 = vld [vmem:[#allocation11_spill] sm:$0xff]  ;;  %v7428_v43 = vpop.eup %5828  ;;  %v1181_v52 = vand.u32 2147483648, %v7368_v8 }
 0x3ac   : > { %v1521_v10 = vsub.f32 %v9973_v21, %v9972_v60  ;;  %v7424_v18 = vpop.xlane.xlu0 %986  ;;  %v1186_v62 = vmul.f32 %v7428_v43, %v7382_v49  ;;  %vm1191_vm12 = vweird.f32 %v7428_v43  ;;  %v1196_v60 = vand.u32 2147483648, %v7382_v49 }
 0x3ad   : > { %5662 = vrot.lane.b32.xlu1 %v7365_v55, %s6206_s21  ;;  %5830 = vrcp.f32 %v7424_v18  ;;  %vm1192_vm14 = vmor %vm1190_vm13, %vm1191_vm12 }
 0x3ae   : > { %1264 = vmatmul.f32.gmra.mxu3 %v1094_v16  ;;  %v1538_v58 = vmul.f32 1.442695, %v1521_v10  ;;  %v1187_v19 = vsub.f32 1.0, %v1186_v62  ;;  %v1194_v10 = vand.u32 2147483647, %v7382_v49  ;;  %v9977_v49 = vld [vmem:[#allocation19_spill] sm:$0xff] }
 0x3b0   : > { %5832 = vpow2.f32 %v1538_v58  ;;  %vm1195_vm15 = vcmp.eq.f32.partialorder %v1194_v10, 8.507059e+37 }
 0x3b2   : > { %2651 = vrot.lane.b32.xlu2 %v6699_v30, %s6210_s27  ;;  %v1141_v30 = vmul.f32 %v5823_v46, %v7353_v59  ;;  %v1172_v59 = vsub.f32 1.0, %v1171_v3 }
 0x3b3   : > { %v7450_v54 = vpop.eup %5830 }
 0x3b4   : > { %v7384_v51 = vpop.xlane.xlu2 %988  ;;  %v1142_v14 = vsub.f32 1.0, %v1141_v30  ;;  %v1159_v30 = vadd.f32 %v7397_v61, %v1158_v48  ;;  %v1201_v27 = vmul.f32 %v7450_v54, %v7424_v18 }
 0x3b5   : > { %5834 = vrcp.f32 %v7384_v51 }
 0x3b6   : > { %1267 = vmatmul.f32.gmra.mxu3 %v1109_v31  ;;  %v1143_v33 = vmul.f32 %v5823_v46, %v1142_v14  ;;  %5836 = vpow2.f32 %v1540_v25  ;;  %v1202_v48 = vsub.f32 1.0, %v1201_v27 }
 0x3b8   : > { %v1144_v5 = vadd.f32 %v5823_v46, %v1143_v33 }
 0x3ba   : > { %5667 = vrot.lane.b32.xlu2 %v7393_v36, %s6206_s21  ;;  %v1148_v6 = vsel %vm1147_vm2, %v5823_v46, %v1144_v5  ;;  %v7431_v46 = vadd.f32 %v1461_v9, %v9974_v44  ;;  %vm1206_vm2 = vweird.f32 %v7450_v54 }
 0x3bb   : > { %v1153_v31 = vsel %vm1150_vm3, %v1152_v40, %v1148_v6  ;;  %v1188_v6 = vmul.f32 %v7428_v43, %v1187_v19  ;;  %vm1205_vm3 = vweird.f32 %v7424_v18 }
 0x3bc   : > { %v2644_v41 = vpop.permute.xlu1 %2643  ;;  %v7400_v22 = vpop.xlane.xlu2 %1494  ;;  %v1154_v14 = vmul.f32 %v7207_v13, %v1153_v31  ;;  %v1167_v13 = vor.u32 1.1754944e-38, %v1166_v56  ;;  %v1203_v56 = vmul.f32 %v7450_v54, %v1202_v48  ;;  %vm1207_vm4 = vmor %vm1205_vm3, %vm1206_vm2 }
 0x3bd   : > { %5557 = vmatmul.msk.f32.gmra.mxu0 %vm732_vm1, %v2644_v41  ;;  %v1163_v41 = vsel %vm1162_vm6, %v7397_v61, %v1159_v30  ;;  %v1189_v40 = vadd.f32 %v7428_v43, %v1188_v6 }
 0x3be   : > { %1270 = vmatmul.f32.gmra.mxu3 %v1124_v7  ;;  %v1173_v7 = vmul.f32 %v7409_v53, %v1172_v59  ;;  %v1168_v1 = vsel %vm1165_vm7, %v1167_v13, %v1163_v41  ;;  %v1464_v59 = vpop.f32.mrf.mxu0  ;;  %v1204_v63 = vadd.f32 %v7450_v54, %v1203_v56  ;;  %v1209_v41 = vand.u32 2147483647, %v7424_v18 }
 0x3bf   : > { %v1169_v5 = vmul.f32 %v7204_v28, %v1168_v1  ;;  %v1182_v28 = vor.u32 1.1754944e-38, %v1181_v52  ;;  %v1193_v44 = vsel %vm1192_vm14, %v7428_v43, %v1189_v40  ;;  %v1211_v43 = vand.u32 2147483648, %v7424_v18 }
 0x3c0   : > { %v1174_v33 = vadd.f32 %v7409_v53, %v1173_v7  ;;  %v1208_v7 = vsel %vm1207_vm4, %v7450_v54, %v1204_v63  ;;  %v7493_v1 = vpack.i.bf16 %v9979_v45, %v9978_v12  ;;  %vm1210_vm5 = vcmp.eq.f32.partialorder %v1209_v41, 8.507059e+37  ;;  %v9986_v41 = vld [vmem:[#allocation14_spill] sm:$0xff] }
 0x3c1   : > { %v1212_v19 = vor.u32 1.1754944e-38, %v1211_v43  ;;  %v1226_v54 = vand.u32 2147483648, %v7384_v51  ;;  %vm1220_vm7 = vweird.f32 %v7384_v51 }
 0x3c2   : > { %v1178_v3 = vsel %vm1177_vm10, %v7409_v53, %v1174_v33  ;;  %v1523_v53 = vsub.f32 %v7227_v38, %v7400_v22  ;;  %v1197_v38 = vor.u32 1.1754944e-38, %v1196_v60 }
 0x3c3   : > { %v1183_v8 = vsel %vm1180_vm11, %v1182_v28, %v1178_v3  ;;  %v9980_v3 = vld [vmem:[#allocation31_spill] sm:$0xff] }
 0x3c4   : > { %v2646_v16 = vpop.permute.xlu1 %2645  ;;  %v7412_v39 = vpop.xlane.xlu2 %1498  ;;  %v1184_v21 = vmul.f32 %v7211_v15, %v1183_v8  ;;  %v1542_v22 = vmul.f32 1.442695, %v1523_v53  ;;  %v9976_v15 = vld [vmem:[#allocation26_spill] sm:$0xff] }
 0x3c5   : > { %5558 = vmatmul.msk.f32.gmra.mxu0 %vm732_vm1, %v2646_v16  ;;  %v7479_v58 = vadd.f32 %v1464_v59, %v9976_v15  ;;  %v9982_v8 = vld [vmem:[#allocation2_spill] sm:$0xff]  ;;  %v9985_v15 = vld [vmem:[#allocation9_spill] sm:$0xff] }
 0x3c6   : > { %1273 = vmatmul.f32.gmra.mxu3 %v1139_v42  ;;  %v7457_v42 = vpop.eup %5832  ;;  %5838 = vpow2.f32 %v1542_v22  ;;  %v7495_v33 = vpop.f32.mrf.mxu0 }
 0x3c7   : > { %v5835_v9 = vpop.eup %5834 }
 0x3c8   : > { %v7472_v31 = vpop.eup %5836  ;;  %v1216_v30 = vmul.f32 %v5835_v9, %v7384_v51  ;;  %vm1221_vm6 = vweird.f32 %v5835_v9 }
 0x3c9   : > { %vm1222_vm8 = vmor %vm1220_vm7, %vm1221_vm6 }
 0x3cc   : > { %v7434_v32 = vpop.permute.xlu1 %1993  ;;  %v2648_v50 = vpop.permute.xlu2 %2647 }
 0x3cd   : > { %1502 = vmax.xlane.f32.xlu0 %v7431_v46  ;;  %5559 = vmatmul.msk.f32.gmra.mxu0 %vm732_vm1, %v2648_v50  ;;  %v1198_v50 = vsel %vm1195_vm15, %v1197_v38, %v1193_v44  ;;  %v7499_v52 = vpop.eup %5838 }
 0x3ce   : > { %1276 = vmatmul.f32.gmra.mxu3 %v1154_v14  ;;  %v1217_v14 = vsub.f32 1.0, %v1216_v30  ;;  %v1199_v62 = vmul.f32 %v7215_v47, %v1198_v50  ;;  %v1213_v47 = vsel %vm1210_vm5, %v1212_v19, %v1208_v7  ;;  %v1470_v27 = vpop.f32.mrf.mxu0  ;;  %v9984_v30 = vld [vmem:[#allocation20_spill] sm:$0xff] }
 0x3cf   : > { %v1214_v25 = vmul.f32 %v7219_v37, %v1213_v47  ;;  %v9981_v37 = vld [vmem:[#allocation3_spill] sm:$0xff] }
 0x3d0   : > { %v1218_v13 = vmul.f32 %v5835_v9, %v1217_v14  ;;  %v7513_v48 = vpack.i.bf16 %v9982_v8, %v9981_v37 }
 0x3d2   : > { %v1219_v18 = vadd.f32 %v5835_v9, %v1218_v13 }
 0x3d3   : > { %v7523_v60 = vpop.f32.mrf.mxu3 }
 0x3d4   : > { %v5643_v61 = vpop.permute.xlu1 %5642  ;;  %v1223_v17 = vsel %vm1222_vm8, %v5835_v9, %v1219_v18  ;;  %v9983_v9 = vld [vmem:[#allocation16_spill] sm:$0xff]  ;;  %v5653_v53 = vpop.permute.xlu2 %5652  ;;  %v9987_v18 = vld [vmem:[#allocation21_spill] sm:$0xff] }
 0x3d5   : > { %v5645_v11 = vunpack.i.h.bf16 %v5643_v61  ;;  %v5644_v16 = vunpack.i.l.bf16 %v5643_v61  ;;  %v1224_v61 = vand.u32 2147483647, %v7384_v51  ;;  %v5654_v10 = vunpack.i.l.bf16 %v5653_v53 }
 0x3d6   : > { %1279 = vmatmul.f32.gmra.mxu3 %v1169_v5  ;;  %v7506_v5 = vpop.permute.xlu0 %1991  ;;  %v7519_v51 = vpop.f32.mrf.mxu0  ;;  %v5655_v59 = vunpack.i.h.bf16 %v5653_v53  ;;  %v6156_v53 = vld [vmem:[%s9886_s1 + $0x58] sm:$0xff] }
 0x3d7   : > { %1570 = vadd.xlane.f32.xlu1 %v7457_v42  ;;  %1904 = vmatpush.msra.mxu1 %v5644_v16  ;;  %vm1225_vm9 = vcmp.eq.f32.partialorder %v1224_v61, 8.507059e+37  ;;  %v6154_v61 = vld [vmem:[%s9886_s1 + $0x50] sm:$0xff] }
 0x3d9   : > { %1905 = vmatpush.msra.mxu1 %v5645_v11  ;;  %v1227_v11 = vor.u32 1.1754944e-38, %v1226_v54 }
 0x3db   : > { %v1228_v16 = vsel %vm1225_vm9, %v1227_v11, %v1223_v17  ;;  %v7532_v56 = vpop.f32.mrf.mxu3  ;;  %v7560_v17 = vadd.f32 %v6154_v61, %v1470_v27  ;;  %v1525_v27 = vsub.f32 %v7236_v29, %v7412_v39 }
 0x3dc   : > { %v1229_v6 = vmul.f32 %v9980_v3, %v1228_v16  ;;  %v6155_v16 = vld [vmem:[%s9886_s1 + $0x48] sm:$0xff] }
 0x3de   : > { %1282 = vmatmul.f32.gmra.mxu3 %v1184_v21  ;;  %v7529_v44 = vpop.f32.mrf.mxu0 }
 0x3df   : > { %1572 = vadd.xlane.f32.xlu1 %v7472_v31 }
 0x3e1   : > { %1999 = vrot.lane.b32.xlu0 %v9977_v49, %s6209_s24 }
 0x3e3   : > { %1504 = vmax.xlane.f32.xlu2 %v7479_v58 }
 0x3e6   : > { %1285 = vmatmul.f32.gmra.mxu3 %v1199_v62  ;;  %v7542_v50 = vpop.f32.mrf.mxu0 }
 0x3e9   : > { %5672 = vrot.lane.b32.xlu0 %v7493_v1, %s6206_s21 }
 0x3ea   : > { %v1497_v28 = vpop.xlane.xlu0 %1496 }
 0x3eb   : > { %1574 = vadd.xlane.f32.xlu2 %v7499_v52  ;;  %v1524_v47 = vsub.f32 %v7283_v20, %v1497_v28 }
 0x3ed   : > { %v1544_v20 = vmul.f32 1.442695, %v1524_v47  ;;  %v9994_v47 = vld [vmem:[#allocation24_spill] sm:$0xff] }
 0x3ee   : > { %1288 = vmatmul.f32.gmra.mxu3 %v1214_v25  ;;  %v7551_v45 = vpop.f32.mrf.mxu0 }
 0x3f1   : > { %2653 = vrot.lane.b32.xlu0 %v6732_v26, %s6210_s27 }
 0x3f6   : > { %1291 = vmatmul.f32.gmra.mxu3 %v1229_v6  ;;  %v1485_v8 = vpop.f32.mrf.mxu0 }
 0x3f8   : > { %5677 = vrot.lane.b32.xlu1 %v7513_v48, %s6206_s21 }
 0x3f9   : > { %2655 = vrot.lane.b32.xlu0 %v9949_v34, %s6210_s27 }
 0x3fd   : > { %v5648_v40 = vpop.permute.xlu0 %5647 }
 0x3fe   : > { %v5649_v26 = vunpack.i.l.bf16 %v5648_v40  ;;  %5517 = vmatmul.msk.f32.vlgmr.msrb.gmra.mxu3 %vm732_vm1, %v9983_v9  ;;  %v5650_v21 = vunpack.i.h.bf16 %v5648_v40  ;;  %v9988_v40 = vld [vmem:[#allocation22_spill] sm:$0xff] }
 0x400   : > { %1906 = vmatpush.msra.mxu1 %v5649_v26  ;;  %v1546_v26 = vmul.f32 1.442695, %v1525_v27 }
 0x402   : > { %1907 = vmatpush.msra.mxu1 %v5650_v21  ;;  %v7582_v21 = vadd.f32 %v6156_v53, %v7519_v51  ;;  %v6157_v51 = vld [vmem:[%s9886_s1 + $0x78] sm:$0xff] }
 0x403   : > { %2657 = vrot.lane.b32.xlu2 %v9977_v49, %s6210_s27  ;;  %v7540_v49 = vpop.permute.xlu1 %1995 }
 0x404   : > { %1908 = vmatpush.msra.mxu1 %v5654_v10  ;;  %v9990_v10 = vld [vmem:[#allocation27_spill] sm:$0xff] }
 0x405   : > { %v2650_v34 = vpop.permute.xlu0 %2649 }
 0x406   : > { %1909 = vmatpush.msra.mxu1 %v5655_v59  ;;  %5518 = vmatmul.msk.f32.gmra.mxu3 %vm732_vm1, %v9984_v30  ;;  %v2772_v59 = vpop.f32.mrf.mxu0 }
 0x407   : > { %5560 = vmatmul.msk.f32.gmra.mxu0 %vm732_vm1, %v2650_v34 }
 0x40b   : > { %v1501_v7 = vpop.xlane.xlu1 %1500 }
 0x40c   : > { %v1526_v19 = vsub.f32 %v7320_v2, %v1501_v7  ;;  %v7566_v2 = vadd.f32 %v6155_v16, %v7495_v33 }
 0x40d   : > { %v7534_v38 = vpop.permute.xlu0 %1997  ;;  %v7536_v22 = vpop.xlane.xlu2 %1568 }
 0x40e   : > { %5519 = vmatmul.msk.f32.gmra.mxu3 %vm732_vm1, %v9985_v15  ;;  %v1548_v54 = vmul.f32 1.442695, %v1526_v19  ;;  %v7600_v15 = vadd.f32 %v6157_v51, %v1485_v8  ;;  %vm1605_vm11 = vweird.f32 %v7536_v22 }
 0x410   : > { %5840 = vpow2.f32 %v1548_v54 }
 0x411   : > { %v7544_v14 = vpop.f32.mrf.mxu3  ;;  %5842 = vpow2.f32 %v1544_v20 }
 0x412   : > { %5844 = vpow2.f32 %v1546_v26  ;;  %v7676_v26 = vld [vmem:[%s9886_s1 + $0x18] sm:$0xff] }
 0x415   : > { %v5658_v63 = vpop.permute.xlu0 %5657  ;;  %v2652_v43 = vpop.permute.xlu2 %2651 }
 0x416   : > { %v5659_v62 = vunpack.i.l.bf16 %v5658_v63  ;;  %5520 = vmatmul.msk.f32.gmra.mxu3 %vm732_vm1, %v9986_v41  ;;  %5561 = vmatmul.msk.f32.gmra.mxu0 %vm732_vm1, %v2652_v43  ;;  %v5660_v13 = vunpack.i.h.bf16 %v5658_v63  ;;  %v7576_v9 = vpop.eup %5840  ;;  %v9992_v63 = vld [vmem:[#allocation23_spill] sm:$0xff]  ;;  %v6158_v43 = vld [vmem:[%s9886_s1 + $0x60] sm:$0xff]  ;;  %v2775_v41 = vpop.f32.mrf.mxu0 }
 0x417   : > { %v7587_v39 = vpop.eup %5842 }
 0x418   : > { %1910 = vmatpush.msra.mxu1 %v5659_v62  ;;  %v7595_v30 = vpop.eup %5844  ;;  %v7610_v62 = vadd.f32 %v6158_v43, %v7529_v44 }
 0x419   : > { %v7549_v12 = vpop.f32.mrf.mxu3 }
 0x41a   : > { %1911 = vmatpush.msra.mxu1 %v5660_v13  ;;  %v7617_v13 = vld [vmem:[%s9886_s1] sm:$0xff] }
 0x41b   : > { %v7620_v19 = vadd.f32 %v7617_v13, %v2772_v59 }
 0x41d   : > { %v5668_v3 = vpop.permute.xlu2 %5667 }
 0x41e   : > { %5521 = vmatmul.msk.f32.gmra.mxu3 %vm732_vm1, %v9987_v18  ;;  %v5669_v37 = vunpack.i.l.bf16 %v5668_v3  ;;  %v5670_v33 = vunpack.i.h.bf16 %v5668_v3  ;;  %v6160_v18 = vld [vmem:[%s9886_s1 + $0x68] sm:$0xff]  ;;  %v2778_v20 = vpop.f32.mrf.mxu0 }
 0x41f   : > { %v5663_v25 = vpop.permute.xlu1 %5662  ;;  %v7630_v54 = vadd.f32 %v6160_v18, %v7542_v50  ;;  %v9996_v50 = vld [vmem:[#allocation28_spill] sm:$0xff]  ;;  %v7696_v18 = vld [vmem:[%s9886_s1 + $0x20] sm:$0xff] }
 0x420   : > { %v5664_v11 = vunpack.i.l.bf16 %v5663_v25  ;;  %v5665_v28 = vunpack.i.h.bf16 %v5663_v25 }
 0x421   : > { %v7568_v6 = vpop.f32.mrf.mxu3 }
 0x422   : > { %1508 = vmax.xlane.f32.xlu1 %v7560_v17  ;;  %1912 = vmatpush.msra.mxu1 %v5664_v11  ;;  %v7638_v11 = vld [vmem:[%s9886_s1 + $0x8] sm:$0xff] }
 0x423   : > { %1506 = vmax.xlane.f32.xlu0 %v7566_v2  ;;  %v7641_v16 = vadd.f32 %v7638_v11, %v2775_v41 }
 0x424   : > { %1913 = vmatpush.msra.mxu1 %v5665_v28 }
 0x426   : > { %1914 = vmatpush.msra.mxu1 %v5669_v37  ;;  %5522 = vmatmul.msk.f32.gmra.mxu3 %vm732_vm1, %v9988_v40  ;;  %v7658_v37 = vld [vmem:[%s9886_s1 + $0x10] sm:$0xff] }
 0x427   : > { %v7661_v8 = vadd.f32 %v7658_v37, %v2778_v20 }
 0x428   : > { %1915 = vmatpush.msra.mxu1 %v5670_v33 }
 0x429   : > { %v7584_v29 = vpop.f32.mrf.mxu3 }
 0x42a   : > { %9989 = vst [vmem:[#allocation18_spill] sm:$0xff] %v7584_v29  ;;  %1580 = vadd.xlane.f32.xlu1 %v7576_v9 }
 0x42b   : > { %1510 = vmax.xlane.f32.xlu0 %v7582_v21 }
 0x42c   : > { %1576 = vadd.xlane.f32.xlu2 %v7587_v39 }
 0x42e   : > { %5523 = vmatmul.msk.f32.gmra.mxu3 %vm732_vm1, %v9990_v10 }
 0x431   : > { %v7593_v34 = vpop.f32.mrf.mxu3 }
 0x432   : > { %9991 = vst [vmem:[#allocation17_spill] sm:$0xff] %v7593_v34 }
 0x433   : > { %1578 = vadd.xlane.f32.xlu0 %v7595_v30 }
 0x434   : > { %1518 = vmax.xlane.f32.xlu2 %v7600_v15 }
 0x436   : > { %5524 = vmatmul.msk.f32.gmra.mxu3 %vm732_vm1, %v9992_v63 }
 0x439   : > { %v7612_v7 = vpop.f32.mrf.mxu3 }
 0x43a   : > { %9993 = vst [vmem:[#allocation12_spill] sm:$0xff] %v7612_v7 }
 0x43b   : > { %1512 = vmax.xlane.f32.xlu0 %v7610_v62 }
 0x43c   : > { %2820 = vmax.xlane.f32.xlu2 %v7620_v19 }
 0x43e   : > { %5525 = vmatmul.msk.f32.gmra.mxu3 %vm732_vm1, %v9994_v47 }
 0x440   : > { %v1503_v44 = vpop.xlane.xlu0 %1502 }
 0x441   : > { %v1527_v25 = vsub.f32 %v7431_v46, %v1503_v44  ;;  %v7633_v61 = vpop.f32.mrf.mxu3  ;;  %v6162_v46 = vld [vmem:[%s9886_s1 + $0x70] sm:$0xff] }
 0x442   : > { %9995 = vst [vmem:[#allocation10_spill] sm:$0xff] %v7633_v61  ;;  %v7651_v28 = vadd.f32 %v6162_v46, %v7551_v45  ;;  %v2781_v45 = vpop.f32.mrf.mxu0 }
 0x443   : > { %v1550_v3 = vmul.f32 1.442695, %v1527_v25  ;;  %1514 = vmax.xlane.f32.xlu0 %v7630_v54  ;;  %v7679_v53 = vadd.f32 %v7676_v26, %v2781_v45 }
 0x444   : > { %2822 = vmax.xlane.f32.xlu2 %v7641_v16 }
 0x445   : > { %5846 = vpow2.f32 %v1550_v3 }
 0x446   : > { %5526 = vmatmul.msk.f32.gmra.mxu3 %vm732_vm1, %v9996_v50  ;;  %5848 = vrcp.f32 %v7536_v22 }
 0x449   : > { %v7653_v27 = vpop.f32.mrf.mxu3 }
 0x44a   : > { %9997 = vst [vmem:[#allocation15_spill] sm:$0xff] %v7653_v27  ;;  %v7681_v10 = vpop.xlane.xlu1 %1570  ;;  %v2784_v63 = vpop.f32.mrf.mxu0 }
 0x44b   : > { %v7663_v33 = vpop.eup %5846  ;;  %1516 = vmax.xlane.f32.xlu0 %v7651_v28  ;;  %5850 = vrcp.f32 %v7681_v10  ;;  %v7699_v25 = vadd.f32 %v7696_v18, %v2784_v63  ;;  %vm1620_vm15 = vweird.f32 %v7681_v10 }
 0x44c   : > { %1582 = vadd.xlane.f32.xlu1 %v7663_v33  ;;  %2824 = vmax.xlane.f32.xlu2 %v7661_v8  ;;  %v5849_v51 = vpop.eup %5848 }
 0x44d   : > { %v1601_v41 = vmul.f32 %v5849_v51, %v7536_v22  ;;  %vm1606_vm10 = vweird.f32 %v5849_v51 }
 0x44e   : > { %5527 = vmatmul.msk.f32.gmra.mxu3 %vm732_vm1, %v7278_v24  ;;  %vm1607_vm12 = vmor %vm1605_vm11, %vm1606_vm10 }
 0x44f   : > { %v1602_v20 = vsub.f32 1.0, %v1601_v41 }
 0x451   : > { %v7671_v40 = vpop.f32.mrf.mxu3  ;;  %v1603_v45 = vmul.f32 %v5849_v51, %v1602_v20  ;;  %v1611_v20 = vand.u32 2147483648, %v7536_v22 }
 0x452   : > { %9998 = vst [vmem:[#allocation13_spill] sm:$0xff] %v7671_v40  ;;  %v7701_v3 = vpop.xlane.xlu1 %1572 }
 0x453   : > { %v7683_v59 = vpop.permute.xlu0 %1999  ;;  %vm1635_vm5 = vweird.f32 %v7701_v3 }
 0x454   : > { %2826 = vmax.xlane.f32.xlu2 %v7679_v53 }
 0x456   : > { %5528 = vmatmul.msk.f32.gmra.mxu3 %vm732_vm1, %v7506_v5  ;;  %v1505_v24 = vpop.xlane.xlu2 %1504 }
 0x457   : > { %v1528_v43 = vsub.f32 %v7479_v58, %v1505_v24  ;;  %v5851_v58 = vpop.eup %5850 }
 0x458   : > { %v1616_v24 = vmul.f32 %v5851_v58, %v7681_v10  ;;  %vm1621_vm14 = vweird.f32 %v5851_v58 }
 0x459   : > { %v1552_v47 = vmul.f32 1.442695, %v1528_v43  ;;  %v7691_v44 = vpop.f32.mrf.mxu3  ;;  %vm1622_vm2 = vmor %vm1620_vm15, %vm1621_vm14 }
 0x45a   : > { %9999 = vst [vmem:[#allocation8_spill] sm:$0xff] %v7691_v44  ;;  %v1612_v44 = vor.u32 1.1754944e-38, %v1611_v20 }
 0x45b   : > { %5852 = vpow2.f32 %v1552_v47  ;;  %v5673_v5 = vpop.permute.xlu0 %5672  ;;  %v1604_v47 = vadd.f32 %v5849_v51, %v1603_v45 }
 0x45c   : > { %v5674_v50 = vunpack.i.l.bf16 %v5673_v5  ;;  %2828 = vmax.xlane.f32.xlu2 %v7699_v25  ;;  %v5675_v46 = vunpack.i.h.bf16 %v5673_v5  ;;  %5854 = vrcp.f32 %v7701_v3 }
 0x45d   : > { %v1608_v45 = vsel %vm1607_vm12, %v5849_v51, %v1604_v47  ;;  %v1624_v47 = vand.u32 2147483647, %v7681_v10 }
 0x45e   : > { %5529 = vmatmul.msk.f32.gmra.mxu3 %vm732_vm1, %v7434_v32  ;;  %1916 = vmatpush.msra.mxu1 %v5674_v50  ;;  %v1617_v32 = vsub.f32 1.0, %v1616_v24  ;;  %v7715_v5 = vpop.xlane.xlu2 %1574 }
 0x45f   : > { %5687 = vrot.lane.b32.xlu0 %v7303_v35, %s6209_s24  ;;  %5856 = vrcp.f32 %v7715_v5  ;;  %vm1625_vm3 = vcmp.eq.f32.partialorder %v1624_v47, 8.507059e+37  ;;  %vm1650_vm9 = vweird.f32 %v7715_v5 }
 0x460   : > { %1917 = vmatpush.msra.mxu1 %v5675_v46  ;;  %v1609_v46 = vand.u32 2147483647, %v7536_v22 }
 0x461   : > { %v7710_v63 = vpop.eup %5852  ;;  %v7712_v43 = vpop.f32.mrf.mxu3 }
 0x462   : > { %10000 = vst [vmem:[#allocation7_spill] sm:$0xff] %v7712_v43  ;;  %1584 = vadd.xlane.f32.xlu1 %v7710_v63  ;;  %v5855_v50 = vpop.eup %5854  ;;  %v1618_v43 = vmul.f32 %v5851_v58, %v1617_v32  ;;  %vm1610_vm13 = vcmp.eq.f32.partialorder %v1609_v46, 8.507059e+37 }
 0x463   : > { %v2654_v41 = vpop.permute.xlu0 %2653  ;;  %v1631_v24 = vmul.f32 %v5855_v50, %v7701_v3  ;;  %v1613_v61 = vsel %vm1610_vm13, %v1612_v44, %v1608_v45  ;;  %vm1636_vm4 = vweird.f32 %v5855_v50 }
 0x464   : > { %5562 = vmatmul.msk.f32.gmra.mxu0 %vm732_vm1, %v2654_v41  ;;  %v1619_v34 = vadd.f32 %v5851_v58, %v1618_v43  ;;  %v1614_v51 = vmul.f32 %v7336_v23, %v1613_v61  ;;  %v1641_v23 = vand.u32 2147483648, %v7701_v3  ;;  %vm1637_vm6 = vmor %vm1635_vm5, %vm1636_vm4 }
 0x465   : > { %v1632_v7 = vsub.f32 1.0, %v1631_v24  ;;  %v5857_v22 = vpop.eup %5856 }
 0x466   : > { %5530 = vmatmul.msk.f32.gmra.mxu3 %vm732_vm1, %v7540_v49  ;;  %v1626_v49 = vand.u32 2147483648, %v7681_v10  ;;  %v1646_v44 = vmul.f32 %v5857_v22, %v7715_v5  ;;  %v1623_v43 = vsel %vm1622_vm2, %v5851_v58, %v1619_v34  ;;  %v1639_v34 = vand.u32 2147483647, %v7701_v3 }
 0x467   : > { %v1633_v32 = vmul.f32 %v5855_v50, %v1632_v7  ;;  %v1642_v58 = vor.u32 1.1754944e-38, %v1641_v23  ;;  %vm1651_vm8 = vweird.f32 %v5857_v22  ;;  %v1654_v3 = vand.u32 2147483647, %v7715_v5 }
 0x468   : > { %v1647_v45 = vsub.f32 1.0, %v1646_v44  ;;  %vm1640_vm7 = vcmp.eq.f32.partialorder %v1639_v34, 8.507059e+37  ;;  %vm1652_vm10 = vmor %vm1650_vm9, %vm1651_vm8 }
 0x469   : > { %v7725_v40 = vpop.f32.mrf.mxu3  ;;  %vm1655_vm11 = vcmp.eq.f32.partialorder %v1654_v3, 8.507059e+37 }
 0x46a   : > { %v5678_v41 = vpop.permute.xlu1 %5677  ;;  %v1648_v61 = vmul.f32 %v5857_v22, %v1647_v45 }
 0x46b   : > { %v5679_v27 = vunpack.i.l.bf16 %v5678_v41  ;;  %v5680_v29 = vunpack.i.h.bf16 %v5678_v41 }
 0x46c   : > { %v1649_v41 = vadd.f32 %v5857_v22, %v1648_v61 }
 0x46d   : > { %1918 = vmatpush.msra.mxu1 %v5679_v27  ;;  %v1627_v27 = vor.u32 1.1754944e-38, %v1626_v49  ;;  %v2656_v49 = vpop.permute.xlu0 %2655 }
 0x46e   : > { %5531 = vmatmul.msk.f32.gmra.mxu3 %vm732_vm1, %v7534_v38  ;;  %v1634_v38 = vadd.f32 %v5855_v50, %v1633_v32 }
 0x46f   : > { %1919 = vmatpush.msra.mxu1 %v5680_v29  ;;  %v1628_v46 = vsel %vm1625_vm3, %v1627_v27, %v1623_v43  ;;  %v2658_v43 = vpop.permute.xlu2 %2657 }
 0x470   : > { %1920 = vmatmul.f32.vlgmr.msra.gmra.mxu1 %v1614_v51  ;;  %v1629_v29 = vmul.f32 %v7457_v42, %v1628_v46  ;;  %v1638_v7 = vsel %vm1637_vm6, %v5855_v50, %v1634_v38  ;;  %v1653_v50 = vsel %vm1652_vm10, %v5857_v22, %v1649_v41 }
 0x471   : > { %v7734_v20 = vpop.f32.mrf.mxu3  ;;  %v1643_v24 = vsel %vm1640_vm7, %v1642_v58, %v1638_v7 }
 0x472   : > { %v1644_v42 = vmul.f32 %v7472_v31, %v1643_v24 }
 0x476   : > { %5532 = vmatmul.msk.f32.gmra.mxu3 %vm732_vm1, %v7683_v59  ;;  %v1656_v59 = vand.u32 2147483648, %v7715_v5 }
 0x478   : > { %1923 = vmatmul.f32.gmra.mxu1 %v1629_v29  ;;  %v1657_v47 = vor.u32 1.1754944e-38, %v1656_v59 }
 0x479   : > { %v7742_v10 = vpop.f32.mrf.mxu3 }
 0x47a   : > { %10001 = vst [vmem:[#allocation6_spill] sm:$0xff] %v7742_v10  ;;  %v1658_v44 = vsel %vm1655_vm11, %v1657_v47, %v1653_v50 }
 0x47b   : > { %v1659_v32 = vmul.f32 %v7499_v52, %v1658_v44 }
 0x47e   : > { %5563 = vmatmul.msk.f32.vlgmr.msra.gmra.mxu3 %vm732_vm1, %v2656_v49 }
 0x480   : > { %1926 = vmatmul.f32.gmra.mxu1 %v1644_v42 }
 0x481   : > { %v2114_v51 = vpop.f32.mrf.mxu3 }
 0x482   : > { %v7752_v27 = vadd.f32 %v7617_v13, %v2114_v51 }
 0x486   : > { %5564 = vmatmul.msk.f32.gmra.mxu3 %vm732_vm1, %v2658_v43 }
 0x488   : > { %1929 = vmatmul.f32.gmra.mxu1 %v1659_v32 }
 0x489   : > { %v2117_v31 = vpop.f32.mrf.mxu3  ;;  %2162 = vmax.xlane.f32.xlu0 %v7752_v27 }
 0x48a   : > { %v7756_v5 = vadd.f32 %v7638_v11, %v2117_v31 }
 0x491   : > { %v2120_v22 = vpop.f32.mrf.mxu3  ;;  %2164 = vmax.xlane.f32.xlu0 %v7756_v5 }
 0x492   : > { %v7760_v38 = vadd.f32 %v7658_v37, %v2120_v22 }
 0x495   : > { %v1509_v46 = vpop.xlane.xlu1 %1508 }
 0x496   : > { %v1507_v45 = vpop.xlane.xlu0 %1506  ;;  %v1530_v29 = vsub.f32 %v7560_v17, %v1509_v46 }
 0x497   : > { %v1529_v52 = vsub.f32 %v7566_v2, %v1507_v45 }
 0x498   : > { %v1556_v11 = vmul.f32 1.442695, %v1530_v29 }
 0x499   : > { %v1554_v23 = vmul.f32 1.442695, %v1529_v52  ;;  %v2123_v13 = vpop.f32.mrf.mxu3  ;;  %2166 = vmax.xlane.f32.xlu0 %v7760_v38  ;;  %v7790_v52 = vld [vmem:[%s9886_s1 + $0x28] sm:$0xff] }
 0x49a   : > { %v7766_v7 = vadd.f32 %v7676_v26, %v2123_v13 }
 0x49b   : > { %5858 = vpow2.f32 %v1554_v23 }
 0x49d   : > { %v7768_v61 = vpop.xlane.xlu1 %1580 }
 0x49e   : > { %v1511_v34 = vpop.xlane.xlu0 %1510  ;;  %vm1695_vm7 = vweird.f32 %v7768_v61 }
 0x49f   : > { %v1577_v58 = vpop.xlane.xlu2 %1576  ;;  %v1531_v17 = vsub.f32 %v7582_v21, %v1511_v34 }
 0x4a0   : > { %5860 = vrcp.f32 %v1577_v58  ;;  %v1669_v51 = vand.u32 2147483647, %v1577_v58  ;;  %v1671_v47 = vand.u32 2147483648, %v1577_v58  ;;  %vm1665_vm13 = vweird.f32 %v1577_v58 }
 0x4a1   : > { %v7770_v37 = vpop.eup %5858  ;;  %2168 = vmax.xlane.f32.xlu0 %v7766_v7  ;;  %5862 = vrcp.f32 %v7768_v61  ;;  %v2126_v2 = vpop.f32.mrf.mxu3  ;;  %v1558_v26 = vmul.f32 1.442695, %v1531_v17 }
 0x4a2   : > { %1586 = vadd.xlane.f32.xlu1 %v7770_v37  ;;  %5864 = vpow2.f32 %v1556_v11  ;;  %v7777_v59 = vadd.f32 %v7696_v18, %v2126_v2  ;;  %vm1670_vm15 = vcmp.eq.f32.partialorder %v1669_v51, 8.507059e+37  ;;  %v1672_v46 = vor.u32 1.1754944e-38, %v1671_v47 }
 0x4a6   : > { %v5861_v24 = vpop.eup %5860  ;;  %v1579_v41 = vpop.xlane.xlu0 %1578 }
 0x4a7   : > { %v1661_v49 = vmul.f32 %v5861_v24, %v1577_v58  ;;  %5866 = vrcp.f32 %v1579_v41  ;;  %v7779_v42 = vpop.eup %5862  ;;  %vm1666_vm12 = vweird.f32 %v5861_v24  ;;  %vm1680_vm3 = vweird.f32 %v1579_v41 }
 0x4a8   : > { %v7781_v3 = vpop.eup %5864  ;;  %v1691_v21 = vmul.f32 %v7779_v42, %v7768_v61  ;;  %5868 = vpow2.f32 %v1558_v26  ;;  %vm1667_vm14 = vmor %vm1665_vm13, %vm1666_vm12  ;;  %v1686_v26 = vand.u32 2147483648, %v1579_v41  ;;  %vm1696_vm6 = vweird.f32 %v7779_v42 }
 0x4a9   : > { %v1662_v50 = vsub.f32 1.0, %v1661_v49  ;;  %2170 = vmax.xlane.f32.xlu0 %v7777_v59  ;;  %v2129_v18 = vpop.f32.mrf.mxu3  ;;  %vm1697_vm8 = vmor %vm1695_vm7, %vm1696_vm6 }
 0x4aa   : > { %1588 = vadd.xlane.f32.xlu1 %v7781_v3  ;;  %v1692_v45 = vsub.f32 1.0, %v1691_v21  ;;  %v7793_v23 = vadd.f32 %v7790_v52, %v2129_v18  ;;  %v1687_v51 = vor.u32 1.1754944e-38, %v1686_v26 }
 0x4ab   : > { %v1663_v44 = vmul.f32 %v5861_v24, %v1662_v50  ;;  %v1684_v50 = vand.u32 2147483647, %v1579_v41 }
 0x4ad   : > { %v5867_v43 = vpop.eup %5866  ;;  %v1664_v32 = vadd.f32 %v5861_v24, %v1663_v44  ;;  %vm1685_vm5 = vcmp.eq.f32.partialorder %v1684_v50, 8.507059e+37 }
 0x4ae   : > { %v1676_v31 = vmul.f32 %v5867_v43, %v1579_v41  ;;  %v1513_v22 = vpop.xlane.xlu0 %1512  ;;  %v7796_v58 = vpop.eup %5868  ;;  %vm1681_vm2 = vweird.f32 %v5867_v43  ;;  %v1699_v41 = vand.u32 2147483647, %v7768_v61 }
 0x4af   : > { %v1532_v13 = vsub.f32 %v7610_v62, %v1513_v22  ;;  %v1668_v29 = vsel %vm1667_vm14, %v5861_v24, %v1664_v32  ;;  %v1693_v62 = vmul.f32 %v7779_v42, %v1692_v45  ;;  %vm1682_vm4 = vmor %vm1680_vm3, %vm1681_vm2 }
 0x4b0   : > { %v1677_v34 = vsub.f32 1.0, %v1676_v31  ;;  %v1673_v11 = vsel %vm1670_vm15, %v1672_v46, %v1668_v29  ;;  %v1701_v31 = vand.u32 2147483648, %v7768_v61  ;;  %vm1700_vm9 = vcmp.eq.f32.partialorder %v1699_v41, 8.507059e+37 }
 0x4b1   : > { %v1560_v2 = vmul.f32 1.442695, %v1532_v13  ;;  %2172 = vmax.xlane.f32.xlu0 %v7793_v23  ;;  %v1674_v17 = vmul.f32 %v7587_v39, %v1673_v11  ;;  %v1694_v18 = vadd.f32 %v7779_v42, %v1693_v62  ;;  %v2787_v62 = vpop.f32.mrf.mxu0 }
 0x4b2   : > { %1590 = vadd.xlane.f32.xlu1 %v7796_v58  ;;  %v1678_v49 = vmul.f32 %v5867_v43, %v1677_v34 }
 0x4b3   : > { %5870 = vpow2.f32 %v1560_v2  ;;  %1932 = vmatmul.f32.gmra.mxu1 %v1674_v17 }
 0x4b4   : > { %v1679_v24 = vadd.f32 %v5867_v43, %v1678_v49 }
 0x4b6   : > { %v1515_v47 = vpop.xlane.xlu0 %1514  ;;  %v1683_v21 = vsel %vm1682_vm4, %v5867_v43, %v1679_v24  ;;  %v1702_v43 = vor.u32 1.1754944e-38, %v1701_v31 }
 0x4b7   : > { %v1533_v44 = vsub.f32 %v7630_v54, %v1515_v47  ;;  %v1688_v39 = vsel %vm1685_vm5, %v1687_v51, %v1683_v21  ;;  %v1698_v54 = vsel %vm1697_vm8, %v7779_v42, %v1694_v18  ;;  %v7824_v47 = vadd.f32 %v7790_v52, %v2787_v62 }
 0x4b8   : > { %v1689_v32 = vmul.f32 %v7595_v30, %v1688_v39  ;;  %v1703_v30 = vsel %vm1700_vm9, %v1702_v43, %v1698_v54 }
 0x4b9   : > { %v7807_v22 = vpop.eup %5870  ;;  %v1562_v46 = vmul.f32 1.442695, %v1533_v44  ;;  %v1704_v61 = vmul.f32 %v7576_v9, %v1703_v30 }
 0x4ba   : > { %1592 = vadd.xlane.f32.xlu1 %v7807_v22 }
 0x4bb   : > { %5872 = vpow2.f32 %v1562_v46  ;;  %1935 = vmatmul.f32.gmra.mxu1 %v1689_v32  ;;  %v1519_v32 = vpop.xlane.xlu2 %1518 }
 0x4bc   : > { %v1535_v41 = vsub.f32 %v7600_v15, %v1519_v32 }
 0x4be   : > { %v1517_v45 = vpop.xlane.xlu0 %1516 }
 0x4bf   : > { %v1534_v13 = vsub.f32 %v7651_v28, %v1517_v45  ;;  %v1583_v29 = vpop.xlane.xlu1 %1582 }
 0x4c0   : > { %5874 = vrcp.f32 %v1583_v29  ;;  %v1716_v28 = vand.u32 2147483648, %v1583_v29  ;;  %v1714_v50 = vand.u32 2147483647, %v1583_v29  ;;  %vm1710_vm11 = vweird.f32 %v1583_v29 }
 0x4c1   : > { %v7814_v34 = vpop.eup %5872  ;;  %v1564_v11 = vmul.f32 1.442695, %v1534_v13 }
 0x4c2   : > { %1594 = vadd.xlane.f32.xlu1 %v7814_v34  ;;  %v1717_v24 = vor.u32 1.1754944e-38, %v1716_v28  ;;  %vm1715_vm13 = vcmp.eq.f32.partialorder %v1714_v50, 8.507059e+37 }
 0x4c3   : > { %5876 = vpow2.f32 %v1564_v11  ;;  %1938 = vmatmul.f32.gmra.mxu1 %v1704_v61  ;;  %v2132_v61 = vpop.f32.mrf.mxu3 }
 0x4c5   : > { %5697 = vrot.lane.b32.xlu0 %v7272_v4, %s6209_s24 }
 0x4c6   : > { %v5875_v42 = vpop.eup %5874 }
 0x4c7   : > { %v1706_v2 = vmul.f32 %v5875_v42, %v1583_v29  ;;  %vm1711_vm10 = vweird.f32 %v5875_v42 }
 0x4c8   : > { %vm1712_vm12 = vmor %vm1710_vm11, %vm1711_vm10 }
 0x4c9   : > { %v7820_v17 = vpop.eup %5876  ;;  %v1707_v26 = vsub.f32 1.0, %v1706_v2 }
 0x4ca   : > { %1596 = vadd.xlane.f32.xlu2 %v7820_v17 }
 0x4cb   : > { %v1708_v49 = vmul.f32 %v5875_v42, %v1707_v26  ;;  %v2790_v26 = vpop.f32.mrf.mxu0 }
 0x4cd   : > { %v1709_v9 = vadd.f32 %v5875_v42, %v1708_v49 }
 0x4cf   : > { %v1713_v51 = vsel %vm1712_vm12, %v5875_v42, %v1709_v9  ;;  %v6167_v42 = vld [vmem:[%s9886_s1 + $0x30] sm:$0xff]  ;;  %v2135_v9 = vpop.f32.mrf.mxu3 }
 0x4d0   : > { %v1718_v21 = vsel %vm1715_vm13, %v1717_v24, %v1713_v51  ;;  %v7840_v2 = vadd.f32 %v6167_v42, %v2132_v61  ;;  %v7851_v49 = vadd.f32 %v6167_v42, %v2790_v26 }
 0x4d1   : > { %v1719_v44 = vmul.f32 %v7663_v33, %v1718_v21  ;;  %v1566_v33 = vmul.f32 1.442695, %v1535_v41  ;;  %v7862_v21 = vld [vmem:[%s9886_s1 + $0x38] sm:$0xff] }
 0x4d2   : > { %2830 = vmax.xlane.f32.xlu2 %v7824_v47 }
 0x4d3   : > { %1941 = vmatmul.f32.gmra.mxu1 %v1719_v44  ;;  %v7865_v44 = vadd.f32 %v7862_v21, %v2135_v9 }
 0x4d5   : > { %v1585_v39 = vpop.xlane.xlu1 %1584 }
 0x4d6   : > { %5878 = vrcp.f32 %v1585_v39  ;;  %v1731_v54 = vand.u32 2147483648, %v1585_v39  ;;  %v1729_v43 = vand.u32 2147483647, %v1585_v39  ;;  %vm1725_vm15 = vweird.f32 %v1585_v39 }
 0x4d7   : > { %5880 = vpow2.f32 %v1566_v33 }
 0x4d8   : > { %v1732_v30 = vor.u32 1.1754944e-38, %v1731_v54  ;;  %vm1730_vm3 = vcmp.eq.f32.partialorder %v1729_v43, 8.507059e+37 }
 0x4db   : > { %5682 = vrot.lane.b32.xlu1 %v7254_v57, %s6209_s24 }
 0x4dc   : > { %v5879_v18 = vpop.eup %5878 }
 0x4dd   : > { %v1721_v31 = vmul.f32 %v5879_v18, %v1585_v39  ;;  %vm1726_vm14 = vweird.f32 %v5879_v18  ;;  %v7834_v15 = vpop.eup %5880 }
 0x4de   : > { %vm1727_vm2 = vmor %vm1725_vm15, %vm1726_vm14 }
 0x4df   : > { %v1722_v46 = vsub.f32 1.0, %v1721_v31 }
 0x4e1   : > { %v1723_v52 = vmul.f32 %v5879_v18, %v1722_v46 }
 0x4e3   : > { %v1724_v45 = vadd.f32 %v5879_v18, %v1723_v52 }
 0x4e5   : > { %v1728_v13 = vsel %vm1727_vm2, %v5879_v18, %v1724_v45 }
 0x4e6   : > { %v1733_v29 = vsel %vm1730_vm3, %v1732_v30, %v1728_v13 }
 0x4e7   : > { %v1734_v11 = vmul.f32 %v7710_v63, %v1733_v29  ;;  %v7845_v63 = vpop.permute.xlu0 %5687 }
 0x4e9   : > { %1944 = vmatmul.f32.gmra.mxu1 %v1734_v11 }
 0x4ea   : > { %5692 = vrot.lane.b32.xlu2 %v7254_v57, %s6210_s27  ;;  %v7849_v57 = vpop.xlane.xlu2 %2820 }
 0x4ef   : > { %1598 = vadd.xlane.f32.xlu0 %v7834_v15 }
 0x4f2   : > { %v7857_v24 = vpop.xlane.xlu2 %2822 }
 0x4fa   : > { %v7871_v54 = vpop.xlane.xlu2 %2824 }
 0x4fc   : > { %v2163_v28 = vpop.xlane.xlu0 %2162 }
 0x4fd   : > { %v2194_v50 = vsub.f32 %v7752_v27, %v2163_v28 }
 0x4ff   : > { %v2210_v51 = vmul.f32 1.442695, %v2194_v50 }
 0x502   : > { %v7881_v9 = vpop.xlane.xlu2 %2826 }
 0x503   : > { %5707 = vrot.lane.b32.xlu0 %v7351_v0, %s6209_s24 }
 0x504   : > { %v2165_v39 = vpop.xlane.xlu0 %2164 }
 0x505   : > { %2174 = vmax.xlane.f32.xlu1 %v7840_v2  ;;  %v2195_v27 = vsub.f32 %v7756_v5, %v2165_v39 }
 0x507   : > { %v2212_v46 = vmul.f32 1.442695, %v2195_v27 }
 0x50b   : > { %5717 = vrot.lane.b32.xlu0 %v7365_v55, %s6209_s24 }
 0x513   : > { %2832 = vmax.xlane.f32.xlu2 %v7851_v49  ;;  %5722 = vrot.lane.b32.xlu0 %v7351_v0, %s6210_s27 }
 0x515   : > { %v1587_v62 = vpop.xlane.xlu1 %1586 }
 0x516   : > { %5882 = vrcp.f32 %v1587_v62  ;;  %v1746_v41 = vand.u32 2147483648, %v1587_v62  ;;  %v1744_v43 = vand.u32 2147483647, %v1587_v62  ;;  %vm1740_vm5 = vweird.f32 %v1587_v62 }
 0x517   : > { %5884 = vpow2.f32 %v2210_v51 }
 0x518   : > { %v1747_v30 = vor.u32 1.1754944e-38, %v1746_v41  ;;  %vm1745_vm7 = vcmp.eq.f32.partialorder %v1744_v43, 8.507059e+37 }
 0x51b   : > { %2176 = vmax.xlane.f32.xlu2 %v7865_v44 }
 0x51c   : > { %v5883_v0 = vpop.eup %5882 }
 0x51d   : > { %v1736_v18 = vmul.f32 %v5883_v0, %v1587_v62  ;;  %v1589_v32 = vpop.xlane.xlu1 %1588  ;;  %vm1741_vm4 = vweird.f32 %v5883_v0  ;;  %v7873_v45 = vpop.eup %5884 }
 0x51e   : > { %5886 = vrcp.f32 %v1589_v32  ;;  %5702 = vrot.lane.b32.xlu1 %v7303_v35, %s6210_s27  ;;  %vm1742_vm6 = vmor %vm1740_vm5, %vm1741_vm4  ;;  %v1761_v26 = vand.u32 2147483648, %v1589_v32  ;;  %v1759_v50 = vand.u32 2147483647, %v1589_v32  ;;  %vm1755_vm9 = vweird.f32 %v1589_v32 }
 0x51f   : > { %v1737_v31 = vsub.f32 1.0, %v1736_v18  ;;  %5888 = vpow2.f32 %v2212_v46 }
 0x520   : > { %vm1760_vm11 = vcmp.eq.f32.partialorder %v1759_v50, 8.507059e+37 }
 0x521   : > { %v1738_v52 = vmul.f32 %v5883_v0, %v1737_v31 }
 0x523   : > { %2242 = vadd.xlane.f32.xlu2 %v7873_v45  ;;  %v1739_v33 = vadd.f32 %v5883_v0, %v1738_v52 }
 0x524   : > { %v5887_v5 = vpop.eup %5886 }
 0x525   : > { %v1751_v13 = vmul.f32 %v5887_v5, %v1589_v32  ;;  %v1591_v35 = vpop.xlane.xlu1 %1590  ;;  %v1743_v29 = vsel %vm1742_vm6, %v5883_v0, %v1739_v33  ;;  %vm1756_vm8 = vweird.f32 %v5887_v5  ;;  %v7879_v62 = vpop.eup %5888 }
 0x526   : > { %5890 = vrcp.f32 %v1591_v35  ;;  %5712 = vrot.lane.b32.xlu1 %v7272_v4, %s6210_s27  ;;  %v1748_v11 = vsel %vm1745_vm7, %v1747_v30, %v1743_v29  ;;  %vm1757_vm10 = vmor %vm1755_vm9, %vm1756_vm8  ;;  %v1762_v4 = vor.u32 1.1754944e-38, %v1761_v26  ;;  %v2167_v0 = vpop.xlane.xlu0 %2166  ;;  %v1776_v52 = vand.u32 2147483648, %v1591_v35 }
 0x527   : > { %v1752_v61 = vsub.f32 1.0, %v1751_v13  ;;  %v1749_v42 = vmul.f32 %v7770_v37, %v1748_v11  ;;  %v1774_v33 = vand.u32 2147483647, %v1591_v35  ;;  %vm1770_vm13 = vweird.f32 %v1591_v35 }
 0x528   : > { %v1777_v13 = vor.u32 1.1754944e-38, %v1776_v52  ;;  %v2853_v29 = vsub.f32 %v7641_v16, %v7857_v24  ;;  %v2196_v52 = vsub.f32 %v7760_v38, %v2167_v0 }
 0x529   : > { %1947 = vmatmul.f32.gmra.mxu1 %v1749_v42  ;;  %v1753_v28 = vmul.f32 %v5887_v5, %v1752_v61  ;;  %vm1775_vm15 = vcmp.eq.f32.partialorder %v1774_v33, 8.507059e+37 }
 0x52b   : > { %2244 = vadd.xlane.f32.xlu2 %v7879_v62  ;;  %v1754_v51 = vadd.f32 %v5887_v5, %v1753_v28 }
 0x52c   : > { %v5891_v39 = vpop.eup %5890 }
 0x52d   : > { %v1766_v27 = vmul.f32 %v5891_v39, %v1591_v35  ;;  %v1593_v18 = vpop.xlane.xlu1 %1592  ;;  %v1758_v37 = vsel %vm1757_vm10, %v5887_v5, %v1754_v51  ;;  %vm1771_vm12 = vweird.f32 %v5891_v39  ;;  %v7887_v5 = vpop.xlane.xlu2 %2828 }
 0x52e   : > { %5892 = vrcp.f32 %v1593_v18  ;;  %v1763_v31 = vsel %vm1760_vm11, %v1762_v4, %v1758_v37  ;;  %vm1772_vm14 = vmor %vm1770_vm13, %vm1771_vm12  ;;  %v7889_v26 = vpop.xlane.xlu0 %2168  ;;  %v2793_v35 = vpop.f32.mrf.mxu0  ;;  %v1791_v51 = vand.u32 2147483648, %v1593_v18  ;;  %v2870_v4 = vmul.f32 1.442695, %v2853_v29 }
 0x52f   : > { %v1767_v46 = vsub.f32 1.0, %v1766_v27  ;;  %v1764_v41 = vmul.f32 %v7781_v3, %v1763_v31  ;;  %v1789_v16 = vand.u32 2147483647, %v1593_v18  ;;  %v7893_v24 = vadd.f32 %v7862_v21, %v2793_v35 }
 0x530   : > { %vm1785_vm3 = vweird.f32 %v1593_v18  ;;  %v1792_v31 = vor.u32 1.1754944e-38, %v1791_v51 }
 0x531   : > { %1950 = vmatmul.f32.gmra.mxu1 %v1764_v41  ;;  %v1768_v43 = vmul.f32 %v5891_v39, %v1767_v46  ;;  %vm1790_vm5 = vcmp.eq.f32.partialorder %v1789_v16, 8.507059e+37 }
 0x533   : > { %v1769_v30 = vadd.f32 %v5891_v39, %v1768_v43 }
 0x534   : > { %v5893_v32 = vpop.eup %5892 }
 0x535   : > { %v1781_v11 = vmul.f32 %v5893_v32, %v1593_v18  ;;  %v1595_v61 = vpop.xlane.xlu1 %1594  ;;  %v1773_v42 = vsel %vm1772_vm14, %v5891_v39, %v1769_v30  ;;  %vm1786_vm2 = vweird.f32 %v5893_v32  ;;  %v2852_v18 = vsub.f32 %v7620_v19, %v7849_v57 }
 0x536   : > { %5894 = vrcp.f32 %v1595_v61  ;;  %v1778_v3 = vsel %vm1775_vm15, %v1777_v13, %v1773_v42  ;;  %vm1787_vm4 = vmor %vm1785_vm3, %vm1786_vm2  ;;  %v1806_v30 = vand.u32 2147483648, %v1595_v61  ;;  %v7900_v13 = vpop.xlane.xlu0 %2170  ;;  %v2214_v42 = vmul.f32 1.442695, %v2196_v52 }
 0x537   : > { %v1782_v28 = vsub.f32 1.0, %v1781_v11  ;;  %v1779_v50 = vmul.f32 %v7796_v58, %v1778_v3  ;;  %5896 = vpow2.f32 %v2870_v4  ;;  %v1804_v11 = vand.u32 2147483647, %v1595_v61 }
 0x538   : > { %vm1800_vm7 = vweird.f32 %v1595_v61  ;;  %v2868_v3 = vmul.f32 1.442695, %v2852_v18  ;;  %v5689_v18 = vunpack.i.l.bf16 %v7845_v63 }
 0x539   : > { %1953 = vmatmul.f32.gmra.mxu1 %v1779_v50  ;;  %v1783_v27 = vmul.f32 %v5893_v32, %v1782_v28  ;;  %vm1805_vm9 = vcmp.eq.f32.partialorder %v1804_v11, 8.507059e+37  ;;  %v5690_v11 = vunpack.i.h.bf16 %v7845_v63 }
 0x53b   : > { %v1784_v37 = vadd.f32 %v5893_v32, %v1783_v27 }
 0x53c   : > { %v5895_v39 = vpop.eup %5894 }
 0x53d   : > { %v1796_v46 = vmul.f32 %v5895_v39, %v1595_v61  ;;  %2834 = vmax.xlane.f32.xlu0 %v7893_v24  ;;  %v1597_v58 = vpop.xlane.xlu2 %1596  ;;  %v1788_v41 = vsel %vm1787_vm4, %v5893_v32, %v1784_v37  ;;  %vm1801_vm6 = vweird.f32 %v5895_v39  ;;  %v7902_v32 = vpop.eup %5896 }
 0x53e   : > { %5898 = vrcp.f32 %v1597_v58  ;;  %v1793_v43 = vsel %vm1790_vm5, %v1792_v31, %v1788_v41  ;;  %vm1802_vm8 = vmor %vm1800_vm7, %vm1801_vm6  ;;  %v1821_v4 = vand.u32 2147483648, %v1597_v58  ;;  %v1819_v27 = vand.u32 2147483647, %v1597_v58  ;;  %v7910_v16 = vpop.xlane.xlu0 %2172 }
 0x53f   : > { %v1797_v33 = vsub.f32 1.0, %v1796_v46  ;;  %v1794_v21 = vmul.f32 %v7807_v22, %v1793_v43  ;;  %v1807_v22 = vor.u32 1.1754944e-38, %v1806_v30  ;;  %5900 = vpow2.f32 %v2214_v42 }
 0x540   : > { %5902 = vpow2.f32 %v2868_v3  ;;  %vm1815_vm11 = vweird.f32 %v1597_v58  ;;  %v1822_v31 = vor.u32 1.1754944e-38, %v1821_v4  ;;  %vm1820_vm13 = vcmp.eq.f32.partialorder %v1819_v27, 8.507059e+37  ;;  %v6169_v4 = vld [vmem:[%s9886_s1 + $0x40] sm:$0xff] }
 0x541   : > { %1956 = vmatmul.f32.gmra.mxu1 %v1794_v21  ;;  %v1798_v29 = vmul.f32 %v5895_v39, %v1797_v33 }
 0x543   : > { %5727 = vrot.lane.b32.xlu2 %v7393_v36, %s6209_s24  ;;  %v1799_v38 = vadd.f32 %v5895_v39, %v1798_v29 }
 0x544   : > { %v5899_v0 = vpop.eup %5898 }
 0x545   : > { %v1811_v28 = vmul.f32 %v5899_v0, %v1597_v58  ;;  %2902 = vadd.xlane.f32.xlu0 %v7902_v32  ;;  %v7907_v19 = vpop.xlane.xlu2 %2830  ;;  %v1803_v57 = vsel %vm1802_vm8, %v5895_v39, %v1799_v38  ;;  %vm1816_vm10 = vweird.f32 %v5899_v0  ;;  %v7914_v39 = vpop.eup %5900 }
 0x546   : > { %v1808_v50 = vsel %vm1805_vm9, %v1807_v22, %v1803_v57  ;;  %vm1817_vm12 = vmor %vm1815_vm11, %vm1816_vm10  ;;  %v7917_v21 = vpop.eup %5902  ;;  %v5698_v29 = vpop.permute.xlu0 %5697 }
 0x547   : > { %v1812_v35 = vsub.f32 1.0, %v1811_v28  ;;  %v1809_v51 = vmul.f32 %v7814_v34, %v1808_v50  ;;  %v5699_v42 = vunpack.i.l.bf16 %v5698_v29  ;;  %v5700_v38 = vunpack.i.h.bf16 %v5698_v29  ;;  %v2138_v50 = vpop.f32.mrf.mxu3 }
 0x549   : > { %1959 = vmatmul.f32.gmra.mxu1 %v1809_v51  ;;  %v1813_v61 = vmul.f32 %v5899_v0, %v1812_v35 }
 0x54b   : > { %5732 = vrot.lane.b32.xlu2 %v7365_v55, %s6210_s27  ;;  %v1814_v37 = vadd.f32 %v5899_v0, %v1813_v61  ;;  %v7932_v61 = vadd.f32 %v6169_v4, %v2138_v50 }
 0x54d   : > { %v5683_v46 = vpop.permute.xlu1 %5682  ;;  %2246 = vadd.xlane.f32.xlu0 %v7914_v39  ;;  %v5693_v34 = vpop.permute.xlu2 %5692  ;;  %v1818_v41 = vsel %vm1817_vm12, %v5899_v0, %v1814_v37 }
 0x54e   : > { %v5694_v52 = vunpack.i.l.bf16 %v5693_v34  ;;  %v5684_v43 = vunpack.i.l.bf16 %v5683_v46  ;;  %v1823_v33 = vsel %vm1820_vm13, %v1822_v31, %v1818_v41  ;;  %v5685_v55 = vunpack.i.h.bf16 %v5683_v46 }
 0x54f   : > { %v1824_v30 = vmul.f32 %v7820_v17, %v1823_v33  ;;  %v5695_v58 = vunpack.i.h.bf16 %v5693_v34  ;;  %v2796_v33 = vpop.f32.mrf.mxu0 }
 0x550   : > { %2562 = vmatpush.msrb.mxu2 %v5684_v43  ;;  %2900 = vadd.xlane.f32.xlu1 %v7917_v21 }
 0x551   : > { %3220 = vmatpush.msrb.mxu1 %v5694_v52 }
 0x552   : > { %1962 = vmatmul.f32.gmra.mxu1 %v1824_v30  ;;  %2563 = vmatpush.msrb.mxu2 %v5685_v55  ;;  %v2141_v30 = vpop.f32.mrf.mxu3 }
 0x553   : > { %3221 = vmatpush.msrb.mxu1 %v5695_v58 }
 0x554   : > { %2564 = vmatpush.msrb.mxu2 %v5689_v18 }
 0x556   : > { %2565 = vmatpush.msrb.mxu2 %v5690_v11 }
 0x557   : > { %v2799_v29 = vpop.f32.mrf.mxu0 }
 0x558   : > { %2566 = vmatpush.msrb.mxu2 %v5699_v42 }
 0x55a   : > { %2567 = vmatpush.msrb.mxu2 %v5700_v38 }
 0x561   : > { %5747 = vrot.lane.b32.xlu0 %v7513_v48, %s6209_s24 }
 0x562   : > { %v1599_v17 = vpop.xlane.xlu0 %1598 }
 0x563   : > { %5904 = vrcp.f32 %v1599_v17  ;;  %v1836_v28 = vand.u32 2147483648, %v1599_v17  ;;  %v1834_v63 = vand.u32 2147483647, %v1599_v17  ;;  %vm1830_vm15 = vweird.f32 %v1599_v17 }
 0x565   : > { %v1837_v51 = vor.u32 1.1754944e-38, %v1836_v28  ;;  %vm1835_vm3 = vcmp.eq.f32.partialorder %v1834_v63, 8.507059e+37  ;;  %v2144_v28 = vpop.f32.mrf.mxu3 }
 0x569   : > { %v5905_v0 = vpop.eup %5904  ;;  %5737 = vrot.lane.b32.xlu1 %v7493_v1, %s6209_s24  ;;  %s9782_s24 = scalar_lea.vmem %s9898_s13, %s5599_s20 }
 0x56a   : > { %v1826_v22 = vmul.f32 %v5905_v0, %v1599_v17  ;;  %vm1831_vm14 = vweird.f32 %v5905_v0 }
 0x56b   : > { %vm1832_vm2 = vmor %vm1830_vm15, %vm1831_vm14 }
 0x56c   : > { %v1827_v3 = vsub.f32 1.0, %v1826_v22 }
 0x56e   : > { %v1828_v57 = vmul.f32 %v5905_v0, %v1827_v3  ;;  %v2198_v3 = vsub.f32 %v7777_v59, %v7900_v13  ;;  %v2856_v13 = vsub.f32 %v7699_v25, %v7887_v5  ;;  %v2147_v25 = vpop.f32.mrf.mxu3  ;;  %v7981_v5 = vpop.f32.mrf.mxu0 }
 0x570   : > { %v1829_v35 = vadd.f32 %v5905_v0, %v1828_v57  ;;  %v2218_v63 = vmul.f32 1.442695, %v2198_v3  ;;  %v6172_v3 = vld [vmem:[%s9886_s1 + $0x58] sm:$0xff] }
 0x571   : > { %5742 = vrot.lane.b32.xlu1 %v7393_v36, %s6210_s27 }
 0x572   : > { %v1833_v27 = vsel %vm1832_vm2, %v5905_v0, %v1829_v35  ;;  %v2197_v0 = vsub.f32 %v7766_v7, %v7889_v26  ;;  %v7959_v35 = vadd.f32 %v6169_v4, %v2796_v33  ;;  %v7964_v7 = vld [vmem:[%s9886_s1 + $0x50] sm:$0xff] }
 0x573   : > { %v1838_v37 = vsel %vm1835_vm3, %v1837_v51, %v1833_v27  ;;  %v7967_v26 = vadd.f32 %v7964_v7, %v2144_v28 }
 0x574   : > { %2178 = vmax.xlane.f32.xlu2 %v7932_v61  ;;  %v1839_v31 = vmul.f32 %v7834_v15, %v1838_v37  ;;  %v6170_v15 = vld [vmem:[%s9886_s1 + $0x48] sm:$0xff]  ;;  %v2216_v57 = vmul.f32 1.442695, %v2197_v0 }
 0x575   : > { %v5708_v46 = vpop.permute.xlu0 %5707  ;;  %v7943_v18 = vadd.f32 %v6170_v15, %v2141_v30  ;;  %v7950_v38 = vadd.f32 %v6170_v15, %v2799_v29  ;;  %v2857_v29 = vsub.f32 %v7824_v47, %v7907_v19 }
 0x576   : > { %1965 = vmatmul.f32.gmra.mxu1 %v1839_v31  ;;  %v5709_v34 = vunpack.i.l.bf16 %v5708_v46  ;;  %v5710_v36 = vunpack.i.h.bf16 %v5708_v46  ;;  %5906 = vpow2.f32 %v2216_v57  ;;  %v2876_v31 = vmul.f32 1.442695, %v2856_v13  ;;  %v2150_v0 = vpop.f32.mrf.mxu3 }
 0x577   : > { %5908 = vpow2.f32 %v2218_v63  ;;  %v2199_v13 = vsub.f32 %v7793_v23, %v7910_v16 }
 0x578   : > { %2568 = vmatpush.msrb.mxu2 %v5709_v34  ;;  %v7938_v58 = vpop.xlane.xlu1 %2174  ;;  %5910 = vpow2.f32 %v2876_v31 }
 0x579   : > { %v2220_v31 = vmul.f32 1.442695, %v2199_v13 }
 0x57a   : > { %2569 = vmatpush.msrb.mxu2 %v5710_v36 }
 0x57c   : > { %v7975_v34 = vpop.eup %5906 }
 0x57d   : > { %v5718_v41 = vpop.permute.xlu0 %5717  ;;  %v7977_v36 = vpop.eup %5908 }
 0x57e   : > { %v5719_v52 = vunpack.i.l.bf16 %v5718_v41  ;;  %v5720_v43 = vunpack.i.h.bf16 %v5718_v41  ;;  %v2854_v41 = vsub.f32 %v7661_v8, %v7871_v54  ;;  %v7985_v30 = vpop.eup %5910 }
 0x580   : > { %2570 = vmatpush.msrb.mxu2 %v5719_v52  ;;  %v2872_v15 = vmul.f32 1.442695, %v2854_v41 }
 0x582   : > { %2571 = vmatpush.msrb.mxu2 %v5720_v43  ;;  %5912 = vpow2.f32 %v2872_v15 }
 0x585   : > { %v5723_v59 = vpop.permute.xlu0 %5722 }
 0x586   : > { %v7936_v55 = vpop.xlane.xlu2 %2832  ;;  %v5724_v27 = vunpack.i.l.bf16 %v5723_v59  ;;  %v5725_v46 = vunpack.i.h.bf16 %v5723_v59 }
 0x587   : > { %v2858_v19 = vsub.f32 %v7851_v49, %v7936_v55  ;;  %v6173_v49 = vld [vmem:[%s9886_s1 + $0x60] sm:$0xff] }
 0x588   : > { %v7998_v47 = vpop.eup %5912 }
 0x58b   : > { %2180 = vmax.xlane.f32.xlu0 %v7943_v18 }
 0x58c   : > { %5752 = vrot.lane.b32.xlu2 %v7493_v1, %s6210_s27 }
 0x58e   : > { %v7948_v11 = vpop.xlane.xlu2 %2176 }
 0x590   : > { %v5703_v42 = vpop.permute.xlu1 %5702 }
 0x591   : > { %v5704_v17 = vunpack.i.l.bf16 %v5703_v42  ;;  %v5705_v22 = vunpack.i.h.bf16 %v5703_v42  ;;  %v2805_v42 = vpop.f32.mrf.mxu0 }
 0x592   : > { %v7995_v28 = vadd.f32 %v6172_v3, %v2805_v42 }
 0x593   : > { %2838 = vmax.xlane.f32.xlu0 %v7950_v38  ;;  %3222 = vmatpush.msrb.mxu1 %v5704_v17  ;;  %v2855_v17 = vsub.f32 %v7679_v53, %v7881_v9  ;;  %v8001_v53 = vpop.f32.mrf.mxu3 }
 0x595   : > { %3223 = vmatpush.msrb.mxu1 %v5705_v22  ;;  %v2878_v22 = vmul.f32 1.442695, %v2857_v29  ;;  %v2874_v63 = vmul.f32 1.442695, %v2855_v17 }
 0x596   : > { %v7957_v1 = vpop.xlane.xlu2 %2242 }
 0x597   : > { %5914 = vpow2.f32 %v2878_v22  ;;  %vm2279_vm5 = vweird.f32 %v7957_v1 }
 0x598   : > { %v5713_v50 = vpop.permute.xlu1 %5712  ;;  %5916 = vpow2.f32 %v2874_v63 }
 0x599   : > { %v5714_v51 = vunpack.i.l.bf16 %v5713_v50  ;;  %v5715_v4 = vunpack.i.h.bf16 %v5713_v50  ;;  %v2808_v59 = vpop.f32.mrf.mxu0 }
 0x59a   : > { %v8020_v55 = vadd.f32 %v6173_v49, %v2808_v59  ;;  %v2285_v59 = vand.u32 2147483648, %v7957_v1 }
 0x59b   : > { %2836 = vmax.xlane.f32.xlu1 %v7959_v35  ;;  %2182 = vmax.xlane.f32.xlu0 %v7967_v26 }
 0x59c   : > { %3224 = vmatpush.msrb.mxu1 %v5714_v51 }
 0x59d   : > { %v8003_v9 = vpop.eup %5914 }
 0x59e   : > { %3225 = vmatpush.msrb.mxu1 %v5715_v4  ;;  %v7973_v37 = vpop.xlane.xlu2 %2244  ;;  %v8008_v50 = vpop.eup %5916  ;;  %v2880_v4 = vmul.f32 1.442695, %v2858_v19 }
 0x59f   : > { %vm2294_vm9 = vweird.f32 %v7973_v37 }
 0x5a0   : > { %3226 = vmatpush.msrb.mxu1 %v5724_v27  ;;  %v2156_v27 = vpop.f32.mrf.mxu3  ;;  %5918 = vpow2.f32 %v2880_v4  ;;  %v2283_v4 = vand.u32 2147483647, %v7957_v1 }
 0x5a1   : > { %5920 = vrcp.f32 %v7957_v1 }
 0x5a2   : > { %3227 = vmatpush.msrb.mxu1 %v5725_v46  ;;  %v8022_v46 = vadd.f32 %v6172_v3, %v2147_v25  ;;  %5922 = vpow2.f32 %v2220_v31  ;;  %vm2284_vm7 = vcmp.eq.f32.partialorder %v2283_v4, 8.507059e+37  ;;  %v2298_v4 = vand.u32 2147483647, %v7973_v37 }
 0x5a3   : > { %2248 = vadd.xlane.f32.xlu1 %v7975_v34  ;;  %2250 = vadd.xlane.f32.xlu0 %v7977_v36  ;;  %5924 = vrcp.f32 %v7973_v37 }
 0x5a4   : > { %vm2299_vm11 = vcmp.eq.f32.partialorder %v2298_v4, 8.507059e+37 }
 0x5a6   : > { %v5728_v52 = vpop.permute.xlu2 %5727  ;;  %v8029_v23 = vpop.eup %5918 }
 0x5a7   : > { %v5729_v43 = vunpack.i.l.bf16 %v5728_v52  ;;  %v5730_v33 = vunpack.i.h.bf16 %v5728_v52  ;;  %v5921_v16 = vpop.eup %5920 }
 0x5a8   : > { %v8032_v41 = vpop.eup %5922  ;;  %v8034_v52 = vpop.f32.mrf.mxu3  ;;  %v2275_v25 = vmul.f32 %v5921_v16, %v7957_v1  ;;  %vm2280_vm4 = vweird.f32 %v5921_v16 }
 0x5a9   : > { %2572 = vmatpush.msrb.mxu2 %v5729_v43  ;;  %v2200_v43 = vsub.f32 %v7840_v2, %v7938_v58  ;;  %v8048_v17 = vpop.eup %5924  ;;  %vm2281_vm6 = vmor %vm2279_vm5, %vm2280_vm4 }
 0x5aa   : > { %v2276_v29 = vsub.f32 1.0, %v2275_v25  ;;  %v2290_v2 = vmul.f32 %v8048_v17, %v7973_v37  ;;  %vm2295_vm8 = vweird.f32 %v8048_v17 }
 0x5ab   : > { %2908 = vadd.xlane.f32.xlu0 %v7985_v30  ;;  %2573 = vmatpush.msrb.mxu2 %v5730_v33  ;;  %v6174_v33 = vld [vmem:[%s9886_s1 + $0x70] sm:$0xff]  ;;  %vm8091_vm10 = vmor %vm2294_vm9, %vm2295_vm8 }
 0x5ac   : > { %v8044_v15 = vadd.f32 %v6174_v33, %v2156_v27  ;;  %v2277_v58 = vmul.f32 %v5921_v16, %v2276_v29  ;;  %v2291_v63 = vsub.f32 1.0, %v2290_v2  ;;  %v2201_v2 = vsub.f32 %v7865_v44, %v7948_v11 }
 0x5ad   : > { %v2300_v44 = vand.u32 2147483648, %v7973_v37 }
 0x5ae   : > { %v5733_v8 = vpop.permute.xlu2 %5732  ;;  %v2278_v19 = vadd.f32 %v5921_v16, %v2277_v58  ;;  %v2224_v11 = vmul.f32 1.442695, %v2201_v2 }
 0x5af   : > { %v5734_v54 = vunpack.i.l.bf16 %v5733_v8  ;;  %v5735_v57 = vunpack.i.h.bf16 %v5733_v8  ;;  %v2222_v8 = vmul.f32 1.442695, %v2200_v43 }
 0x5b0   : > { %v8012_v51 = vpop.xlane.xlu0 %2834  ;;  %v2814_v3 = vpop.f32.mrf.mxu3  ;;  %v2282_v43 = vsel %vm2281_vm6, %v5921_v16, %v2278_v19  ;;  %v6175_v16 = vld [vmem:[%s9886_s1 + $0x68] sm:$0xff] }
 0x5b1   : > { %3228 = vmatpush.msrb.mxu1 %v5734_v54  ;;  %v8050_v54 = vadd.f32 %v6173_v49, %v2150_v0 }
 0x5b3   : > { %2842 = vmax.xlane.f32.xlu0 %v7995_v28  ;;  %3229 = vmatpush.msrb.mxu1 %v5735_v57  ;;  %v8059_v57 = vadd.f32 %v6174_v33, %v2814_v3  ;;  %v2292_v33 = vmul.f32 %v8048_v17, %v2291_v63  ;;  %v8081_v63 = vadd.f32 %v6175_v16, %v8001_v53 }
 0x5b5   : > { %2904 = vadd.xlane.f32.xlu2 %v7998_v47  ;;  %v2293_v10 = vadd.f32 %v8048_v17, %v2292_v33 }
 0x5b8   : > { %v2817_v53 = vpop.f32.mrf.mxu3 }
 0x5bb   : > { %2910 = vadd.xlane.f32.xlu0 %v8003_v9 }
 0x5bc   : > { %5757 = vrot.lane.b32.xlu1 %v7513_v48, %s6210_s27  ;;  %v8027_v48 = vpop.xlane.xlu0 %2902 }
 0x5bd   : > { %2906 = vadd.xlane.f32.xlu2 %v8008_v50 }
 0x5c3   : > { %2844 = vmax.xlane.f32.xlu0 %v8020_v55  ;;  %v8052_v22 = vpop.xlane.xlu1 %2900 }
 0x5c4   : > { %v8046_v42 = vpop.xlane.xlu0 %2246 }
 0x5c5   : > { %2184 = vmax.xlane.f32.xlu2 %v8022_v46  ;;  %5926 = vrcp.f32 %v8046_v42  ;;  %vm2309_vm13 = vweird.f32 %v8046_v42 }
 0x5c6   : > { %5928 = vpow2.f32 %v2222_v8  ;;  %v2286_v8 = vor.u32 1.1754944e-38, %v2285_v59 }
 0x5c7   : > { %5930 = vpow2.f32 %v2224_v11 }
 0x5c8   : > { %v2287_v58 = vsel %vm2284_vm7, %v2286_v8, %v2282_v43  ;;  %v2859_v43 = vsub.f32 %v7893_v24, %v8012_v51  ;;  %v2313_v24 = vand.u32 2147483647, %v8046_v42 }
 0x5ca   : > { %vm2314_vm15 = vcmp.eq.f32.partialorder %v2313_v24, 8.507059e+37 }
 0x5cb   : > { %2912 = vadd.xlane.f32.xlu0 %v8029_v23  ;;  %v8061_v0 = vpop.eup %5926 }
 0x5cc   : > { %v8067_v49 = vpop.eup %5928  ;;  %v2305_v31 = vmul.f32 %v8061_v0, %v8046_v42  ;;  %vm2310_vm12 = vweird.f32 %v8061_v0 }
 0x5cd   : > { %2252 = vadd.xlane.f32.xlu2 %v8032_v41  ;;  %vm2311_vm14 = vmor %vm2309_vm13, %vm2310_vm12 }
 0x5ce   : > { %v2306_v3 = vsub.f32 1.0, %v2305_v31 }
 0x5d3   : > { %2190 = vmax.xlane.f32.xlu0 %v8044_v15  ;;  %v5748_v25 = vpop.permute.xlu0 %5747 }
 0x5d4   : > { %v5749_v1 = vunpack.i.l.bf16 %v5748_v25  ;;  %v5750_v19 = vunpack.i.h.bf16 %v5748_v25  ;;  %v2307_v25 = vmul.f32 %v8061_v0, %v2306_v3 }
 0x5d5   : > { %2186 = vmax.xlane.f32.xlu2 %v8050_v54 }
 0x5db   : > { %v5738_v13 = vpop.permute.xlu1 %5737  ;;  %2848 = vmax.xlane.f32.xlu0 %v8059_v57 }
 0x5dc   : > { %v5739_v27 = vunpack.i.l.bf16 %v5738_v13  ;;  %v5740_v29 = vunpack.i.h.bf16 %v5738_v13  ;;  %v2288_v13 = vmul.f32 %v7873_v45, %v2287_v58  ;;  %v2297_v45 = vsel %vm8091_vm10, %v8048_v17, %v2293_v10 }
 0x5dd   : > { %2254 = vadd.xlane.f32.xlu2 %v8067_v49  ;;  %v2308_v10 = vadd.f32 %v8061_v0, %v2307_v25  ;;  %v2882_v58 = vmul.f32 1.442695, %v2859_v43  ;;  %vm2937_vm10 = vweird.f32 %v8052_v22 }
 0x5de   : > { %2574 = vmatpush.msrb.mxu2 %v5739_v27  ;;  %v8089_v27 = vadd.f32 %v7964_v7, %v7981_v5  ;;  %v2301_v7 = vor.u32 1.1754944e-38, %v2300_v44  ;;  %v2811_v5 = vpop.f32.mrf.mxu0 }
 0x5df   : > { %v8106_v17 = vadd.f32 %v6175_v16, %v2811_v5  ;;  %v2312_v51 = vsel %vm2311_vm14, %v8061_v0, %v2308_v10  ;;  %v6176_v0 = vld [vmem:[%s9886_s1 + $0x78] sm:$0xff] }
 0x5e0   : > { %2575 = vmatpush.msrb.mxu2 %v5740_v29  ;;  %v2302_v8 = vsel %vm2299_vm11, %v2301_v7, %v2297_v45  ;;  %v8128_v4 = vadd.f32 %v6176_v0, %v8034_v52  ;;  %v8132_v25 = vadd.f32 %v6176_v0, %v2817_v53 }
 0x5e1   : > { %v2303_v3 = vmul.f32 %v7879_v62, %v2302_v8 }
 0x5e2   : > { %2576 = vmatpush.msrb.mxu2 %v5749_v1  ;;  %v2315_v1 = vand.u32 2147483648, %v8046_v42 }
 0x5e3   : > { %v5743_v59 = vpop.permute.xlu1 %5742 }
 0x5e4   : > { %v5744_v31 = vunpack.i.l.bf16 %v5743_v59  ;;  %2577 = vmatpush.msrb.mxu2 %v5750_v19  ;;  %v5745_v37 = vunpack.i.h.bf16 %v5743_v59  ;;  %v2316_v16 = vor.u32 1.1754944e-38, %v2315_v1 }
 0x5e5   : > { %2188 = vmax.xlane.f32.xlu2 %v8081_v63  ;;  %2578 = vmatmul.f32.vlgmr.msrb.gmra.mxu2 %v2288_v13 }
 0x5e6   : > { %2840 = vmax.xlane.f32.xlu1 %v8089_v27  ;;  %3230 = vmatpush.msrb.mxu1 %v5744_v31  ;;  %v2317_v44 = vsel %vm2314_vm15, %v2316_v16, %v2312_v51  ;;  %vm2952_vm15 = vweird.f32 %v8027_v48 }
 0x5e7   : > { %v2179_v33 = vpop.xlane.xlu2 %2178  ;;  %v2318_v42 = vmul.f32 %v7914_v39, %v2317_v44 }
 0x5e8   : > { %v2202_v29 = vsub.f32 %v7932_v61, %v2179_v33  ;;  %3231 = vmatpush.msrb.mxu1 %v5745_v37  ;;  %v8112_v61 = vpop.eup %5930 }
 0x5ea   : > { %v2226_v2 = vmul.f32 1.442695, %v2202_v29 }
 0x5ec   : > { %5932 = vpow2.f32 %v2226_v2 }
 0x5ed   : > { %2846 = vmax.xlane.f32.xlu2 %v8106_v17  ;;  %2581 = vmatmul.f32.gmra.mxu2 %v2303_v3  ;;  %5934 = vpow2.f32 %v2882_v58  ;;  %v8156_v3 = vpop.f32.mrf.mxu1 }
 0x5ee   : > { %2256 = vadd.xlane.f32.xlu1 %v8112_v61 }
 0x5ef   : > { %v5753_v19 = vpop.permute.xlu2 %5752 }
 0x5f0   : > { %v5754_v62 = vunpack.i.l.bf16 %v5753_v19  ;;  %v5755_v11 = vunpack.i.h.bf16 %v5753_v19 }
 0x5f2   : > { %3232 = vmatpush.msrb.mxu1 %v5754_v62  ;;  %v8118_v59 = vpop.eup %5932 }
 0x5f3   : > { %v8120_v13 = vpop.eup %5934 }
 0x5f4   : > { %3233 = vmatpush.msrb.mxu1 %v5755_v11 }
 0x5f5   : > { %2258 = vadd.xlane.f32.xlu2 %v8118_v59  ;;  %2584 = vmatmul.f32.gmra.mxu2 %v2318_v42 }
 0x5f6   : > { %2914 = vadd.xlane.f32.xlu1 %v8120_v13 }
 0x5fe   : > { %v2181_v31 = vpop.xlane.xlu0 %2180  ;;  %2192 = vmax.xlane.f32.xlu1 %v8128_v4 }
 0x5ff   : > { %v2203_v39 = vsub.f32 %v7943_v18, %v2181_v31 }
 0x601   : > { %v2228_v45 = vmul.f32 1.442695, %v2203_v39 }
 0x603   : > { %5936 = vpow2.f32 %v2228_v45 }
 0x604   : > { %5938 = vrcp.f32 %v8052_v22 }
 0x606   : > { %v2839_v37 = vpop.xlane.xlu0 %2838  ;;  %2850 = vmax.xlane.f32.xlu1 %v8132_v25 }
 0x607   : > { %v2861_v8 = vsub.f32 %v7950_v38, %v2839_v37 }
 0x609   : > { %v8135_v7 = vpop.eup %5936  ;;  %v2886_v1 = vmul.f32 1.442695, %v2861_v8 }
 0x60a   : > { %2260 = vadd.xlane.f32.xlu0 %v8135_v7  ;;  %v8145_v58 = vpop.eup %5938 }
 0x60b   : > { %v2933_v24 = vmul.f32 %v8145_v58, %v8052_v22  ;;  %vm2938_vm7 = vweird.f32 %v8145_v58 }
 0x60c   : > { %vm2939_vm11 = vmor %vm2937_vm10, %vm2938_vm7 }
 0x60d   : > { %v2934_v11 = vsub.f32 1.0, %v2933_v24 }
 0x60e   : > { %v2837_v5 = vpop.xlane.xlu1 %2836  ;;  %v2183_v52 = vpop.xlane.xlu0 %2182 }
 0x60f   : > { %v2860_v43 = vsub.f32 %v7959_v35, %v2837_v5  ;;  %v2204_v33 = vsub.f32 %v7967_v26, %v2183_v52  ;;  %v2935_v52 = vmul.f32 %v8145_v58, %v2934_v11 }
 0x611   : > { %v2884_v29 = vmul.f32 1.442695, %v2860_v43  ;;  %v2230_v18 = vmul.f32 1.442695, %v2204_v33  ;;  %v2936_v11 = vadd.f32 %v8145_v58, %v2935_v52 }
 0x613   : > { %5940 = vpow2.f32 %v2884_v29 }
 0x614   : > { %5942 = vpow2.f32 %v2230_v18  ;;  %v8169_v18 = vpop.f32.mrf.mxu1 }
 0x615   : > { %5944 = vrcp.f32 %v8027_v48 }
 0x616   : > { %v2249_v10 = vpop.xlane.xlu1 %2248  ;;  %v8143_v2 = vpop.xlane.xlu0 %2250 }
 0x617   : > { %5946 = vrcp.f32 %v2249_v10  ;;  %v2330_v53 = vand.u32 2147483648, %v2249_v10  ;;  %v2328_v37 = vand.u32 2147483647, %v2249_v10  ;;  %vm2324_vm3 = vweird.f32 %v2249_v10 }
 0x618   : > { %5948 = vrcp.f32 %v8143_v2  ;;  %vm2339_vm8 = vweird.f32 %v8143_v2 }
 0x619   : > { %v8148_v35 = vpop.eup %5940  ;;  %5950 = vpow2.f32 %v2886_v1  ;;  %v2331_v29 = vor.u32 1.1754944e-38, %v2330_v53  ;;  %vm2329_vm5 = vcmp.eq.f32.partialorder %v2328_v37, 8.507059e+37  ;;  %v2940_v37 = vsel %vm2939_vm11, %v8145_v58, %v2936_v11 }
 0x61a   : > { %v8150_v26 = vpop.eup %5942  ;;  %2916 = vadd.xlane.f32.xlu2 %v8148_v35  ;;  %v2958_v11 = vand.u32 2147483648, %v8027_v48 }
 0x61b   : > { %2262 = vadd.xlane.f32.xlu0 %v8150_v26  ;;  %v8154_v38 = vpop.eup %5944 }
 0x61c   : > { %v2948_v31 = vmul.f32 %v8154_v38, %v8027_v48  ;;  %vm2953_vm14 = vweird.f32 %v8154_v38 }
 0x61d   : > { %v5947_v51 = vpop.eup %5946 }
 0x61e   : > { %v5949_v16 = vpop.eup %5948  ;;  %v2320_v19 = vmul.f32 %v5947_v51, %v2249_v10  ;;  %v8160_v62 = vpop.xlane.xlu0 %2908  ;;  %vm2325_vm2 = vweird.f32 %v5947_v51  ;;  %v2949_v33 = vsub.f32 1.0, %v2948_v31 }
 0x61f   : > { %v2335_v44 = vmul.f32 %v5949_v16, %v8143_v2  ;;  %v8163_v0 = vpop.eup %5950  ;;  %vm2326_vm4 = vmor %vm2324_vm3, %vm2325_vm2  ;;  %vm2340_vm6 = vweird.f32 %v5949_v16 }
 0x620   : > { %v2321_v42 = vsub.f32 1.0, %v2320_v19  ;;  %vm2341_vm9 = vmor %vm2339_vm8, %vm2340_vm6 }
 0x621   : > { %v2336_v39 = vsub.f32 1.0, %v2335_v44  ;;  %vm2954_vm2 = vmor %vm2952_vm15, %vm2953_vm14 }
 0x622   : > { %v2322_v45 = vmul.f32 %v5947_v51, %v2321_v42  ;;  %2918 = vadd.xlane.f32.xlu2 %v8163_v0  ;;  %v2345_v42 = vand.u32 2147483648, %v8143_v2 }
 0x623   : > { %v2337_v5 = vmul.f32 %v5949_v16, %v2336_v39  ;;  %v2943_v39 = vand.u32 2147483648, %v8052_v22 }
 0x624   : > { %v2323_v43 = vadd.f32 %v5947_v51, %v2322_v45 }
 0x625   : > { %v2338_v24 = vadd.f32 %v5949_v16, %v2337_v5  ;;  %v2944_v5 = vor.u32 1.1754944e-38, %v2943_v39 }
 0x626   : > { %v2843_v8 = vpop.xlane.xlu0 %2842  ;;  %v2327_v1 = vsel %vm2326_vm4, %v5947_v51, %v2323_v43  ;;  %v2343_v51 = vand.u32 2147483647, %v8143_v2  ;;  %v2950_v2 = vmul.f32 %v8154_v38, %v2949_v33 }
 0x627   : > { %v2863_v19 = vsub.f32 %v7995_v28, %v2843_v8  ;;  %v2332_v44 = vsel %vm2329_vm5, %v2331_v29, %v2327_v1  ;;  %v2941_v28 = vand.u32 2147483647, %v8052_v22  ;;  %v2342_v45 = vsel %vm2341_vm9, %v5949_v16, %v2338_v24  ;;  %v8190_v16 = vpop.f32.mrf.mxu1 }
 0x628   : > { %v8175_v10 = vpop.xlane.xlu2 %2904  ;;  %v2333_v31 = vmul.f32 %v7975_v34, %v2332_v44  ;;  %v2346_v34 = vor.u32 1.1754944e-38, %v2345_v42  ;;  %vm2344_vm12 = vcmp.eq.f32.partialorder %v2343_v51, 8.507059e+37  ;;  %v2951_v44 = vadd.f32 %v8154_v38, %v2950_v2 }
 0x629   : > { %v2890_v53 = vmul.f32 1.442695, %v2863_v19  ;;  %5952 = vrcp.f32 %v8175_v10  ;;  %vm2942_vm13 = vcmp.eq.f32.partialorder %v2941_v28, 8.507059e+37  ;;  %v2959_v28 = vor.u32 1.1754944e-38, %v2958_v11 }
 0x62a   : > { %2587 = vmatmul.f32.gmra.mxu2 %v2333_v31  ;;  %v2347_v52 = vsel %vm2344_vm12, %v2346_v34, %v2342_v45  ;;  %v2945_v1 = vsel %vm2942_vm13, %v2944_v5, %v2940_v37  ;;  %v2955_v39 = vsel %vm2954_vm2, %v8154_v38, %v2951_v44  ;;  %vm2967_vm5 = vweird.f32 %v8175_v10 }
 0x62b   : > { %5954 = vpow2.f32 %v2890_v53  ;;  %v2348_v58 = vmul.f32 %v7977_v36, %v2347_v52  ;;  %v2946_v51 = vmul.f32 %v7917_v21, %v2945_v1  ;;  %v2956_v36 = vand.u32 2147483647, %v8027_v48 }
 0x62c   : > { %v2973_v52 = vand.u32 2147483648, %v8175_v10  ;;  %vm2997_vm13 = vweird.f32 %v8160_v62 }
 0x62d   : > { %vm2957_vm3 = vcmp.eq.f32.partialorder %v2956_v36, 8.507059e+37 }
 0x62e   : > { %v5758_v43 = vpop.permute.xlu1 %5757  ;;  %v8188_v29 = vpop.xlane.xlu0 %2910  ;;  %v2960_v37 = vsel %vm2957_vm3, %v2959_v28, %v2955_v39 }
 0x62f   : > { %v5953_v8 = vpop.eup %5952  ;;  %v5759_v22 = vunpack.i.l.bf16 %v5758_v43  ;;  %v5760_v42 = vunpack.i.h.bf16 %v5758_v43  ;;  %v2961_v1 = vmul.f32 %v7902_v32, %v2960_v37 }
 0x630   : > { %v2963_v24 = vmul.f32 %v5953_v8, %v8175_v10  ;;  %v8193_v19 = vpop.xlane.xlu2 %2906  ;;  %vm2968_vm4 = vweird.f32 %v5953_v8 }
 0x631   : > { %v8198_v33 = vpop.eup %5954  ;;  %5956 = vrcp.f32 %v8193_v19  ;;  %3234 = vmatpush.msrb.mxu1 %v5759_v22  ;;  %v8213_v22 = vpop.f32.mrf.mxu1  ;;  %vm2969_vm6 = vmor %vm2967_vm5, %vm2968_vm4  ;;  %vm2982_vm9 = vweird.f32 %v8193_v19 }
 0x632   : > { %v2964_v31 = vsub.f32 1.0, %v2963_v24  ;;  %2922 = vadd.xlane.f32.xlu0 %v8198_v33  ;;  %2590 = vmatmul.f32.gmra.mxu2 %v2348_v58  ;;  %5958 = vrcp.f32 %v8160_v62  ;;  %v2971_v24 = vand.u32 2147483647, %v8175_v10 }
 0x633   : > { %3235 = vmatpush.msrb.mxu1 %v5760_v42  ;;  %5960 = vrcp.f32 %v8188_v29 }
 0x634   : > { %3236 = vmatmul.f32.vlgmr.msrb.gmra.mxu1 %v2946_v51  ;;  %v2965_v53 = vmul.f32 %v5953_v8, %v2964_v31  ;;  %v2974_v31 = vor.u32 1.1754944e-38, %v2973_v52  ;;  %vm2972_vm7 = vcmp.eq.f32.partialorder %v2971_v24, 8.507059e+37 }
 0x636   : > { %v2845_v45 = vpop.xlane.xlu0 %2844  ;;  %v2966_v5 = vadd.f32 %v5953_v8, %v2965_v53 }
 0x637   : > { %v5957_v34 = vpop.eup %5956  ;;  %v2864_v11 = vsub.f32 %v8020_v55, %v2845_v45  ;;  %v2986_v45 = vand.u32 2147483647, %v8193_v19 }
 0x638   : > { %v2978_v2 = vmul.f32 %v5957_v34, %v8193_v19  ;;  %v2185_v21 = vpop.xlane.xlu2 %2184  ;;  %v8211_v43 = vpop.eup %5958  ;;  %v2970_v44 = vsel %vm2969_vm6, %v5953_v8, %v2966_v5  ;;  %vm2983_vm8 = vweird.f32 %v5957_v34  ;;  %v2988_v8 = vand.u32 2147483648, %v8193_v19 }
 0x639   : > { %v2205_v48 = vsub.f32 %v8022_v46, %v2185_v21  ;;  %v2993_v42 = vmul.f32 %v8211_v43, %v8160_v62  ;;  %v2975_v32 = vsel %vm2972_vm7, %v2974_v31, %v2970_v44  ;;  %v2892_v53 = vmul.f32 1.442695, %v2864_v11  ;;  %v8225_v28 = vpop.eup %5960  ;;  %v8227_v37 = vpop.f32.mrf.mxu1  ;;  %vm2984_vm10 = vmor %vm2982_vm9, %vm2983_vm8 }
 0x63a   : > { %v2979_v38 = vsub.f32 1.0, %v2978_v2  ;;  %v2976_v55 = vmul.f32 %v7998_v47, %v2975_v32  ;;  %v3008_v5 = vmul.f32 %v8225_v28, %v8188_v29  ;;  %vm2987_vm11 = vcmp.eq.f32.partialorder %v2986_v45, 8.507059e+37 }
 0x63b   : > { %v2232_v58 = vmul.f32 1.442695, %v2205_v48  ;;  %v2994_v39 = vsub.f32 1.0, %v2993_v42  ;;  %v2989_v48 = vor.u32 1.1754944e-38, %v2988_v8  ;;  %vm2998_vm12 = vweird.f32 %v8211_v43 }
 0x63c   : > { %3239 = vmatmul.f32.gmra.mxu1 %v2961_v1  ;;  %v2980_v46 = vmul.f32 %v5957_v34, %v2979_v38  ;;  %v3009_v44 = vsub.f32 1.0, %v3008_v5  ;;  %v3003_v32 = vand.u32 2147483648, %v8160_v62  ;;  %vm2999_vm15 = vmor %vm2997_vm13, %vm2998_vm12  ;;  %vm3013_vm6 = vweird.f32 %v8225_v28 }
 0x63d   : > { %5962 = vpow2.f32 %v2232_v58  ;;  %v2995_v47 = vmul.f32 %v8211_v43, %v2994_v39  ;;  %v3001_v39 = vand.u32 2147483647, %v8160_v62  ;;  %vm3012_vm7 = vweird.f32 %v8188_v29 }
 0x63e   : > { %v8222_v51 = vpop.xlane.xlu0 %2912  ;;  %v2981_v10 = vadd.f32 %v5957_v34, %v2980_v46  ;;  %v3004_v5 = vor.u32 1.1754944e-38, %v3003_v32  ;;  %vm3014_vm8 = vmor %vm3012_vm7, %vm3013_vm6 }
 0x63f   : > { %vm3002_vm4 = vcmp.eq.f32.partialorder %v3001_v39, 8.507059e+37 }
 0x640   : > { %v2253_v36 = vpop.xlane.xlu2 %2252  ;;  %v2985_v21 = vsel %vm2984_vm10, %v5957_v34, %v2981_v10  ;;  %v2996_v34 = vadd.f32 %v8211_v43, %v2995_v47 }
 0x641   : > { %5964 = vrcp.f32 %v2253_v36  ;;  %v2990_v1 = vsel %vm2987_vm11, %v2989_v48, %v2985_v21  ;;  %vm2354_vm2 = vweird.f32 %v2253_v36  ;;  %vm3027_vm11 = vweird.f32 %v8222_v51 }
 0x642   : > { %5966 = vrcp.f32 %v8222_v51  ;;  %v2991_v31 = vmul.f32 %v8008_v50, %v2990_v1  ;;  %v3010_v50 = vmul.f32 %v8225_v28, %v3009_v44  ;;  %v3000_v21 = vsel %vm2999_vm15, %v8211_v43, %v2996_v34 }
 0x643   : > { %v8232_v2 = vpop.eup %5962  ;;  %5968 = vpow2.f32 %v2892_v53  ;;  %v8252_v53 = vpop.f32.mrf.mxu1 }
 0x644   : > { %2264 = vadd.xlane.f32.xlu2 %v8232_v2  ;;  %3242 = vmatmul.f32.gmra.mxu1 %v2976_v55  ;;  %v2358_v55 = vand.u32 2147483647, %v2253_v36  ;;  %v3011_v44 = vadd.f32 %v8225_v28, %v3010_v50 }
 0x646   : > { %v2191_v52 = vpop.xlane.xlu0 %2190  ;;  %vm2359_vm5 = vcmp.eq.f32.partialorder %v2358_v55, 8.507059e+37 }
 0x647   : > { %v5965_v38 = vpop.eup %5964  ;;  %v2208_v19 = vsub.f32 %v8044_v15, %v2191_v52  ;;  %v2360_v15 = vand.u32 2147483648, %v2253_v36 }
 0x648   : > { %v2350_v24 = vmul.f32 %v5965_v38, %v2253_v36  ;;  %v8240_v58 = vpop.xlane.xlu2 %2186  ;;  %v8244_v42 = vpop.eup %5966  ;;  %vm2355_vm14 = vweird.f32 %v5965_v38 }
 0x649   : > { %v2238_v46 = vmul.f32 1.442695, %v2208_v19  ;;  %v8248_v10 = vpop.eup %5968  ;;  %v3023_v45 = vmul.f32 %v8244_v42, %v8222_v51  ;;  %vm2356_vm3 = vmor %vm2354_vm2, %vm2355_vm14  ;;  %v2361_v48 = vor.u32 1.1754944e-38, %v2360_v15  ;;  %v3005_v19 = vsel %vm3002_vm4, %v3004_v5, %v3000_v21 }
 0x64a   : > { %v2351_v11 = vsub.f32 1.0, %v2350_v24  ;;  %v3006_v34 = vmul.f32 %v7985_v30, %v3005_v19  ;;  %v3033_v30 = vand.u32 2147483648, %v8222_v51  ;;  %vm3028_vm10 = vweird.f32 %v8244_v42 }
 0x64b   : > { %5970 = vpow2.f32 %v2238_v46  ;;  %v3024_v1 = vsub.f32 1.0, %v3023_v45  ;;  %v3018_v46 = vand.u32 2147483648, %v8188_v29  ;;  %v8273_v32 = vpop.f32.mrf.mxu1  ;;  %v3031_v19 = vand.u32 2147483647, %v8222_v51  ;;  %vm8283_vm13 = vmor %vm3027_vm11, %vm3028_vm10 }
 0x64c   : > { %v2352_v8 = vmul.f32 %v5965_v38, %v2351_v11  ;;  %2924 = vadd.xlane.f32.xlu2 %v8248_v10  ;;  %3245 = vmatmul.f32.gmra.mxu1 %v2991_v31  ;;  %v3015_v31 = vsel %vm3014_vm8, %v8225_v28, %v3011_v44  ;;  %v2206_v51 = vsub.f32 %v8050_v54, %v8240_v58 }
 0x64d   : > { %v3025_v11 = vmul.f32 %v8244_v42, %v3024_v1  ;;  %vm3032_vm2 = vcmp.eq.f32.partialorder %v3031_v19, 8.507059e+37 }
 0x64e   : > { %v2353_v62 = vadd.f32 %v5965_v38, %v2352_v8  ;;  %v2849_v28 = vpop.xlane.xlu0 %2848 }
 0x64f   : > { %v3026_v45 = vadd.f32 %v8244_v42, %v3025_v11 }
 0x650   : > { %v2255_v47 = vpop.xlane.xlu2 %2254  ;;  %v2357_v52 = vsel %vm2356_vm3, %v5965_v38, %v2353_v62  ;;  %v3016_v38 = vand.u32 2147483647, %v8188_v29 }
 0x651   : > { %5972 = vrcp.f32 %v2255_v47  ;;  %v2362_v24 = vsel %vm2359_vm5, %v2361_v48, %v2357_v52  ;;  %v8265_v36 = vpop.eup %5970  ;;  %v2375_v52 = vand.u32 2147483648, %v2255_v47  ;;  %vm2369_vm14 = vweird.f32 %v2255_v47 }
 0x652   : > { %v2363_v43 = vmul.f32 %v8032_v41, %v2362_v24  ;;  %v3019_v41 = vor.u32 1.1754944e-38, %v3018_v46  ;;  %vm3017_vm9 = vcmp.eq.f32.partialorder %v3016_v38, 8.507059e+37  ;;  %v3034_v46 = vor.u32 1.1754944e-38, %v3033_v30 }
 0x653   : > { %v2376_v38 = vor.u32 1.1754944e-38, %v2375_v52 }
 0x654   : > { %2270 = vadd.xlane.f32.xlu2 %v8265_v36  ;;  %2593 = vmatmul.f32.gmra.mxu2 %v2363_v43  ;;  %v3020_v55 = vsel %vm3017_vm9, %v3019_v41, %v3015_v31  ;;  %v2866_v43 = vsub.f32 %v8059_v57, %v2849_v28 }
 0x655   : > { %3248 = vmatmul.f32.gmra.mxu1 %v3006_v34  ;;  %v3021_v48 = vmul.f32 %v8003_v9, %v3020_v55  ;;  %v3030_v9 = vsel %vm8283_vm13, %v8244_v42, %v3026_v45  ;;  %v2234_v55 = vmul.f32 1.442695, %v2206_v51 }
 0x656   : > { %v3035_v57 = vsel %vm3032_vm2, %v3034_v46, %v3030_v9  ;;  %v2896_v41 = vmul.f32 1.442695, %v2866_v43 }
 0x657   : > { %v5973_v15 = vpop.eup %5972  ;;  %v3036_v54 = vmul.f32 %v8029_v23, %v3035_v57 }
 0x658   : > { %v2365_v39 = vmul.f32 %v5973_v15, %v2255_v47  ;;  %v2189_v8 = vpop.xlane.xlu2 %2188  ;;  %vm2370_vm12 = vweird.f32 %v5973_v15 }
 0x659   : > { %v2207_v29 = vsub.f32 %v8081_v63, %v2189_v8  ;;  %v2841_v50 = vpop.xlane.xlu1 %2840  ;;  %v2373_v63 = vand.u32 2147483647, %v2255_v47  ;;  %vm2371_vm15 = vmor %vm2369_vm14, %vm2370_vm12 }
 0x65a   : > { %v2366_v21 = vsub.f32 1.0, %v2365_v39  ;;  %v2862_v62 = vsub.f32 %v8089_v27, %v2841_v50  ;;  %v8291_v27 = vpop.f32.mrf.mxu1 }
 0x65b   : > { %v2236_v5 = vmul.f32 1.442695, %v2207_v29  ;;  %vm2374_vm3 = vcmp.eq.f32.partialorder %v2373_v63, 8.507059e+37 }
 0x65c   : > { %v2367_v1 = vmul.f32 %v5973_v15, %v2366_v21  ;;  %v2888_v24 = vmul.f32 1.442695, %v2862_v62 }
 0x65d   : > { %5974 = vpow2.f32 %v2236_v5  ;;  %3251 = vmatmul.f32.gmra.mxu1 %v3021_v48 }
 0x65e   : > { %5976 = vpow2.f32 %v2888_v24  ;;  %v2368_v34 = vadd.f32 %v5973_v15, %v2367_v1 }
 0x660   : > { %v2847_v11 = vpop.xlane.xlu2 %2846  ;;  %v2372_v31 = vsel %vm2371_vm15, %v5973_v15, %v2368_v34 }
 0x661   : > { %v2257_v39 = vpop.xlane.xlu1 %2256  ;;  %v2377_v8 = vsel %vm2374_vm3, %v2376_v38, %v2372_v31  ;;  %v2865_v15 = vsub.f32 %v8106_v17, %v2847_v11 }
 0x662   : > { %5978 = vrcp.f32 %v2257_v39  ;;  %v2378_v42 = vmul.f32 %v8067_v49, %v2377_v8  ;;  %v8303_v47 = vpop.f32.mrf.mxu1  ;;  %v2390_v5 = vand.u32 2147483648, %v2257_v39  ;;  %v2388_v17 = vand.u32 2147483647, %v2257_v39 }
 0x663   : > { %v8296_v30 = vpop.eup %5974  ;;  %5980 = vpow2.f32 %v2896_v41  ;;  %v2894_v23 = vmul.f32 1.442695, %v2865_v15  ;;  %vm2384_vm5 = vweird.f32 %v2257_v39 }
 0x664   : > { %v8299_v58 = vpop.eup %5976  ;;  %2268 = vadd.xlane.f32.xlu0 %v8296_v30  ;;  %2596 = vmatmul.f32.gmra.mxu2 %v2378_v42  ;;  %5982 = vpow2.f32 %v2234_v55  ;;  %v2391_v44 = vor.u32 1.1754944e-38, %v2390_v5  ;;  %vm2389_vm7 = vcmp.eq.f32.partialorder %v2388_v17, 8.507059e+37 }
 0x665   : > { %3254 = vmatmul.f32.gmra.mxu1 %v3036_v54  ;;  %2920 = vadd.xlane.f32.xlu1 %v8299_v58 }
 0x668   : > { %v5979_v29 = vpop.eup %5978  ;;  %v2259_v49 = vpop.xlane.xlu2 %2258 }
 0x669   : > { %v2380_v50 = vmul.f32 %v5979_v29, %v2257_v39  ;;  %5984 = vrcp.f32 %v2259_v49  ;;  %v2915_v45 = vpop.xlane.xlu1 %2914  ;;  %v8306_v28 = vpop.eup %5980  ;;  %vm2385_vm4 = vweird.f32 %v5979_v29  ;;  %v2405_v11 = vand.u32 2147483648, %v2259_v49 }
 0x66a   : > { %5986 = vrcp.f32 %v2915_v45  ;;  %v8308_v62 = vpop.eup %5982  ;;  %v8312_v52 = vpop.f32.mrf.mxu1  ;;  %vm2386_vm6 = vmor %vm2384_vm5, %vm2385_vm4  ;;  %v3048_v57 = vand.u32 2147483648, %v2915_v45  ;;  %v2403_v42 = vand.u32 2147483647, %v2259_v49  ;;  %v3046_v15 = vand.u32 2147483647, %v2915_v45 }
 0x66b   : > { %v2381_v21 = vsub.f32 1.0, %v2380_v50  ;;  %5988 = vpow2.f32 %v2894_v23  ;;  %vm2399_vm10 = vweird.f32 %v2259_v49  ;;  %vm3042_vm11 = vweird.f32 %v2915_v45 }
 0x66c   : > { %2928 = vadd.xlane.f32.xlu0 %v8306_v28  ;;  %v3049_v23 = vor.u32 1.1754944e-38, %v3048_v57  ;;  %vm2404_vm13 = vcmp.eq.f32.partialorder %v2403_v42, 8.507059e+37  ;;  %vm3047_vm15 = vcmp.eq.f32.partialorder %v3046_v15, 8.507059e+37 }
 0x66d   : > { %v2382_v48 = vmul.f32 %v5979_v29, %v2381_v21  ;;  %2266 = vadd.xlane.f32.xlu1 %v8308_v62 }
 0x66f   : > { %v5985_v19 = vpop.eup %5984  ;;  %v2383_v1 = vadd.f32 %v5979_v29, %v2382_v48 }
 0x670   : > { %v5987_v24 = vpop.eup %5986  ;;  %v2395_v63 = vmul.f32 %v5985_v19, %v2259_v49  ;;  %vm2400_vm8 = vweird.f32 %v5985_v19 }
 0x671   : > { %v3038_v46 = vmul.f32 %v5987_v24, %v2915_v45  ;;  %v2193_v43 = vpop.xlane.xlu1 %2192  ;;  %v2387_v9 = vsel %vm2386_vm6, %v5979_v29, %v2383_v1  ;;  %v8316_v8 = vpop.eup %5988  ;;  %vm3043_vm9 = vweird.f32 %v5987_v24  ;;  %v2406_v29 = vor.u32 1.1754944e-38, %v2405_v11  ;;  %vm2401_vm12 = vmor %vm2399_vm10, %vm2400_vm8 }
 0x672   : > { %v2396_v51 = vsub.f32 1.0, %v2395_v63  ;;  %v2209_v34 = vsub.f32 %v8128_v4, %v2193_v43  ;;  %v2392_v38 = vsel %vm2389_vm7, %v2391_v44, %v2387_v9  ;;  %vm3044_vm14 = vmor %vm3042_vm11, %vm3043_vm9 }
 0x673   : > { %v3039_v31 = vsub.f32 1.0, %v3038_v46  ;;  %v2393_v41 = vmul.f32 %v8112_v61, %v2392_v38  ;;  %v8319_v61 = vpop.f32.mrf.mxu1 }
 0x674   : > { %v2397_v39 = vmul.f32 %v5985_v19, %v2396_v51  ;;  %v2240_v55 = vmul.f32 1.442695, %v2209_v34 }
 0x675   : > { %v3040_v54 = vmul.f32 %v5987_v24, %v3039_v31  ;;  %2926 = vadd.xlane.f32.xlu1 %v8316_v8  ;;  %2599 = vmatmul.f32.gmra.mxu2 %v2393_v41 }
 0x676   : > { %5990 = vpow2.f32 %v2240_v55  ;;  %v2398_v4 = vadd.f32 %v5985_v19, %v2397_v39 }
 0x677   : > { %v3041_v50 = vadd.f32 %v5987_v24, %v3040_v54 }
 0x678   : > { %v2402_v21 = vsel %vm2401_vm12, %v5985_v19, %v2398_v4 }
 0x679   : > { %v2851_v5 = vpop.xlane.xlu1 %2850  ;;  %v2407_v48 = vsel %vm2404_vm13, %v2406_v29, %v2402_v21  ;;  %v3045_v17 = vsel %vm3044_vm14, %v5987_v24, %v3041_v50 }
 0x67a   : > { %v2867_v1 = vsub.f32 %v8132_v25, %v2851_v5  ;;  %v2408_v49 = vmul.f32 %v8118_v59, %v2407_v48  ;;  %v3050_v63 = vsel %vm3047_vm15, %v3049_v23, %v3045_v17  ;;  %v2579_v25 = vpop.f32.mrf.mxu2 }
 0x67b   : > { %v3051_v44 = vmul.f32 %v8120_v13, %v3050_v63  ;;  %v8329_v19 = vpop.f32.mrf.mxu1 }
 0x67c   : > { %v8324_v45 = vpop.eup %5990  ;;  %v2898_v46 = vmul.f32 1.442695, %v2867_v1 }
 0x67d   : > { %v2261_v43 = vpop.xlane.xlu0 %2260  ;;  %2272 = vadd.xlane.f32.xlu1 %v8324_v45  ;;  %2602 = vmatmul.f32.gmra.mxu2 %v2408_v49 }
 0x67e   : > { %5992 = vpow2.f32 %v2898_v46  ;;  %3257 = vmatmul.f32.gmra.mxu1 %v3051_v44  ;;  %v2420_v51 = vand.u32 2147483648, %v2261_v43  ;;  %v2418_v38 = vand.u32 2147483647, %v2261_v43  ;;  %vm2414_vm3 = vweird.f32 %v2261_v43 }
 0x67f   : > { %5994 = vrcp.f32 %v2261_v43 }
 0x680   : > { %3301 = vrot.lane.b32.xlu0 %v8156_v3, %s6208_s23  ;;  %v2421_v57 = vor.u32 1.1754944e-38, %v2420_v51  ;;  %vm2419_vm5 = vcmp.eq.f32.partialorder %v2418_v38, 8.507059e+37 }
 0x682   : > { %v2582_v31 = vpop.f32.mrf.mxu2 }
 0x683   : > { %v8336_v11 = vpop.f32.mrf.mxu1 }
 0x684   : > { %v8331_v59 = vpop.eup %5992 }
 0x685   : > { %v5995_v24 = vpop.eup %5994  ;;  %2930 = vadd.xlane.f32.xlu2 %v8331_v59 }
 0x686   : > { %v2410_v13 = vmul.f32 %v5995_v24, %v2261_v43  ;;  %vm2415_vm2 = vweird.f32 %v5995_v24 }
 0x687   : > { %vm2416_vm4 = vmor %vm2414_vm3, %vm2415_vm2 }
 0x688   : > { %v2411_v9 = vsub.f32 1.0, %v2410_v13  ;;  %3303 = vrot.lane.b32.xlu0 %v8169_v18, %s6208_s23 }
 0x68a   : > { %v2412_v34 = vmul.f32 %v5995_v24, %v2411_v9  ;;  %v2585_v21 = vpop.f32.mrf.mxu2 }
 0x68b   : > { %v8341_v23 = vpop.f32.mrf.mxu1 }
 0x68c   : > { %v2413_v3 = vadd.f32 %v5995_v24, %v2412_v34 }
 0x68d   : > { %v2917_v41 = vpop.xlane.xlu2 %2916 }
 0x68e   : > { %v2263_v39 = vpop.xlane.xlu0 %2262  ;;  %5996 = vrcp.f32 %v2917_v41  ;;  %v2417_v55 = vsel %vm2416_vm4, %v5995_v24, %v2413_v3  ;;  %v3063_v17 = vand.u32 2147483648, %v2917_v41  ;;  %vm3057_vm8 = vweird.f32 %v2917_v41 }
 0x68f   : > { %5998 = vrcp.f32 %v2263_v39  ;;  %v2422_v42 = vsel %vm2419_vm5, %v2421_v57, %v2417_v55  ;;  %v2435_v1 = vand.u32 2147483648, %v2263_v39  ;;  %v2433_v44 = vand.u32 2147483647, %v2263_v39 }
 0x690   : > { %3367 = vrot.lane.b32.xlu0 %v2582_v31, %s6207_s22  ;;  %v2423_v18 = vmul.f32 %v8135_v7, %v2422_v42  ;;  %v3061_v7 = vand.u32 2147483647, %v2917_v41  ;;  %vm2429_vm9 = vweird.f32 %v2263_v39 }
 0x691   : > { %v2436_v13 = vor.u32 1.1754944e-38, %v2435_v1  ;;  %vm2434_vm13 = vcmp.eq.f32.partialorder %v2433_v44, 8.507059e+37 }
 0x692   : > { %2605 = vmatmul.f32.gmra.mxu2 %v2423_v18  ;;  %vm3062_vm12 = vcmp.eq.f32.partialorder %v3061_v7, 8.507059e+37 }
 0x693   : > { %v8346_v42 = vpop.f32.mrf.mxu1 }
 0x694   : > { %v5997_v54 = vpop.eup %5996 }
 0x695   : > { %v5999_v15 = vpop.eup %5998  ;;  %v3053_v4 = vmul.f32 %v5997_v54, %v2917_v41  ;;  %v2919_v29 = vpop.xlane.xlu2 %2918  ;;  %vm3058_vm6 = vweird.f32 %v5997_v54 }
 0x696   : > { %v2425_v50 = vmul.f32 %v5999_v15, %v2263_v39  ;;  %6000 = vrcp.f32 %v2919_v29  ;;  %3365 = vrot.lane.b32.xlu1 %v2579_v25, %s6207_s22  ;;  %vm2430_vm7 = vweird.f32 %v5999_v15  ;;  %v3064_v25 = vor.u32 1.1754944e-38, %v3063_v17  ;;  %vm3059_vm10 = vmor %vm3057_vm8, %vm3058_vm6 }
 0x697   : > { %v3054_v5 = vsub.f32 1.0, %v3053_v4  ;;  %vm2431_vm11 = vmor %vm2429_vm9, %vm2430_vm7  ;;  %v3078_v55 = vand.u32 2147483648, %v2919_v29  ;;  %v3076_v18 = vand.u32 2147483647, %v2919_v29  ;;  %vm3072_vm15 = vweird.f32 %v2919_v29 }
 0x698   : > { %v2426_v48 = vsub.f32 1.0, %v2425_v50  ;;  %3369 = vrot.lane.b32.xlu0 %v2585_v21, %s6207_s22 }
 0x699   : > { %v3055_v49 = vmul.f32 %v5997_v54, %v3054_v5  ;;  %v3079_v4 = vor.u32 1.1754944e-38, %v3078_v55  ;;  %vm3077_vm3 = vcmp.eq.f32.partialorder %v3076_v18, 8.507059e+37 }
 0x69a   : > { %v2427_v63 = vmul.f32 %v5999_v15, %v2426_v48 }
 0x69b   : > { %v3056_v46 = vadd.f32 %v5997_v54, %v3055_v49 }
 0x69c   : > { %v6001_v43 = vpop.eup %6000  ;;  %v2428_v24 = vadd.f32 %v5999_v15, %v2427_v63 }
 0x69d   : > { %v3068_v9 = vmul.f32 %v6001_v43, %v2919_v29  ;;  %v3060_v51 = vsel %vm3059_vm10, %v5997_v54, %v3056_v46  ;;  %vm3073_vm14 = vweird.f32 %v6001_v43 }
 0x69e   : > { %v2432_v34 = vsel %vm2431_vm11, %v5999_v15, %v2428_v24  ;;  %v3065_v38 = vsel %vm3062_vm12, %v3064_v25, %v3060_v51  ;;  %vm3074_vm2 = vmor %vm3072_vm15, %vm3073_vm14 }
 0x69f   : > { %v3069_v3 = vsub.f32 1.0, %v3068_v9  ;;  %v2437_v31 = vsel %vm2434_vm13, %v2436_v13, %v2432_v34  ;;  %v3066_v57 = vmul.f32 %v8148_v35, %v3065_v38  ;;  %v8349_v35 = vpop.f32.mrf.mxu1 }
 0x6a0   : > { %v2438_v41 = vmul.f32 %v8150_v26, %v2437_v31 }
 0x6a1   : > { %v3070_v39 = vmul.f32 %v6001_v43, %v3069_v3  ;;  %3260 = vmatmul.f32.gmra.mxu1 %v3066_v57 }
 0x6a2   : > { %2608 = vmatmul.f32.gmra.mxu2 %v2438_v41 }
 0x6a3   : > { %v3071_v54 = vadd.f32 %v6001_v43, %v3070_v39 }
 0x6a5   : > { %v3075_v15 = vsel %vm3074_vm2, %v6001_v43, %v3071_v54 }
 0x6a6   : > { %v3080_v50 = vsel %vm3077_vm3, %v3079_v4, %v3075_v15 }
 0x6a7   : > { %v3081_v21 = vmul.f32 %v8163_v0, %v3080_v50 }
 0x6a9   : > { %3263 = vmatmul.f32.gmra.mxu1 %v3081_v21  ;;  %v3534_v21 = vld [vmem:[%s9888_s3 + $0x38] sm:$0xff] }
 0x6aa   : > { %3595 = vmatpush.msrb.mxu3 %v3534_v21 }
 0x6ad   : > { %v2588_v26 = vpop.f32.mrf.mxu2 }
 0x6ae   : > { %3371 = vrot.lane.b32.xlu0 %v2588_v26, %s6207_s22 }
 0x6b1   : > { %v3237_v5 = vpop.f32.mrf.mxu1 }
 0x6b2   : > { %3429 = vrot.lane.b32.xlu2 %v3237_v5, %s6204_s18 }
 0x6b5   : > { %v2591_v48 = vpop.f32.mrf.mxu2 }
 0x6b6   : > { %3373 = vrot.lane.b32.xlu0 %v2591_v48, %s6207_s22 }
 0x6b7   : > { %v2265_v29 = vpop.xlane.xlu2 %2264 }
 0x6b8   : > { %6002 = vrcp.f32 %v2265_v29  ;;  %v2450_v63 = vand.u32 2147483648, %v2265_v29  ;;  %v2448_v46 = vand.u32 2147483647, %v2265_v29  ;;  %vm2444_vm5 = vweird.f32 %v2265_v29 }
 0x6b9   : > { %v3240_v17 = vpop.f32.mrf.mxu1 }
 0x6ba   : > { %3305 = vrot.lane.b32.xlu2 %v8190_v16, %s6208_s23  ;;  %3431 = vrot.lane.b32.xlu1 %v3240_v17, %s6204_s18  ;;  %v2451_v25 = vor.u32 1.1754944e-38, %v2450_v63  ;;  %vm2449_vm7 = vcmp.eq.f32.partialorder %v2448_v46, 8.507059e+37 }
 0x6be   : > { %v6003_v0 = vpop.eup %6002 }
 0x6bf   : > { %v2440_v1 = vmul.f32 %v6003_v0, %v2265_v29  ;;  %vm2445_vm4 = vweird.f32 %v6003_v0  ;;  %v8370_v34 = vpop.xlane.xlu2 %2924  ;;  %v3533_v29 = vld [vmem:[%s9888_s3 + $0x30] sm:$0xff] }
 0x6c0   : > { %vm2446_vm6 = vmor %vm2444_vm5, %vm2445_vm4  ;;  %3596 = vmatpush.msrb.mxu3 %v3533_v29 }
 0x6c1   : > { %v2441_v49 = vsub.f32 1.0, %v2440_v1  ;;  %v3243_v7 = vpop.f32.mrf.mxu1 }
 0x6c2   : > { %3307 = vrot.lane.b32.xlu2 %v8213_v22, %s6208_s23  ;;  %3433 = vrot.lane.b32.xlu1 %v3243_v7, %s6204_s18  ;;  %v8364_v22 = vpop.xlane.xlu0 %2922 }
 0x6c3   : > { %v2442_v44 = vmul.f32 %v6003_v0, %v2441_v49  ;;  %6004 = vrcp.f32 %v8364_v22  ;;  %v3108_v17 = vand.u32 2147483648, %v8364_v22  ;;  %v3106_v49 = vand.u32 2147483647, %v8364_v22 }
 0x6c4   : > { %vm3102_vm11 = vweird.f32 %v8364_v22 }
 0x6c5   : > { %v2443_v43 = vadd.f32 %v6003_v0, %v2442_v44  ;;  %v3531_v44 = vld [vmem:[%s9888_s3 + $0x20] sm:$0xff]  ;;  %vm3107_vm15 = vcmp.eq.f32.partialorder %v3106_v49, 8.507059e+37 }
 0x6c7   : > { %v2447_v16 = vsel %vm2446_vm6, %v6003_v0, %v2443_v43  ;;  %v8384_v41 = vpop.xlane.xlu2 %2270 }
 0x6c8   : > { %v2452_v24 = vsel %vm2449_vm7, %v2451_v25, %v2447_v16 }
 0x6c9   : > { %v3246_v13 = vpop.f32.mrf.mxu1  ;;  %v2453_v9 = vmul.f32 %v8232_v2, %v2452_v24  ;;  %v8372_v38 = vpop.eup %6004 }
 0x6ca   : > { %3309 = vrot.lane.b32.xlu2 %v8227_v37, %s6208_s23  ;;  %3435 = vrot.lane.b32.xlu1 %v3246_v13, %s6204_s18  ;;  %v3098_v31 = vmul.f32 %v8372_v38, %v8364_v22  ;;  %vm3103_vm10 = vweird.f32 %v8372_v38 }
 0x6cb   : > { %2611 = vmatmul.f32.gmra.mxu2 %v2453_v9  ;;  %vm8442_vm14 = vmor %vm3102_vm11, %vm3103_vm10 }
 0x6d2   : > { %v3249_v51 = vpop.f32.mrf.mxu1  ;;  %3311 = vrot.lane.b32.xlu2 %v8252_v53, %s6208_s23  ;;  %v3099_v53 = vsub.f32 1.0, %v3098_v31  ;;  %v3530_v31 = vld [vmem:[%s9888_s3 + $0x18] sm:$0xff] }
 0x6d3   : > { %3437 = vrot.lane.b32.xlu1 %v3249_v51, %s6204_s18 }
 0x6d7   : > { %v2594_v2 = vpop.f32.mrf.mxu2  ;;  %v8374_v3 = vpop.xlane.xlu0 %2268 }
 0x6d8   : > { %v2921_v37 = vpop.xlane.xlu1 %2920  ;;  %3375 = vrot.lane.b32.xlu0 %v2594_v2, %s6207_s22 }
 0x6d9   : > { %6006 = vrcp.f32 %v2921_v37  ;;  %v3093_v48 = vand.u32 2147483648, %v2921_v37  ;;  %v3091_v1 = vand.u32 2147483647, %v2921_v37  ;;  %vm3087_vm9 = vweird.f32 %v2921_v37 }
 0x6da   : > { %v3252_v57 = vpop.f32.mrf.mxu1  ;;  %3313 = vrot.lane.b32.xlu2 %v8273_v32, %s6208_s23  ;;  %6008 = vrcp.f32 %v8374_v3  ;;  %v3100_v32 = vmul.f32 %v8372_v38, %v3099_v53 }
 0x6db   : > { %3439 = vrot.lane.b32.xlu1 %v3252_v57, %s6204_s18  ;;  %6010 = vrcp.f32 %v8370_v34  ;;  %v3094_v13 = vor.u32 1.1754944e-38, %v3093_v48  ;;  %v3109_v57 = vor.u32 1.1754944e-38, %v3108_v17  ;;  %vm3092_vm13 = vcmp.eq.f32.partialorder %v3091_v1, 8.507059e+37  ;;  %v3528_v48 = vld [vmem:[%s9888_s3 + $0x8] sm:$0xff]  ;;  %v3527_v1 = vld [vmem:[%s9888_s3] sm:$0xff] }
 0x6dc   : > { %v3101_v63 = vadd.f32 %v8372_v38, %v3100_v32  ;;  %v3123_v17 = vand.u32 2147483648, %v8370_v34 }
 0x6df   : > { %v6007_v55 = vpop.eup %6006  ;;  %v8426_v9 = vpop.xlane.xlu0 %2928 }
 0x6e0   : > { %v3083_v39 = vmul.f32 %v6007_v55, %v2921_v37  ;;  %v8386_v18 = vpop.xlane.xlu1 %2266  ;;  %v8388_v54 = vpop.eup %6008  ;;  %vm3088_vm8 = vweird.f32 %v6007_v55 }
 0x6e1   : > { %6012 = vrcp.f32 %v8386_v18  ;;  %v8391_v4 = vpop.eup %6010  ;;  %v2470_v26 = vmul.f32 %v8388_v54, %v8374_v3  ;;  %vm8420_vm12 = vmor %vm3087_vm9, %vm3088_vm8  ;;  %v2465_v21 = vand.u32 2147483648, %v8386_v18  ;;  %vm2459_vm3 = vweird.f32 %v8386_v18 }
 0x6e2   : > { %6014 = vrcp.f32 %v8384_v41  ;;  %v3084_v15 = vsub.f32 1.0, %v3083_v39  ;;  %v3255_v50 = vpop.f32.mrf.mxu1  ;;  %3315 = vrot.lane.b32.xlu2 %v8291_v27, %s6208_s23  ;;  %v3532_v27 = vld [vmem:[%s9888_s3 + $0x28] sm:$0xff]  ;;  %v3113_v0 = vmul.f32 %v8391_v4, %v8370_v34  ;;  %vm2475_vm5 = vweird.f32 %v8388_v54 }
 0x6e3   : > { %3441 = vrot.lane.b32.xlu1 %v3255_v50, %s6204_s18  ;;  %3597 = vmatpush.msrb.mxu3 %v3532_v27  ;;  %v2471_v24 = vsub.f32 1.0, %v2470_v26  ;;  %v3529_v50 = vld [vmem:[%s9888_s3 + $0x10] sm:$0xff]  ;;  %vm3118_vm6 = vweird.f32 %v8391_v4  ;;  %vm2474_vm8 = vweird.f32 %v8374_v3  ;;  %vm3117_vm9 = vweird.f32 %v8370_v34 }
 0x6e4   : > { %v3085_v5 = vmul.f32 %v6007_v55, %v3084_v15  ;;  %v3114_v53 = vsub.f32 1.0, %v3113_v0  ;;  %v3105_v15 = vsel %vm8442_vm14, %v8372_v38, %v3101_v63  ;;  %v2463_v38 = vand.u32 2147483647, %v8386_v18  ;;  %vm2476_vm10 = vmor %vm2474_vm8, %vm2475_vm5 }
 0x6e5   : > { %3598 = vmatpush.msrb.mxu3 %v3531_v44  ;;  %v3110_v27 = vsel %vm3107_vm15, %v3109_v57, %v3105_v15  ;;  %v3121_v0 = vand.u32 2147483647, %v8370_v34  ;;  %v2466_v63 = vor.u32 1.1754944e-38, %v2465_v21  ;;  %v2478_v57 = vand.u32 2147483647, %v8374_v3  ;;  %vm8499_vm11 = vmor %vm3117_vm9, %vm3118_vm6 }
 0x6e6   : > { %v3086_v7 = vadd.f32 %v6007_v55, %v3085_v5  ;;  %v3115_v29 = vmul.f32 %v8391_v4, %v3114_v53  ;;  %vm2464_vm7 = vcmp.eq.f32.partialorder %v2463_v38, 8.507059e+37  ;;  %v3111_v39 = vmul.f32 %v8198_v33, %v3110_v27 }
 0x6e7   : > { %v6013_v46 = vpop.eup %6012  ;;  %v2597_v43 = vpop.f32.mrf.mxu2  ;;  %3599 = vmatpush.msrb.mxu3 %v3530_v31  ;;  %vm2489_vm14 = vweird.f32 %v8384_v41 }
 0x6e8   : > { %v8424_v16 = vpop.eup %6014  ;;  %v2455_v51 = vmul.f32 %v6013_v46, %v8386_v18  ;;  %v8429_v2 = vpop.xlane.xlu1 %2926  ;;  %3377 = vrot.lane.b32.xlu0 %v2597_v43, %s6207_s22  ;;  %v3090_v37 = vsel %vm8420_vm12, %v6007_v55, %v3086_v7  ;;  %vm2460_vm2 = vweird.f32 %v6013_v46  ;;  %vm2479_vm12 = vcmp.eq.f32.partialorder %v2478_v57, 8.507059e+37 }
 0x6e9   : > { %6016 = vrcp.f32 %v8429_v2  ;;  %v3095_v55 = vsel %vm3092_vm13, %v3094_v13, %v3090_v37  ;;  %v2485_v22 = vmul.f32 %v8424_v16, %v8384_v41  ;;  %3600 = vmatpush.msrb.mxu3 %v3529_v50  ;;  %vm2461_vm4 = vmor %vm2459_vm3, %vm2460_vm2  ;;  %v2480_v13 = vand.u32 2147483648, %v8374_v3 }
 0x6ea   : > { %v2456_v32 = vsub.f32 1.0, %v2455_v51  ;;  %3317 = vrot.lane.b32.xlu2 %v8303_v47, %s6208_s23  ;;  %6018 = vrcp.f32 %v8426_v9  ;;  %v3096_v26 = vmul.f32 %v8299_v58, %v3095_v55  ;;  %v2472_v47 = vmul.f32 %v8388_v54, %v2471_v24 }
 0x6eb   : > { %v2486_v7 = vsub.f32 1.0, %v2485_v22  ;;  %3601 = vmatpush.msrb.mxu3 %v3528_v48  ;;  %v3116_v37 = vadd.f32 %v8391_v4, %v3115_v29  ;;  %v3124_v55 = vor.u32 1.1754944e-38, %v3123_v17  ;;  %vm3122_vm13 = vcmp.eq.f32.partialorder %v3121_v0, 8.507059e+37 }
 0x6ec   : > { %v2457_v5 = vmul.f32 %v6013_v46, %v2456_v32  ;;  %3266 = vmatmul.f32.gmra.mxu1 %v3096_v26  ;;  %v2473_v25 = vadd.f32 %v8388_v54, %v2472_v47  ;;  %vm2490_vm15 = vweird.f32 %v8424_v16  ;;  %v2495_v22 = vand.u32 2147483648, %v8384_v41 }
 0x6ed   : > { %3602 = vmatpush.msrb.mxu3 %v3527_v1  ;;  %v2487_v53 = vmul.f32 %v8424_v16, %v2486_v7  ;;  %v3120_v33 = vsel %vm8499_vm11, %v8391_v4, %v3116_v37  ;;  %v3138_v29 = vand.u32 2147483648, %v8429_v2  ;;  %vm8532_vm3 = vmor %vm2489_vm14, %vm2490_vm15  ;;  %vm3147_vm11 = vweird.f32 %v8426_v9 }
 0x6ee   : > { %v2458_v58 = vadd.f32 %v6013_v46, %v2457_v5  ;;  %v2477_v32 = vsel %vm2476_vm10, %v8388_v54, %v2473_v25  ;;  %v3125_v47 = vsel %vm3122_vm13, %v3124_v55, %v3120_v33  ;;  %v2493_v5 = vand.u32 2147483647, %v8384_v41 }
 0x6ef   : > { %v8471_v49 = vpop.eup %6016  ;;  %v2488_v50 = vadd.f32 %v8424_v16, %v2487_v53  ;;  %v3126_v1 = vmul.f32 %v8248_v10, %v3125_v47 }
 0x6f0   : > { %v3128_v18 = vmul.f32 %v8471_v49, %v8429_v2  ;;  %v8478_v44 = vpop.xlane.xlu1 %2272  ;;  %v2462_v43 = vsel %vm2461_vm4, %v6013_v46, %v2458_v58  ;;  %v8481_v24 = vpop.eup %6018  ;;  %vm3133_vm2 = vweird.f32 %v8471_v49  ;;  %vm3132_vm4 = vweird.f32 %v8429_v2 }
 0x6f1   : > { %6020 = vrcp.f32 %v8478_v44  ;;  %v2467_v51 = vsel %vm2464_vm7, %v2466_v63, %v2462_v43  ;;  %v3143_v34 = vmul.f32 %v8481_v24, %v8426_v9  ;;  %v2492_v7 = vsel %vm8532_vm3, %v8424_v16, %v2488_v50  ;;  %vm3134_vm5 = vmor %vm3132_vm4, %vm3133_vm2 }
 0x6f2   : > { %v3129_v31 = vsub.f32 1.0, %v3128_v18  ;;  %3319 = vrot.lane.b32.xlu2 %v8312_v52, %s6208_s23  ;;  %v2468_v46 = vmul.f32 %v8308_v62, %v2467_v51  ;;  %v2481_v62 = vor.u32 1.1754944e-38, %v2480_v13  ;;  %vm2494_vm6 = vcmp.eq.f32.partialorder %v2493_v5, 8.507059e+37 }
 0x6f3   : > { %v3144_v38 = vsub.f32 1.0, %v3143_v34  ;;  %v3139_v18 = vor.u32 1.1754944e-38, %v3138_v29  ;;  %v2510_v37 = vand.u32 2147483648, %v8478_v44  ;;  %vm3148_vm9 = vweird.f32 %v8481_v24 }
 0x6f4   : > { %2614 = vmatmul.f32.gmra.mxu2 %v2468_v46  ;;  %v3130_v3 = vmul.f32 %v8471_v49, %v3129_v31  ;;  %3269 = vmatmul.f32.gmra.mxu1 %v3111_v39  ;;  %v2482_v15 = vsel %vm2479_vm12, %v2481_v62, %v2477_v32  ;;  %v3153_v46 = vand.u32 2147483648, %v8426_v9  ;;  %vm2504_vm10 = vweird.f32 %v8478_v44  ;;  %vm3149_vm13 = vmor %vm3147_vm11, %vm3148_vm9 }
 0x6f5   : > { %v2483_v17 = vmul.f32 %v8296_v30, %v2482_v15  ;;  %v2496_v30 = vor.u32 1.1754944e-38, %v2495_v22  ;;  %v3145_v41 = vmul.f32 %v8481_v24, %v3144_v38  ;;  %v2508_v53 = vand.u32 2147483647, %v8478_v44 }
 0x6f6   : > { %v3131_v48 = vadd.f32 %v8471_v49, %v3130_v3  ;;  %v2511_v52 = vor.u32 1.1754944e-38, %v2510_v37  ;;  %v3154_v3 = vor.u32 1.1754944e-38, %v3153_v46  ;;  %vm3493_vm3 = vcmask 261120  }
 0x6f7   : > { %v8509_v54 = vpop.eup %6020  ;;  %v2497_v43 = vsel %vm2494_vm6, %v2496_v30, %v2492_v7  ;;  %vm2509_vm14 = vcmp.eq.f32.partialorder %v2508_v53, 8.507059e+37  ;;  %vm3510_vm4 = vcmask 392192   ;;  %v10015_v53 = vld [vmem:[#allocation17_spill] sm:$0xff] }
 0x6f8   : > { %v2500_v21 = vmul.f32 %v8509_v54, %v8478_v44  ;;  %v8517_v26 = vpop.xlane.xlu2 %2930  ;;  %v2600_v4 = vpop.f32.mrf.mxu2  ;;  %v3135_v10 = vsel %vm3134_vm5, %v8471_v49, %v3131_v48  ;;  %vm2505_vm8 = vweird.f32 %v8509_v54  ;;  %v2498_v31 = vmul.f32 %v8265_v36, %v2497_v43 }
 0x6f9   : > { %6022 = vrcp.f32 %v8517_v26  ;;  %3379 = vrot.lane.b32.xlu0 %v2600_v4, %s6207_s22  ;;  %v3146_v49 = vadd.f32 %v8481_v24, %v3145_v41  ;;  %vm2506_vm12 = vmor %vm2504_vm10, %vm2505_vm8  ;;  %v3151_v36 = vand.u32 2147483647, %v8426_v9  ;;  %v3302_v44 = vpop.permute.xlu0 %3301  ;;  %v3168_v9 = vand.u32 2147483648, %v8517_v26 }
 0x6fa   : > { %v2501_v27 = vsub.f32 1.0, %v2500_v21  ;;  %3321 = vrot.lane.b32.xlu2 %v8319_v61, %s6208_s23  ;;  %v3136_v61 = vand.u32 2147483647, %v8429_v2  ;;  %vm3162_vm5 = vweird.f32 %v8517_v26  ;;  %v3166_v50 = vand.u32 2147483647, %v8517_v26 }
 0x6fb   : > { %v3258_v0 = vpop.f32.mrf.mxu1  ;;  %v3150_v34 = vsel %vm3149_vm13, %v8481_v24, %v3146_v49  ;;  %vm3152_vm15 = vcmp.eq.f32.partialorder %v3151_v36, 8.507059e+37  ;;  %v3477_v24 = vsel %vm732_vm1, %v7523_v60, %v3302_v44 }
 0x6fc   : > { %v2502_v63 = vmul.f32 %v8509_v54, %v2501_v27  ;;  %3443 = vrot.lane.b32.xlu1 %v3258_v0, %s6204_s18  ;;  %2617 = vmatmul.f32.gmra.mxu2 %v2483_v17  ;;  %vm3137_vm7 = vcmp.eq.f32.partialorder %v3136_v61, 8.507059e+37  ;;  %v3155_v33 = vsel %vm3152_vm15, %v3154_v3, %v3150_v34 }
 0x6fd   : > { %3272 = vmatmul.f32.gmra.mxu1 %v3126_v1  ;;  %v3140_v13 = vsel %vm3137_vm7, %v3139_v18, %v3135_v10  ;;  %v3156_v15 = vmul.f32 %v8306_v28, %v3155_v33  ;;  %vm3167_vm7 = vcmp.eq.f32.partialorder %v3166_v50, 8.507059e+37 }
 0x6fe   : > { %v2503_v51 = vadd.f32 %v8509_v54, %v2502_v63  ;;  %v3141_v39 = vmul.f32 %v8316_v8, %v3140_v13 }
 0x6ff   : > { %v6023_v16 = vpop.eup %6022 }
 0x700   : > { %v3158_v2 = vmul.f32 %v6023_v16, %v8517_v26  ;;  %v2603_v25 = vpop.f32.mrf.mxu2  ;;  %v2507_v32 = vsel %vm2506_vm12, %v8509_v54, %v2503_v51  ;;  %vm3163_vm2 = vweird.f32 %v6023_v16 }
 0x701   : > { %3381 = vrot.lane.b32.xlu0 %v2603_v25, %s6207_s22  ;;  %vm3164_vm6 = vmor %vm3162_vm5, %vm3163_vm2  ;;  %v3304_v47 = vpop.permute.xlu0 %3303 }
 0x702   : > { %v3159_v57 = vsub.f32 1.0, %v3158_v2  ;;  %3323 = vrot.lane.b32.xlu2 %v8329_v19, %s6208_s23  ;;  %v2512_v19 = vsel %vm2509_vm14, %v2511_v52, %v2507_v32  ;;  %v3478_v29 = vsel %vm732_vm1, %v7532_v56, %v3304_v47 }
 0x703   : > { %v2513_v54 = vmul.f32 %v8324_v45, %v2512_v19  ;;  %v3169_v45 = vor.u32 1.1754944e-38, %v3168_v9  ;;  %v10016_v19 = vld [vmem:[#allocation12_spill] sm:$0xff] }
 0x704   : > { %2620 = vmatmul.f32.gmra.mxu2 %v2498_v31  ;;  %v3160_v62 = vmul.f32 %v6023_v16, %v3159_v57 }
 0x705   : > { %3275 = vmatmul.f32.gmra.mxu1 %v3141_v39 }
 0x706   : > { %v3161_v8 = vadd.f32 %v6023_v16, %v3160_v62 }
 0x708   : > { %v3366_v55 = vpop.permute.xlu1 %3365  ;;  %v3165_v4 = vsel %vm3164_vm6, %v6023_v16, %v3161_v8 }
 0x709   : > { %v3494_v22 = vsel %vm3493_vm3, %v3477_v24, %v3366_v55  ;;  %v3170_v60 = vsel %vm3167_vm7, %v3169_v45, %v3165_v4  ;;  %v3368_v48 = vpop.permute.xlu0 %3367 }
 0x70a   : > { %3325 = vrot.lane.b32.xlu2 %v8336_v11, %s6208_s23  ;;  %v3171_v28 = vmul.f32 %v8331_v59, %v3170_v60  ;;  %v8636_v60 = vld [vmem:[%s9889_s4] ss:$0 sm:$0xff] }
 0x70c   : > { %2623 = vmatmul.f32.gmra.mxu2 %v2513_v54  ;;  %v3430_v21 = vpop.permute.xlu2 %3429 }
 0x70d   : > { %3278 = vmatmul.f32.gmra.mxu1 %v3156_v15  ;;  %v3511_v11 = vsel %vm3510_vm4, %v3494_v22, %v3430_v21 }
 0x70e   : > { %5565 = vmatmul.msk.f32.vlgmr.msrb.gmra.mxu3 %vm489_vm0, %v3511_v11 }
 0x711   : > { %v3370_v58 = vpop.permute.xlu0 %3369 }
 0x712   : > { %3327 = vrot.lane.b32.xlu2 %v8341_v23, %s6208_s23 }
 0x714   : > { %v3306_v59 = vpop.permute.xlu2 %3305 }
 0x715   : > { %v2606_v26 = vpop.f32.mrf.mxu2  ;;  %3281 = vmatmul.f32.gmra.mxu1 %v3171_v28 }
 0x716   : > { %3383 = vrot.lane.b32.xlu0 %v2606_v26, %s6207_s22  ;;  %v10017_v26 = vld [vmem:[#allocation10_spill] sm:$0xff] }
 0x71a   : > { %3329 = vrot.lane.b32.xlu2 %v8346_v42, %s6208_s23  ;;  %v3495_v42 = vsel %vm3493_vm3, %v3478_v29, %v3368_v48 }
 0x71c   : > { %v3308_v0 = vpop.permute.xlu2 %3307 }
 0x71d   : > { %v3480_v30 = vsel %vm732_vm1, %v7549_v12, %v3308_v0  ;;  %v10014_v12 = vld [vmem:[#allocation18_spill] sm:$0xff]  ;;  %v10018_v0 = vld [vmem:[#allocation15_spill] sm:$0xff] }
 0x71e   : > { %v3261_v5 = vpop.f32.mrf.mxu1 }
 0x71f   : > { %3445 = vrot.lane.b32.xlu1 %v3261_v5, %s6204_s18 }
 0x720   : > { %v3372_v56 = vpop.permute.xlu0 %3371 }
 0x721   : > { %v3497_v63 = vsel %vm3493_vm3, %v3480_v30, %v3372_v56 }
 0x722   : > { %3331 = vrot.lane.b32.xlu2 %v8349_v35, %s6208_s23  ;;  %v3479_v35 = vsel %vm732_vm1, %v7544_v14, %v3306_v59 }
 0x723   : > { %v3496_v1 = vsel %vm3493_vm3, %v3479_v35, %v3370_v58 }
 0x724   : > { %v3310_v10 = vpop.permute.xlu2 %3309 }
 0x725   : > { %v2609_v38 = vpop.f32.mrf.mxu2  ;;  %v3481_v43 = vsel %vm732_vm1, %v7568_v6, %v3310_v10 }
 0x726   : > { %3385 = vrot.lane.b32.xlu0 %v2609_v38, %s6207_s22  ;;  %v3264_v23 = vpop.f32.mrf.mxu1 }
 0x727   : > { %3447 = vrot.lane.b32.xlu1 %v3264_v23, %s6204_s18 }
 0x728   : > { %v3374_v14 = vpop.permute.xlu0 %3373 }
 0x729   : > { %v3498_v16 = vsel %vm3493_vm3, %v3481_v43, %v3374_v14 }
 0x72c   : > { %v3432_v27 = vpop.permute.xlu1 %3431  ;;  %v3312_v13 = vpop.permute.xlu2 %3311 }
 0x72d   : > { %v3512_v17 = vsel %vm3510_vm4, %v3495_v42, %v3432_v27  ;;  %v3482_v51 = vsel %vm732_vm1, %v10014_v12, %v3312_v13  ;;  %v6177_v42 = vld [vmem:[%s6319_s29] sm:$0xff] }
 0x72e   : > { %5566 = vmatmul.msk.f32.gmra.mxu3 %vm489_vm0, %v3512_v17 }
 0x734   : > { %v3434_v7 = vpop.permute.xlu1 %3433  ;;  %v3314_v6 = vpop.permute.xlu2 %3313 }
 0x735   : > { %v3513_v61 = vsel %vm3510_vm4, %v3496_v1, %v3434_v7  ;;  %v3483_v39 = vsel %vm732_vm1, %v10015_v53, %v3314_v6  ;;  %v6181_v6 = vld [vmem:[%s6319_s29 + $0x20] sm:$0xff] }
 0x736   : > { %5567 = vmatmul.msk.f32.gmra.mxu3 %vm489_vm0, %v3513_v61 }
 0x73c   : > { %v3436_v41 = vpop.permute.xlu1 %3435  ;;  %v3316_v34 = vpop.permute.xlu2 %3315 }
 0x73d   : > { %v3514_v18 = vsel %vm3510_vm4, %v3497_v63, %v3436_v41  ;;  %v3484_v44 = vsel %vm732_vm1, %v10016_v19, %v3316_v34  ;;  %v6178_v41 = vld [vmem:[%s6319_s29 + $0x8] sm:$0xff] }
 0x73e   : > { %5568 = vmatmul.msk.f32.gmra.mxu3 %vm489_vm0, %v3514_v18 }
 0x744   : > { %v3318_v4 = vpop.permute.xlu2 %3317 }
 0x745   : > { %v3438_v2 = vpop.permute.xlu1 %3437  ;;  %v3485_v47 = vsel %vm732_vm1, %v10017_v26, %v3318_v4 }
 0x746   : > { %v3515_v25 = vsel %vm3510_vm4, %v3498_v16, %v3438_v2  ;;  %v6179_v16 = vld [vmem:[%s6319_s29 + $0x10] sm:$0xff] }
 0x747   : > { %5569 = vmatmul.msk.f32.gmra.mxu3 %vm489_vm0, %v3515_v25 }
 0x74a   : > { %v3376_v37 = vpop.permute.xlu0 %3375 }
 0x74b   : > { %v3499_v31 = vsel %vm3493_vm3, %v3482_v51, %v3376_v37  ;;  %v6180_v51 = vld [vmem:[%s6319_s29 + $0x18] sm:$0xff] }
 0x74c   : > { %v3320_v17 = vpop.permute.xlu2 %3319 }
 0x74d   : > { %v3440_v49 = vpop.permute.xlu1 %3439  ;;  %v3486_v1 = vsel %vm732_vm1, %v10018_v0, %v3320_v17  ;;  %v6211_v17 = vmov 64.0  }
 0x74e   : > { %v3516_v46 = vsel %vm3510_vm4, %v3499_v31, %v3440_v49  ;;  %v2612_v57 = vpop.f32.mrf.mxu2  ;;  %6024 = vrcp.f32 %v6211_v17 }
 0x74f   : > { %5570 = vmatmul.msk.f32.gmra.mxu3 %vm489_vm0, %v3516_v46  ;;  %3387 = vrot.lane.b32.xlu0 %v2612_v57, %s6207_s22 }
 0x754   : > { %v3322_v57 = vpop.permute.xlu2 %3321 }
 0x755   : > { %v3442_v32 = vpop.permute.xlu1 %3441 }
 0x75a   : > { %v3378_v36 = vpop.permute.xlu0 %3377 }
 0x75b   : > { %v3500_v52 = vsel %vm3493_vm3, %v3483_v39, %v3378_v36 }
 0x75c   : > { %v3517_v62 = vsel %vm3510_vm4, %v3500_v52, %v3442_v32  ;;  %v6182_v52 = vld [vmem:[%s6319_s29 + $0x28] sm:$0xff]  ;;  %v3324_v34 = vpop.permute.xlu2 %3323 }
 0x75d   : > { %5571 = vmatmul.msk.f32.gmra.mxu3 %vm489_vm0, %v3517_v62 }
 0x769   : > { %v3267_v3 = vpop.f32.mrf.mxu1 }
 0x76a   : > { %3449 = vrot.lane.b32.xlu1 %v3267_v3, %s6204_s18 }
 0x76b   : > { %v3380_v33 = vpop.permute.xlu0 %3379 }
 0x76c   : > { %v3501_v55 = vsel %vm3493_vm3, %v3484_v44, %v3380_v33  ;;  %v10019_v44 = vld [vmem:[#allocation13_spill] sm:$0xff] }
 0x76d   : > { %v3487_v33 = vsel %vm732_vm1, %v10019_v44, %v3322_v57 }
 0x76e   : > { %v3444_v8 = vpop.permute.xlu1 %3443 }
 0x76f   : > { %v3518_v9 = vsel %vm3510_vm4, %v3501_v55, %v3444_v8 }
 0x770   : > { %5572 = vmatmul.msk.f32.gmra.mxu3 %vm489_vm0, %v3518_v9 }
 0x771   : > { %v3270_v54 = vpop.f32.mrf.mxu1 }
 0x772   : > { %3451 = vrot.lane.b32.xlu1 %v3270_v54, %s6204_s18 }
 0x773   : > { %v3382_v45 = vpop.permute.xlu0 %3381 }
 0x774   : > { %v3502_v5 = vsel %vm3493_vm3, %v3485_v47, %v3382_v45 }
 0x777   : > { %v2615_v24 = vpop.f32.mrf.mxu2 }
 0x778   : > { %3389 = vrot.lane.b32.xlu0 %v2615_v24, %s6207_s22  ;;  %v3326_v24 = vpop.permute.xlu2 %3325 }
 0x77a   : > { %v3273_v15 = vpop.f32.mrf.mxu1 }
 0x77b   : > { %3453 = vrot.lane.b32.xlu1 %v3273_v15, %s6204_s18 }
 0x77f   : > { %v2618_v50 = vpop.f32.mrf.mxu2 }
 0x780   : > { %3391 = vrot.lane.b32.xlu0 %v2618_v50, %s6207_s22 }
 0x782   : > { %v3276_v22 = vpop.f32.mrf.mxu1 }
 0x783   : > { %3455 = vrot.lane.b32.xlu1 %v3276_v22, %s6204_s18  ;;  %v6183_v22 = vld [vmem:[%s6319_s29 + $0x30] sm:$0xff] }
 0x787   : > { %v2621_v21 = vpop.f32.mrf.mxu2 }
 0x788   : > { %3393 = vrot.lane.b32.xlu0 %v2621_v21, %s6207_s22  ;;  %v3384_v58 = vpop.permute.xlu0 %3383 }
 0x789   : > { %v3503_v7 = vsel %vm3493_vm3, %v3486_v1, %v3384_v58  ;;  %v6025_v1 = vpop.eup %6024 }
 0x78a   : > { %v3279_v11 = vpop.f32.mrf.mxu1  ;;  %vm3723_vm8 = vweird.f32 %v6025_v1 }
 0x78b   : > { %3457 = vrot.lane.b32.xlu1 %v3279_v11, %s6204_s18  ;;  %v10020_v11 = vld [vmem:[#allocation8_spill] sm:$0xff] }
 0x78c   : > { %v3488_v4 = vsel %vm732_vm1, %v10020_v11, %v3324_v34 }
 0x78f   : > { %v2624_v28 = vpop.f32.mrf.mxu2 }
 0x790   : > { %3395 = vrot.lane.b32.xlu0 %v2624_v28, %s6207_s22 }
 0x791   : > { %v3604_v38 = vpop.f32.mrf.mxu3  ;;  %v3446_v48 = vpop.permute.xlu1 %3445 }
 0x792   : > { %v3605_v23 = vadd.f32 %v8636_v60, %v3604_v38  ;;  %v3519_v59 = vsel %vm3510_vm4, %v3502_v5, %v3446_v48  ;;  %v3282_v29 = vpop.f32.mrf.mxu1  ;;  %v10021_v5 = vld [vmem:[#allocation7_spill] sm:$0xff] }
 0x793   : > { %3459 = vrot.lane.b32.xlu1 %v3282_v29, %s6204_s18  ;;  %5573 = vmatmul.msk.f32.gmra.mxu3 %vm489_vm0, %v3519_v59  ;;  %v3489_v38 = vsel %vm732_vm1, %v10021_v5, %v3326_v24 }
 0x794   : > { %v8647_v27 = vadd.f32 %v6177_v42, %v3605_v23  ;;  %v3328_v23 = vpop.permute.xlu2 %3327 }
 0x795   : > { %v3490_v58 = vsel %vm732_vm1, %v7725_v40, %v3328_v23 }
 0x796   : > { %v3670_v35 = vsel %vm489_vm0, %v8647_v27, 0.0 }
 0x797   : > { %3671 = vadd.xlane.f32.xlu2 %v3670_v35 }
 0x798   : > { %v3386_v19 = vpop.permute.xlu0 %3385 }
 0x799   : > { %v3448_v61 = vpop.permute.xlu1 %3447  ;;  %v3504_v55 = vsel %vm3493_vm3, %v3487_v33, %v3386_v19  ;;  %v6184_v19 = vld [vmem:[%s6319_s29 + $0x38] sm:$0xff] }
 0x79a   : > { %v3520_v56 = vsel %vm3510_vm4, %v3503_v7, %v3448_v61 }
 0x79b   : > { %5574 = vmatmul.msk.f32.gmra.mxu3 %vm489_vm0, %v3520_v56 }
 0x79c   : > { %v3330_v7 = vpop.permute.xlu2 %3329 }
 0x7b1   : > { %v3607_v30 = vpop.f32.mrf.mxu3 }
 0x7b2   : > { %v3608_v63 = vadd.f32 %v8636_v60, %v3607_v30  ;;  %v3719_v30 = vmul.f32 64.0, %v6025_v1 }
 0x7b4   : > { %v8658_v10 = vadd.f32 %v6178_v41, %v3608_v63  ;;  %v3491_v63 = vsel %vm732_vm1, %v7734_v20, %v3330_v7 }
 0x7b6   : > { %v3673_v14 = vsel %vm489_vm0, %v8658_v10, 0.0 }
 0x7b9   : > { %v3610_v18 = vpop.f32.mrf.mxu3 }
 0x7ba   : > { %v3611_v43 = vadd.f32 %v8636_v60, %v3610_v18  ;;  %3674 = vadd.xlane.f32.xlu0 %v3673_v14  ;;  %v3720_v14 = vsub.f32 1.0, %v3719_v30 }
 0x7bc   : > { %v8664_v2 = vadd.f32 %v6179_v16, %v3611_v43  ;;  %v3332_v16 = vpop.permute.xlu2 %3331 }
 0x7be   : > { %v3676_v25 = vsel %vm489_vm0, %v8664_v2, 0.0 }
 0x7bf   : > { %3677 = vadd.xlane.f32.xlu1 %v3676_v25  ;;  %v3721_v25 = vmul.f32 %v6025_v1, %v3720_v14 }
 0x7c1   : > { %v3613_v13 = vpop.f32.mrf.mxu3  ;;  %v3388_v50 = vpop.permute.xlu0 %3387 }
 0x7c2   : > { %v3614_v12 = vadd.f32 %v8636_v60, %v3613_v13  ;;  %v3505_v45 = vsel %vm3493_vm3, %v3488_v4, %v3388_v50  ;;  %v10022_v13 = vld [vmem:[#allocation6_spill] sm:$0xff] }
 0x7c4   : > { %v8670_v37 = vadd.f32 %v6180_v51, %v3614_v12  ;;  %v3492_v12 = vsel %vm732_vm1, %v10022_v13, %v3332_v16 }
 0x7c6   : > { %v3679_v31 = vsel %vm489_vm0, %v8670_v37, 0.0 }
 0x7c7   : > { %3680 = vadd.xlane.f32.xlu2 %v3679_v31 }
 0x7ca   : > { %v3616_v49 = vpop.f32.mrf.mxu3 }
 0x7cb   : > { %v3617_v46 = vadd.f32 %v8636_v60, %v3616_v49  ;;  %v3722_v49 = vadd.f32 %v6025_v1, %v3721_v25 }
 0x7cd   : > { %v8676_v53 = vadd.f32 %v6181_v6, %v3617_v46  ;;  %v8722_v57 = vsel %vm3723_vm8, %v6025_v1, %v3722_v49 }
 0x7cf   : > { %v3682_v39 = vsel %vm489_vm0, %v8676_v53, 0.0 }
 0x7d0   : > { %3683 = vadd.xlane.f32.xlu0 %v3682_v39 }
 0x7d2   : > { %v3619_v36 = vpop.f32.mrf.mxu3 }
 0x7d3   : > { %v3620_v32 = vadd.f32 %v8636_v60, %v3619_v36 }
 0x7d5   : > { %v8682_v62 = vadd.f32 %v6182_v52, %v3620_v32 }
 0x7d7   : > { %v3685_v3 = vsel %vm489_vm0, %v8682_v62, 0.0 }
 0x7d8   : > { %3686 = vadd.xlane.f32.xlu1 %v3685_v3 }
 0x7dc   : > { %v3450_v8 = vpop.permute.xlu1 %3449 }
 0x7dd   : > { %v3521_v9 = vsel %vm3510_vm4, %v3504_v55, %v3450_v8 }
 0x7de   : > { %5575 = vmatmul.msk.f32.gmra.mxu3 %vm489_vm0, %v3521_v9 }
 0x7e0   : > { %v3622_v54 = vpop.f32.mrf.mxu3 }
 0x7e1   : > { %v3623_v15 = vadd.f32 %v8636_v60, %v3622_v54 }
 0x7e3   : > { %v8693_v21 = vadd.f32 %v6183_v22, %v3623_v15 }
 0x7e4   : > { %v3452_v28 = vpop.permute.xlu1 %3451 }
 0x7e5   : > { %v3688_v26 = vsel %vm489_vm0, %v8693_v21, 0.0  ;;  %v3522_v47 = vsel %vm3510_vm4, %v3505_v45, %v3452_v28  ;;  %v6185_v45 = vld [vmem:[%s6319_s29 + $0x40] sm:$0xff] }
 0x7e6   : > { %3689 = vadd.xlane.f32.xlu0 %v3688_v26  ;;  %5576 = vmatmul.msk.f32.gmra.mxu3 %vm489_vm0, %v3522_v47 }
 0x7ea   : > { %v3390_v48 = vpop.permute.xlu0 %3389 }
 0x7eb   : > { %v3506_v59 = vsel %vm3493_vm3, %v3489_v38, %v3390_v48  ;;  %v6186_v48 = vld [vmem:[%s6319_s29 + $0x48] sm:$0xff] }
 0x7ed   : > { %v3454_v29 = vpop.permute.xlu1 %3453 }
 0x7ee   : > { %v3523_v42 = vsel %vm3510_vm4, %v3506_v59, %v3454_v29 }
 0x7ef   : > { %5577 = vmatmul.msk.f32.gmra.mxu3 %vm489_vm0, %v3523_v42 }
 0x7f2   : > { %v3392_v35 = vpop.permute.xlu0 %3391 }
 0x7f3   : > { %v3507_v0 = vsel %vm3493_vm3, %v3490_v58, %v3392_v35  ;;  %v3625_v32 = vpop.f32.mrf.mxu3 }
 0x7f4   : > { %v3626_v34 = vadd.f32 %v8636_v60, %v3625_v32  ;;  %v4074_v32 = vld [vmem:[%s9892_s7 + $0x38] sm:$0xff] }
 0x7f5   : > { %v3456_v61 = vpop.permute.xlu1 %3455  ;;  %4135 = vmatpush.msra.mxu2 %v4074_v32 }
 0x7f6   : > { %v3524_v56 = vsel %vm3510_vm4, %v3507_v0, %v3456_v61  ;;  %v8733_v44 = vadd.f32 %v6184_v19, %v3626_v34  ;;  %v4073_v34 = vld [vmem:[%s9892_s7 + $0x30] sm:$0xff]  ;;  %v4072_v19 = vld [vmem:[%s9892_s7 + $0x28] sm:$0xff] }
 0x7f7   : > { %5578 = vmatmul.msk.f32.gmra.mxu3 %vm489_vm0, %v3524_v56  ;;  %4136 = vmatpush.msra.mxu2 %v4073_v34 }
 0x7f8   : > { %v3691_v33 = vsel %vm489_vm0, %v8733_v44, 0.0 }
 0x7f9   : > { %4137 = vmatpush.msra.mxu2 %v4072_v19 }
 0x7fa   : > { %v3394_v41 = vpop.permute.xlu0 %3393 }
 0x7fb   : > { %v3508_v18 = vsel %vm3493_vm3, %v3491_v63, %v3394_v41 }
 0x7fd   : > { %v3458_v43 = vpop.permute.xlu1 %3457 }
 0x7fe   : > { %v3525_v40 = vsel %vm3510_vm4, %v3508_v18, %v3458_v43  ;;  %v6187_v43 = vld [vmem:[%s6319_s29 + $0x50] sm:$0xff] }
 0x7ff   : > { %5579 = vmatmul.msk.f32.gmra.mxu3 %vm489_vm0, %v3525_v40 }
 0x802   : > { %v3396_v51 = vpop.permute.xlu0 %3395 }
 0x803   : > { %v3509_v31 = vsel %vm3493_vm3, %v3492_v12, %v3396_v51  ;;  %v6188_v51 = vld [vmem:[%s6319_s29 + $0x58] sm:$0xff] }
 0x805   : > { %v3460_v20 = vpop.permute.xlu1 %3459 }
 0x806   : > { %v3526_v46 = vsel %vm3510_vm4, %v3509_v31, %v3460_v20 }
 0x807   : > { %5580 = vmatmul.msk.f32.gmra.mxu3 %vm489_vm0, %v3526_v46 }
 0x80a   : > { %v3672_v6 = vpop.xlane.xlu2 %3671 }
 0x80b   : > { %v3725_v39 = vmul.f32 %v8722_v57, %v3672_v6  ;;  %v6189_v6 = vld [vmem:[%s6319_s29 + $0x60] sm:$0xff] }
 0x80d   : > { %v8726_v36 = vsub.f32 %v8647_v27, %v3725_v39 }
 0x80f   : > { %v3757_v52 = vmul.f32 %v8726_v36, %v8726_v36 }
 0x811   : > { %v3773_v3 = vsel %vm489_vm0, %v3757_v52, 0.0 }
 0x812   : > { %3774 = vadd.xlane.f32.xlu2 %v3773_v3 }
 0x816   : > { %v3628_v55 = vpop.f32.mrf.mxu3 }
 0x817   : > { %v3629_v50 = vadd.f32 %v8636_v60, %v3628_v55  ;;  %v4071_v55 = vld [vmem:[%s9892_s7 + $0x20] sm:$0xff] }
 0x818   : > { %4138 = vmatpush.msra.mxu2 %v4071_v55 }
 0x819   : > { %v8752_v28 = vadd.f32 %v6185_v45, %v3629_v50  ;;  %v4068_v50 = vld [vmem:[%s9892_s7 + $0x8] sm:$0xff] }
 0x81a   : > { %3692 = vadd.xlane.f32.xlu2 %v3691_v33 }
 0x81e   : > { %v3631_v4 = vpop.f32.mrf.mxu3 }
 0x81f   : > { %v3632_v26 = vadd.f32 %v8636_v60, %v3631_v4 }
 0x821   : > { %v8760_v23 = vadd.f32 %v6186_v48, %v3632_v26 }
 0x823   : > { %v3697_v17 = vsel %vm489_vm0, %v8760_v23, 0.0 }
 0x82d   : > { %v3675_v27 = vpop.xlane.xlu0 %3674 }
 0x82e   : > { %v3726_v8 = vmul.f32 %v8722_v57, %v3675_v27  ;;  %v6190_v27 = vld [vmem:[%s6319_s29 + $0x68] sm:$0xff] }
 0x830   : > { %v8739_v9 = vsub.f32 %v8658_v10, %v3726_v8 }
 0x832   : > { %v3678_v54 = vpop.xlane.xlu1 %3677  ;;  %v3758_v24 = vmul.f32 %v8739_v9, %v8739_v9 }
 0x833   : > { %v3727_v15 = vmul.f32 %v8722_v57, %v3678_v54  ;;  %v4070_v54 = vld [vmem:[%s9892_s7 + $0x18] sm:$0xff] }
 0x834   : > { %v3776_v22 = vsel %vm489_vm0, %v3758_v24, 0.0  ;;  %4139 = vmatpush.msra.mxu2 %v4070_v54 }
 0x835   : > { %v8747_v11 = vsub.f32 %v8664_v2, %v3727_v15  ;;  %3777 = vadd.xlane.f32.xlu1 %v3776_v22  ;;  %v3694_v2 = vsel %vm489_vm0, %v8752_v28, 0.0  ;;  %v4069_v15 = vld [vmem:[%s9892_s7 + $0x10] sm:$0xff]  ;;  %v4067_v22 = vld [vmem:[%s9892_s7] sm:$0xff] }
 0x836   : > { %4140 = vmatpush.msra.mxu2 %v4069_v15 }
 0x837   : > { %v3759_v10 = vmul.f32 %v8747_v11, %v8747_v11 }
 0x838   : > { %4141 = vmatpush.msra.mxu2 %v4068_v50 }
 0x839   : > { %v3779_v47 = vsel %vm489_vm0, %v3759_v10, 0.0 }
 0x83a   : > { %v3681_v5 = vpop.xlane.xlu2 %3680  ;;  %3780 = vadd.xlane.f32.xlu0 %v3779_v47  ;;  %4142 = vmatpush.msra.mxu2 %v4067_v22 }
 0x83b   : > { %v3728_v38 = vmul.f32 %v8722_v57, %v3681_v5 }
 0x83d   : > { %v8763_v59 = vsub.f32 %v8670_v37, %v3728_v38  ;;  %3695 = vadd.xlane.f32.xlu1 %v3694_v2 }
 0x83f   : > { %v3760_v29 = vmul.f32 %v8763_v59, %v8763_v59 }
 0x841   : > { %v3782_v42 = vsel %vm489_vm0, %v3760_v29, 0.0 }
 0x842   : > { %3783 = vadd.xlane.f32.xlu2 %v3782_v42  ;;  %3698 = vadd.xlane.f32.xlu0 %v3697_v17 }
 0x843   : > { %v3684_v58 = vpop.xlane.xlu0 %3683 }
 0x844   : > { %v3729_v35 = vmul.f32 %v8722_v57, %v3684_v58 }
 0x846   : > { %v8772_v0 = vsub.f32 %v8676_v53, %v3729_v35 }
 0x848   : > { %v3761_v37 = vmul.f32 %v8772_v0, %v8772_v0 }
 0x84a   : > { %v3785_v1 = vsel %vm489_vm0, %v3761_v37, 0.0 }
 0x84b   : > { %3786 = vadd.xlane.f32.xlu1 %v3785_v1  ;;  %v3687_v7 = vpop.xlane.xlu1 %3686  ;;  %v6191_v1 = vld [vmem:[%s6319_s29 + $0x70] sm:$0xff] }
 0x84c   : > { %v3730_v61 = vmul.f32 %v8722_v57, %v3687_v7 }
 0x84e   : > { %v8779_v56 = vsub.f32 %v8682_v62, %v3730_v61 }
 0x850   : > { %v3762_v30 = vmul.f32 %v8779_v56, %v8779_v56 }
 0x852   : > { %v3788_v63 = vsel %vm489_vm0, %v3762_v30, 0.0 }
 0x853   : > { %3789 = vadd.xlane.f32.xlu0 %v3788_v63  ;;  %v8859_v63 = vld [vmem:[%s9891_s6] ss:$0 sm:$0xff] }
 0x859   : > { %v3690_v53 = vpop.xlane.xlu0 %3689 }
 0x85a   : > { %v3731_v18 = vmul.f32 %v8722_v57, %v3690_v53 }
 0x85c   : > { %v8790_v62 = vsub.f32 %v8693_v21, %v3731_v18 }
 0x85e   : > { %v3763_v12 = vmul.f32 %v8790_v62, %v8790_v62 }
 0x860   : > { %v3791_v49 = vsel %vm489_vm0, %v3763_v12, 0.0 }
 0x861   : > { %v3634_v41 = vpop.f32.mrf.mxu3 }
 0x862   : > { %v3635_v14 = vadd.f32 %v8636_v60, %v3634_v41 }
 0x864   : > { %v8787_v40 = vadd.f32 %v6187_v43, %v3635_v14 }
 0x866   : > { %v3700_v16 = vsel %vm489_vm0, %v8787_v40, 0.0 }
 0x867   : > { %3701 = vadd.xlane.f32.xlu2 %v3700_v16 }
 0x869   : > { %v3637_v25 = vpop.f32.mrf.mxu3 }
 0x86a   : > { %v3638_v13 = vadd.f32 %v8636_v60, %v3637_v25 }
 0x86c   : > { %v8798_v31 = vadd.f32 %v6188_v51, %v3638_v13 }
 0x86e   : > { %v3703_v20 = vsel %vm489_vm0, %v8798_v31, 0.0 }
 0x86f   : > { %3792 = vadd.xlane.f32.xlu2 %v3791_v49  ;;  %3704 = vadd.xlane.f32.xlu1 %v3703_v20 }
 0x872   : > { %v3640_v21 = vpop.f32.mrf.mxu3 }
 0x873   : > { %v3641_v46 = vadd.f32 %v8636_v60, %v3640_v21 }
 0x875   : > { %v8805_v39 = vadd.f32 %v6189_v6, %v3641_v46 }
 0x877   : > { %v3706_v52 = vsel %vm489_vm0, %v8805_v39, 0.0 }
 0x878   : > { %3707 = vadd.xlane.f32.xlu0 %v3706_v52 }
 0x87a   : > { %v3643_v3 = vpop.f32.mrf.mxu3 }
 0x87b   : > { %v3644_v33 = vadd.f32 %v8636_v60, %v3643_v3 }
 0x87d   : > { %v8823_v8 = vadd.f32 %v6190_v27, %v3644_v33 }
 0x87f   : > { %v3709_v24 = vsel %vm489_vm0, %v8823_v8, 0.0 }
 0x880   : > { %3710 = vadd.xlane.f32.xlu2 %v3709_v24 }
 0x882   : > { %v3646_v2 = vpop.f32.mrf.mxu3 }
 0x883   : > { %v3647_v17 = vadd.f32 %v8636_v60, %v3646_v2 }
 0x885   : > { %v3775_v4 = vpop.xlane.xlu2 %3774  ;;  %v8849_v7 = vadd.f32 %v6191_v1, %v3647_v17 }
 0x886   : > { %v3821_v10 = vmul.f32 %v3775_v4, %v8722_v57 }
 0x887   : > { %v3712_v41 = vsel %vm489_vm0, %v8849_v7, 0.0 }
 0x888   : > { %v3837_v45 = vadd.f32 1e-06, %v3821_v10 }
 0x88a   : > { %6026 = vrsqrt.f32 %v3837_v45  ;;  %vm3859_vm9 = vweird.f32 %v3837_v45  ;;  %v3649_v20 = vpop.f32.mrf.mxu3 }
 0x88b   : > { %v3650_v32 = vadd.f32 %v8636_v60, %v3649_v20  ;;  %v6192_v60 = vld [vmem:[%s6319_s29 + $0x78] sm:$0xff] }
 0x88d   : > { %v3693_v26 = vpop.xlane.xlu2 %3692  ;;  %v8886_v50 = vadd.f32 %v6192_v60, %v3650_v32 }
 0x88e   : > { %v3732_v47 = vmul.f32 %v8722_v57, %v3693_v26 }
 0x890   : > { %v6027_v5 = vpop.eup %6026  ;;  %v8842_v38 = vsub.f32 %v8733_v44, %v3732_v47  ;;  %v8854_v44 = vld [vmem:[%s9890_s5] ss:$0 sm:$0xff] }
 0x891   : > { %v3854_v48 = vmul.f32 %v6027_v5, %v3837_v45  ;;  %vm3860_vm1 = vweird.f32 %v6027_v5 }
 0x892   : > { %v3764_v29 = vmul.f32 %v8842_v38, %v8842_v38  ;;  %vm3861_vm10 = vmor %vm3859_vm9, %vm3860_vm1 }
 0x893   : > { %v3855_v42 = vmul.f32 %v6027_v5, %v3854_v48  ;;  %v3715_v48 = vsel %vm489_vm0, %v8886_v50, 0.0 }
 0x894   : > { %v3794_v58 = vsel %vm489_vm0, %v3764_v29, 0.0 }
 0x895   : > { %v3856_v35 = vmul.f32 0.5, %v3855_v42  ;;  %3795 = vadd.xlane.f32.xlu1 %v3794_v58 }
 0x897   : > { %v3857_v37 = vsub.f32 1.5, %v3856_v35 }
 0x899   : > { %v3858_v61 = vmul.f32 %v6027_v5, %v3857_v37 }
 0x89b   : > { %v3862_v30 = vsel %vm3861_vm10, %v6027_v5, %v3858_v61 }
 0x89c   : > { %v4013_v53 = vmul.f32 %v3862_v30, %v8726_v36 }
 0x89d   : > { %3713 = vadd.xlane.f32.xlu1 %v3712_v41 }
 0x89e   : > { %v4032_v18 = vmul.f32 %v8854_v44, %v4013_v53 }
 0x8a0   : > { %v8866_v14 = vadd.f32 %v8859_v63, %v4032_v18 }
 0x8a2   : > { %5581 = vmatmul.msk.f32.vlgmr.msra.gmra.mxu2 %vm489_vm0, %v8866_v14 }
 0x8a8   : > { %v3778_v43 = vpop.xlane.xlu1 %3777 }
 0x8a9   : > { %v3822_v16 = vmul.f32 %v3778_v43, %v8722_v57 }
 0x8ab   : > { %v3838_v25 = vadd.f32 1e-06, %v3822_v16 }
 0x8ad   : > { %6028 = vrsqrt.f32 %v3838_v25  ;;  %v3781_v13 = vpop.xlane.xlu0 %3780  ;;  %vm3869_vm12 = vweird.f32 %v3838_v25 }
 0x8ae   : > { %v3823_v36 = vmul.f32 %v3781_v13, %v8722_v57 }
 0x8b0   : > { %v3839_v12 = vadd.f32 1e-06, %v3823_v36  ;;  %v3696_v51 = vpop.xlane.xlu1 %3695 }
 0x8b1   : > { %v3733_v49 = vmul.f32 %v8722_v57, %v3696_v51 }
 0x8b2   : > { %6030 = vrsqrt.f32 %v3839_v12  ;;  %vm3879_vm15 = vweird.f32 %v3839_v12 }
 0x8b3   : > { %v6029_v21 = vpop.eup %6028  ;;  %v8874_v46 = vsub.f32 %v8752_v28, %v3733_v49 }
 0x8b4   : > { %v3864_v6 = vmul.f32 %v6029_v21, %v3838_v25  ;;  %vm3870_vm11 = vweird.f32 %v6029_v21 }
 0x8b5   : > { %v3784_v52 = vpop.xlane.xlu2 %3783  ;;  %v3699_v34 = vpop.xlane.xlu0 %3698  ;;  %v3765_v3 = vmul.f32 %v8874_v46, %v8874_v46  ;;  %vm3871_vm13 = vmor %vm3869_vm12, %vm3870_vm11 }
 0x8b6   : > { %v3865_v19 = vmul.f32 %v6029_v21, %v3864_v6  ;;  %v3824_v33 = vmul.f32 %v3784_v52, %v8722_v57  ;;  %v3734_v55 = vmul.f32 %v8722_v57, %v3699_v34 }
 0x8b7   : > { %v3797_v27 = vsel %vm489_vm0, %v3765_v3, 0.0 }
 0x8b8   : > { %v6031_v54 = vpop.eup %6030  ;;  %v3866_v24 = vmul.f32 0.5, %v3865_v19  ;;  %v3840_v15 = vadd.f32 1e-06, %v3824_v33  ;;  %v8883_v28 = vsub.f32 %v8760_v23, %v3734_v55  ;;  %3798 = vadd.xlane.f32.xlu0 %v3797_v27 }
 0x8b9   : > { %v3874_v22 = vmul.f32 %v6031_v54, %v3839_v12  ;;  %vm3880_vm14 = vweird.f32 %v6031_v54 }
 0x8ba   : > { %v3867_v4 = vsub.f32 1.5, %v3866_v24  ;;  %6032 = vrsqrt.f32 %v3840_v15  ;;  %v3766_v10 = vmul.f32 %v8883_v28, %v8883_v28  ;;  %vm3881_vm2 = vmor %vm3879_vm15, %vm3880_vm14  ;;  %vm3889_vm4 = vweird.f32 %v3840_v15 }
 0x8bb   : > { %v3875_v45 = vmul.f32 %v6031_v54, %v3874_v22 }
 0x8bc   : > { %v3868_v26 = vmul.f32 %v6029_v21, %v3867_v4  ;;  %v3800_v47 = vsel %vm489_vm0, %v3766_v10, 0.0 }
 0x8bd   : > { %v3876_v5 = vmul.f32 0.5, %v3875_v45  ;;  %3801 = vadd.xlane.f32.xlu2 %v3800_v47 }
 0x8be   : > { %v3872_v23 = vsel %vm3871_vm13, %v6029_v21, %v3868_v26  ;;  %v3787_v2 = vpop.xlane.xlu1 %3786 }
 0x8bf   : > { %v4014_v29 = vmul.f32 %v3872_v23, %v8739_v9  ;;  %v3877_v42 = vsub.f32 1.5, %v3876_v5  ;;  %v3825_v17 = vmul.f32 %v3787_v2, %v8722_v57 }
 0x8c0   : > { %v6033_v58 = vpop.eup %6032  ;;  %3716 = vadd.xlane.f32.xlu0 %v3715_v48 }
 0x8c1   : > { %v3878_v35 = vmul.f32 %v6031_v54, %v3877_v42  ;;  %v3884_v37 = vmul.f32 %v6033_v58, %v3840_v15  ;;  %v3841_v1 = vadd.f32 1e-06, %v3825_v17  ;;  %v4033_v61 = vmul.f32 %v8854_v44, %v4014_v29 }
 0x8c2   : > { %vm3890_vm3 = vweird.f32 %v6033_v58 }
 0x8c3   : > { %v3882_v30 = vsel %vm3881_vm2, %v6031_v54, %v3878_v35  ;;  %v3885_v53 = vmul.f32 %v6033_v58, %v3884_v37  ;;  %6034 = vrsqrt.f32 %v3841_v1  ;;  %v8898_v9 = vadd.f32 %v8859_v63, %v4033_v61  ;;  %vm3891_vm5 = vmor %vm3889_vm4, %vm3890_vm3 }
 0x8c4   : > { %v4015_v41 = vmul.f32 %v3882_v30, %v8747_v11  ;;  %vm3899_vm7 = vweird.f32 %v3841_v1 }
 0x8c5   : > { %v3886_v18 = vmul.f32 0.5, %v3885_v53  ;;  %5582 = vmatmul.msk.f32.gmra.mxu2 %vm489_vm0, %v8898_v9 }
 0x8c6   : > { %v3790_v43 = vpop.xlane.xlu0 %3789  ;;  %v4034_v13 = vmul.f32 %v8854_v44, %v4015_v41 }
 0x8c7   : > { %v3887_v16 = vsub.f32 1.5, %v3886_v18  ;;  %v3826_v25 = vmul.f32 %v3790_v43, %v8722_v57 }
 0x8c8   : > { %v8906_v6 = vadd.f32 %v8859_v63, %v4034_v13 }
 0x8c9   : > { %v6035_v36 = vpop.eup %6034  ;;  %v3888_v12 = vmul.f32 %v6033_v58, %v3887_v16  ;;  %v3842_v51 = vadd.f32 1e-06, %v3826_v25 }
 0x8ca   : > { %v3894_v11 = vmul.f32 %v6035_v36, %v3841_v1  ;;  %vm3900_vm6 = vweird.f32 %v6035_v36 }
 0x8cb   : > { %v3892_v49 = vsel %vm3891_vm5, %v6033_v58, %v3888_v12  ;;  %6036 = vrsqrt.f32 %v3842_v51  ;;  %vm3901_vm8 = vmor %vm3899_vm7, %vm3900_vm6  ;;  %vm3909_vm9 = vweird.f32 %v3842_v51 }
 0x8cc   : > { %v4016_v20 = vmul.f32 %v3892_v49, %v8763_v59  ;;  %v3895_v21 = vmul.f32 %v6035_v36, %v3894_v11 }
 0x8cd   : > { %5583 = vmatmul.msk.f32.gmra.mxu2 %vm489_vm0, %v8906_v6 }
 0x8ce   : > { %v3896_v32 = vmul.f32 0.5, %v3895_v21  ;;  %v4035_v34 = vmul.f32 %v8854_v44, %v4016_v20 }
 0x8d0   : > { %v3897_v52 = vsub.f32 1.5, %v3896_v32  ;;  %v8912_v59 = vadd.f32 %v8859_v63, %v4035_v34 }
 0x8d1   : > { %v6037_v3 = vpop.eup %6036 }
 0x8d2   : > { %v3898_v19 = vmul.f32 %v6035_v36, %v3897_v52  ;;  %v3904_v33 = vmul.f32 %v6037_v3, %v3842_v51  ;;  %vm3910_vm1 = vweird.f32 %v6037_v3 }
 0x8d3   : > { %vm3911_vm10 = vmor %vm3909_vm9, %vm3910_vm1 }
 0x8d4   : > { %v3902_v55 = vsel %vm3901_vm8, %v6035_v36, %v3898_v19  ;;  %v3905_v27 = vmul.f32 %v6037_v3, %v3904_v33 }
 0x8d5   : > { %v4017_v54 = vmul.f32 %v3902_v55, %v8772_v0  ;;  %5584 = vmatmul.msk.f32.gmra.mxu2 %vm489_vm0, %v8912_v59 }
 0x8d6   : > { %v3906_v24 = vmul.f32 0.5, %v3905_v27 }
 0x8d7   : > { %v4036_v60 = vmul.f32 %v8854_v44, %v4017_v54 }
 0x8d8   : > { %v3907_v15 = vsub.f32 1.5, %v3906_v24 }
 0x8d9   : > { %v8920_v26 = vadd.f32 %v8859_v63, %v4036_v60 }
 0x8da   : > { %v3908_v22 = vmul.f32 %v6037_v3, %v3907_v15  ;;  %v3702_v4 = vpop.xlane.xlu2 %3701 }
 0x8db   : > { %v3735_v45 = vmul.f32 %v8722_v57, %v3702_v4 }
 0x8dc   : > { %v3912_v10 = vsel %vm3911_vm10, %v6037_v3, %v3908_v22 }
 0x8dd   : > { %v4018_v0 = vmul.f32 %v3912_v10, %v8779_v56  ;;  %v8924_v47 = vsub.f32 %v8787_v40, %v3735_v45  ;;  %5585 = vmatmul.msk.f32.gmra.mxu2 %vm489_vm0, %v8920_v26  ;;  %v8979_v45 = vld [vmem:[%s9893_s8] ss:$0 sm:$0xff] }
 0x8df   : > { %v3767_v5 = vmul.f32 %v8924_v47, %v8924_v47  ;;  %v4037_v23 = vmul.f32 %v8854_v44, %v4018_v0  ;;  %v4847_v0 = vld [vmem:[%s9894_s9 + $0x78] sm:$0xff] }
 0x8e0   : > { %4852 = vmatpush.msrb.mxu0 %v4847_v0 }
 0x8e1   : > { %v3803_v2 = vsel %vm489_vm0, %v3767_v5, 0.0  ;;  %v8935_v40 = vadd.f32 %v8859_v63, %v4037_v23  ;;  %v4846_v23 = vld [vmem:[%s9894_s9 + $0x70] sm:$0xff] }
 0x8e2   : > { %v3793_v48 = vpop.xlane.xlu2 %3792  ;;  %3804 = vadd.xlane.f32.xlu1 %v3803_v2  ;;  %v3705_v29 = vpop.xlane.xlu1 %3704  ;;  %4853 = vmatpush.msrb.mxu0 %v4846_v23 }
 0x8e3   : > { %v3827_v42 = vmul.f32 %v3793_v48, %v8722_v57  ;;  %v3736_v56 = vmul.f32 %v8722_v57, %v3705_v29  ;;  %v4845_v48 = vld [vmem:[%s9894_s9 + $0x68] sm:$0xff] }
 0x8e4   : > { %4854 = vmatpush.msrb.mxu0 %v4845_v48 }
 0x8e5   : > { %v3843_v17 = vadd.f32 1e-06, %v3827_v42  ;;  %v8938_v58 = vsub.f32 %v8798_v31, %v3736_v56  ;;  %5586 = vmatmul.msk.f32.gmra.mxu2 %vm489_vm0, %v8935_v40  ;;  %v4844_v42 = vld [vmem:[%s9894_s9 + $0x60] sm:$0xff] }
 0x8e6   : > { %4855 = vmatpush.msrb.mxu0 %v4844_v42 }
 0x8e7   : > { %6038 = vrsqrt.f32 %v3843_v17  ;;  %v3768_v35 = vmul.f32 %v8938_v58, %v8938_v58  ;;  %vm3919_vm12 = vweird.f32 %v3843_v17 }
 0x8e9   : > { %v3806_v37 = vsel %vm489_vm0, %v3768_v35, 0.0 }
 0x8ea   : > { %3807 = vadd.xlane.f32.xlu2 %v3806_v37 }
 0x8eb   : > { %v3708_v1 = vpop.xlane.xlu0 %3707 }
 0x8ec   : > { %v3737_v61 = vmul.f32 %v8722_v57, %v3708_v1 }
 0x8ed   : > { %v6039_v30 = vpop.eup %6038 }
 0x8ee   : > { %v8947_v53 = vsub.f32 %v8805_v39, %v3737_v61  ;;  %v3914_v41 = vmul.f32 %v6039_v30, %v3843_v17  ;;  %vm3920_vm11 = vweird.f32 %v6039_v30  ;;  %v4843_v17 = vld [vmem:[%s9894_s9 + $0x58] sm:$0xff]  ;;  %v4842_v61 = vld [vmem:[%s9894_s9 + $0x50] sm:$0xff] }
 0x8ef   : > { %vm3921_vm13 = vmor %vm3919_vm12, %vm3920_vm11  ;;  %4856 = vmatpush.msrb.mxu0 %v4843_v17 }
 0x8f0   : > { %v3769_v31 = vmul.f32 %v8947_v53, %v8947_v53  ;;  %v3915_v18 = vmul.f32 %v6039_v30, %v3914_v41 }
 0x8f1   : > { %4857 = vmatpush.msrb.mxu0 %v4842_v61 }
 0x8f2   : > { %v3809_v43 = vsel %vm489_vm0, %v3769_v31, 0.0  ;;  %v3916_v16 = vmul.f32 0.5, %v3915_v18  ;;  %v4841_v31 = vld [vmem:[%s9894_s9 + $0x48] sm:$0xff] }
 0x8f3   : > { %v3711_v25 = vpop.xlane.xlu2 %3710  ;;  %3810 = vadd.xlane.f32.xlu0 %v3809_v43  ;;  %4858 = vmatpush.msrb.mxu0 %v4841_v31  ;;  %v4840_v43 = vld [vmem:[%s9894_s9 + $0x40] sm:$0xff] }
 0x8f4   : > { %v3738_v13 = vmul.f32 %v8722_v57, %v3711_v25  ;;  %v3917_v36 = vsub.f32 1.5, %v3916_v16  ;;  %v4839_v25 = vld [vmem:[%s9894_s9 + $0x38] sm:$0xff] }
 0x8f5   : > { %4859 = vmatpush.msrb.mxu0 %v4840_v43 }
 0x8f6   : > { %v8954_v12 = vsub.f32 %v8823_v8, %v3738_v13  ;;  %v3918_v51 = vmul.f32 %v6039_v30, %v3917_v36 }
 0x8f7   : > { %4860 = vmatpush.msrb.mxu0 %v4839_v25 }
 0x8f8   : > { %v3770_v39 = vmul.f32 %v8954_v12, %v8954_v12  ;;  %v3922_v11 = vsel %vm3921_vm13, %v6039_v30, %v3918_v51 }
 0x8f9   : > { %v4019_v49 = vmul.f32 %v3922_v11, %v8790_v62 }
 0x8fa   : > { %v3812_v20 = vsel %vm489_vm0, %v3770_v39, 0.0  ;;  %v4838_v39 = vld [vmem:[%s9894_s9 + $0x30] sm:$0xff] }
 0x8fb   : > { %3813 = vadd.xlane.f32.xlu1 %v3812_v20  ;;  %v4038_v21 = vmul.f32 %v8854_v44, %v4019_v49  ;;  %4861 = vmatpush.msrb.mxu0 %v4838_v39  ;;  %v4837_v20 = vld [vmem:[%s9894_s9 + $0x28] sm:$0xff] }
 0x8fd   : > { %v8962_v32 = vadd.f32 %v8859_v63, %v4038_v21  ;;  %4862 = vmatpush.msrb.mxu0 %v4837_v20 }
 0x8ff   : > { %5587 = vmatmul.msk.f32.gmra.mxu2 %vm489_vm0, %v8962_v32 }
 0x908   : > { %v3796_v8 = vpop.xlane.xlu1 %3795 }
 0x909   : > { %v3828_v52 = vmul.f32 %v3796_v8, %v8722_v57 }
 0x90b   : > { %v3844_v34 = vadd.f32 1e-06, %v3828_v52 }
 0x90d   : > { %6040 = vrsqrt.f32 %v3844_v34  ;;  %vm3929_vm15 = vweird.f32 %v3844_v34 }
 0x910   : > { %v3714_v3 = vpop.xlane.xlu1 %3713 }
 0x911   : > { %v3739_v19 = vmul.f32 %v8722_v57, %v3714_v3  ;;  %v4836_v3 = vld [vmem:[%s9894_s9 + $0x20] sm:$0xff] }
 0x912   : > { %4863 = vmatpush.msrb.mxu0 %v4836_v3 }
 0x913   : > { %v6041_v62 = vpop.eup %6040  ;;  %v8969_v33 = vsub.f32 %v8849_v7, %v3739_v19 }
 0x914   : > { %v3924_v55 = vmul.f32 %v6041_v62, %v3844_v34  ;;  %vm3930_vm14 = vweird.f32 %v6041_v62 }
 0x915   : > { %v3771_v27 = vmul.f32 %v8969_v33, %v8969_v33  ;;  %vm3931_vm2 = vmor %vm3929_vm15, %vm3930_vm14 }
 0x916   : > { %v3925_v54 = vmul.f32 %v6041_v62, %v3924_v55 }
 0x917   : > { %v3815_v24 = vsel %vm489_vm0, %v3771_v27, 0.0  ;;  %v4835_v27 = vld [vmem:[%s9894_s9 + $0x18] sm:$0xff] }
 0x918   : > { %v3926_v15 = vmul.f32 0.5, %v3925_v54  ;;  %3816 = vadd.xlane.f32.xlu2 %v3815_v24  ;;  %4864 = vmatpush.msrb.mxu0 %v4835_v27 }
 0x91a   : > { %v3927_v60 = vsub.f32 1.5, %v3926_v15 }
 0x91c   : > { %v3928_v22 = vmul.f32 %v6041_v62, %v3927_v60 }
 0x91e   : > { %v3932_v4 = vsel %vm3931_vm2, %v6041_v62, %v3928_v22 }
 0x91f   : > { %v4020_v10 = vmul.f32 %v3932_v4, %v8842_v38  ;;  %v4834_v4 = vld [vmem:[%s9894_s9 + $0x10] sm:$0xff] }
 0x920   : > { %4865 = vmatpush.msrb.mxu0 %v4834_v4 }
 0x921   : > { %v4039_v7 = vmul.f32 %v8854_v44, %v4020_v10 }
 0x923   : > { %v8985_v5 = vadd.f32 %v8859_v63, %v4039_v7 }
 0x925   : > { %v4144_v38 = vpop.f32.mrf.mxu2  ;;  %5588 = vmatmul.msk.f32.gmra.mxu2 %vm489_vm0, %v8985_v5 }
 0x926   : > { %v8993_v2 = vadd.f32 %v8979_v45, %v4144_v38  ;;  %v4833_v38 = vld [vmem:[%s9894_s9 + $0x8] sm:$0xff] }
 0x927   : > { %4866 = vmatpush.msrb.mxu0 %v4833_v38 }
 0x928   : > { %v8999_v29 = vmul.f32 0.70710677, %v8993_v2 }
 0x92a   : > { %v9005_v56 = vand.u32 2147483647, %v8999_v29  ;;  %vm4752_vm12 = vcmp.lt.f32.partialorder %v8999_v29, 0.0 }
 0x92b   : > { %v3799_v35 = vpop.xlane.xlu0 %3798 }
 0x92c   : > { %v4240_v37 = vmul.f32 0.3275911, %v9005_v56  ;;  %v3829_v1 = vmul.f32 %v3799_v35, %v8722_v57  ;;  %v4656_v42 = vsub.f32 0.0, %v9005_v56 }
 0x92e   : > { %v4256_v30 = vadd.f32 1.0, %v4240_v37  ;;  %v3845_v41 = vadd.f32 1e-06, %v3829_v1  ;;  %v4832_v1 = vld [vmem:[%s9894_s9] sm:$0xff] }
 0x92f   : > { %4867 = vmatpush.msrb.mxu0 %v4832_v1 }
 0x930   : > { %6042 = vrcp.f32 %v4256_v30  ;;  %v3802_v18 = vpop.xlane.xlu2 %3801  ;;  %v4283_v62 = vand.u32 2147483648, %v4256_v30  ;;  %v4281_v15 = vand.u32 2147483647, %v4256_v30  ;;  %vm4277_vm4 = vweird.f32 %v4256_v30 }
 0x931   : > { %6044 = vrsqrt.f32 %v3845_v41  ;;  %v3830_v16 = vmul.f32 %v3802_v18, %v8722_v57  ;;  %vm3939_vm8 = vweird.f32 %v3845_v41 }
 0x932   : > { %v4284_v7 = vor.u32 1.1754944e-38, %v4283_v62  ;;  %vm4282_vm7 = vcmp.eq.f32.partialorder %v4281_v15, 8.507059e+37 }
 0x933   : > { %v3846_v13 = vadd.f32 1e-06, %v3830_v16  ;;  %v3717_v36 = vpop.xlane.xlu0 %3716  ;;  %v4672_v16 = vmul.f32 %v4656_v42, %v9005_v56 }
 0x934   : > { %v3740_v51 = vmul.f32 %v8722_v57, %v3717_v36 }
 0x935   : > { %6046 = vrsqrt.f32 %v3846_v13  ;;  %vm3949_vm10 = vweird.f32 %v3846_v13 }
 0x936   : > { %v6043_v11 = vpop.eup %6042  ;;  %v9030_v49 = vsub.f32 %v8886_v50, %v3740_v51 }
 0x937   : > { %v6045_v21 = vpop.eup %6044  ;;  %v4273_v8 = vmul.f32 %v6043_v11, %v4256_v30  ;;  %vm4278_vm3 = vweird.f32 %v6043_v11 }
 0x938   : > { %v3934_v52 = vmul.f32 %v6045_v21, %v3845_v41  ;;  %v3772_v34 = vmul.f32 %v9030_v49, %v9030_v49  ;;  %vm4279_vm5 = vmor %vm4277_vm4, %vm4278_vm3  ;;  %vm3940_vm6 = vweird.f32 %v6045_v21 }
 0x939   : > { %v4274_v19 = vsub.f32 1.0, %v4273_v8  ;;  %vm3941_vm1 = vmor %vm3939_vm8, %vm3940_vm6 }
 0x93a   : > { %v3935_v50 = vmul.f32 %v6045_v21, %v3934_v52  ;;  %v3818_v55 = vsel %vm489_vm0, %v3772_v34, 0.0 }
 0x93b   : > { %v6047_v54 = vpop.eup %6046  ;;  %v4275_v24 = vmul.f32 %v6043_v11, %v4274_v19  ;;  %3819 = vadd.xlane.f32.xlu0 %v3818_v55 }
 0x93c   : > { %v3936_v60 = vmul.f32 0.5, %v3935_v50  ;;  %v3944_v22 = vmul.f32 %v6047_v54, %v3846_v13  ;;  %vm3950_vm9 = vweird.f32 %v6047_v54 }
 0x93d   : > { %v4276_v10 = vadd.f32 %v6043_v11, %v4275_v24  ;;  %vm3951_vm11 = vmor %vm3949_vm10, %vm3950_vm9 }
 0x93e   : > { %v3937_v0 = vsub.f32 1.5, %v3936_v60  ;;  %v3945_v23 = vmul.f32 %v6047_v54, %v3944_v22 }
 0x93f   : > { %v4280_v48 = vsel %vm4279_vm5, %v6043_v11, %v4276_v10 }
 0x940   : > { %v4285_v17 = vsel %vm4282_vm7, %v4284_v7, %v4280_v48  ;;  %v3938_v35 = vmul.f32 %v6045_v21, %v3937_v0  ;;  %v3946_v37 = vmul.f32 0.5, %v3945_v23 }
 0x941   : > { %v4512_v61 = vmul.f32 1.0614054, %v4285_v17 }
 0x942   : > { %v3942_v30 = vsel %vm3941_vm1, %v6045_v21, %v3938_v35  ;;  %v3947_v31 = vsub.f32 1.5, %v3946_v37  ;;  %v4688_v21 = vmul.f32 1.442695, %v4672_v16  ;;  %v4192_v35 = vmul.f32 0.5, %v8993_v2 }
 0x943   : > { %v4528_v18 = vadd.f32 -1.4531521, %v4512_v61  ;;  %v4021_v43 = vmul.f32 %v3942_v30, %v8874_v46 }
 0x944   : > { %v3948_v25 = vmul.f32 %v6047_v54, %v3947_v31  ;;  %6048 = vpow2.f32 %v4688_v21 }
 0x945   : > { %v4544_v36 = vmul.f32 %v4528_v18, %v4285_v17  ;;  %v4040_v41 = vmul.f32 %v8854_v44, %v4021_v43 }
 0x946   : > { %v3952_v51 = vsel %vm3951_vm11, %v6047_v54, %v3948_v25 }
 0x947   : > { %v4560_v39 = vadd.f32 1.4214138, %v4544_v36  ;;  %v4022_v11 = vmul.f32 %v3952_v51, %v8883_v28  ;;  %v9059_v20 = vadd.f32 %v8859_v63, %v4040_v41 }
 0x948   : > { %v4147_v52 = vpop.f32.mrf.mxu2 }
 0x949   : > { %v4576_v8 = vmul.f32 %v4560_v39, %v4285_v17  ;;  %5589 = vmatmul.msk.f32.gmra.mxu2 %vm489_vm0, %v9059_v20  ;;  %v4148_v46 = vadd.f32 %v8979_v45, %v4147_v52  ;;  %v4041_v13 = vmul.f32 %v8854_v44, %v4022_v11 }
 0x94a   : > { %v6049_v54 = vpop.eup %6048 }
 0x94b   : > { %v4592_v56 = vadd.f32 -0.28449672, %v4576_v8  ;;  %v9065_v34 = vmul.f32 0.70710677, %v4148_v46  ;;  %v9069_v62 = vadd.f32 %v8859_v63, %v4041_v13 }
 0x94d   : > { %v4608_v3 = vmul.f32 %v4592_v56, %v4285_v17  ;;  %v4225_v28 = vand.u32 2147483647, %v9065_v34 }
 0x94f   : > { %v4624_v19 = vadd.f32 0.2548296, %v4608_v3  ;;  %v4241_v50 = vmul.f32 0.3275911, %v4225_v28  ;;  %v4657_v18 = vsub.f32 0.0, %v4225_v28 }
 0x950   : > { %v4150_v27 = vpop.f32.mrf.mxu2 }
 0x951   : > { %v4640_v55 = vmul.f32 %v4624_v19, %v4285_v17  ;;  %5590 = vmatmul.msk.f32.gmra.mxu2 %vm489_vm0, %v9069_v62  ;;  %v4257_v24 = vadd.f32 1.0, %v4241_v50  ;;  %v9074_v15 = vadd.f32 %v8979_v45, %v4150_v27  ;;  %v4673_v51 = vmul.f32 %v4657_v18, %v4225_v28 }
 0x953   : > { %v4720_v60 = vmul.f32 %v6049_v54, %v4640_v55  ;;  %6050 = vrcp.f32 %v4257_v24  ;;  %v9077_v4 = vmul.f32 0.70710677, %v9074_v15  ;;  %v4298_v11 = vand.u32 2147483648, %v4257_v24 }
 0x954   : > { %v4296_v56 = vand.u32 2147483647, %v4257_v24  ;;  %v9110_v55 = vmul.f32 0.5, %v4148_v46  ;;  %v4690_v27 = vmul.f32 1.442695, %v4673_v51  ;;  %vm4292_vm14 = vweird.f32 %v4257_v24 }
 0x955   : > { %v4736_v22 = vsub.f32 1.0, %v4720_v60  ;;  %v3805_v10 = vpop.xlane.xlu1 %3804  ;;  %v4226_v0 = vand.u32 2147483647, %v9077_v4 }
 0x956   : > { %v3831_v23 = vmul.f32 %v3805_v10, %v8722_v57  ;;  %vm9125_vm2 = vcmp.eq.f32.partialorder %v4296_v56, 8.507059e+37 }
 0x957   : > { %v4768_v7 = vsub.f32 0.0, %v4736_v22  ;;  %v4242_v48 = vmul.f32 0.3275911, %v4226_v0  ;;  %v4658_v16 = vsub.f32 0.0, %v4226_v0 }
 0x958   : > { %v4153_v42 = vpop.f32.mrf.mxu2  ;;  %v9085_v1 = vadd.f32 1e-06, %v3831_v23 }
 0x959   : > { %v4784_v38 = vsel %vm4752_vm12, %v4768_v7, %v4736_v22  ;;  %v9082_v17 = vpop.eup %6050  ;;  %v9088_v61 = vadd.f32 %v8979_v45, %v4153_v42  ;;  %v9091_v31 = vadd.f32 1.0, %v4242_v48  ;;  %v4674_v13 = vmul.f32 %v4658_v16, %v4226_v0 }
 0x95a   : > { %v4800_v37 = vadd.f32 1.0, %v4784_v38  ;;  %v4288_v30 = vmul.f32 %v9082_v17, %v4257_v24  ;;  %6052 = vrsqrt.f32 %v9085_v1  ;;  %vm4293_vm13 = vweird.f32 %v9082_v17 }
 0x95b   : > { %v9095_v25 = vmul.f32 0.70710677, %v9088_v61  ;;  %6054 = vrcp.f32 %v9091_v31  ;;  %v4299_v22 = vor.u32 1.1754944e-38, %v4298_v11  ;;  %vm9119_vm15 = vmor %vm4292_vm14, %vm4293_vm13  ;;  %v4313_v23 = vand.u32 2147483648, %v9091_v31 }
 0x95c   : > { %v4816_v29 = vmul.f32 %v4800_v37, %v4192_v35  ;;  %v4289_v43 = vsub.f32 1.0, %v4288_v30  ;;  %v4692_v38 = vmul.f32 1.442695, %v4674_v13  ;;  %vm3959_vm3 = vweird.f32 %v9085_v1 }
 0x95d   : > { %v3808_v2 = vpop.xlane.xlu2 %3807  ;;  %v4227_v39 = vand.u32 2147483647, %v9095_v25  ;;  %vm4307_vm1 = vweird.f32 %v9091_v31 }
 0x95e   : > { %4868 = vmatmul.f32.vlgmr.msrb.gmra.mxu0 %v4816_v29  ;;  %v4290_v36 = vmul.f32 %v9082_v17, %v4289_v43  ;;  %v3832_v41 = vmul.f32 %v3808_v2, %v8722_v57  ;;  %v4311_v43 = vand.u32 2147483647, %v9091_v31 }
 0x95f   : > { %v4243_v3 = vmul.f32 0.3275911, %v4227_v39  ;;  %v4659_v42 = vsub.f32 0.0, %v4227_v39 }
 0x960   : > { %v9101_v21 = vadd.f32 1e-06, %v3832_v41  ;;  %v4156_v8 = vpop.f32.mrf.mxu2  ;;  %v6053_v52 = vpop.eup %6052  ;;  %v4291_v28 = vadd.f32 %v9082_v17, %v4290_v36  ;;  %v9141_v41 = vor.u32 1.1754944e-38, %v4313_v23  ;;  %vm9191_vm10 = vcmp.eq.f32.partialorder %v4311_v43, 8.507059e+37 }
 0x961   : > { %v9104_v19 = vadd.f32 %v8979_v45, %v4156_v8  ;;  %v3954_v50 = vmul.f32 %v6053_v52, %v9085_v1  ;;  %v9112_v54 = vadd.f32 1.0, %v4243_v3  ;;  %v9114_v60 = vpop.eup %6054  ;;  %vm3960_vm4 = vweird.f32 %v6053_v52 }
 0x962   : > { %6056 = vrsqrt.f32 %v9101_v21  ;;  %v4295_v37 = vsel %vm9119_vm15, %v9082_v17, %v4291_v28  ;;  %v4303_v30 = vmul.f32 %v9114_v60, %v9091_v31  ;;  %v4675_v56 = vmul.f32 %v4659_v42, %v4227_v39  ;;  %vm3961_vm5 = vmor %vm3959_vm3, %vm3960_vm4 }
 0x963   : > { %v3955_v10 = vmul.f32 %v6053_v52, %v3954_v50  ;;  %v9117_v7 = vmul.f32 0.70710677, %v9104_v19  ;;  %6058 = vrcp.f32 %v9112_v54  ;;  %v9148_v11 = vsel %vm9125_vm2, %v4299_v22, %v4295_v37 }
 0x964   : > { %6060 = vpow2.f32 %v4690_v27  ;;  %v4304_v50 = vsub.f32 1.0, %v4303_v30  ;;  %v4328_v22 = vand.u32 2147483648, %v9112_v54  ;;  %v4513_v39 = vmul.f32 1.0614054, %v9148_v11 }
 0x965   : > { %v3956_v24 = vmul.f32 0.5, %v3955_v10  ;;  %v9130_v35 = vand.u32 2147483647, %v9117_v7  ;;  %6062 = vpow2.f32 %v4692_v38  ;;  %vm3969_vm6 = vweird.f32 %v9101_v21 }
 0x966   : > { %v3811_v46 = vpop.xlane.xlu0 %3810  ;;  %vm4308_vm7 = vweird.f32 %v9114_v60  ;;  %vm4322_vm9 = vweird.f32 %v9112_v54 }
 0x967   : > { %v3833_v29 = vmul.f32 %v3811_v46, %v8722_v57  ;;  %v3957_v16 = vsub.f32 1.5, %v3956_v24  ;;  %v4244_v2 = vmul.f32 0.3275911, %v9130_v35  ;;  %v4660_v48 = vsub.f32 0.0, %v9130_v35  ;;  %vm4309_vm15 = vmor %vm4307_vm1, %vm4308_vm7 }
 0x968   : > { %v6057_v18 = vpop.eup %6056  ;;  %v4159_v36 = vpop.f32.mrf.mxu2 }
 0x969   : > { %v3964_v17 = vmul.f32 %v6057_v18, %v9101_v21  ;;  %v9144_v51 = vadd.f32 1e-06, %v3833_v29  ;;  %v3958_v8 = vmul.f32 %v6053_v52, %v3957_v16  ;;  %v9150_v13 = vadd.f32 1.0, %v4244_v2  ;;  %v9152_v3 = vpop.eup %6058 }
 0x96a   : > { %v9158_v27 = vadd.f32 %v8979_v45, %v4159_v36  ;;  %v9163_v0 = vpop.eup %6060  ;;  %v4318_v1 = vmul.f32 %v9152_v3, %v9112_v54  ;;  %vm3970_vm8 = vweird.f32 %v6057_v18  ;;  %v4305_v29 = vmul.f32 %v9114_v60, %v4304_v50 }
 0x96b   : > { %v3965_v28 = vmul.f32 %v6057_v18, %v3964_v17  ;;  %6064 = vrsqrt.f32 %v9144_v51  ;;  %v3962_v10 = vsel %vm3961_vm5, %v6053_v52, %v3958_v8  ;;  %v4694_v52 = vmul.f32 1.442695, %v4675_v56  ;;  %v9177_v30 = vpop.eup %6062  ;;  %vm3971_vm11 = vmor %vm3969_vm6, %vm3970_vm8 }
 0x96c   : > { %6066 = vrcp.f32 %v9150_v13  ;;  %v4023_v23 = vmul.f32 %v3962_v10, %v8924_v47  ;;  %v9173_v42 = vmul.f32 0.70710677, %v9158_v27  ;;  %v9181_v2 = vor.u32 1.1754944e-38, %v4328_v22 }
 0x96d   : > { %v3966_v38 = vmul.f32 0.5, %v3965_v28  ;;  %v4529_v36 = vadd.f32 -1.4531521, %v4513_v39  ;;  %v4319_v8 = vsub.f32 1.0, %v4318_v1  ;;  %6068 = vpow2.f32 %v4694_v52 }
 0x96e   : > { %v3814_v46 = vpop.xlane.xlu1 %3813  ;;  %v4042_v37 = vmul.f32 %v8854_v44, %v4023_v23  ;;  %v9187_v28 = vand.u32 2147483647, %v9173_v42  ;;  %vm3979_vm12 = vweird.f32 %v9144_v51  ;;  %vm4323_vm13 = vweird.f32 %v9152_v3 }
 0x96f   : > { %v3967_v24 = vsub.f32 1.5, %v3966_v38  ;;  %v3834_v47 = vmul.f32 %v3814_v46, %v8722_v57  ;;  %v4545_v1 = vmul.f32 %v4529_v36, %v9148_v11  ;;  %v9209_v46 = vmul.f32 %v4660_v48, %v9130_v35  ;;  %vm9246_vm3 = vmor %vm4322_vm9, %vm4323_vm13 }
 0x970   : > { %v9203_v39 = vadd.f32 %v8859_v63, %v4042_v37  ;;  %v4245_v52 = vmul.f32 0.3275911, %v9187_v28  ;;  %vm4337_vm14 = vweird.f32 %v9150_v13  ;;  %vm4753_vm9 = vcmp.lt.f32.partialorder %v9065_v34, 0.0 }
 0x971   : > { %v9183_v17 = vpop.eup %6064  ;;  %v3968_v56 = vmul.f32 %v6057_v18, %v3967_v24  ;;  %v9189_v10 = vadd.f32 1e-06, %v3834_v47  ;;  %v4343_v24 = vand.u32 2147483648, %v9150_v13  ;;  %v4561_v35 = vadd.f32 1.4214138, %v4545_v1 }
 0x972   : > { %v9195_v50 = vpop.eup %6066  ;;  %v3974_v22 = vmul.f32 %v9183_v17, %v9144_v51  ;;  %5591 = vmatmul.msk.f32.gmra.mxu2 %vm489_vm0, %v9203_v39  ;;  %v9219_v36 = vadd.f32 1.0, %v4245_v52  ;;  %vm3980_vm2 = vweird.f32 %v9183_v17  ;;  %v10031_v51 = vand.u32 2147483647, %v9112_v54 }
 0x973   : > { %v3972_v38 = vsel %vm3971_vm11, %v6057_v18, %v3968_v56  ;;  %v4333_v43 = vmul.f32 %v9195_v50, %v9150_v13  ;;  %6070 = vrsqrt.f32 %v9189_v10  ;;  %v4320_v18 = vmul.f32 %v9152_v3, %v4319_v8  ;;  %v9228_v8 = vpop.eup %6068  ;;  %vm3981_vm5 = vmor %vm3979_vm12, %vm3980_vm2 }
 0x974   : > { %v4024_v21 = vmul.f32 %v3972_v38, %v8938_v58  ;;  %v3975_v47 = vmul.f32 %v9183_v17, %v3974_v22  ;;  %v4306_v56 = vadd.f32 %v9114_v60, %v4305_v29  ;;  %v4341_v22 = vand.u32 2147483647, %v9150_v13 }
 0x975   : > { %v4334_v37 = vsub.f32 1.0, %v4333_v43  ;;  %6072 = vrcp.f32 %v9219_v36  ;;  %v4344_v43 = vor.u32 1.1754944e-38, %v4343_v24  ;;  %v4577_v52 = vmul.f32 %v4561_v35, %v9148_v11 }
 0x976   : > { %v3976_v48 = vmul.f32 0.5, %v3975_v47  ;;  %v4043_v58 = vmul.f32 %v8854_v44, %v4024_v21  ;;  %v4310_v21 = vsel %vm4309_vm15, %v9114_v60, %v4306_v56  ;;  %v4321_v47 = vadd.f32 %v9152_v3, %v4320_v18 }
 0x977   : > { %v4335_v1 = vmul.f32 %v9195_v50, %v4334_v37  ;;  %vm4338_vm4 = vweird.f32 %v9195_v50  ;;  %v4356_v24 = vand.u32 2147483647, %v9219_v36  ;;  %v9256_v60 = vsel %vm9191_vm10, %v9141_v41, %v4310_v21 }
 0x978   : > { %v3977_v38 = vsub.f32 1.5, %v3976_v48  ;;  %v9237_v29 = vadd.f32 %v8859_v63, %v4043_v58  ;;  %v4358_v18 = vand.u32 2147483648, %v9219_v36  ;;  %vm3989_vm6 = vweird.f32 %v9189_v10  ;;  %vm9277_vm8 = vmor %vm4337_vm14, %vm4338_vm4 }
 0x979   : > { %v6071_v16 = vpop.eup %6070  ;;  %v4593_v48 = vadd.f32 -0.28449672, %v4577_v52  ;;  %v4514_v58 = vmul.f32 1.0614054, %v9256_v60  ;;  %v4325_v41 = vsel %vm9246_vm3, %v9152_v3, %v4321_v47  ;;  %vm4327_vm7 = vcmp.eq.f32.partialorder %v10031_v51, 8.507059e+37 }
 0x97a   : > { %v3978_v37 = vmul.f32 %v9183_v17, %v3977_v38  ;;  %v3984_v35 = vmul.f32 %v6071_v16, %v9189_v10  ;;  %5592 = vmatmul.msk.f32.gmra.mxu2 %vm489_vm0, %v9237_v29  ;;  %v4336_v23 = vadd.f32 %v9195_v50, %v4335_v1  ;;  %v9285_v47 = vsel %vm4327_vm7, %v9181_v2, %v4325_v41 }
 0x97b   : > { %v6073_v38 = vpop.eup %6072  ;;  %v4609_v31 = vmul.f32 %v4593_v48, %v9148_v11  ;;  %v4530_v3 = vadd.f32 -1.4531521, %v4514_v58  ;;  %vm4342_vm1 = vcmp.eq.f32.partialorder %v4341_v22, 8.507059e+37  ;;  %vm3990_vm10 = vweird.f32 %v6071_v16 }
 0x97c   : > { %v3982_v56 = vsel %vm3981_vm5, %v9183_v17, %v3978_v37  ;;  %v3985_v21 = vmul.f32 %v6071_v16, %v3984_v35  ;;  %v4348_v54 = vmul.f32 %v6073_v38, %v9219_v36  ;;  %v4340_v1 = vsel %vm9277_vm8, %v9195_v50, %v4336_v23  ;;  %vm3991_vm13 = vmor %vm3989_vm6, %vm3990_vm10 }
 0x97d   : > { %v4025_v17 = vmul.f32 %v3982_v56, %v8947_v53  ;;  %v4625_v37 = vadd.f32 0.2548296, %v4609_v31  ;;  %v4546_v53 = vmul.f32 %v4530_v3, %v9256_v60  ;;  %v4515_v48 = vmul.f32 1.0614054, %v9285_v47 }
 0x97e   : > { %v3986_v13 = vmul.f32 0.5, %v3985_v21  ;;  %v4349_v35 = vsub.f32 1.0, %v4348_v54  ;;  %v9294_v58 = vsel %vm4342_vm1, %v4344_v43, %v4340_v1  ;;  %vm4353_vm11 = vweird.f32 %v6073_v38 }
 0x97f   : > { %v4044_v51 = vmul.f32 %v8854_v44, %v4025_v17  ;;  %v4641_v56 = vmul.f32 %v4625_v37, %v9148_v11  ;;  %v4562_v22 = vadd.f32 1.4214138, %v4546_v53  ;;  %v4531_v23 = vadd.f32 -1.4531521, %v4515_v48 }
 0x980   : > { %v3987_v2 = vsub.f32 1.5, %v3986_v13  ;;  %v4350_v41 = vmul.f32 %v6073_v38, %v4349_v35  ;;  %v4516_v52 = vmul.f32 1.0614054, %v9294_v58  ;;  %vm4352_vm12 = vweird.f32 %v9219_v36 }
 0x981   : > { %v9298_v50 = vadd.f32 %v8859_v63, %v4044_v51  ;;  %v4721_v21 = vmul.f32 %v9163_v0, %v4641_v56  ;;  %v4578_v43 = vmul.f32 %v4562_v22, %v9256_v60  ;;  %v4547_v63 = vmul.f32 %v4531_v23, %v9285_v47  ;;  %vm9317_vm14 = vmor %vm4352_vm12, %vm4353_vm11 }
 0x982   : > { %v4162_v44 = vpop.f32.mrf.mxu2  ;;  %v3988_v17 = vmul.f32 %v6071_v16, %v3987_v2  ;;  %v4532_v11 = vadd.f32 -1.4531521, %v4516_v52  ;;  %v4351_v3 = vadd.f32 %v6073_v38, %v4350_v41  ;;  %v4359_v54 = vor.u32 1.1754944e-38, %v4358_v18 }
 0x983   : > { %v9303_v31 = vadd.f32 %v8979_v45, %v4162_v44  ;;  %5593 = vmatmul.msk.f32.gmra.mxu2 %vm489_vm0, %v9298_v50  ;;  %v4737_v1 = vsub.f32 1.0, %v4721_v21  ;;  %v4594_v51 = vadd.f32 -0.28449672, %v4578_v43  ;;  %v4563_v53 = vadd.f32 1.4214138, %v4547_v63 }
 0x984   : > { %v3992_v0 = vsel %vm3991_vm13, %v6071_v16, %v3988_v17  ;;  %v4548_v35 = vmul.f32 %v4532_v11, %v9294_v58  ;;  %v4355_v16 = vsel %vm9317_vm14, %v6073_v38, %v4351_v3  ;;  %vm4357_vm15 = vcmp.eq.f32.partialorder %v4356_v24, 8.507059e+37  ;;  %v9347_v17 = vld [vmem:[%s9891_s6] ss:$0 sm:$0xff] }
 0x985   : > { %v9314_v13 = vmul.f32 0.70710677, %v9303_v31  ;;  %v4026_v10 = vmul.f32 %v3992_v0, %v8954_v12  ;;  %v4769_v48 = vsub.f32 0.0, %v4737_v1  ;;  %v4610_v18 = vmul.f32 %v4594_v51, %v9256_v60  ;;  %v9334_v12 = vld [vmem:[%s9890_s5] ss:$0 sm:$0xff] }
 0x986   : > { %v4579_v22 = vmul.f32 %v4563_v53, %v9285_v47  ;;  %v4564_v41 = vadd.f32 1.4214138, %v4548_v35  ;;  %v4661_v44 = vsub.f32 0.0, %v9187_v28  ;;  %v9342_v24 = vsel %vm4357_vm15, %v4359_v54, %v4355_v16 }
 0x987   : > { %v9324_v2 = vand.u32 2147483647, %v9314_v13  ;;  %v4045_v56 = vmul.f32 %v9334_v12, %v4026_v10  ;;  %v4785_v38 = vsel %vm4753_vm9, %v4769_v48, %v4737_v1  ;;  %v4626_v52 = vadd.f32 0.2548296, %v4610_v18 }
 0x988   : > { %v4801_v23 = vadd.f32 1.0, %v4785_v38  ;;  %v4595_v63 = vadd.f32 -0.28449672, %v4579_v22  ;;  %v4696_v11 = vmul.f32 1.442695, %v9209_v46  ;;  %v4580_v54 = vmul.f32 %v4564_v41, %v9294_v58 }
 0x989   : > { %v4246_v36 = vmul.f32 0.3275911, %v9324_v2  ;;  %v9350_v21 = vadd.f32 %v9347_v17, %v4045_v56  ;;  %v4642_v1 = vmul.f32 %v4626_v52, %v9256_v60  ;;  %v4517_v10 = vmul.f32 1.0614054, %v9342_v24 }
 0x98a   : > { %v4817_v0 = vmul.f32 %v4801_v23, %v9110_v55  ;;  %v4611_v37 = vmul.f32 %v4595_v63, %v9285_v47  ;;  %v4677_v46 = vmul.f32 %v4661_v44, %v9187_v28  ;;  %v4596_v55 = vadd.f32 -0.28449672, %v4580_v54 }
 0x98b   : > { %v3817_v43 = vpop.xlane.xlu2 %3816  ;;  %v9353_v34 = vadd.f32 1.0, %v4246_v36  ;;  %5594 = vmatmul.msk.f32.gmra.mxu2 %vm489_vm0, %v9350_v21  ;;  %v4722_v51 = vmul.f32 %v9177_v30, %v4642_v1  ;;  %v4533_v48 = vadd.f32 -1.4531521, %v4517_v10  ;;  %vm4754_vm2 = vcmp.lt.f32.partialorder %v9077_v4, 0.0 }
 0x98c   : > { %v3835_v3 = vmul.f32 %v3817_v43, %v8722_v57  ;;  %4871 = vmatmul.f32.gmra.mxu0 %v4817_v0  ;;  %v4627_v35 = vadd.f32 0.2548296, %v4611_v37  ;;  %v4612_v18 = vmul.f32 %v4596_v55, %v9294_v58  ;;  %v4698_v22 = vmul.f32 1.442695, %v4677_v46 }
 0x98d   : > { %6074 = vrcp.f32 %v9353_v34  ;;  %v4738_v60 = vsub.f32 1.0, %v4722_v51  ;;  %v4549_v56 = vmul.f32 %v4533_v48, %v9342_v24  ;;  %v4194_v36 = vmul.f32 0.5, %v9074_v15 }
 0x98e   : > { %v9366_v53 = vadd.f32 1e-06, %v3835_v3  ;;  %6076 = vpow2.f32 %v4696_v11  ;;  %v4643_v16 = vmul.f32 %v4627_v35, %v9285_v47  ;;  %v4628_v44 = vadd.f32 0.2548296, %v4612_v18 }
 0x98f   : > { %v4770_v28 = vsub.f32 0.0, %v4738_v60  ;;  %v4565_v38 = vadd.f32 1.4214138, %v4549_v56  ;;  %vm4755_vm3 = vcmp.lt.f32.partialorder %v9095_v25, 0.0  ;;  %v4371_v4 = vand.u32 2147483647, %v9353_v34 }
 0x990   : > { %6078 = vrsqrt.f32 %v9366_v53  ;;  %v4723_v41 = vmul.f32 %v9228_v8, %v4643_v16  ;;  %v4644_v63 = vmul.f32 %v4628_v44, %v9294_v58  ;;  %v4373_v15 = vand.u32 2147483648, %v9353_v34 }
 0x991   : > { %v4786_v47 = vsel %vm4754_vm2, %v4770_v28, %v4738_v60  ;;  %v4581_v11 = vmul.f32 %v4565_v38, %v9342_v24  ;;  %6080 = vpow2.f32 %v4698_v22  ;;  %vm4367_vm5 = vweird.f32 %v9353_v34 }
 0x992   : > { %v4739_v52 = vsub.f32 1.0, %v4723_v41  ;;  %v4802_v43 = vadd.f32 1.0, %v4786_v47  ;;  %v4195_v18 = vmul.f32 0.5, %v9088_v61  ;;  %v4374_v56 = vor.u32 1.1754944e-38, %v4373_v15 }
 0x993   : > { %v6075_v30 = vpop.eup %6074  ;;  %v4597_v10 = vadd.f32 -0.28449672, %v4581_v11  ;;  %vm4756_vm7 = vcmp.lt.f32.partialorder %v9117_v7, 0.0  ;;  %vm4372_vm8 = vcmp.eq.f32.partialorder %v4371_v4, 8.507059e+37  ;;  %v4662_v38 = vsub.f32 0.0, %v9324_v2 }
 0x994   : > { %v4363_v23 = vmul.f32 %v6075_v30, %v9353_v34  ;;  %v6077_v3 = vpop.eup %6076  ;;  %v4771_v54 = vsub.f32 0.0, %v4739_v52  ;;  %v4818_v1 = vmul.f32 %v4802_v43, %v4194_v36  ;;  %vm4368_vm4 = vweird.f32 %v6075_v30 }
 0x995   : > { %v4724_v37 = vmul.f32 %v6077_v3, %v4644_v63  ;;  %v4613_v48 = vmul.f32 %v4597_v10, %v9342_v24  ;;  %vm4369_vm6 = vmor %vm4367_vm5, %vm4368_vm4  ;;  %vm3999_vm9 = vweird.f32 %v9366_v53  ;;  %v4678_v7 = vmul.f32 %v4662_v38, %v9324_v2 }
 0x996   : > { %v4364_v8 = vsub.f32 1.0, %v4363_v23  ;;  %v6079_v0 = vpop.eup %6078  ;;  %v4787_v58 = vsel %vm4755_vm3, %v4771_v54, %v4739_v52  ;;  %4874 = vmatmul.f32.gmra.mxu0 %v4818_v1  ;;  %vm4757_vm11 = vcmp.lt.f32.partialorder %v9173_v42, 0.0  ;;  %vm4758_vm12 = vcmp.lt.f32.partialorder %v9314_v13, 0.0 }
 0x997   : > { %v3994_v51 = vmul.f32 %v6079_v0, %v9366_v53  ;;  %v4803_v35 = vadd.f32 1.0, %v4787_v58  ;;  %v4740_v55 = vsub.f32 1.0, %v4724_v37  ;;  %v4629_v28 = vadd.f32 0.2548296, %v4613_v48  ;;  %v6081_v41 = vpop.eup %6080 }
 0x998   : > { %v4365_v46 = vmul.f32 %v6075_v30, %v4364_v8  ;;  %vm4000_vm1 = vweird.f32 %v6079_v0  ;;  %v4700_v37 = vmul.f32 1.442695, %v4678_v7 }
 0x999   : > { %v3995_v60 = vmul.f32 %v6079_v0, %v3994_v51  ;;  %v4772_v22 = vsub.f32 0.0, %v4740_v55  ;;  %v4819_v36 = vmul.f32 %v4803_v35, %v4195_v18  ;;  %v4645_v23 = vmul.f32 %v4629_v28, %v9342_v24  ;;  %vm4001_vm10 = vmor %vm3999_vm9, %vm4000_vm1 }
 0x99a   : > { %v4366_v16 = vadd.f32 %v6075_v30, %v4365_v46  ;;  %v4196_v24 = vmul.f32 0.5, %v9104_v19  ;;  %6082 = vpow2.f32 %v4700_v37 }
 0x99b   : > { %v3996_v25 = vmul.f32 0.5, %v3995_v60  ;;  %v4788_v52 = vsel %vm4756_vm7, %v4772_v22, %v4740_v55  ;;  %v4725_v43 = vmul.f32 %v6081_v41, %v4645_v23  ;;  %v4197_v55 = vmul.f32 0.5, %v9158_v27 }
 0x99c   : > { %v4370_v44 = vsel %vm4369_vm6, %v6075_v30, %v4366_v16  ;;  %v4804_v30 = vadd.f32 1.0, %v4788_v52 }
 0x99d   : > { %v4375_v34 = vsel %vm4372_vm8, %v4374_v56, %v4370_v44  ;;  %v3997_v47 = vsub.f32 1.5, %v3996_v25  ;;  %v4741_v3 = vsub.f32 1.0, %v4725_v43 }
 0x99e   : > { %v4518_v61 = vmul.f32 1.0614054, %v4375_v34  ;;  %4877 = vmatmul.f32.gmra.mxu0 %v4819_v36  ;;  %v4820_v10 = vmul.f32 %v4804_v30, %v4196_v24 }
 0x99f   : > { %v3998_v63 = vmul.f32 %v6079_v0, %v3997_v47  ;;  %v4773_v15 = vsub.f32 0.0, %v4741_v3  ;;  %v4198_v47 = vmul.f32 0.5, %v9303_v31 }
 0x9a0   : > { %v4534_v11 = vadd.f32 -1.4531521, %v4518_v61  ;;  %v6083_v28 = vpop.eup %6082 }
 0x9a1   : > { %v4002_v8 = vsel %vm4001_vm10, %v6079_v0, %v3998_v63  ;;  %v4789_v46 = vsel %vm4757_vm11, %v4773_v15, %v4741_v3 }
 0x9a2   : > { %v4550_v4 = vmul.f32 %v4534_v11, %v4375_v34  ;;  %v4027_v54 = vmul.f32 %v4002_v8, %v8969_v33  ;;  %v4805_v33 = vadd.f32 1.0, %v4789_v46 }
 0x9a4   : > { %v4566_v1 = vadd.f32 1.4214138, %v4550_v4  ;;  %v4046_v53 = vmul.f32 %v9334_v12, %v4027_v54  ;;  %v4821_v16 = vmul.f32 %v4805_v33, %v4197_v55 }
 0x9a6   : > { %v4582_v2 = vmul.f32 %v4566_v1, %v4375_v34  ;;  %v9397_v58 = vadd.f32 %v9347_v17, %v4046_v53  ;;  %4880 = vmatmul.f32.gmra.mxu0 %v4820_v10 }
 0x9a8   : > { %v4165_v51 = vpop.f32.mrf.mxu2  ;;  %v4598_v19 = vadd.f32 -0.28449672, %v4582_v2  ;;  %5595 = vmatmul.msk.f32.gmra.mxu2 %vm489_vm0, %v9397_v58 }
 0x9a9   : > { %v9400_v0 = vadd.f32 %v8979_v45, %v4165_v51 }
 0x9aa   : > { %v4614_v35 = vmul.f32 %v4598_v19, %v4375_v34 }
 0x9ab   : > { %v9405_v42 = vmul.f32 0.70710677, %v9400_v0 }
 0x9ac   : > { %v4630_v60 = vadd.f32 0.2548296, %v4614_v35 }
 0x9ad   : > { %v4231_v48 = vand.u32 2147483647, %v9405_v42  ;;  %vm4759_vm6 = vcmp.lt.f32.partialorder %v9405_v42, 0.0 }
 0x9ae   : > { %v3820_v18 = vpop.xlane.xlu0 %3819  ;;  %v4646_v22 = vmul.f32 %v4630_v60, %v4375_v34  ;;  %4883 = vmatmul.f32.gmra.mxu0 %v4821_v16 }
 0x9af   : > { %v4247_v45 = vmul.f32 0.3275911, %v4231_v48  ;;  %v3836_v56 = vmul.f32 %v3820_v18, %v8722_v57  ;;  %v4663_v15 = vsub.f32 0.0, %v4231_v48 }
 0x9b0   : > { %v4726_v44 = vmul.f32 %v6083_v28, %v4646_v22 }
 0x9b1   : > { %v4263_v41 = vadd.f32 1.0, %v4247_v45  ;;  %v3852_v25 = vadd.f32 1e-06, %v3836_v56  ;;  %v4679_v51 = vmul.f32 %v4663_v15, %v4231_v48  ;;  %v9422_v45 = vld [vmem:[%s9893_s8] ss:$0 sm:$0xff] }
 0x9b2   : > { %v4742_v38 = vsub.f32 1.0, %v4726_v44 }
 0x9b3   : > { %6084 = vrcp.f32 %v4263_v41  ;;  %v4388_v7 = vand.u32 2147483648, %v4263_v41  ;;  %v4386_v8 = vand.u32 2147483647, %v4263_v41  ;;  %vm4382_vm14 = vweird.f32 %v4263_v41 }
 0x9b4   : > { %6086 = vrsqrt.f32 %v3852_v25  ;;  %v4774_v36 = vsub.f32 0.0, %v4742_v38  ;;  %vm4009_vm4 = vweird.f32 %v3852_v25  ;;  %v4702_v60 = vmul.f32 1.442695, %v4679_v51 }
 0x9b5   : > { %v4389_v13 = vor.u32 1.1754944e-38, %v4388_v7  ;;  %vm4387_vm3 = vcmp.eq.f32.partialorder %v4386_v8, 8.507059e+37 }
 0x9b6   : > { %v4790_v27 = vsel %vm4758_vm12, %v4774_v36, %v4742_v38  ;;  %6088 = vpow2.f32 %v4702_v60 }
 0x9b7   : > { %v4806_v52 = vadd.f32 1.0, %v4790_v27 }
 0x9b9   : > { %v6085_v23 = vpop.eup %6084  ;;  %v4822_v34 = vmul.f32 %v4806_v52, %v4198_v47  ;;  %v9440_v47 = vld [vmem:[%s9895_s10] ss:$0 sm:$0xff] }
 0x9ba   : > { %v6087_v61 = vpop.eup %6086  ;;  %v4378_v43 = vmul.f32 %v6085_v23, %v4263_v41  ;;  %vm4383_vm13 = vweird.f32 %v6085_v23 }
 0x9bb   : > { %v4004_v63 = vmul.f32 %v6087_v61, %v3852_v25  ;;  %4886 = vmatmul.f32.gmra.mxu0 %v4822_v34  ;;  %vm4384_vm15 = vmor %vm4382_vm14, %vm4383_vm13  ;;  %vm4010_vm2 = vweird.f32 %v6087_v61 }
 0x9bc   : > { %v4379_v11 = vsub.f32 1.0, %v4378_v43  ;;  %vm4011_vm5 = vmor %vm4009_vm4, %vm4010_vm2  ;;  %v6089_v44 = vpop.eup %6088 }
 0x9bd   : > { %v4005_v30 = vmul.f32 %v6087_v61, %v4004_v63 }
 0x9be   : > { %v4380_v3 = vmul.f32 %v6085_v23, %v4379_v11 }
 0x9bf   : > { %v4006_v4 = vmul.f32 0.5, %v4005_v30 }
 0x9c0   : > { %v4381_v24 = vadd.f32 %v6085_v23, %v4380_v3  ;;  %v4199_v3 = vmul.f32 0.5, %v9400_v0 }
 0x9c1   : > { %v4007_v54 = vsub.f32 1.5, %v4006_v4 }
 0x9c2   : > { %v4385_v31 = vsel %vm4384_vm15, %v6085_v23, %v4381_v24 }
 0x9c3   : > { %v4008_v1 = vmul.f32 %v6087_v61, %v4007_v54  ;;  %v4390_v37 = vsel %vm4387_vm3, %v4389_v13, %v4385_v31 }
 0x9c4   : > { %v4519_v10 = vmul.f32 1.0614054, %v4390_v37 }
 0x9c5   : > { %v4012_v53 = vsel %vm4011_vm5, %v6087_v61, %v4008_v1 }
 0x9c6   : > { %v4028_v46 = vmul.f32 %v4012_v53, %v9030_v49  ;;  %v4535_v2 = vadd.f32 -1.4531521, %v4519_v10 }
 0x9c8   : > { %v4047_v19 = vmul.f32 %v9334_v12, %v4028_v46  ;;  %v4551_v33 = vmul.f32 %v4535_v2, %v4390_v37 }
 0x9ca   : > { %v9415_v35 = vadd.f32 %v9347_v17, %v4047_v19  ;;  %v4567_v55 = vadd.f32 1.4214138, %v4551_v33 }
 0x9cc   : > { %v4168_v16 = vpop.f32.mrf.mxu2  ;;  %5596 = vmatmul.msk.f32.gmra.mxu2 %vm489_vm0, %v9415_v35  ;;  %v4583_v18 = vmul.f32 %v4567_v55, %v4390_v37 }
 0x9cd   : > { %v9425_v49 = vadd.f32 %v9422_v45, %v4168_v16 }
 0x9ce   : > { %v4599_v12 = vadd.f32 -0.28449672, %v4583_v18 }
 0x9cf   : > { %v9428_v17 = vmul.f32 0.70710677, %v9425_v49 }
 0x9d0   : > { %v4615_v48 = vmul.f32 %v4599_v12, %v4390_v37 }
 0x9d1   : > { %v4232_v56 = vand.u32 2147483647, %v9428_v17  ;;  %vm4760_vm14 = vcmp.lt.f32.partialorder %v9428_v17, 0.0 }
 0x9d2   : > { %v4631_v22 = vadd.f32 0.2548296, %v4615_v48 }
 0x9d3   : > { %v4248_v28 = vmul.f32 0.3275911, %v4232_v56 }
 0x9d4   : > { %v4171_v41 = vpop.f32.mrf.mxu2  ;;  %v4647_v25 = vmul.f32 %v4631_v22, %v4390_v37 }
 0x9d5   : > { %v4264_v38 = vadd.f32 1.0, %v4248_v28  ;;  %v9432_v36 = vadd.f32 %v9422_v45, %v4171_v41 }
 0x9d6   : > { %v4727_v27 = vmul.f32 %v6089_v44, %v4647_v25 }
 0x9d7   : > { %6090 = vrcp.f32 %v4264_v38  ;;  %v9435_v23 = vmul.f32 0.70710677, %v9432_v36  ;;  %v4403_v15 = vand.u32 2147483648, %v4264_v38  ;;  %v4401_v37 = vand.u32 2147483647, %v4264_v38 }
 0x9d8   : > { %v4743_v52 = vsub.f32 1.0, %v4727_v27  ;;  %vm4397_vm8 = vweird.f32 %v4264_v38 }
 0x9d9   : > { %v4233_v61 = vand.u32 2147483647, %v9435_v23  ;;  %v4404_v10 = vor.u32 1.1754944e-38, %v4403_v15  ;;  %vm4402_vm9 = vcmp.eq.f32.partialorder %v4401_v37, 8.507059e+37  ;;  %vm4761_vm15 = vcmp.lt.f32.partialorder %v9435_v23, 0.0 }
 0x9da   : > { %v4775_v43 = vsub.f32 0.0, %v4743_v52 }
 0x9db   : > { %v4869_v63 = vpop.f32.mrf.mxu0  ;;  %v4249_v34 = vmul.f32 0.3275911, %v4233_v61 }
 0x9dc   : > { %v4870_v11 = vadd.f32 %v9440_v47, %v4869_v63  ;;  %v4791_v7 = vsel %vm4759_vm6, %v4775_v43, %v4743_v52  ;;  %v4665_v43 = vsub.f32 0.0, %v4233_v61 }
 0x9dd   : > { %v6091_v30 = vpop.eup %6090  ;;  %v4807_v8 = vadd.f32 1.0, %v4791_v7  ;;  %v4265_v24 = vadd.f32 1.0, %v4249_v34 }
 0x9de   : > { %v4393_v4 = vmul.f32 %v6091_v30, %v4264_v38  ;;  %v9447_v13 = vadd.f32 %v4870_v11, %v8866_v14  ;;  %vm4398_vm7 = vweird.f32 %v6091_v30  ;;  %v4664_v14 = vsub.f32 0.0, %v4232_v56 }
 0x9df   : > { %v4823_v54 = vmul.f32 %v4807_v8, %v4199_v3  ;;  %6092 = vrcp.f32 %v4265_v24  ;;  %vm4399_vm1 = vmor %vm4397_vm8, %vm4398_vm7  ;;  %v4418_v55 = vand.u32 2147483648, %v4265_v24  ;;  %v4416_v12 = vand.u32 2147483647, %v4265_v24 }
 0x9e0   : > { %v4394_v31 = vsub.f32 1.0, %v4393_v4  ;;  %v4935_v42 = vsel %vm489_vm0, %v9447_v13, 0.0  ;;  %v4680_v16 = vmul.f32 %v4664_v14, %v4232_v56  ;;  %vm4412_vm11 = vweird.f32 %v4265_v24 }
 0x9e1   : > { %4889 = vmatmul.f32.gmra.mxu0 %v4823_v54  ;;  %4936 = vadd.xlane.f32.xlu1 %v4935_v42  ;;  %v4419_v28 = vor.u32 1.1754944e-38, %v4418_v55  ;;  %vm4417_vm13 = vcmp.eq.f32.partialorder %v4416_v12, 8.507059e+37  ;;  %v4681_v7 = vmul.f32 %v4665_v43, %v4233_v61 }
 0x9e2   : > { %v4395_v1 = vmul.f32 %v6091_v30, %v4394_v31  ;;  %v4704_v25 = vmul.f32 1.442695, %v4680_v16 }
 0x9e3   : > { %v4706_v15 = vmul.f32 1.442695, %v4681_v7 }
 0x9e4   : > { %v4396_v0 = vadd.f32 %v6091_v30, %v4395_v1  ;;  %6094 = vpow2.f32 %v4704_v25 }
 0x9e5   : > { %v6093_v53 = vpop.eup %6092  ;;  %6096 = vpow2.f32 %v4706_v15 }
 0x9e6   : > { %v4400_v46 = vsel %vm4399_vm1, %v6091_v30, %v4396_v0  ;;  %v4408_v2 = vmul.f32 %v6093_v53, %v4265_v24  ;;  %vm4413_vm10 = vweird.f32 %v6093_v53 }
 0x9e7   : > { %v4405_v51 = vsel %vm4402_vm9, %v4404_v10, %v4400_v46  ;;  %vm4414_vm12 = vmor %vm4412_vm11, %vm4413_vm10 }
 0x9e8   : > { %v4520_v19 = vmul.f32 1.0614054, %v4405_v51  ;;  %v4409_v33 = vsub.f32 1.0, %v4408_v2 }
 0x9ea   : > { %v4536_v60 = vadd.f32 -1.4531521, %v4520_v19  ;;  %v4410_v18 = vmul.f32 %v6093_v53, %v4409_v33  ;;  %v6095_v24 = vpop.eup %6094 }
 0x9ec   : > { %v4552_v48 = vmul.f32 %v4536_v60, %v4405_v51  ;;  %v4411_v22 = vadd.f32 %v6093_v53, %v4410_v18  ;;  %v4200_v60 = vmul.f32 0.5, %v9425_v49  ;;  %v6097_v18 = vpop.eup %6096 }
 0x9ee   : > { %v4568_v41 = vadd.f32 1.4214138, %v4552_v48  ;;  %v4415_v44 = vsel %vm4414_vm12, %v6093_v53, %v4411_v22 }
 0x9ef   : > { %v4420_v27 = vsel %vm4417_vm13, %v4419_v28, %v4415_v44 }
 0x9f0   : > { %v4584_v38 = vmul.f32 %v4568_v41, %v4405_v51  ;;  %v4521_v52 = vmul.f32 1.0614054, %v4420_v27 }
 0x9f2   : > { %v4600_v63 = vadd.f32 -0.28449672, %v4584_v38  ;;  %v4537_v34 = vadd.f32 -1.4531521, %v4521_v52 }
 0x9f4   : > { %v4616_v56 = vmul.f32 %v4600_v63, %v4405_v51  ;;  %v4553_v11 = vmul.f32 %v4537_v34, %v4420_v27 }
 0x9f5   : > { %v4174_v8 = vpop.f32.mrf.mxu2 }
 0x9f6   : > { %v4632_v30 = vadd.f32 0.2548296, %v4616_v56  ;;  %v4569_v3 = vadd.f32 1.4214138, %v4553_v11  ;;  %v9452_v54 = vadd.f32 %v9422_v45, %v4174_v8 }
 0x9f8   : > { %v4648_v4 = vmul.f32 %v4632_v30, %v4405_v51  ;;  %v4585_v31 = vmul.f32 %v4569_v3, %v4420_v27  ;;  %v9455_v1 = vmul.f32 0.70710677, %v9452_v54  ;;  %v4201_v30 = vmul.f32 0.5, %v9432_v36 }
 0x9fa   : > { %v4728_v42 = vmul.f32 %v6095_v24, %v4648_v4  ;;  %v4601_v37 = vadd.f32 -0.28449672, %v4585_v31  ;;  %v9458_v10 = vand.u32 2147483647, %v9455_v1 }
 0x9fc   : > { %v4744_v0 = vsub.f32 1.0, %v4728_v42  ;;  %v4617_v61 = vmul.f32 %v4601_v37, %v4420_v27  ;;  %v4250_v46 = vmul.f32 0.3275911, %v9458_v10 }
 0x9fd   : > { %v4177_v2 = vpop.f32.mrf.mxu2 }
 0x9fe   : > { %v4776_v53 = vsub.f32 0.0, %v4744_v0  ;;  %v4633_v14 = vadd.f32 0.2548296, %v4617_v61  ;;  %v4266_v19 = vadd.f32 1.0, %v4250_v46  ;;  %v9463_v33 = vadd.f32 %v9422_v45, %v4177_v2 }
 0xa00   : > { %v4792_v51 = vsel %vm4760_vm14, %v4776_v53, %v4744_v0  ;;  %v4649_v16 = vmul.f32 %v4633_v14, %v4420_v27  ;;  %6098 = vrcp.f32 %v4266_v19  ;;  %v9467_v12 = vmul.f32 0.70710677, %v9463_v33 }
 0xa01   : > { %v4808_v55 = vadd.f32 1.0, %v4792_v51  ;;  %v4433_v23 = vand.u32 2147483648, %v4266_v19  ;;  %vm4427_vm3 = vweird.f32 %v4266_v19  ;;  %v4431_v31 = vand.u32 2147483647, %v4266_v19 }
 0xa02   : > { %v4729_v17 = vmul.f32 %v6097_v18, %v4649_v16  ;;  %v9470_v22 = vand.u32 2147483647, %v9467_v12  ;;  %v4666_v51 = vsub.f32 0.0, %v9458_v10 }
 0xa03   : > { %v4824_v48 = vmul.f32 %v4808_v55, %v4200_v60  ;;  %v4434_v14 = vor.u32 1.1754944e-38, %v4433_v23  ;;  %vm4432_vm5 = vcmp.eq.f32.partialorder %v4431_v31, 8.507059e+37 }
 0xa04   : > { %v4745_v28 = vsub.f32 1.0, %v4729_v17  ;;  %v4251_v41 = vmul.f32 0.3275911, %v9470_v22 }
 0xa05   : > { %4892 = vmatmul.f32.gmra.mxu0 %v4824_v48 }
 0xa06   : > { %v4180_v25 = vpop.f32.mrf.mxu2  ;;  %v6099_v44 = vpop.eup %6098  ;;  %v4777_v49 = vsub.f32 0.0, %v4745_v28  ;;  %v4267_v52 = vadd.f32 1.0, %v4251_v41 }
 0xa07   : > { %v9474_v38 = vadd.f32 %v9422_v45, %v4180_v25  ;;  %v4423_v27 = vmul.f32 %v6099_v44, %v4266_v19  ;;  %vm4428_vm2 = vweird.f32 %v6099_v44 }
 0xa08   : > { %v4793_v63 = vsel %vm4761_vm15, %v4777_v49, %v4745_v28  ;;  %6100 = vrcp.f32 %v4267_v52  ;;  %vm9489_vm4 = vmor %vm4427_vm3, %vm4428_vm2  ;;  %v4448_v16 = vand.u32 2147483648, %v4267_v52  ;;  %v4446_v17 = vand.u32 2147483647, %v4267_v52 }
 0xa09   : > { %v9478_v43 = vmul.f32 0.70710677, %v9474_v38  ;;  %v4424_v34 = vsub.f32 1.0, %v4423_v27  ;;  %v4872_v56 = vpop.f32.mrf.mxu0  ;;  %v4809_v8 = vadd.f32 1.0, %v4793_v63  ;;  %v4682_v27 = vmul.f32 %v4666_v51, %v9458_v10 }
 0xa0a   : > { %v4873_v11 = vadd.f32 %v9440_v47, %v4872_v56  ;;  %vm4442_vm7 = vweird.f32 %v4267_v52  ;;  %v4449_v56 = vor.u32 1.1754944e-38, %v4448_v16  ;;  %vm4447_vm1 = vcmp.eq.f32.partialorder %v4446_v17, 8.507059e+37 }
 0xa0b   : > { %v9482_v7 = vand.u32 2147483647, %v9478_v43  ;;  %v4425_v3 = vmul.f32 %v6099_v44, %v4424_v34  ;;  %v4825_v15 = vmul.f32 %v4809_v8, %v4201_v30  ;;  %vm4762_vm3 = vcmp.lt.f32.partialorder %v9455_v1, 0.0 }
 0xa0c   : > { %v9486_v4 = vadd.f32 %v4873_v11, %v8898_v9 }
 0xa0d   : > { %v4252_v24 = vmul.f32 0.3275911, %v9482_v7  ;;  %v4426_v37 = vadd.f32 %v6099_v44, %v4425_v3  ;;  %4895 = vmatmul.f32.gmra.mxu0 %v4825_v15  ;;  %v4708_v15 = vmul.f32 1.442695, %v4682_v27 }
 0xa0e   : > { %v4183_v42 = vpop.f32.mrf.mxu2  ;;  %v4938_v36 = vsel %vm489_vm0, %v9486_v4, 0.0  ;;  %v6101_v9 = vpop.eup %6100 }
 0xa0f   : > { %v9495_v61 = vadd.f32 1.0, %v4252_v24  ;;  %v9498_v53 = vadd.f32 %v9422_v45, %v4183_v42  ;;  %4939 = vadd.xlane.f32.xlu2 %v4938_v36  ;;  %v4430_v46 = vsel %vm9489_vm4, %v6099_v44, %v4426_v37  ;;  %v4438_v2 = vmul.f32 %v6101_v9, %v4267_v52 }
 0xa10   : > { %v4435_v60 = vsel %vm4432_vm5, %v4434_v14, %v4430_v46  ;;  %vm4443_vm6 = vweird.f32 %v6101_v9  ;;  %v4667_v42 = vsub.f32 0.0, %v9470_v22  ;;  %vm4763_vm4 = vcmp.lt.f32.partialorder %v9467_v12, 0.0 }
 0xa11   : > { %6102 = vrcp.f32 %v9495_v61  ;;  %v4439_v19 = vsub.f32 1.0, %v4438_v2  ;;  %v9505_v55 = vmul.f32 0.70710677, %v9498_v53  ;;  %v4522_v18 = vmul.f32 1.0614054, %v4435_v60  ;;  %vm4444_vm8 = vmor %vm4442_vm7, %vm4443_vm6 }
 0xa12   : > { %v4463_v36 = vand.u32 2147483648, %v9495_v61  ;;  %v4461_v46 = vand.u32 2147483647, %v9495_v61  ;;  %vm4457_vm10 = vweird.f32 %v9495_v61  ;;  %vm4764_vm5 = vcmp.lt.f32.partialorder %v9478_v43, 0.0 }
 0xa13   : > { %v4440_v48 = vmul.f32 %v6101_v9, %v4439_v19  ;;  %v4875_v28 = vpop.f32.mrf.mxu0  ;;  %v9508_v41 = vand.u32 2147483647, %v9505_v55  ;;  %v4538_v44 = vadd.f32 -1.4531521, %v4522_v18  ;;  %v4683_v19 = vmul.f32 %v4667_v42, %v9470_v22 }
 0xa14   : > { %v4876_v25 = vadd.f32 %v9440_v47, %v4875_v28  ;;  %vm4462_vm12 = vcmp.eq.f32.partialorder %v4461_v46, 8.507059e+37 }
 0xa15   : > { %v4253_v63 = vmul.f32 0.3275911, %v9508_v41  ;;  %v4441_v34 = vadd.f32 %v6101_v9, %v4440_v48  ;;  %v4554_v3 = vmul.f32 %v4538_v44, %v4435_v60  ;;  %v4464_v44 = vor.u32 1.1754944e-38, %v4463_v36 }
 0xa16   : > { %v9515_v30 = vadd.f32 %v4876_v25, %v8906_v6 }
 0xa17   : > { %v6103_v49 = vpop.eup %6102  ;;  %v9517_v8 = vadd.f32 1.0, %v4253_v63  ;;  %v4445_v23 = vsel %vm4444_vm8, %v6101_v9, %v4441_v34  ;;  %v4570_v52 = vadd.f32 1.4214138, %v4554_v3  ;;  %v4710_v34 = vmul.f32 1.442695, %v4683_v19 }
 0xa18   : > { %v4453_v11 = vmul.f32 %v6103_v49, %v9495_v61  ;;  %v4941_v10 = vsel %vm489_vm0, %v9515_v30, 0.0  ;;  %v9521_v31 = vsel %vm4447_vm1, %v4449_v56, %v4445_v23  ;;  %vm4458_vm9 = vweird.f32 %v6103_v49 }
 0xa19   : > { %4942 = vadd.xlane.f32.xlu0 %v4941_v10  ;;  %6104 = vrcp.f32 %v9517_v8  ;;  %v4586_v37 = vmul.f32 %v4570_v52, %v4435_v60  ;;  %v4523_v0 = vmul.f32 1.0614054, %v9521_v31  ;;  %vm9531_vm11 = vmor %vm4457_vm10, %vm4458_vm9  ;;  %v4668_v56 = vsub.f32 0.0, %v9482_v7 }
 0xa1a   : > { %v4454_v24 = vsub.f32 1.0, %v4453_v11  ;;  %6106 = vpow2.f32 %v4708_v15  ;;  %v4478_v52 = vand.u32 2147483648, %v9517_v8  ;;  %vm4472_vm14 = vweird.f32 %v9517_v8 }
 0xa1b   : > { %v4878_v9 = vpop.f32.mrf.mxu0  ;;  %v4602_v2 = vadd.f32 -0.28449672, %v4586_v37  ;;  %v4539_v51 = vadd.f32 -1.4531521, %v4523_v0  ;;  %6108 = vpow2.f32 %v4710_v34  ;;  %vm4765_vm1 = vcmp.lt.f32.partialorder %v9505_v55, 0.0 }
 0xa1c   : > { %v4455_v6 = vmul.f32 %v6103_v49, %v4454_v24  ;;  %v4879_v14 = vadd.f32 %v9440_v47, %v4878_v9  ;;  %v4684_v9 = vmul.f32 %v4668_v56, %v9482_v7  ;;  %v4479_v19 = vor.u32 1.1754944e-38, %v4478_v52 }
 0xa1d   : > { %v4618_v17 = vmul.f32 %v4602_v2, %v4435_v60  ;;  %v4555_v28 = vmul.f32 %v4539_v51, %v9521_v31 }
 0xa1e   : > { %v4456_v16 = vadd.f32 %v6103_v49, %v4455_v6  ;;  %v9536_v48 = vadd.f32 %v4879_v14, %v8912_v59 }
 0xa1f   : > { %v6105_v25 = vpop.eup %6104  ;;  %v4634_v63 = vadd.f32 0.2548296, %v4618_v17  ;;  %v4571_v59 = vadd.f32 1.4214138, %v4555_v28 }
 0xa20   : > { %v4460_v27 = vsel %vm9531_vm11, %v6103_v49, %v4456_v16  ;;  %v4468_v22 = vmul.f32 %v6105_v25, %v9517_v8  ;;  %v4944_v61 = vsel %vm489_vm0, %v9536_v48, 0.0  ;;  %v6107_v10 = vpop.eup %6106  ;;  %vm4473_vm13 = vweird.f32 %v6105_v25 }
 0xa21   : > { %4945 = vadd.xlane.f32.xlu1 %v4944_v61  ;;  %v9545_v11 = vsel %vm4462_vm12, %v4464_v44, %v4460_v27  ;;  %v4650_v23 = vmul.f32 %v4634_v63, %v4435_v60  ;;  %v4476_v49 = vand.u32 2147483647, %v9517_v8  ;;  %v4587_v42 = vmul.f32 %v4571_v59, %v9521_v31  ;;  %vm4474_vm15 = vmor %vm4472_vm14, %vm4473_vm13  ;;  %v6109_v56 = vpop.eup %6108 }
 0xa22   : > { %v4469_v3 = vsub.f32 1.0, %v4468_v22  ;;  %v4524_v24 = vmul.f32 1.0614054, %v9545_v11  ;;  %v4202_v59 = vmul.f32 0.5, %v9452_v54 }
 0xa23   : > { %v4881_v15 = vpop.f32.mrf.mxu0  ;;  %v4730_v0 = vmul.f32 %v6107_v10, %v4650_v23  ;;  %v4603_v60 = vadd.f32 -0.28449672, %v4587_v42  ;;  %vm4477_vm2 = vcmp.eq.f32.partialorder %v4476_v49, 8.507059e+37 }
 0xa24   : > { %v4470_v6 = vmul.f32 %v6105_v25, %v4469_v3  ;;  %v4882_v37 = vadd.f32 %v9440_v47, %v4881_v15  ;;  %v4540_v36 = vadd.f32 -1.4531521, %v4524_v24  ;;  %v4669_v3 = vsub.f32 0.0, %v9508_v41 }
 0xa25   : > { %v4746_v14 = vsub.f32 1.0, %v4730_v0  ;;  %v4619_v16 = vmul.f32 %v4603_v60, %v9521_v31 }
 0xa26   : > { %v9555_v46 = vadd.f32 %v4882_v37, %v8920_v26  ;;  %v4556_v2 = vmul.f32 %v4540_v36, %v9545_v11  ;;  %v4471_v51 = vadd.f32 %v6105_v25, %v4470_v6  ;;  %v4712_v26 = vmul.f32 1.442695, %v4684_v9 }
 0xa27   : > { %v4778_v7 = vsub.f32 0.0, %v4746_v14  ;;  %v4635_v44 = vadd.f32 0.2548296, %v4619_v16 }
 0xa28   : > { %v4947_v18 = vsel %vm489_vm0, %v9555_v46, 0.0  ;;  %v4572_v17 = vadd.f32 1.4214138, %v4556_v2  ;;  %v4475_v8 = vsel %vm4474_vm15, %v6105_v25, %v4471_v51  ;;  %6110 = vpow2.f32 %v4712_v26 }
 0xa29   : > { %4948 = vadd.xlane.f32.xlu2 %v4947_v18  ;;  %v4480_v27 = vsel %vm4477_vm2, %v4479_v19, %v4475_v8  ;;  %v4794_v61 = vsel %vm4762_vm3, %v4778_v7, %v4746_v14  ;;  %v4651_v1 = vmul.f32 %v4635_v44, %v9521_v31  ;;  %v4685_v31 = vmul.f32 %v4669_v3, %v9508_v41 }
 0xa2a   : > { %v4588_v63 = vmul.f32 %v4572_v17, %v9545_v11  ;;  %v4525_v34 = vmul.f32 1.0614054, %v4480_v27  ;;  %v4810_v23 = vadd.f32 1.0, %v4794_v61  ;;  %v4203_v17 = vmul.f32 0.5, %v9463_v33 }
 0xa2b   : > { %v4186_v28 = vpop.f32.mrf.mxu2  ;;  %v4884_v25 = vpop.f32.mrf.mxu0  ;;  %v4731_v15 = vmul.f32 %v6109_v56, %v4651_v1  ;;  %v4714_v16 = vmul.f32 1.442695, %v4685_v31  ;;  %v4204_v1 = vmul.f32 0.5, %v9474_v38 }
 0xa2c   : > { %v9564_v22 = vadd.f32 %v9422_v45, %v4186_v28  ;;  %v4885_v24 = vadd.f32 %v9440_v47, %v4884_v25  ;;  %v4604_v49 = vadd.f32 -0.28449672, %v4588_v63  ;;  %v4826_v52 = vmul.f32 %v4810_v23, %v4202_v59 }
 0xa2d   : > { %v4541_v42 = vadd.f32 -1.4531521, %v4525_v34  ;;  %v4747_v0 = vsub.f32 1.0, %v4731_v15 }
 0xa2e   : > { %v9572_v10 = vmul.f32 0.70710677, %v9564_v22  ;;  %v9575_v6 = vadd.f32 %v4885_v24, %v8935_v40  ;;  %v4620_v37 = vmul.f32 %v4604_v49, %v9545_v11  ;;  %4898 = vmatmul.f32.gmra.mxu0 %v4826_v52  ;;  %v6111_v7 = vpop.eup %6110 }
 0xa2f   : > { %v4557_v36 = vmul.f32 %v4541_v42, %v4480_v27  ;;  %v4779_v2 = vsub.f32 0.0, %v4747_v0 }
 0xa30   : > { %v9578_v54 = vand.u32 2147483647, %v9572_v10  ;;  %v4950_v9 = vsel %vm489_vm0, %v9575_v6, 0.0  ;;  %v4636_v14 = vadd.f32 0.2548296, %v4620_v37  ;;  %vm4766_vm10 = vcmp.lt.f32.partialorder %v9572_v10, 0.0 }
 0xa31   : > { %4951 = vadd.xlane.f32.xlu0 %v4950_v9  ;;  %v4573_v40 = vadd.f32 1.4214138, %v4557_v36  ;;  %v4795_v18 = vsel %vm4763_vm4, %v4779_v2, %v4747_v0 }
 0xa32   : > { %v4254_v60 = vmul.f32 0.3275911, %v9578_v54  ;;  %v4652_v19 = vmul.f32 %v4636_v14, %v9545_v11  ;;  %v4811_v8 = vadd.f32 1.0, %v4795_v18 }
 0xa33   : > { %v4589_v41 = vmul.f32 %v4573_v40, %v4480_v27  ;;  %v4205_v40 = vmul.f32 0.5, %v9498_v53 }
 0xa34   : > { %v4270_v51 = vadd.f32 1.0, %v4254_v60  ;;  %v4732_v26 = vmul.f32 %v6111_v7, %v4652_v19  ;;  %v4827_v61 = vmul.f32 %v4811_v8, %v4203_v17 }
 0xa35   : > { %v4605_v28 = vadd.f32 -0.28449672, %v4589_v41 }
 0xa36   : > { %6112 = vrcp.f32 %v4270_v51  ;;  %v4748_v34 = vsub.f32 1.0, %v4732_v26  ;;  %4901 = vmatmul.f32.gmra.mxu0 %v4827_v61  ;;  %v4493_v42 = vand.u32 2147483648, %v4270_v51  ;;  %v4491_v0 = vand.u32 2147483647, %v4270_v51 }
 0xa37   : > { %6114 = vpow2.f32 %v4714_v16  ;;  %v4621_v12 = vmul.f32 %v4605_v28, %v4480_v27  ;;  %vm4487_vm7 = vweird.f32 %v4270_v51 }
 0xa38   : > { %v4887_v44 = vpop.f32.mrf.mxu0  ;;  %v4780_v56 = vsub.f32 0.0, %v4748_v34  ;;  %v4494_v9 = vor.u32 1.1754944e-38, %v4493_v42  ;;  %vm4492_vm9 = vcmp.eq.f32.partialorder %v4491_v0, 8.507059e+37 }
 0xa39   : > { %v4888_v63 = vadd.f32 %v9440_v47, %v4887_v44  ;;  %v4637_v3 = vadd.f32 0.2548296, %v4621_v12 }
 0xa3a   : > { %v4796_v23 = vsel %vm4764_vm5, %v4780_v56, %v4748_v34 }
 0xa3b   : > { %v9590_v11 = vadd.f32 %v4888_v63, %v8962_v32  ;;  %v4812_v24 = vadd.f32 1.0, %v4796_v23  ;;  %v4653_v49 = vmul.f32 %v4637_v3, %v4480_v27  ;;  %v4670_v27 = vsub.f32 0.0, %v9578_v54 }
 0xa3c   : > { %v6113_v59 = vpop.eup %6112 }
 0xa3d   : > { %v4483_v33 = vmul.f32 %v6113_v59, %v4270_v51  ;;  %v4953_v25 = vsel %vm489_vm0, %v9590_v11, 0.0  ;;  %v6115_v52 = vpop.eup %6114  ;;  %v4828_v32 = vmul.f32 %v4812_v24, %v4204_v1  ;;  %vm4488_vm6 = vweird.f32 %v6113_v59 }
 0xa3e   : > { %4954 = vadd.xlane.f32.xlu1 %v4953_v25  ;;  %v4733_v37 = vmul.f32 %v6115_v52, %v4653_v49  ;;  %vm4489_vm8 = vmor %vm4487_vm7, %vm4488_vm6  ;;  %v4686_v51 = vmul.f32 %v4670_v27, %v9578_v54 }
 0xa3f   : > { %v4484_v15 = vsub.f32 1.0, %v4483_v33  ;;  %4904 = vmatmul.f32.gmra.mxu0 %v4828_v32 }
 0xa40   : > { %v4749_v43 = vsub.f32 1.0, %v4733_v37  ;;  %v4716_v26 = vmul.f32 1.442695, %v4686_v51 }
 0xa41   : > { %v4485_v31 = vmul.f32 %v6113_v59, %v4484_v15  ;;  %v4206_v15 = vmul.f32 0.5, %v9564_v22 }
 0xa42   : > { %v4781_v60 = vsub.f32 0.0, %v4749_v43  ;;  %6116 = vpow2.f32 %v4716_v26 }
 0xa43   : > { %v4486_v36 = vadd.f32 %v6113_v59, %v4485_v31 }
 0xa44   : > { %v4797_v14 = vsel %vm4765_vm1, %v4781_v60, %v4749_v43 }
 0xa45   : > { %v4490_v38 = vsel %vm4489_vm8, %v6113_v59, %v4486_v36  ;;  %v4813_v19 = vadd.f32 1.0, %v4797_v14 }
 0xa46   : > { %v4495_v2 = vsel %vm4492_vm9, %v4494_v9, %v4490_v38 }
 0xa47   : > { %v4526_v16 = vmul.f32 1.0614054, %v4495_v2  ;;  %v4829_v18 = vmul.f32 %v4813_v19, %v4205_v40 }
 0xa48   : > { %v6117_v3 = vpop.eup %6116 }
 0xa49   : > { %v4542_v41 = vadd.f32 -1.4531521, %v4526_v16  ;;  %4907 = vmatmul.f32.gmra.mxu0 %v4829_v18 }
 0xa4b   : > { %v4558_v7 = vmul.f32 %v4542_v41, %v4495_v2 }
 0xa4d   : > { %v4574_v8 = vadd.f32 1.4214138, %v4558_v7 }
 0xa4f   : > { %v4189_v17 = vpop.f32.mrf.mxu2  ;;  %v4590_v28 = vmul.f32 %v4574_v8, %v4495_v2 }
 0xa50   : > { %v4190_v55 = vadd.f32 %v9422_v45, %v4189_v17 }
 0xa51   : > { %v4606_v61 = vadd.f32 -0.28449672, %v4590_v28 }
 0xa52   : > { %v4223_v44 = vmul.f32 0.70710677, %v4190_v55 }
 0xa53   : > { %v4622_v34 = vmul.f32 %v4606_v61, %v4495_v2 }
 0xa54   : > { %v4239_v63 = vand.u32 2147483647, %v4223_v44  ;;  %vm4767_vm15 = vcmp.lt.f32.partialorder %v4223_v44, 0.0 }
 0xa55   : > { %v4638_v12 = vadd.f32 0.2548296, %v4622_v34 }
 0xa56   : > { %v4255_v53 = vmul.f32 0.3275911, %v4239_v63  ;;  %v4671_v60 = vsub.f32 0.0, %v4239_v63 }
 0xa57   : > { %v4654_v59 = vmul.f32 %v4638_v12, %v4495_v2 }
 0xa58   : > { %v4271_v56 = vadd.f32 1.0, %v4255_v53  ;;  %v4687_v14 = vmul.f32 %v4671_v60, %v4239_v63  ;;  %v4207_v53 = vmul.f32 0.5, %v4190_v55 }
 0xa59   : > { %v4734_v54 = vmul.f32 %v6117_v3, %v4654_v59 }
 0xa5a   : > { %6118 = vrcp.f32 %v4271_v56  ;;  %v4508_v31 = vand.u32 2147483648, %v4271_v56  ;;  %v4506_v36 = vand.u32 2147483647, %v4271_v56  ;;  %vm4502_vm12 = vweird.f32 %v4271_v56 }
 0xa5b   : > { %v4750_v33 = vsub.f32 1.0, %v4734_v54  ;;  %v4718_v19 = vmul.f32 1.442695, %v4687_v14 }
 0xa5c   : > { %vm4507_vm14 = vcmp.eq.f32.partialorder %v4506_v36, 8.507059e+37 }
 0xa5d   : > { %v4782_v1 = vsub.f32 0.0, %v4750_v33  ;;  %6120 = vpow2.f32 %v4718_v19 }
 0xa5e   : > { %v4890_v25 = vpop.f32.mrf.mxu0 }
 0xa5f   : > { %v4891_v23 = vadd.f32 %v9440_v47, %v4890_v25  ;;  %v4798_v52 = vsel %vm4766_vm10, %v4782_v1, %v4750_v33 }
 0xa60   : > { %v6119_v24 = vpop.eup %6118  ;;  %v4814_v42 = vadd.f32 1.0, %v4798_v52 }
 0xa61   : > { %v4498_v45 = vmul.f32 %v6119_v24, %v4271_v56  ;;  %v9604_v49 = vadd.f32 %v4891_v23, %v8985_v5  ;;  %vm4503_vm11 = vweird.f32 %v6119_v24  ;;  %v4509_v5 = vor.u32 1.1754944e-38, %v4508_v31 }
 0xa62   : > { %v4830_v0 = vmul.f32 %v4814_v42, %v4206_v15  ;;  %vm4504_vm13 = vmor %vm4502_vm12, %vm4503_vm11 }
 0xa63   : > { %v4499_v32 = vsub.f32 1.0, %v4498_v45  ;;  %v4956_v37 = vsel %vm489_vm0, %v9604_v49, 0.0  ;;  %v6121_v17 = vpop.eup %6120 }
 0xa64   : > { %4957 = vadd.xlane.f32.xlu2 %v4956_v37  ;;  %4910 = vmatmul.f32.gmra.mxu0 %v4830_v0  ;;  %v4937_v37 = vpop.xlane.xlu1 %4936 }
 0xa65   : > { %v4500_v43 = vmul.f32 %v6119_v24, %v4499_v32  ;;  %v4983_v0 = vmul.f32 %v4937_v37, %v8722_v57 }
 0xa67   : > { %v4501_v10 = vadd.f32 %v6119_v24, %v4500_v43  ;;  %v9645_v36 = vsub.f32 %v9447_v13, %v4983_v0 }
 0xa69   : > { %v4505_v9 = vsel %vm4504_vm13, %v6119_v24, %v4501_v10 }
 0xa6a   : > { %v4510_v22 = vsel %vm4507_vm14, %v4509_v5, %v4505_v9  ;;  %v5015_v9 = vmul.f32 %v9645_v36, %v9645_v36 }
 0xa6b   : > { %v4527_v38 = vmul.f32 1.0614054, %v4510_v22 }
 0xa6d   : > { %v4543_v27 = vadd.f32 -1.4531521, %v4527_v38 }
 0xa6f   : > { %v4559_v2 = vmul.f32 %v4543_v27, %v4510_v22 }
 0xa71   : > { %v4575_v40 = vadd.f32 1.4214138, %v4559_v2 }
 0xa73   : > { %v4591_v16 = vmul.f32 %v4575_v40, %v4510_v22 }
 0xa75   : > { %v4607_v18 = vadd.f32 -0.28449672, %v4591_v16 }
 0xa77   : > { %v4623_v41 = vmul.f32 %v4607_v18, %v4510_v22 }
 0xa79   : > { %v4639_v51 = vadd.f32 0.2548296, %v4623_v41 }
 0xa7b   : > { %v4655_v7 = vmul.f32 %v4639_v51, %v4510_v22  ;;  %v5031_v22 = vsel %vm489_vm0, %v5015_v9, 0.0 }
 0xa7d   : > { %v4735_v8 = vmul.f32 %v6121_v17, %v4655_v7 }
 0xa7f   : > { %v4751_v26 = vsub.f32 1.0, %v4735_v8 }
 0xa81   : > { %v4783_v28 = vsub.f32 0.0, %v4751_v26 }
 0xa82   : > { %v4893_v61 = vpop.f32.mrf.mxu0  ;;  %v4940_v2 = vpop.xlane.xlu2 %4939 }
 0xa83   : > { %v4799_v34 = vsel %vm4767_vm15, %v4783_v28, %v4751_v26  ;;  %v4894_v12 = vadd.f32 %v9440_v47, %v4893_v61  ;;  %v4984_v19 = vmul.f32 %v4940_v2, %v8722_v57 }
 0xa84   : > { %v4815_v63 = vadd.f32 1.0, %v4799_v34 }
 0xa85   : > { %v9611_v56 = vadd.f32 %v4894_v12, %v9059_v20 }
 0xa86   : > { %v4831_v59 = vmul.f32 %v4815_v63, %v4207_v53 }
 0xa87   : > { %v4959_v3 = vsel %vm489_vm0, %v9611_v56, 0.0 }
 0xa88   : > { %4913 = vmatmul.f32.gmra.mxu0 %v4831_v59  ;;  %4960 = vadd.xlane.f32.xlu0 %v4959_v3 }
 0xa8a   : > { %v4896_v54 = vpop.f32.mrf.mxu0 }
 0xa8b   : > { %v4897_v33 = vadd.f32 %v9440_v47, %v4896_v54 }
 0xa8c   : > { %v4943_v63 = vpop.xlane.xlu0 %4942 }
 0xa8d   : > { %v9617_v44 = vadd.f32 %v4897_v33, %v9069_v62  ;;  %v4985_v3 = vmul.f32 %v4943_v63, %v8722_v57 }
 0xa8f   : > { %v4962_v55 = vsel %vm489_vm0, %v9617_v44, 0.0 }
 0xa90   : > { %4963 = vadd.xlane.f32.xlu1 %v4962_v55 }
 0xa94   : > { %v4946_v10 = vpop.xlane.xlu1 %4945 }
 0xa95   : > { %v4986_v5 = vmul.f32 %v4946_v10, %v8722_v57 }
 0xa97   : > { %v9653_v60 = vsub.f32 %v9536_v48, %v4986_v5 }
 0xa99   : > { %v5018_v38 = vmul.f32 %v9653_v60, %v9653_v60 }
 0xa9b   : > { %v5040_v14 = vsel %vm489_vm0, %v5018_v38, 0.0 }
 0xa9c   : > { %v4949_v7 = vpop.xlane.xlu2 %4948 }
 0xa9d   : > { %v4987_v17 = vmul.f32 %v4949_v7, %v8722_v57 }
 0xa9f   : > { %v9680_v26 = vsub.f32 %v9555_v46, %v4987_v17 }
 0xaa1   : > { %v5019_v61 = vmul.f32 %v9680_v26, %v9680_v26 }
 0xaa3   : > { %v5043_v53 = vsel %vm489_vm0, %v5019_v61, 0.0 }
 0xaab   : > { %v4899_v25 = vpop.f32.mrf.mxu0 }
 0xaac   : > { %v4900_v20 = vadd.f32 %v9440_v47, %v4899_v25  ;;  %v9700_v25 = vsub.f32 %v9515_v30, %v4985_v3 }
 0xaae   : > { %v9623_v23 = vadd.f32 %v4900_v20, %v9203_v39 }
 0xab0   : > { %v4965_v1 = vsel %vm489_vm0, %v9623_v23, 0.0 }
 0xab1   : > { %4966 = vadd.xlane.f32.xlu2 %v4965_v1  ;;  %v4952_v1 = vpop.xlane.xlu0 %4951 }
 0xab3   : > { %v4902_v24 = vpop.f32.mrf.mxu0 }
 0xab4   : > { %v4903_v45 = vadd.f32 %v9440_v47, %v4902_v24 }
 0xab6   : > { %v9629_v62 = vadd.f32 %v4903_v45, %v9237_v29  ;;  %v4988_v45 = vmul.f32 %v4952_v1, %v8722_v57 }
 0xab8   : > { %v4968_v52 = vsel %vm489_vm0, %v9629_v62, 0.0  ;;  %v9714_v30 = vsub.f32 %v9575_v6, %v4988_v45 }
 0xab9   : > { %4969 = vadd.xlane.f32.xlu0 %v4968_v52 }
 0xabc   : > { %v4905_v15 = vpop.f32.mrf.mxu0 }
 0xabd   : > { %v4906_v42 = vadd.f32 %v9440_v47, %v4905_v15 }
 0xabf   : > { %v9635_v39 = vadd.f32 %v4906_v42, %v9298_v50 }
 0xac1   : > { %v4971_v32 = vsel %vm489_vm0, %v9635_v39, 0.0 }
 0xac2   : > { %4972 = vadd.xlane.f32.xlu1 %v4971_v32  ;;  %v5020_v32 = vmul.f32 %v9714_v30, %v9714_v30 }
 0xac6   : > { %v4908_v31 = vpop.f32.mrf.mxu0 }
 0xac7   : > { %v4909_v29 = vadd.f32 %v9440_v47, %v4908_v31  ;;  %v5046_v31 = vsel %vm489_vm0, %v5020_v32, 0.0 }
 0xac9   : > { %v9642_v43 = vadd.f32 %v4909_v29, %v9350_v21  ;;  %v4955_v21 = vpop.xlane.xlu1 %4954 }
 0xaca   : > { %v4989_v13 = vmul.f32 %v4955_v21, %v8722_v57 }
 0xacb   : > { %v4974_v50 = vsel %vm489_vm0, %v9642_v43, 0.0 }
 0xacc   : > { %4975 = vadd.xlane.f32.xlu2 %v4974_v50  ;;  %v9660_v27 = vsub.f32 %v9590_v11, %v4989_v13  ;;  %v9672_v11 = vsub.f32 %v9486_v4, %v4984_v19 }
 0xace   : > { %v5021_v48 = vmul.f32 %v9660_v27, %v9660_v27  ;;  %v5016_v8 = vmul.f32 %v9672_v11, %v9672_v11 }
 0xad0   : > { %v5049_v41 = vsel %vm489_vm0, %v5021_v48, 0.0 }
 0xad4   : > { %5032 = vadd.xlane.f32.xlu2 %v5031_v22 }
 0xad7   : > { %v4958_v28 = vpop.xlane.xlu2 %4957 }
 0xad8   : > { %v4990_v4 = vmul.f32 %v4958_v28, %v8722_v57 }
 0xada   : > { %v9687_v34 = vsub.f32 %v9604_v49, %v4990_v4 }
 0xadc   : > { %5041 = vadd.xlane.f32.xlu2 %v5040_v14  ;;  %v5022_v12 = vmul.f32 %v9687_v34, %v9687_v34 }
 0xade   : > { %v5052_v46 = vsel %vm489_vm0, %v5022_v12, 0.0 }
 0xae1   : > { %v4911_v40 = vpop.f32.mrf.mxu0 }
 0xae2   : > { %v4912_v16 = vadd.f32 %v9440_v47, %v4911_v40 }
 0xae4   : > { %v9668_v18 = vadd.f32 %v4912_v16, %v9397_v58  ;;  %5050 = vadd.xlane.f32.xlu2 %v5049_v41  ;;  %v5034_v58 = vsel %vm489_vm0, %v5016_v8, 0.0 }
 0xae6   : > { %v4977_v51 = vsel %vm489_vm0, %v9668_v18, 0.0 }
 0xae7   : > { %4978 = vadd.xlane.f32.xlu0 %v4977_v51 }
 0xaef   : > { %5035 = vadd.xlane.f32.xlu0 %v5034_v58 }
 0xaf7   : > { %5044 = vadd.xlane.f32.xlu0 %v5043_v53 }
 0xafb   : > { %v4961_v42 = vpop.xlane.xlu0 %4960 }
 0xaff   : > { %5053 = vadd.xlane.f32.xlu0 %v5052_v46 }
 0xb03   : > { %v4964_v33 = vpop.xlane.xlu1 %4963 }
 0xb04   : > { %v4992_v49 = vmul.f32 %v4964_v33, %v8722_v57 }
 0xb05   : > { %v4914_v59 = vpop.f32.mrf.mxu0 }
 0xb06   : > { %v4915_v54 = vadd.f32 %v9440_v47, %v4914_v59  ;;  %v9705_v24 = vsub.f32 %v9617_v44, %v4992_v49  ;;  %v4991_v44 = vmul.f32 %v4961_v42, %v8722_v57 }
 0xb08   : > { %v9696_v55 = vadd.f32 %v4915_v54, %v9415_v35  ;;  %v5024_v47 = vmul.f32 %v9705_v24, %v9705_v24  ;;  %v5017_v35 = vmul.f32 %v9700_v25, %v9700_v25  ;;  %v9721_v37 = vsub.f32 %v9611_v56, %v4991_v44 }
 0xb0a   : > { %v4980_v20 = vsel %vm489_vm0, %v9696_v55, 0.0  ;;  %v5058_v52 = vsel %vm489_vm0, %v5024_v47, 0.0  ;;  %v5037_v15 = vsel %vm489_vm0, %v5017_v35, 0.0  ;;  %v5023_v0 = vmul.f32 %v9721_v37, %v9721_v37  ;;  %v9765_v47 = vld [vmem:[%s9896_s11] ss:$0 sm:$0xff] }
 0xb0b   : > { %4981 = vadd.xlane.f32.xlu1 %v4980_v20  ;;  %5059 = vadd.xlane.f32.xlu2 %v5058_v52 }
 0xb0c   : > { %v5055_v6 = vsel %vm489_vm0, %v5023_v0, 0.0 }
 0xb13   : > { %5038 = vadd.xlane.f32.xlu1 %v5037_v15  ;;  %v9772_v15 = vld [vmem:[%s9897_s12] ss:$0 sm:$0xff] }
 0xb1b   : > { %5047 = vadd.xlane.f32.xlu1 %v5046_v31 }
 0xb23   : > { %5056 = vadd.xlane.f32.xlu1 %v5055_v6 }
 0xb24   : > { %v4967_v29 = vpop.xlane.xlu2 %4966 }
 0xb25   : > { %v4993_v50 = vmul.f32 %v4967_v29, %v8722_v57 }
 0xb27   : > { %v9729_v10 = vsub.f32 %v9623_v23, %v4993_v50 }
 0xb29   : > { %v5025_v5 = vmul.f32 %v9729_v10, %v9729_v10 }
 0xb2b   : > { %v5061_v56 = vsel %vm489_vm0, %v5025_v5, 0.0 }
 0xb2c   : > { %5062 = vadd.xlane.f32.xlu0 %v5061_v56  ;;  %v4970_v9 = vpop.xlane.xlu0 %4969 }
 0xb2d   : > { %v4994_v22 = vmul.f32 %v4970_v9, %v8722_v57 }
 0xb2f   : > { %v9736_v21 = vsub.f32 %v9629_v62, %v4994_v22 }
 0xb31   : > { %v5026_v13 = vmul.f32 %v9736_v21, %v9736_v21 }
 0xb33   : > { %v5064_v38 = vsel %vm489_vm0, %v5026_v13, 0.0 }
 0xb34   : > { %5065 = vadd.xlane.f32.xlu1 %v5064_v38 }
 0xb35   : > { %v4973_v23 = vpop.xlane.xlu1 %4972 }
 0xb36   : > { %v4995_v14 = vmul.f32 %v4973_v23, %v8722_v57 }
 0xb38   : > { %v9743_v2 = vsub.f32 %v9635_v39, %v4995_v14 }
 0xb3a   : > { %v5027_v40 = vmul.f32 %v9743_v2, %v9743_v2 }
 0xb3c   : > { %v5067_v48 = vsel %vm489_vm0, %v5027_v40, 0.0 }
 0xb3d   : > { %5068 = vadd.xlane.f32.xlu2 %v5067_v48 }
 0xb3f   : > { %v4976_v19 = vpop.xlane.xlu2 %4975 }
 0xb40   : > { %v4996_v62 = vmul.f32 %v4976_v19, %v8722_v57 }
 0xb42   : > { %v9750_v16 = vsub.f32 %v9642_v43, %v4996_v62 }
 0xb44   : > { %v5028_v41 = vmul.f32 %v9750_v16, %v9750_v16 }
 0xb46   : > { %v5070_v51 = vsel %vm489_vm0, %v5028_v41, 0.0 }
 0xb47   : > { %5071 = vadd.xlane.f32.xlu0 %v5070_v51  ;;  %v5033_v39 = vpop.xlane.xlu2 %5032 }
 0xb48   : > { %v5079_v7 = vmul.f32 %v5033_v39, %v8722_v57 }
 0xb4a   : > { %v5095_v17 = vadd.f32 1e-06, %v5079_v7 }
 0xb4c   : > { %6122 = vrsqrt.f32 %v5095_v17  ;;  %vm5117_vm3 = vweird.f32 %v5095_v17 }
 0xb4f   : > { %v5042_v8 = vpop.xlane.xlu2 %5041 }
 0xb50   : > { %v5082_v58 = vmul.f32 %v5042_v8, %v8722_v57 }
 0xb52   : > { %v6123_v28 = vpop.eup %6122  ;;  %v5098_v4 = vadd.f32 1e-06, %v5082_v58 }
 0xb53   : > { %v5112_v61 = vmul.f32 %v6123_v28, %v5095_v17  ;;  %vm5118_vm2 = vweird.f32 %v6123_v28 }
 0xb54   : > { %6124 = vrsqrt.f32 %v5098_v4  ;;  %vm5119_vm4 = vmor %vm5117_vm3, %vm5118_vm2  ;;  %vm5147_vm6 = vweird.f32 %v5098_v4 }
 0xb55   : > { %v5113_v43 = vmul.f32 %v6123_v28, %v5112_v61 }
 0xb57   : > { %v5114_v53 = vmul.f32 0.5, %v5113_v43  ;;  %v5051_v12 = vpop.xlane.xlu2 %5050 }
 0xb58   : > { %v5085_v46 = vmul.f32 %v5051_v12, %v8722_v57 }
 0xb59   : > { %v5115_v59 = vsub.f32 1.5, %v5114_v53 }
 0xb5a   : > { %v4979_v63 = vpop.xlane.xlu0 %4978  ;;  %v6125_v54 = vpop.eup %6124  ;;  %v5101_v33 = vadd.f32 1e-06, %v5085_v46 }
 0xb5b   : > { %v4997_v3 = vmul.f32 %v4979_v63, %v8722_v57  ;;  %v5116_v49 = vmul.f32 %v6123_v28, %v5115_v59  ;;  %v5142_v20 = vmul.f32 %v6125_v54, %v5098_v4  ;;  %vm5148_vm5 = vweird.f32 %v6125_v54 }
 0xb5c   : > { %6126 = vrsqrt.f32 %v5101_v33  ;;  %vm5149_vm7 = vmor %vm5147_vm6, %vm5148_vm5  ;;  %vm5177_vm1 = vweird.f32 %v5101_v33 }
 0xb5d   : > { %v9760_v1 = vsub.f32 %v9668_v18, %v4997_v3  ;;  %v5120_v45 = vsel %vm5119_vm4, %v6123_v28, %v5116_v49  ;;  %v5143_v35 = vmul.f32 %v6125_v54, %v5142_v20 }
 0xb5e   : > { %v5271_v18 = vmul.f32 %v5120_v45, %v9645_v36 }
 0xb5f   : > { %v5029_v52 = vmul.f32 %v9760_v1, %v9760_v1  ;;  %v5144_v42 = vmul.f32 0.5, %v5143_v35 }
 0xb60   : > { %v5290_v32 = vmul.f32 %v9765_v47, %v5271_v18 }
 0xb61   : > { %v5073_v44 = vsel %vm489_vm0, %v5029_v52, 0.0  ;;  %v5145_v0 = vsub.f32 1.5, %v5144_v42 }
 0xb62   : > { %5074 = vadd.xlane.f32.xlu1 %v5073_v44  ;;  %v5036_v31 = vpop.xlane.xlu0 %5035  ;;  %v6127_v29 = vpop.eup %6126  ;;  %v5309_v36 = vadd.f32 %v9772_v15, %v5290_v32 }
 0xb63   : > { %v5080_v6 = vmul.f32 %v5036_v31, %v8722_v57  ;;  %v5146_v50 = vmul.f32 %v6125_v54, %v5145_v0  ;;  %v5172_v5 = vmul.f32 %v6127_v29, %v5101_v33  ;;  %vm5178_vm8 = vweird.f32 %v6127_v29 }
 0xb64   : > { %5325 = vst.msk [vmem:[%s9782_s24] sm:$0xff] %vm489_vm0, %v5309_v36  ;;  %vm5179_vm9 = vmor %vm5177_vm1, %vm5178_vm8 }
 0xb65   : > { %v5096_v56 = vadd.f32 1e-06, %v5080_v6  ;;  %v5150_v9 = vsel %vm5149_vm7, %v6125_v54, %v5146_v50  ;;  %v5173_v22 = vmul.f32 %v6127_v29, %v5172_v5 }
 0xb66   : > { %v5274_v13 = vmul.f32 %v5150_v9, %v9653_v60 }
 0xb67   : > { %6128 = vrsqrt.f32 %v5096_v56  ;;  %v5174_v38 = vmul.f32 0.5, %v5173_v22  ;;  %vm5127_vm11 = vweird.f32 %v5096_v56 }
 0xb68   : > { %v5293_v23 = vmul.f32 %v9765_v47, %v5274_v13 }
 0xb69   : > { %v5175_v40 = vsub.f32 1.5, %v5174_v38 }
 0xb6a   : > { %v5045_v14 = vpop.xlane.xlu0 %5044  ;;  %v5312_v19 = vadd.f32 %v9772_v15, %v5293_v23 }
 0xb6b   : > { %v5083_v48 = vmul.f32 %v5045_v14, %v8722_v57  ;;  %v5176_v41 = vmul.f32 %v6127_v29, %v5175_v40 }
 0xb6c   : > { %5328 = vst.msk [vmem:[%s9782_s24 + $0x18] sm:$0xff] %vm489_vm0, %v5312_v19 }
 0xb6d   : > { %v6129_v62 = vpop.eup %6128  ;;  %v5099_v51 = vadd.f32 1e-06, %v5083_v48  ;;  %v5180_v60 = vsel %vm5179_vm9, %v6127_v29, %v5176_v41 }
 0xb6e   : > { %v5122_v39 = vmul.f32 %v6129_v62, %v5096_v56  ;;  %v5277_v7 = vmul.f32 %v5180_v60, %v9660_v27  ;;  %vm5128_vm10 = vweird.f32 %v6129_v62 }
 0xb6f   : > { %6130 = vrsqrt.f32 %v5099_v51  ;;  %vm5129_vm12 = vmor %vm5127_vm11, %vm5128_vm10  ;;  %vm5157_vm14 = vweird.f32 %v5099_v51 }
 0xb70   : > { %v5123_v17 = vmul.f32 %v6129_v62, %v5122_v39  ;;  %v5296_v8 = vmul.f32 %v9765_v47, %v5277_v7 }
 0xb72   : > { %v5124_v58 = vmul.f32 0.5, %v5123_v17  ;;  %v5054_v28 = vpop.xlane.xlu0 %5053  ;;  %v5315_v61 = vadd.f32 %v9772_v15, %v5296_v8 }
 0xb73   : > { %v5086_v4 = vmul.f32 %v5054_v28, %v8722_v57 }
 0xb74   : > { %v5125_v43 = vsub.f32 1.5, %v5124_v58  ;;  %5331 = vst.msk [vmem:[%s9782_s24 + $0x30] sm:$0xff] %vm489_vm0, %v5315_v61 }
 0xb75   : > { %v6131_v53 = vpop.eup %6130  ;;  %v5102_v12 = vadd.f32 1e-06, %v5086_v4 }
 0xb76   : > { %v5126_v46 = vmul.f32 %v6129_v62, %v5125_v43  ;;  %v5152_v63 = vmul.f32 %v6131_v53, %v5099_v51  ;;  %vm5158_vm13 = vweird.f32 %v6131_v53 }
 0xb77   : > { %6132 = vrsqrt.f32 %v5102_v12  ;;  %vm5159_vm15 = vmor %vm5157_vm14, %vm5158_vm13  ;;  %vm5187_vm3 = vweird.f32 %v5102_v12 }
 0xb78   : > { %v5130_v27 = vsel %vm5129_vm12, %v6129_v62, %v5126_v46  ;;  %v5153_v59 = vmul.f32 %v6131_v53, %v5152_v63 }
 0xb79   : > { %v5272_v3 = vmul.f32 %v5130_v27, %v9672_v11 }
 0xb7a   : > { %v5154_v54 = vmul.f32 0.5, %v5153_v59 }
 0xb7b   : > { %v5291_v33 = vmul.f32 %v9765_v47, %v5272_v3 }
 0xb7c   : > { %v5155_v49 = vsub.f32 1.5, %v5154_v54 }
 0xb7d   : > { %v6133_v45 = vpop.eup %6132  ;;  %v5310_v35 = vadd.f32 %v9772_v15, %v5291_v33 }
 0xb7e   : > { %v4982_v20 = vpop.xlane.xlu1 %4981  ;;  %v5156_v18 = vmul.f32 %v6131_v53, %v5155_v49  ;;  %v5182_v42 = vmul.f32 %v6133_v45, %v5102_v12  ;;  %v5060_v0 = vpop.xlane.xlu2 %5059  ;;  %vm5188_vm2 = vweird.f32 %v6133_v45 }
 0xb7f   : > { %v4998_v52 = vmul.f32 %v4982_v20, %v8722_v57  ;;  %5326 = vst.msk [vmem:[%s9782_s24 + $0x8] sm:$0xff] %vm489_vm0, %v5310_v35  ;;  %v5088_v36 = vmul.f32 %v5060_v0, %v8722_v57  ;;  %vm5189_vm4 = vmor %vm5187_vm3, %vm5188_vm2 }
 0xb80   : > { %v5160_v11 = vsel %vm5159_vm15, %v6131_v53, %v5156_v18  ;;  %v5183_v32 = vmul.f32 %v6133_v45, %v5182_v42 }
 0xb81   : > { %v9807_v44 = vsub.f32 %v9696_v55, %v4998_v52  ;;  %v5275_v31 = vmul.f32 %v5160_v11, %v9680_v26  ;;  %v5104_v55 = vadd.f32 1e-06, %v5088_v36 }
 0xb82   : > { %v5184_v29 = vmul.f32 0.5, %v5183_v32 }
 0xb83   : > { %v5030_v6 = vmul.f32 %v9807_v44, %v9807_v44  ;;  %v5294_v50 = vmul.f32 %v9765_v47, %v5275_v31  ;;  %6134 = vrsqrt.f32 %v5104_v55  ;;  %vm5207_vm6 = vweird.f32 %v5104_v55 }
 0xb84   : > { %v5185_v56 = vsub.f32 1.5, %v5184_v29 }
 0xb85   : > { %v5076_v5 = vsel %vm489_vm0, %v5030_v6, 0.0  ;;  %v5313_v22 = vadd.f32 %v9772_v15, %v5294_v50 }
 0xb86   : > { %5077 = vadd.xlane.f32.xlu2 %v5076_v5  ;;  %v5039_v9 = vpop.xlane.xlu1 %5038  ;;  %v5186_v13 = vmul.f32 %v6133_v45, %v5185_v56 }
 0xb87   : > { %v5081_v26 = vmul.f32 %v5039_v9, %v8722_v57  ;;  %5329 = vst.msk [vmem:[%s9782_s24 + $0x20] sm:$0xff] %vm489_vm0, %v5313_v22 }
 0xb88   : > { %v5190_v23 = vsel %vm5189_vm4, %v6133_v45, %v5186_v13 }
 0xb89   : > { %v5097_v38 = vadd.f32 1e-06, %v5081_v26  ;;  %v5278_v14 = vmul.f32 %v5190_v23, %v9687_v34  ;;  %v6135_v48 = vpop.eup %6134 }
 0xb8a   : > { %v5202_v41 = vmul.f32 %v6135_v48, %v5104_v55  ;;  %vm5208_vm5 = vweird.f32 %v6135_v48 }
 0xb8b   : > { %6136 = vrsqrt.f32 %v5097_v38  ;;  %v5297_v40 = vmul.f32 %v9765_v47, %v5278_v14  ;;  %vm5209_vm7 = vmor %vm5207_vm6, %vm5208_vm5  ;;  %vm5137_vm1 = vweird.f32 %v5097_v38 }
 0xb8c   : > { %v5203_v60 = vmul.f32 %v6135_v48, %v5202_v41 }
 0xb8d   : > { %v5316_v62 = vadd.f32 %v9772_v15, %v5297_v40 }
 0xb8e   : > { %v5048_v19 = vpop.xlane.xlu1 %5047  ;;  %v5204_v8 = vmul.f32 0.5, %v5203_v60 }
 0xb8f   : > { %v5084_v51 = vmul.f32 %v5048_v19, %v8722_v57  ;;  %5332 = vst.msk [vmem:[%s9782_s24 + $0x38] sm:$0xff] %vm489_vm0, %v5316_v62 }
 0xb90   : > { %v5205_v34 = vsub.f32 1.5, %v5204_v8 }
 0xb91   : > { %v6137_v39 = vpop.eup %6136  ;;  %v5100_v7 = vadd.f32 1e-06, %v5084_v51 }
 0xb92   : > { %v5132_v17 = vmul.f32 %v6137_v39, %v5097_v38  ;;  %v5206_v61 = vmul.f32 %v6135_v48, %v5205_v34  ;;  %vm5138_vm8 = vweird.f32 %v6137_v39 }
 0xb93   : > { %6138 = vrsqrt.f32 %v5100_v7  ;;  %vm5139_vm9 = vmor %vm5137_vm1, %vm5138_vm8  ;;  %vm5167_vm11 = vweird.f32 %v5100_v7 }
 0xb94   : > { %v5133_v58 = vmul.f32 %v6137_v39, %v5132_v17  ;;  %v5210_v46 = vsel %vm5209_vm7, %v6135_v48, %v5206_v61 }
 0xb95   : > { %v5280_v27 = vmul.f32 %v5210_v46, %v9705_v24 }
 0xb96   : > { %v5134_v28 = vmul.f32 0.5, %v5133_v58  ;;  %v5057_v4 = vpop.xlane.xlu1 %5056 }
 0xb97   : > { %v5087_v43 = vmul.f32 %v5057_v4, %v8722_v57  ;;  %v5299_v54 = vmul.f32 %v9765_v47, %v5280_v27 }
 0xb98   : > { %v5135_v53 = vsub.f32 1.5, %v5134_v28 }
 0xb99   : > { %v6139_v12 = vpop.eup %6138  ;;  %v5103_v63 = vadd.f32 1e-06, %v5087_v43  ;;  %v5318_v45 = vadd.f32 %v9772_v15, %v5299_v54 }
 0xb9a   : > { %v5136_v59 = vmul.f32 %v6137_v39, %v5135_v53  ;;  %v5162_v3 = vmul.f32 %v6139_v12, %v5100_v7  ;;  %vm5168_vm10 = vweird.f32 %v6139_v12 }
 0xb9b   : > { %6140 = vrsqrt.f32 %v5103_v63  ;;  %5334 = vst.msk [vmem:[%s9782_s24 + $0x48] sm:$0xff] %vm489_vm0, %v5318_v45  ;;  %vm5169_vm12 = vmor %vm5167_vm11, %vm5168_vm10  ;;  %vm5197_vm14 = vweird.f32 %v5103_v63 }
 0xb9c   : > { %v5140_v33 = vsel %vm5139_vm9, %v6137_v39, %v5136_v59  ;;  %v5163_v49 = vmul.f32 %v6139_v12, %v5162_v3 }
 0xb9d   : > { %v5273_v20 = vmul.f32 %v5140_v33, %v9700_v25 }
 0xb9e   : > { %v5164_v35 = vmul.f32 0.5, %v5163_v49 }
 0xb9f   : > { %v5292_v52 = vmul.f32 %v9765_v47, %v5273_v20  ;;  %v5063_v0 = vpop.xlane.xlu0 %5062 }
 0xba0   : > { %v5165_v24 = vsub.f32 1.5, %v5164_v35  ;;  %v5089_v29 = vmul.f32 %v5063_v0, %v8722_v57 }
 0xba1   : > { %v6141_v18 = vpop.eup %6140  ;;  %v5311_v42 = vadd.f32 %v9772_v15, %v5292_v52 }
 0xba2   : > { %v5166_v11 = vmul.f32 %v6139_v12, %v5165_v24  ;;  %v5192_v32 = vmul.f32 %v6141_v18, %v5103_v63  ;;  %v5105_v5 = vadd.f32 1e-06, %v5089_v29  ;;  %vm5198_vm13 = vweird.f32 %v6141_v18 }
 0xba3   : > { %5327 = vst.msk [vmem:[%s9782_s24 + $0x10] sm:$0xff] %vm489_vm0, %v5311_v42  ;;  %vm5199_vm15 = vmor %vm5197_vm14, %vm5198_vm13 }
 0xba4   : > { %v5170_v25 = vsel %vm5169_vm12, %v6139_v12, %v5166_v11  ;;  %v5193_v31 = vmul.f32 %v6141_v18, %v5192_v32  ;;  %6142 = vrsqrt.f32 %v5105_v5  ;;  %vm5217_vm3 = vweird.f32 %v5105_v5 }
 0xba5   : > { %v5276_v6 = vmul.f32 %v5170_v25, %v9714_v30 }
 0xba6   : > { %v5194_v36 = vmul.f32 0.5, %v5193_v31 }
 0xba7   : > { %v5295_v50 = vmul.f32 %v9765_v47, %v5276_v6  ;;  %v5066_v26 = vpop.xlane.xlu1 %5065 }
 0xba8   : > { %v5195_v56 = vsub.f32 1.5, %v5194_v36  ;;  %v5090_v23 = vmul.f32 %v5066_v26, %v8722_v57 }
 0xba9   : > { %v5314_v55 = vadd.f32 %v9772_v15, %v5295_v50 }
 0xbaa   : > { %v5196_v9 = vmul.f32 %v6141_v18, %v5195_v56  ;;  %v6143_v13 = vpop.eup %6142  ;;  %v5106_v48 = vadd.f32 1e-06, %v5090_v23 }
 0xbab   : > { %5330 = vst.msk [vmem:[%s9782_s24 + $0x28] sm:$0xff] %vm489_vm0, %v5314_v55  ;;  %v5212_v14 = vmul.f32 %v6143_v13, %v5105_v5  ;;  %vm5218_vm2 = vweird.f32 %v6143_v13 }
 0xbac   : > { %v5200_v22 = vsel %vm5199_vm15, %v6141_v18, %v5196_v9  ;;  %6144 = vrsqrt.f32 %v5106_v48  ;;  %vm5219_vm4 = vmor %vm5217_vm3, %vm5218_vm2  ;;  %vm5227_vm6 = vweird.f32 %v5106_v48 }
 0xbad   : > { %v5279_v30 = vmul.f32 %v5200_v22, %v9721_v37  ;;  %v5213_v19 = vmul.f32 %v6143_v13, %v5212_v14 }
 0xbaf   : > { %v5298_v38 = vmul.f32 %v9765_v47, %v5279_v30  ;;  %v5214_v62 = vmul.f32 0.5, %v5213_v19 }
 0xbb0   : > { %v5069_v51 = vpop.xlane.xlu2 %5068 }
 0xbb1   : > { %v5317_v40 = vadd.f32 %v9772_v15, %v5298_v38  ;;  %v5215_v41 = vsub.f32 1.5, %v5214_v62  ;;  %v5091_v37 = vmul.f32 %v5069_v51, %v8722_v57 }
 0xbb2   : > { %v6145_v60 = vpop.eup %6144 }
 0xbb3   : > { %5333 = vst.msk [vmem:[%s9782_s24 + $0x40] sm:$0xff] %vm489_vm0, %v5317_v40  ;;  %v5216_v39 = vmul.f32 %v6143_v13, %v5215_v41  ;;  %v5107_v7 = vadd.f32 1e-06, %v5091_v37  ;;  %v5222_v8 = vmul.f32 %v6145_v60, %v5106_v48  ;;  %vm5228_vm5 = vweird.f32 %v6145_v60 }
 0xbb4   : > { %vm5229_vm7 = vmor %vm5227_vm6, %vm5228_vm5 }
 0xbb5   : > { %v5220_v17 = vsel %vm5219_vm4, %v6143_v13, %v5216_v39  ;;  %6146 = vrsqrt.f32 %v5107_v7  ;;  %v5223_v34 = vmul.f32 %v6145_v60, %v5222_v8  ;;  %vm5237_vm1 = vweird.f32 %v5107_v7 }
 0xbb6   : > { %v5281_v58 = vmul.f32 %v5220_v17, %v9729_v10 }
 0xbb7   : > { %v5224_v4 = vmul.f32 0.5, %v5223_v34 }
 0xbb8   : > { %v5300_v28 = vmul.f32 %v9765_v47, %v5281_v58 }
 0xbb9   : > { %v5225_v12 = vsub.f32 1.5, %v5224_v4 }
 0xbba   : > { %v5072_v61 = vpop.xlane.xlu0 %5071  ;;  %v5319_v43 = vadd.f32 %v9772_v15, %v5300_v28 }
 0xbbb   : > { %v5092_v53 = vmul.f32 %v5072_v61, %v8722_v57  ;;  %v6147_v46 = vpop.eup %6146  ;;  %v5226_v27 = vmul.f32 %v6145_v60, %v5225_v12 }
 0xbbc   : > { %5335 = vst.msk [vmem:[%s9782_s24 + $0x50] sm:$0xff] %vm489_vm0, %v5319_v43  ;;  %v5232_v10 = vmul.f32 %v6147_v46, %v5107_v7  ;;  %vm5238_vm8 = vweird.f32 %v6147_v46 }
 0xbbd   : > { %v5108_v63 = vadd.f32 1e-06, %v5092_v53  ;;  %v5230_v59 = vsel %vm5229_vm7, %v6145_v60, %v5226_v27  ;;  %vm5239_vm9 = vmor %vm5237_vm1, %vm5238_vm8 }
 0xbbe   : > { %v5233_v3 = vmul.f32 %v6147_v46, %v5232_v10  ;;  %v5282_v54 = vmul.f32 %v5230_v59, %v9736_v21 }
 0xbbf   : > { %6148 = vrsqrt.f32 %v5108_v63  ;;  %vm5247_vm11 = vweird.f32 %v5108_v63 }
 0xbc0   : > { %v5234_v33 = vmul.f32 0.5, %v5233_v3  ;;  %v5301_v49 = vmul.f32 %v9765_v47, %v5282_v54 }
 0xbc2   : > { %v5235_v20 = vsub.f32 1.5, %v5234_v33  ;;  %v5320_v35 = vadd.f32 %v9772_v15, %v5301_v49 }
 0xbc4   : > { %v5236_v52 = vmul.f32 %v6147_v46, %v5235_v20  ;;  %5336 = vst.msk [vmem:[%s9782_s24 + $0x58] sm:$0xff] %vm489_vm0, %v5320_v35 }
 0xbc5   : > { %v6149_v45 = vpop.eup %6148 }
 0xbc6   : > { %v5242_v24 = vmul.f32 %v6149_v45, %v5108_v63  ;;  %v5240_v18 = vsel %vm5239_vm9, %v6147_v46, %v5236_v52  ;;  %vm5248_vm10 = vweird.f32 %v6149_v45 }
 0xbc7   : > { %v5283_v11 = vmul.f32 %v5240_v18, %v9743_v2  ;;  %vm5249_vm12 = vmor %vm5247_vm11, %vm5248_vm10 }
 0xbc8   : > { %v5243_v42 = vmul.f32 %v6149_v45, %v5242_v24 }
 0xbc9   : > { %v5302_v32 = vmul.f32 %v9765_v47, %v5283_v11 }
 0xbca   : > { %v5244_v21 = vmul.f32 0.5, %v5243_v42 }
 0xbcb   : > { %v5321_v31 = vadd.f32 %v9772_v15, %v5302_v32 }
 0xbcc   : > { %v5245_v25 = vsub.f32 1.5, %v5244_v21 }
 0xbcd   : > { %5337 = vst.msk [vmem:[%s9782_s24 + $0x60] sm:$0xff] %vm489_vm0, %v5321_v31 }
 0xbce   : > { %v5246_v0 = vmul.f32 %v6149_v45, %v5245_v25 }
 0xbd0   : > { %v5250_v6 = vsel %vm5249_vm12, %v6149_v45, %v5246_v0 }
 0xbd1   : > { %v5284_v29 = vmul.f32 %v5250_v6, %v9750_v16 }
 0xbd3   : > { %v5303_v36 = vmul.f32 %v9765_v47, %v5284_v29 }
 0xbd5   : > { %v5075_v50 = vpop.xlane.xlu1 %5074  ;;  %v5322_v5 = vadd.f32 %v9772_v15, %v5303_v36 }
 0xbd6   : > { %v5093_v2 = vmul.f32 %v5075_v50, %v8722_v57 }
 0xbd7   : > { %5338 = vst.msk [vmem:[%s9782_s24 + $0x68] sm:$0xff] %vm489_vm0, %v5322_v5 }
 0xbd8   : > { %v5109_v56 = vadd.f32 1e-06, %v5093_v2 }
 0xbda   : > { %6150 = vrsqrt.f32 %v5109_v56  ;;  %vm5257_vm14 = vweird.f32 %v5109_v56 }
 0xbe0   : > { %v6151_v55 = vpop.eup %6150 }
 0xbe1   : > { %v5252_v9 = vmul.f32 %v6151_v55, %v5109_v56  ;;  %vm5258_vm13 = vweird.f32 %v6151_v55 }
 0xbe2   : > { %vm5259_vm15 = vmor %vm5257_vm14, %vm5258_vm13 }
 0xbe3   : > { %v5253_v22 = vmul.f32 %v6151_v55, %v5252_v9 }
 0xbe5   : > { %v5254_v30 = vmul.f32 0.5, %v5253_v22 }
 0xbe7   : > { %v5255_v26 = vsub.f32 1.5, %v5254_v30 }
 0xbe9   : > { %v5256_v13 = vmul.f32 %v6151_v55, %v5255_v26 }
 0xbeb   : > { %v5260_v16 = vsel %vm5259_vm15, %v6151_v55, %v5256_v13 }
 0xbec   : > { %v5285_v38 = vmul.f32 %v5260_v16, %v9760_v1 }
 0xbee   : > { %v5304_v23 = vmul.f32 %v9765_v47, %v5285_v38 }
 0xbf0   : > { %v5323_v14 = vadd.f32 %v9772_v15, %v5304_v23 }
 0xbf2   : > { %5339 = vst.msk [vmem:[%s9782_s24 + $0x70] sm:$0xff] %vm489_vm0, %v5323_v14 }
 0xbf9   : > { %v5078_v40 = vpop.xlane.xlu2 %5077 }
 0xbfa   : > { %v5094_v48 = vmul.f32 %v5078_v40, %v8722_v57 }
 0xbfc   : > { %v5110_v19 = vadd.f32 1e-06, %v5094_v48 }
 0xbfe   : > { %6152 = vrsqrt.f32 %v5110_v19  ;;  %vm5267_vm3 = vweird.f32 %v5110_v19 }
 0xc04   : > { %v6153_v62 = vpop.eup %6152 }
 0xc05   : > { %v5262_v41 = vmul.f32 %v6153_v62, %v5110_v19  ;;  %vm5268_vm2 = vweird.f32 %v6153_v62 }
 0xc06   : > { %vm5269_vm4 = vmor %vm5267_vm3, %vm5268_vm2 }
 0xc07   : > { %v5263_v51 = vmul.f32 %v6153_v62, %v5262_v41 }
 0xc09   : > { %v5264_v37 = vmul.f32 0.5, %v5263_v51 }
 0xc0b   : > { %v5265_v39 = vsub.f32 1.5, %v5264_v37 }
 0xc0d   : > { %v5266_v60 = vmul.f32 %v6153_v62, %v5265_v39 }
 0xc0f   : > { %v5270_v1 = vsel %vm5269_vm4, %v6153_v62, %v5266_v60 }
 0xc10   : > { %v5286_v7 = vmul.f32 %v5270_v1, %v9807_v44 }
 0xc12   : > { %v5305_v17 = vmul.f32 %v9765_v47, %v5286_v7 }
 0xc14   : > { %v5324_v8 = vadd.f32 %v9772_v15, %v5305_v17 }
 0xc16   : > { %5340 = vst.msk [vmem:[%s9782_s24 + $0x78] sm:$0xff] %vm489_vm0, %v5324_v8 }
 0xc17 PF: > { %s23_s25 = sadd.s32 1, %s6202_s25  }
 0xc18   : > { %p20_p4 = scmp.ge.s32.totalorder %s23_s25, 4  }
 0xc1a   :  { %22 = sbr.rel (!%p20_p4) target bundleno = 1 (0x1), region = 102 }

</bundles_post_ra>
